<compile_context>
chip_gen: v7x
topology: tpu7x:2x2x1
jax: 0.10.0
libtpu: 0.0.40
codegen_flags: <defaults>
</compile_context>

<pallas_src>
import functools
import math

import jax
import jax.numpy as jnp
from jax.experimental import pallas as pl
from jax.experimental.pallas import tpu as pltpu

# ----------------------------- configuration --------------------------------
CFG = dict(
    channels=16,
    nheads=2,
    layers=2,
    num_steps=50,
    diffusion_embedding_dim=128,
    side_dim=8,
    inputdim=2,
    dim_feedforward=64,   # nn.TransformerEncoderLayer(dim_feedforward=64)
)

_VMEM = pl.BlockSpec(memory_space=pltpu.MemorySpace.VMEM)
_RSQRT2 = 1.0 / math.sqrt(2.0)


# ----------------------------- in-kernel helpers -----------------------------
def _layernorm(z, g, b):
    mu = jnp.mean(z, axis=-1, keepdims=True)
    zc = z - mu
    var = jnp.mean(zc * zc, axis=-1, keepdims=True)
    return zc * jax.lax.rsqrt(var + 1e-5) * g + b


def _erf(x):
    # TODO(synk): erf via Abramowitz-Stegun 7.1.26 (|err| < 1.5e-7 ~ f32 eps)
    # so the exact-GELU stays fused in-kernel without relying on a Mosaic erf
    # lowering; numerically matches F.gelu(approximate='none') at f32.
    a1, a2, a3, a4, a5 = (0.254829592, -0.284496736, 1.421413741,
                          -1.453152027, 1.061405429)
    p = 0.3275911
    ax = jnp.abs(x)
    t = 1.0 / (1.0 + p * ax)
    poly = ((((a5 * t + a4) * t + a3) * t + a2) * t + a1) * t
    y = 1.0 - poly * jnp.exp(-ax * ax)
    return jnp.where(x >= 0, y, -y)


def _gelu(x):
    return 0.5 * x * (1.0 + _erf(x * (1.0 / math.sqrt(2.0))))


# ----------------------------- Pallas kernels --------------------------------
def _prologue_kernel(x_ref, wi_ref, bi_ref, e_ref, w1_ref, b1_ref,
                     w2_ref, b2_ref, wd_ref, bd_ref, x0_ref, d_ref):
    # input projection (1x1 conv, channels-first, lane-dense): (C, P)
    x0 = jnp.dot(wi_ref[...], x_ref[...],
                 preferred_element_type=jnp.float32) + bi_ref[...]
    x0_ref[...] = jnp.maximum(x0, 0.0)

    # diffusion embedding MLP (Linear+SiLU x2) + all per-block projections
    h = jnp.dot(e_ref[...], w1_ref[...],
                preferred_element_type=jnp.float32) + b1_ref[...]
    h = h * jax.nn.sigmoid(h)
    h = jnp.dot(h, w2_ref[...],
                preferred_element_type=jnp.float32) + b2_ref[...]
    h = h * jax.nn.sigmoid(h)
    d_ref[...] = jnp.dot(h, wd_ref[...],
                         preferred_element_type=jnp.float32) + bd_ref[...]


def _encoder_kernel(x_ref, d_ref, wqkv_ref, bqkv_ref, wo_ref, bo_ref,
                    g1_ref, be1_ref, wf1_ref, bf1_ref, wf2_ref, bf2_ref,
                    g2_ref, be2_ref, o_ref, *, nheads):
    """Fused nn.TransformerEncoderLayer (post-LN, exact GELU, eval mode).

    x_ref: (Nb_block, S, D) batch-first view of the (seq=S, batch=Nb, d_model=D)
    tensor the PyTorch module feeds the encoder.  d_ref: (Nb_block, S, 1)
    per-token diffusion-embedding offset (zeros for the feature path).
    """
    nb, S, D = x_ref.shape
    Dh = D // nheads
    T = nb * S
    scale = 1.0 / math.sqrt(Dh)

    x = x_ref[...] + d_ref[...]                 # fused diffusion-emb add
    x2 = x.reshape(T, D)

    qkv = jnp.dot(x2, wqkv_ref[...],
                  preferred_element_type=jnp.float32) + bqkv_ref[...]
    q3 = qkv[:, 0 * D:1 * D].reshape(nb, S, D)
    k3 = qkv[:, 1 * D:2 * D].reshape(nb, S, D)
    v3 = qkv[:, 2 * D:3 * D].reshape(nb, S, D)

    wo = wo_ref[...]
    attn = jnp.zeros((T, D), jnp.float32)
    for h in range(nheads):                     # static unroll (nheads=2)
        sl = slice(h * Dh, (h + 1) * Dh)
        qh, kh, vh = q3[:, :, sl], k3[:, :, sl], v3[:, :, sl]
        s = jnp.einsum("nsd,ntd->nst", qh, kh,
                       preferred_element_type=jnp.float32) * scale
        s = s - jnp.max(s, axis=-1, keepdims=True)
        p = jnp.exp(s)
        p = p * pl.reciprocal(jnp.sum(p, axis=-1, keepdims=True), approx=True)
        ctx = jnp.einsum("nst,ntd->nsd", p, vh,
                         preferred_element_type=jnp.float32)
        # out_proj folded per head: concat(heads) @ Wo.T == sum_h ctx_h @ Wo.T[h]
        attn = attn + jnp.dot(ctx.reshape(T, Dh), wo[sl, :],
                              preferred_element_type=jnp.float32)
    attn = attn + bo_ref[...]

    h1 = _layernorm(x2 + attn, g1_ref[...], be1_ref[...])
    ff = jnp.dot(h1, wf1_ref[...],
                 preferred_element_type=jnp.float32) + bf1_ref[...]
    ff = _gelu(ff)
    ff = jnp.dot(ff, wf2_ref[...],
                 preferred_element_type=jnp.float32) + bf2_ref[...]
    h2 = _layernorm(h1 + ff, g2_ref[...], be2_ref[...])
    o_ref[...] = h2.reshape(nb, S, D)


def _post_kernel(y_ref, cond_ref, xres_ref, skip_ref, wm_ref, wc_ref, bmc_ref,
                 wo_ref, bo_ref, xnext_ref, skipout_ref, *, channels):
    # mid conv + cond conv (shared bias = mid_b + cond_b) + gate
    z = (jnp.dot(wm_ref[...], y_ref[...], preferred_element_type=jnp.float32)
         + jnp.dot(wc_ref[...], cond_ref[...],
                   preferred_element_type=jnp.float32)
         + bmc_ref[...])
    gated = jax.nn.sigmoid(z[:channels, :]) * jnp.tanh(z[channels:, :])
    # output projection + residual / skip (skip accumulated in place)
    out = jnp.dot(wo_ref[...], gated,
                  preferred_element_type=jnp.float32) + bo_ref[...]
    xnext_ref[...] = (xres_ref[...] + out[:channels, :]) * _RSQRT2
    skipout_ref[...] = skip_ref[...] + out[channels:, :]


def _head_kernel(s_ref, w1_ref, b1_ref, w2_ref, b2_ref, o_ref, *, scale):
    s = s_ref[...] * scale
    h = jnp.dot(w1_ref[...], s, preferred_element_type=jnp.float32) + b1_ref[...]
    h = jnp.maximum(h, 0.0)
    o_ref[...] = jnp.dot(w2_ref[...], h,
                         preferred_element_type=jnp.float32) + b2_ref[...]


# ----------------------------- wrappers / glue --------------------------------
def _encoder_apply(x_enc, d_enc, p, *, nheads, nsplit):
    """Apply one fused transformer-encoder layer.  x_enc: (Nb, S, D)."""
    Nb, S, D = x_enc.shape
    nbt = Nb // nsplit

    weights = (
        p["in_proj_w"].T, p["in_proj_b"][None, :],
        p["out_w"].T, p["out_b"][None, :],
        p["ln1_g"][None, :], p["ln1_b"][None, :],
        p["lin1_w"].T, p["lin1_b"][None, :],
        p["lin2_w"].T, p["lin2_b"][None, :],
        p["ln2_g"][None, :], p["ln2_b"][None, :],
    )

    def full_spec(shape):
        n = len(shape)
        return pl.BlockSpec(shape, lambda i, _n=n: (0,) * _n)

    in_specs = (
        [pl.BlockSpec((nbt, S, D), lambda i: (i, 0, 0)),
         pl.BlockSpec((nbt, S, 1), lambda i: (i, 0, 0))]
        + [full_spec(w.shape) for w in weights]
    )

    return pl.pallas_call(
        functools.partial(_encoder_kernel, nheads=nheads),
        out_shape=jax.ShapeDtypeStruct((Nb, S, D), jnp.float32),
        grid=(nsplit,),
        in_specs=in_specs,
        out_specs=pl.BlockSpec((nbt, S, D), lambda i: (i, 0, 0)),
        compiler_params=pltpu.CompilerParams(
            dimension_semantics=("parallel",)),   # uses both TCs on v7x
    )(x_enc, d_enc, *weights)


@jax.jit
def diff_csdi_forward(params, x, cond_info, diffusion_step):
    B, Cin, K, L = x.shape
    C = CFG["channels"]
    SD = CFG["side_dim"]
    nheads = CFG["nheads"]
    n_layers = len(params["layers"])
    P = B * K * L
    # 'normal' transformer config builds the encoder with d_model == channels,
    # and this module feeds it tensors shaped (B*K, channels, L)/(B*L, channels, K),
    # so the path is only well-defined when K == L == channels.
    assert K == C and L == C, "diff_CSDI 'normal' transformer requires K == L == channels"

    # lane-dense channels-first flat layout, position order (b, l, k)
    x_cf = x.transpose(1, 0, 3, 2).reshape(Cin, P)
    cond_cf = cond_info.transpose(1, 0, 3, 2).reshape(SD, P)
    e0 = params["emb_table"][diffusion_step]                         # (B, DE)

    # all per-block diffusion projections concatenated into one matmul
    dwt = jnp.concatenate([lp["diff_w"].T for lp in params["layers"]], axis=1)
    dbt = jnp.concatenate([lp["diff_b"] for lp in params["layers"]])[None, :]

    x_state, d_flat = pl.pallas_call(
        _prologue_kernel,
        out_shape=(jax.ShapeDtypeStruct((C, P), jnp.float32),
                   jax.ShapeDtypeStruct((B, n_layers * C), jnp.float32)),
        in_specs=[_VMEM] * 10,
        out_specs=(_VMEM, _VMEM),
    )(x_cf, params["inp_w"], params["inp_b"][:, None], e0,
      params["emb_w1"].T, params["emb_b1"][None, :],
      params["emb_w2"].T, params["emb_b2"][None, :], dwt, dbt)

    skip_acc = jnp.zeros((C, P), jnp.float32)
    d_zero = jnp.zeros((C, B * L, 1), jnp.float32)   # feature path has no emb add

    for li, lp in enumerate(params["layers"]):
        # ---- time transformer: (seq=B*K, batch=C, d_model=L), emb-add fused in
        d_l = d_flat[:, li * C:(li + 1) * C]                         # (B, C)
        d_enc = jnp.broadcast_to(d_l.T[:, :, None], (C, B, K)).reshape(C, B * K, 1)
        x_time = x_state.reshape(C, B, L, K).transpose(0, 1, 3, 2).reshape(C, B * K, L)
        y_time = _encoder_apply(x_time, d_enc, lp["time"], nheads=nheads, nsplit=2)

        # ---- feature transformer: (seq=B*L, batch=C, d_model=K)
        x_feat = y_time.reshape(C, B, K, L).transpose(0, 1, 3, 2).reshape(C, B * L, K)
        y_feat = _encoder_apply(x_feat, d_zero, lp["feat"], nheads=nheads, nsplit=2)
        y_cf = y_feat.reshape(C, P)

        # ---- mid/cond conv + gate + out conv + residual + in-place skip accum
        x_state, skip_acc = pl.pallas_call(
            functools.partial(_post_kernel, channels=C),
            out_shape=(jax.ShapeDtypeStruct((C, P), jnp.float32),
                       jax.ShapeDtypeStruct((C, P), jnp.float32)),
            in_specs=[_VMEM] * 9,
            out_specs=(_VMEM, _VMEM),
            input_output_aliases={3: 1},          # skip_acc updated in place
        )(y_cf, cond_cf, x_state, skip_acc,
          lp["mid_w"], lp["cond_w"], (lp["mid_b"] + lp["cond_b"])[:, None],
          lp["out_w"], lp["out_b"][:, None])

    # ---- output head: scale skip sum, conv+relu, conv (zero-init weight)
    y = pl.pallas_call(
        functools.partial(_head_kernel, scale=1.0 / math.sqrt(n_layers)),
        out_shape=jax.ShapeDtypeStruct((1, P), jnp.float32),
        in_specs=[_VMEM] * 5,
        out_specs=_VMEM,
    )(skip_acc, params["op1_w"], params["op1_b"][:, None],
      params["op2_w"], params["op2_b"][:, None])

    return y.reshape(B, L, K).transpose(0, 2, 1)                     # (B, K, L)


# ----------------------------- parameter init --------------------------------
def build_embedding(num_steps, dim):
    steps = jnp.arange(num_steps, dtype=jnp.float32)[:, None]
    freqs = (10.0 ** (jnp.arange(dim, dtype=jnp.float32) / (dim - 1) * 4.0))[None, :]
    table = steps * freqs
    return jnp.concatenate([jnp.sin(table), jnp.cos(table)], axis=1)  # (steps, 2*dim)


def init_params(key):
    C = CFG["channels"]
    DE = CFG["diffusion_embedding_dim"]
    SD = CFG["side_dim"]
    DFF = CFG["dim_feedforward"]
    keys = iter(jax.random.split(key, 256))

    def nrm(shape, scale):
        return scale * jax.random.normal(next(keys), shape, jnp.float32)

    def conv_w(cout, cin):          # kaiming-normal-ish for Conv1d(k=1)
        return nrm((cout, cin), math.sqrt(2.0 / cin))

    def bias(n):
        return nrm((n,), 0.02)

    def init_transformer(d_model):
        return dict(
            in_proj_w=nrm((3 * d_model, d_model), 1.0 / math.sqrt(d_model)),
            in_proj_b=bias(3 * d_model),
            out_w=nrm((d_model, d_model), 1.0 / math.sqrt(d_model)),
            out_b=bias(d_model),
            lin1_w=nrm((DFF, d_model), 1.0 / math.sqrt(d_model)),
            lin1_b=bias(DFF),
            lin2_w=nrm((d_model, DFF), 1.0 / math.sqrt(DFF)),
            lin2_b=bias(d_model),
            ln1_g=jnp.ones((d_model,), jnp.float32),
            ln1_b=jnp.zeros((d_model,), jnp.float32),
            ln2_g=jnp.ones((d_model,), jnp.float32),
            ln2_b=jnp.zeros((d_model,), jnp.float32),
        )

    params = dict(
        emb_table=build_embedding(CFG["num_steps"], DE // 2),
        emb_w1=nrm((DE, DE), 1.0 / math.sqrt(DE)), emb_b1=bias(DE),
        emb_w2=nrm((DE, DE), 1.0 / math.sqrt(DE)), emb_b2=bias(DE),
        inp_w=conv_w(C, CFG["inputdim"]), inp_b=bias(C),
        op1_w=conv_w(C, C), op1_b=bias(C),
        # output_projection2.weight is zero-initialized in the PyTorch __init__
        op2_w=jnp.zeros((1, C), jnp.float32), op2_b=bias(1),
        layers=[],
    )
    for _ in range(CFG["layers"]):
        params["layers"].append(dict(
            diff_w=nrm((C, DE), 1.0 / math.sqrt(DE)), diff_b=bias(C),
            cond_w=conv_w(2 * C, SD), cond_b=bias(2 * C),
            mid_w=conv_w(2 * C, C), mid_b=bias(2 * C),
            out_w=conv_w(2 * C, C), out_b=bias(2 * C),
            time=init_transformer(C),
            feat=init_transformer(C),
        ))
    return params


# ----------------------------------- main ------------------------------------
if __name__ == "__main__":
    # 'normal' transformer config requires K == L == channels (d_model).
    B = 2
    K = CFG["channels"]
    L = CFG["channels"]

    key = jax.random.PRNGKey(0)
    k_x, k_c, k_p = jax.random.split(key, 3)

    x = jax.random.normal(k_x, (B, CFG["inputdim"], K, L), jnp.float32)
    cond_info = jax.random.normal(k_c, (B, CFG["side_dim"], K, L), jnp.float32)
    diffusion_step = jnp.array([3, 41], dtype=jnp.int32)

    params = init_params(k_p)

    out = diff_csdi_forward(params, x, cond_info, diffusion_step)
    out = jax.block_until_ready(out)
    assert out.shape == (B, K, L), out.shape
    assert jnp.all(jnp.isfinite(out))
    print("KERNEL_OK")
</pallas_src>

<mosaic_0001>
module attributes {stable_mosaic.version = 11 : i64} {
  func.func @_prologue_kernel(%arg0: memref<2x512xf32, #tpu.memory_space<vmem>>, %arg1: memref<16x2xf32, #tpu.memory_space<vmem>>, %arg2: memref<16x1xf32, #tpu.memory_space<vmem>>, %arg3: memref<2x128xf32, #tpu.memory_space<vmem>>, %arg4: memref<128x128xf32, #tpu.memory_space<vmem>>, %arg5: memref<1x128xf32, #tpu.memory_space<vmem>>, %arg6: memref<128x128xf32, #tpu.memory_space<vmem>>, %arg7: memref<1x128xf32, #tpu.memory_space<vmem>>, %arg8: memref<128x32xf32, #tpu.memory_space<vmem>>, %arg9: memref<1x32xf32, #tpu.memory_space<vmem>>, %arg10: memref<16x512xf32, #tpu.memory_space<vmem>>, %arg11: memref<2x32xf32, #tpu.memory_space<vmem>>) attributes {dimension_semantics = [], scalar_prefetch = 0 : i64, scratch_operands = 0 : i64, tpu.core_type = #tpu.core_type<tc>} {
    %c0 = arith.constant 0 : index
    %c0_0 = arith.constant 0 : index
    %0 = vector.load %arg1[%c0, %c0_0] : memref<16x2xf32, #tpu.memory_space<vmem>>, vector<16x2xf32>
    %c0_1 = arith.constant 0 : index
    %c0_2 = arith.constant 0 : index
    %1 = vector.load %arg0[%c0_1, %c0_2] : memref<2x512xf32, #tpu.memory_space<vmem>>, vector<2x512xf32>
    %cst = arith.constant dense<0.000000e+00> : vector<16x512xf32>
    %2 = tpu.matmul %0, %1, %cst {dimension_numbers = #tpu.dot_dimension_numbers<[1], [0], [0], [1], [0, 0, 1, 1], [], []>} : vector<16x2xf32>, vector<2x512xf32>, vector<16x512xf32> -> vector<16x512xf32>
    %c0_3 = arith.constant 0 : index
    %c0_4 = arith.constant 0 : index
    %3 = vector.load %arg2[%c0_3, %c0_4] : memref<16x1xf32, #tpu.memory_space<vmem>>, vector<16x1xf32>
    %4 = vector.broadcast %3 : vector<16x1xf32> to vector<16x512xf32>
    %5 = arith.addf %2, %4 : vector<16x512xf32>
    %cst_5 = arith.constant 0.000000e+00 : f32
    %6 = vector.broadcast %cst_5 : f32 to vector<16x512xf32>
    %7 = arith.maximumf %5, %6 : vector<16x512xf32>
    %c0_6 = arith.constant 0 : index
    %c0_7 = arith.constant 0 : index
    %8 = vector.load %arg10[%c0_6, %c0_7] : memref<16x512xf32, #tpu.memory_space<vmem>>, vector<16x512xf32>
    tpu.vector_store %arg10[%c0_6, %c0_7], %7 {strides = array<i32>} : memref<16x512xf32, #tpu.memory_space<vmem>>, vector<16x512xf32>,
    %c0_8 = arith.constant 0 : index
    %c0_9 = arith.constant 0 : index
    %9 = vector.load %arg3[%c0_8, %c0_9] : memref<2x128xf32, #tpu.memory_space<vmem>>, vector<2x128xf32>
    %c0_10 = arith.constant 0 : index
    %c0_11 = arith.constant 0 : index
    %10 = vector.load %arg4[%c0_10, %c0_11] : memref<128x128xf32, #tpu.memory_space<vmem>>, vector<128x128xf32>
    %cst_12 = arith.constant dense<0.000000e+00> : vector<2x128xf32>
    %11 = tpu.matmul %9, %10, %cst_12 {dimension_numbers = #tpu.dot_dimension_numbers<[1], [0], [0], [1], [0, 0, 1, 1], [], []>} : vector<2x128xf32>, vector<128x128xf32>, vector<2x128xf32> -> vector<2x128xf32>
    %c0_13 = arith.constant 0 : index
    %c0_14 = arith.constant 0 : index
    %12 = vector.load %arg5[%c0_13, %c0_14] : memref<1x128xf32, #tpu.memory_space<vmem>>, vector<1x128xf32>
    %13 = vector.broadcast %12 : vector<1x128xf32> to vector<2x128xf32>
    %14 = arith.addf %11, %13 : vector<2x128xf32>
    %15 = arith.negf %14 : vector<2x128xf32>
    %16 = math.exp %15 : vector<2x128xf32>
    %cst_15 = arith.constant 1.000000e+00 : f32
    %17 = vector.broadcast %cst_15 : f32 to vector<2x128xf32>
    %18 = arith.addf %17, %16 : vector<2x128xf32>
    %19 = arith.divf %17, %18 : vector<2x128xf32>
    %20 = arith.mulf %14, %19 : vector<2x128xf32>
    %c0_16 = arith.constant 0 : index
    %c0_17 = arith.constant 0 : index
    %21 = vector.load %arg6[%c0_16, %c0_17] : memref<128x128xf32, #tpu.memory_space<vmem>>, vector<128x128xf32>
    %cst_18 = arith.constant dense<0.000000e+00> : vector<2x128xf32>
    %22 = tpu.matmul %20, %21, %cst_18 {dimension_numbers = #tpu.dot_dimension_numbers<[1], [0], [0], [1], [0, 0, 1, 1], [], []>} : vector<2x128xf32>, vector<128x128xf32>, vector<2x128xf32> -> vector<2x128xf32>
    %c0_19 = arith.constant 0 : index
    %c0_20 = arith.constant 0 : index
    %23 = vector.load %arg7[%c0_19, %c0_20] : memref<1x128xf32, #tpu.memory_space<vmem>>, vector<1x128xf32>
    %24 = vector.broadcast %23 : vector<1x128xf32> to vector<2x128xf32>
    %25 = arith.addf %22, %24 : vector<2x128xf32>
    %26 = arith.negf %25 : vector<2x128xf32>
    %27 = math.exp %26 : vector<2x128xf32>
    %cst_21 = arith.constant 1.000000e+00 : f32
    %28 = vector.broadcast %cst_21 : f32 to vector<2x128xf32>
    %29 = arith.addf %28, %27 : vector<2x128xf32>
    %30 = arith.divf %28, %29 : vector<2x128xf32>
    %31 = arith.mulf %25, %30 : vector<2x128xf32>
    %c0_22 = arith.constant 0 : index
    %c0_23 = arith.constant 0 : index
    %32 = vector.load %arg8[%c0_22, %c0_23] : memref<128x32xf32, #tpu.memory_space<vmem>>, vector<128x32xf32>
    %cst_24 = arith.constant dense<0.000000e+00> : vector<2x32xf32>
    %33 = tpu.matmul %31, %32, %cst_24 {dimension_numbers = #tpu.dot_dimension_numbers<[1], [0], [0], [1], [0, 0, 1, 1], [], []>} : vector<2x128xf32>, vector<128x32xf32>, vector<2x32xf32> -> vector<2x32xf32>
    %c0_25 = arith.constant 0 : index
    %c0_26 = arith.constant 0 : index
    %34 = vector.load %arg9[%c0_25, %c0_26] : memref<1x32xf32, #tpu.memory_space<vmem>>, vector<1x32xf32>
    %35 = vector.broadcast %34 : vector<1x32xf32> to vector<2x32xf32>
    %36 = arith.addf %33, %35 : vector<2x32xf32>
    %c0_27 = arith.constant 0 : index
    %c0_28 = arith.constant 0 : index
    %37 = vector.load %arg11[%c0_27, %c0_28] : memref<2x32xf32, #tpu.memory_space<vmem>>, vector<2x32xf32>
    tpu.vector_store %arg11[%c0_27, %c0_28], %36 {strides = array<i32>} : memref<2x32xf32, #tpu.memory_space<vmem>>, vector<2x32xf32>,
    return
  }
}

module attributes {stable_mosaic.version = 11 : i64} {
  func.func @_encoder_kernel(%arg0: i32, %arg1: memref<8x32x16xf32, #tpu.memory_space<vmem>>, %arg2: memref<8x32x1xf32, #tpu.memory_space<vmem>>, %arg3: memref<16x48xf32, #tpu.memory_space<vmem>>, %arg4: memref<1x48xf32, #tpu.memory_space<vmem>>, %arg5: memref<16x16xf32, #tpu.memory_space<vmem>>, %arg6: memref<1x16xf32, #tpu.memory_space<vmem>>, %arg7: memref<1x16xf32, #tpu.memory_space<vmem>>, %arg8: memref<1x16xf32, #tpu.memory_space<vmem>>, %arg9: memref<16x64xf32, #tpu.memory_space<vmem>>, %arg10: memref<1x64xf32, #tpu.memory_space<vmem>>, %arg11: memref<64x16xf32, #tpu.memory_space<vmem>>, %arg12: memref<1x16xf32, #tpu.memory_space<vmem>>, %arg13: memref<1x16xf32, #tpu.memory_space<vmem>>, %arg14: memref<1x16xf32, #tpu.memory_space<vmem>>, %arg15: memref<8x32x16xf32, #tpu.memory_space<vmem>>) attributes {dimension_semantics = [#tpu.dimension_semantics<parallel>], iteration_bounds = array<i64: 2>, scalar_prefetch = 0 : i64, scratch_operands = 0 : i64, tpu.core_type = #tpu.core_type<tc>, window_params = [{transform_indices = @transform_0, window_bounds = array<i64: 8, 32, 16>}, {transform_indices = @transform_1, window_bounds = array<i64: 8, 32, 1>}, {pipeline_mode = #tpu.pipeline_mode<synchronous>, transform_indices = @transform_2, window_bounds = array<i64: 16, 48>}, {pipeline_mode = #tpu.pipeline_mode<synchronous>, transform_indices = @transform_3, window_bounds = array<i64: 1, 48>}, {pipeline_mode = #tpu.pipeline_mode<synchronous>, transform_indices = @transform_4, window_bounds = array<i64: 16, 16>}, {pipeline_mode = #tpu.pipeline_mode<synchronous>, transform_indices = @transform_5, window_bounds = array<i64: 1, 16>}, {pipeline_mode = #tpu.pipeline_mode<synchronous>, transform_indices = @transform_6, window_bounds = array<i64: 1, 16>}, {pipeline_mode = #tpu.pipeline_mode<synchronous>, transform_indices = @transform_7, window_bounds = array<i64: 1, 16>}, {pipeline_mode = #tpu.pipeline_mode<synchronous>, transform_indices = @transform_8, window_bounds = array<i64: 16, 64>}, {pipeline_mode = #tpu.pipeline_mode<synchronous>, transform_indices = @transform_9, window_bounds = array<i64: 1, 64>}, {pipeline_mode = #tpu.pipeline_mode<synchronous>, transform_indices = @transform_10, window_bounds = array<i64: 64, 16>}, {pipeline_mode = #tpu.pipeline_mode<synchronous>, transform_indices = @transform_11, window_bounds = array<i64: 1, 16>}, {pipeline_mode = #tpu.pipeline_mode<synchronous>, transform_indices = @transform_12, window_bounds = array<i64: 1, 16>}, {pipeline_mode = #tpu.pipeline_mode<synchronous>, transform_indices = @transform_13, window_bounds = array<i64: 1, 16>}, {transform_indices = @transform_14, window_bounds = array<i64: 8, 32, 16>}]} {
    %c0 = arith.constant 0 : index
    %c0_0 = arith.constant 0 : index
    %c0_1 = arith.constant 0 : index
    %0 = vector.load %arg1[%c0, %c0_0, %c0_1] : memref<8x32x16xf32, #tpu.memory_space<vmem>>, vector<8x32x16xf32>
    %c0_2 = arith.constant 0 : index
    %c0_3 = arith.constant 0 : index
    %c0_4 = arith.constant 0 : index
    %1 = vector.load %arg2[%c0_2, %c0_3, %c0_4] : memref<8x32x1xf32, #tpu.memory_space<vmem>>, vector<8x32x1xf32>
    %2 = vector.broadcast %1 : vector<8x32x1xf32> to vector<8x32x16xf32>
    %3 = arith.addf %0, %2 : vector<8x32x16xf32>
    %4 = vector.shape_cast %3 : vector<8x32x16xf32> to vector<256x16xf32>
    %c0_5 = arith.constant 0 : index
    %c0_6 = arith.constant 0 : index
    %5 = vector.load %arg3[%c0_5, %c0_6] : memref<16x48xf32, #tpu.memory_space<vmem>>, vector<16x48xf32>
    %cst = arith.constant dense<0.000000e+00> : vector<256x48xf32>
    %6 = tpu.matmul %4, %5, %cst {dimension_numbers = #tpu.dot_dimension_numbers<[1], [0], [0], [1], [0, 0, 1, 1], [], []>} : vector<256x16xf32>, vector<16x48xf32>, vector<256x48xf32> -> vector<256x48xf32>
    %c0_7 = arith.constant 0 : index
    %c0_8 = arith.constant 0 : index
    %7 = vector.load %arg4[%c0_7, %c0_8] : memref<1x48xf32, #tpu.memory_space<vmem>>, vector<1x48xf32>
    %8 = vector.broadcast %7 : vector<1x48xf32> to vector<256x48xf32>
    %9 = arith.addf %6, %8 : vector<256x48xf32>
    %10 = vector.extract_strided_slice %9 {offsets = [0, 0], sizes = [256, 16], strides = [1, 1]} : vector<256x48xf32> to vector<256x16xf32>
    %11 = vector.shape_cast %10 : vector<256x16xf32> to vector<8x32x16xf32>
    %12 = vector.extract_strided_slice %9 {offsets = [0, 16], sizes = [256, 16], strides = [1, 1]} : vector<256x48xf32> to vector<256x16xf32>
    %13 = vector.shape_cast %12 : vector<256x16xf32> to vector<8x32x16xf32>
    %14 = vector.extract_strided_slice %9 {offsets = [0, 32], sizes = [256, 16], strides = [1, 1]} : vector<256x48xf32> to vector<256x16xf32>
    %15 = vector.shape_cast %14 : vector<256x16xf32> to vector<8x32x16xf32>
    %c0_9 = arith.constant 0 : index
    %c0_10 = arith.constant 0 : index
    %16 = vector.load %arg5[%c0_9, %c0_10] : memref<16x16xf32, #tpu.memory_space<vmem>>, vector<16x16xf32>
    %cst_11 = arith.constant 0.000000e+00 : f32
    %17 = vector.broadcast %cst_11 : f32 to vector<256x16xf32>
    %18 = vector.extract_strided_slice %11 {offsets = [0, 0, 0], sizes = [8, 32, 8], strides = [1, 1, 1]} : vector<8x32x16xf32> to vector<8x32x8xf32>
    %19 = vector.extract_strided_slice %13 {offsets = [0, 0, 0], sizes = [8, 32, 8], strides = [1, 1, 1]} : vector<8x32x16xf32> to vector<8x32x8xf32>
    %20 = vector.extract_strided_slice %15 {offsets = [0, 0, 0], sizes = [8, 32, 8], strides = [1, 1, 1]} : vector<8x32x16xf32> to vector<8x32x8xf32>
    "tpu.trace_start"() <{level = 10 : i32, message = "nsd,ntd->nst"}> : () -> ()
    %cst_12 = arith.constant dense<0.000000e+00> : vector<8x32x32xf32>
    %21 = tpu.matmul %18, %19, %cst_12 {dimension_numbers = #tpu.dot_dimension_numbers<[2], [2], [1], [1], [0, 0, 0, 1, 1, 1], [0], [0]>} : vector<8x32x8xf32>, vector<8x32x8xf32>, vector<8x32x32xf32> -> vector<8x32x32xf32>
    "tpu.trace_stop"() : () -> ()
    %cst_13 = arith.constant 0.353553385 : f32
    %22 = vector.broadcast %cst_13 : f32 to vector<8x32x32xf32>
    %23 = arith.mulf %21, %22 : vector<8x32x32xf32>
    %cst_14 = arith.constant dense<0xFF800000> : vector<8x32xf32>
    %24 = vector.multi_reduction <maximumf>, %23, %cst_14 [2] : vector<8x32x32xf32> to vector<8x32xf32>
    %25 = vector.shape_cast %24 : vector<8x32xf32> to vector<8x32x1xf32>
    %26 = vector.broadcast %25 : vector<8x32x1xf32> to vector<8x32x32xf32>
    %27 = arith.subf %23, %26 : vector<8x32x32xf32>
    %28 = math.exp %27 : vector<8x32x32xf32>
    %cst_15 = arith.constant dense<0.000000e+00> : vector<8x32xf32>
    %29 = vector.multi_reduction <add>, %28, %cst_15 [2] : vector<8x32x32xf32> to vector<8x32xf32>
    %30 = vector.shape_cast %29 : vector<8x32xf32> to vector<8x32x1xf32>
    %31 = tpu.reciprocal %30 {approx = true} : vector<8x32x1xf32> -> vector<8x32x1xf32>
    %32 = vector.broadcast %31 : vector<8x32x1xf32> to vector<8x32x32xf32>
    %33 = arith.mulf %28, %32 : vector<8x32x32xf32>
    "tpu.trace_start"() <{level = 10 : i32, message = "nst,ntd->nsd"}> : () -> ()
    %cst_16 = arith.constant dense<0.000000e+00> : vector<8x32x8xf32>
    %34 = tpu.matmul %33, %20, %cst_16 {dimension_numbers = #tpu.dot_dimension_numbers<[2], [1], [1], [2], [0, 0, 0, 1, 1, 2], [0], [0]>} : vector<8x32x32xf32>, vector<8x32x8xf32>, vector<8x32x8xf32> -> vector<8x32x8xf32>
    "tpu.trace_stop"() : () -> ()
    %35 = vector.shape_cast %34 : vector<8x32x8xf32> to vector<256x8xf32>
    %36 = vector.extract_strided_slice %16 {offsets = [0, 0], sizes = [8, 16], strides = [1, 1]} : vector<16x16xf32> to vector<8x16xf32>
    %cst_17 = arith.constant dense<0.000000e+00> : vector<256x16xf32>
    %37 = tpu.matmul %35, %36, %cst_17 {dimension_numbers = #tpu.dot_dimension_numbers<[1], [0], [0], [1], [0, 0, 1, 1], [], []>} : vector<256x8xf32>, vector<8x16xf32>, vector<256x16xf32> -> vector<256x16xf32>
    %38 = arith.addf %17, %37 : vector<256x16xf32>
    %39 = vector.extract_strided_slice %11 {offsets = [0, 0, 8], sizes = [8, 32, 8], strides = [1, 1, 1]} : vector<8x32x16xf32> to vector<8x32x8xf32>
    %40 = vector.extract_strided_slice %13 {offsets = [0, 0, 8], sizes = [8, 32, 8], strides = [1, 1, 1]} : vector<8x32x16xf32> to vector<8x32x8xf32>
    %41 = vector.extract_strided_slice %15 {offsets = [0, 0, 8], sizes = [8, 32, 8], strides = [1, 1, 1]} : vector<8x32x16xf32> to vector<8x32x8xf32>
    "tpu.trace_start"() <{level = 10 : i32, message = "nsd,ntd->nst"}> : () -> ()
    %cst_18 = arith.constant dense<0.000000e+00> : vector<8x32x32xf32>
    %42 = tpu.matmul %39, %40, %cst_18 {dimension_numbers = #tpu.dot_dimension_numbers<[2], [2], [1], [1], [0, 0, 0, 1, 1, 1], [0], [0]>} : vector<8x32x8xf32>, vector<8x32x8xf32>, vector<8x32x32xf32> -> vector<8x32x32xf32>
    "tpu.trace_stop"() : () -> ()
    %cst_19 = arith.constant 0.353553385 : f32
    %43 = vector.broadcast %cst_19 : f32 to vector<8x32x32xf32>
    %44 = arith.mulf %42, %43 : vector<8x32x32xf32>
    %cst_20 = arith.constant dense<0xFF800000> : vector<8x32xf32>
    %45 = vector.multi_reduction <maximumf>, %44, %cst_20 [2] : vector<8x32x32xf32> to vector<8x32xf32>
    %46 = vector.shape_cast %45 : vector<8x32xf32> to vector<8x32x1xf32>
    %47 = vector.broadcast %46 : vector<8x32x1xf32> to vector<8x32x32xf32>
    %48 = arith.subf %44, %47 : vector<8x32x32xf32>
    %49 = math.exp %48 : vector<8x32x32xf32>
    %cst_21 = arith.constant dense<0.000000e+00> : vector<8x32xf32>
    %50 = vector.multi_reduction <add>, %49, %cst_21 [2] : vector<8x32x32xf32> to vector<8x32xf32>
    %51 = vector.shape_cast %50 : vector<8x32xf32> to vector<8x32x1xf32>
    %52 = tpu.reciprocal %51 {approx = true} : vector<8x32x1xf32> -> vector<8x32x1xf32>
    %53 = vector.broadcast %52 : vector<8x32x1xf32> to vector<8x32x32xf32>
    %54 = arith.mulf %49, %53 : vector<8x32x32xf32>
    "tpu.trace_start"() <{level = 10 : i32, message = "nst,ntd->nsd"}> : () -> ()
    %cst_22 = arith.constant dense<0.000000e+00> : vector<8x32x8xf32>
    %55 = tpu.matmul %54, %41, %cst_22 {dimension_numbers = #tpu.dot_dimension_numbers<[2], [1], [1], [2], [0, 0, 0, 1, 1, 2], [0], [0]>} : vector<8x32x32xf32>, vector<8x32x8xf32>, vector<8x32x8xf32> -> vector<8x32x8xf32>
    "tpu.trace_stop"() : () -> ()
    %56 = vector.shape_cast %55 : vector<8x32x8xf32> to vector<256x8xf32>
    %57 = vector.extract_strided_slice %16 {offsets = [8, 0], sizes = [8, 16], strides = [1, 1]} : vector<16x16xf32> to vector<8x16xf32>
    %cst_23 = arith.constant dense<0.000000e+00> : vector<256x16xf32>
    %58 = tpu.matmul %56, %57, %cst_23 {dimension_numbers = #tpu.dot_dimension_numbers<[1], [0], [0], [1], [0, 0, 1, 1], [], []>} : vector<256x8xf32>, vector<8x16xf32>, vector<256x16xf32> -> vector<256x16xf32>
    %59 = arith.addf %38, %58 : vector<256x16xf32>
    %c0_24 = arith.constant 0 : index
    %c0_25 = arith.constant 0 : index
    %60 = vector.load %arg6[%c0_24, %c0_25] : memref<1x16xf32, #tpu.memory_space<vmem>>, vector<1x16xf32>
    %61 = vector.broadcast %60 : vector<1x16xf32> to vector<256x16xf32>
    %62 = arith.addf %59, %61 : vector<256x16xf32>
    %63 = arith.addf %4, %62 : vector<256x16xf32>
    %c0_26 = arith.constant 0 : index
    %c0_27 = arith.constant 0 : index
    %64 = vector.load %arg7[%c0_26, %c0_27] : memref<1x16xf32, #tpu.memory_space<vmem>>, vector<1x16xf32>
    %c0_28 = arith.constant 0 : index
    %c0_29 = arith.constant 0 : index
    %65 = vector.load %arg8[%c0_28, %c0_29] : memref<1x16xf32, #tpu.memory_space<vmem>>, vector<1x16xf32>
    %cst_30 = arith.constant dense<0.000000e+00> : vector<256xf32>
    %66 = vector.multi_reduction <add>, %63, %cst_30 [1] : vector<256x16xf32> to vector<256xf32>
    %67 = vector.shape_cast %66 : vector<256xf32> to vector<256x1xf32>
    %cst_31 = arith.constant 1.600000e+01 : f32
    %68 = vector.broadcast %cst_31 : f32 to vector<256x1xf32>
    %69 = arith.divf %67, %68 : vector<256x1xf32>
    %70 = vector.broadcast %69 : vector<256x1xf32> to vector<256x16xf32>
    %71 = arith.subf %63, %70 : vector<256x16xf32>
    %72 = arith.mulf %71, %71 : vector<256x16xf32>
    %cst_32 = arith.constant dense<0.000000e+00> : vector<256xf32>
    %73 = vector.multi_reduction <add>, %72, %cst_32 [1] : vector<256x16xf32> to vector<256xf32>
    %74 = vector.shape_cast %73 : vector<256xf32> to vector<256x1xf32>
    %cst_33 = arith.constant 1.600000e+01 : f32
    %75 = vector.broadcast %cst_33 : f32 to vector<256x1xf32>
    %76 = arith.divf %74, %75 : vector<256x1xf32>
    %cst_34 = arith.constant 9.99999974E-6 : f32
    %77 = vector.broadcast %cst_34 : f32 to vector<256x1xf32>
    %78 = arith.addf %76, %77 : vector<256x1xf32>
    %79 = math.rsqrt %78 : vector<256x1xf32>
    %80 = vector.broadcast %79 : vector<256x1xf32> to vector<256x16xf32>
    %81 = arith.mulf %71, %80 : vector<256x16xf32>
    %82 = vector.broadcast %64 : vector<1x16xf32> to vector<256x16xf32>
    %83 = arith.mulf %81, %82 : vector<256x16xf32>
    %84 = vector.broadcast %65 : vector<1x16xf32> to vector<256x16xf32>
    %85 = arith.addf %83, %84 : vector<256x16xf32>
    %c0_35 = arith.constant 0 : index
    %c0_36 = arith.constant 0 : index
    %86 = vector.load %arg9[%c0_35, %c0_36] : memref<16x64xf32, #tpu.memory_space<vmem>>, vector<16x64xf32>
    %cst_37 = arith.constant dense<0.000000e+00> : vector<256x64xf32>
    %87 = tpu.matmul %85, %86, %cst_37 {dimension_numbers = #tpu.dot_dimension_numbers<[1], [0], [0], [1], [0, 0, 1, 1], [], []>} : vector<256x16xf32>, vector<16x64xf32>, vector<256x64xf32> -> vector<256x64xf32>
    %c0_38 = arith.constant 0 : index
    %c0_39 = arith.constant 0 : index
    %88 = vector.load %arg10[%c0_38, %c0_39] : memref<1x64xf32, #tpu.memory_space<vmem>>, vector<1x64xf32>
    %89 = vector.broadcast %88 : vector<1x64xf32> to vector<256x64xf32>
    %90 = arith.addf %87, %89 : vector<256x64xf32>
    %cst_40 = arith.constant 5.000000e-01 : f32
    %91 = vector.broadcast %cst_40 : f32 to vector<256x64xf32>
    %92 = arith.mulf %91, %90 : vector<256x64xf32>
    %cst_41 = arith.constant 0.707106769 : f32
    %93 = vector.broadcast %cst_41 : f32 to vector<256x64xf32>
    %94 = arith.mulf %90, %93 : vector<256x64xf32>
    %95 = math.absf %94 : vector<256x64xf32>
    %cst_42 = arith.constant 0.327591091 : f32
    %96 = vector.broadcast %cst_42 : f32 to vector<256x64xf32>
    %97 = arith.mulf %96, %95 : vector<256x64xf32>
    %cst_43 = arith.constant 1.000000e+00 : f32
    %98 = vector.broadcast %cst_43 : f32 to vector<256x64xf32>
    %99 = arith.addf %98, %97 : vector<256x64xf32>
    %cst_44 = arith.constant 1.000000e+00 : f32
    %100 = vector.broadcast %cst_44 : f32 to vector<256x64xf32>
    %101 = arith.divf %100, %99 : vector<256x64xf32>
    %cst_45 = arith.constant 1.06140542 : f32
    %102 = vector.broadcast %cst_45 : f32 to vector<256x64xf32>
    %103 = arith.mulf %102, %101 : vector<256x64xf32>
    %cst_46 = arith.constant -1.45315206 : f32
    %104 = vector.broadcast %cst_46 : f32 to vector<256x64xf32>
    %105 = arith.addf %103, %104 : vector<256x64xf32>
    %106 = arith.mulf %105, %101 : vector<256x64xf32>
    %cst_47 = arith.constant 1.42141378 : f32
    %107 = vector.broadcast %cst_47 : f32 to vector<256x64xf32>
    %108 = arith.addf %106, %107 : vector<256x64xf32>
    %109 = arith.mulf %108, %101 : vector<256x64xf32>
    %cst_48 = arith.constant -0.284496725 : f32
    %110 = vector.broadcast %cst_48 : f32 to vector<256x64xf32>
    %111 = arith.addf %109, %110 : vector<256x64xf32>
    %112 = arith.mulf %111, %101 : vector<256x64xf32>
    %cst_49 = arith.constant 0.254829586 : f32
    %113 = vector.broadcast %cst_49 : f32 to vector<256x64xf32>
    %114 = arith.addf %112, %113 : vector<256x64xf32>
    %115 = arith.mulf %114, %101 : vector<256x64xf32>
    %cst_50 = arith.constant 0.000000e+00 : f32
    %116 = vector.broadcast %cst_50 : f32 to vector<256x64xf32>
    %117 = arith.subf %116, %95 : vector<256x64xf32>
    %118 = arith.mulf %117, %95 : vector<256x64xf32>
    %119 = math.exp %118 : vector<256x64xf32>
    %120 = arith.mulf %115, %119 : vector<256x64xf32>
    %cst_51 = arith.constant 1.000000e+00 : f32
    %121 = vector.broadcast %cst_51 : f32 to vector<256x64xf32>
    %122 = arith.subf %121, %120 : vector<256x64xf32>
    %cst_52 = arith.constant 0.000000e+00 : f32
    %123 = vector.broadcast %cst_52 : f32 to vector<256x64xf32>
    %124 = arith.cmpf oge, %94, %123 : vector<256x64xf32>
    %cst_53 = arith.constant 0.000000e+00 : f32
    %125 = vector.broadcast %cst_53 : f32 to vector<256x64xf32>
    %126 = arith.subf %125, %122 : vector<256x64xf32>
    %127 = arith.select %124, %122, %126 : vector<256x64xi1>, vector<256x64xf32>
    %cst_54 = arith.constant 1.000000e+00 : f32
    %128 = vector.broadcast %cst_54 : f32 to vector<256x64xf32>
    %129 = arith.addf %128, %127 : vector<256x64xf32>
    %130 = arith.mulf %92, %129 : vector<256x64xf32>
    %c0_55 = arith.constant 0 : index
    %c0_56 = arith.constant 0 : index
    %131 = vector.load %arg11[%c0_55, %c0_56] : memref<64x16xf32, #tpu.memory_space<vmem>>, vector<64x16xf32>
    %cst_57 = arith.constant dense<0.000000e+00> : vector<256x16xf32>
    %132 = tpu.matmul %130, %131, %cst_57 {dimension_numbers = #tpu.dot_dimension_numbers<[1], [0], [0], [1], [0, 0, 1, 1], [], []>} : vector<256x64xf32>, vector<64x16xf32>, vector<256x16xf32> -> vector<256x16xf32>
    %c0_58 = arith.constant 0 : index
    %c0_59 = arith.constant 0 : index
    %133 = vector.load %arg12[%c0_58, %c0_59] : memref<1x16xf32, #tpu.memory_space<vmem>>, vector<1x16xf32>
    %134 = vector.broadcast %133 : vector<1x16xf32> to vector<256x16xf32>
    %135 = arith.addf %132, %134 : vector<256x16xf32>
    %136 = arith.addf %85, %135 : vector<256x16xf32>
    %c0_60 = arith.constant 0 : index
    %c0_61 = arith.constant 0 : index
    %137 = vector.load %arg13[%c0_60, %c0_61] : memref<1x16xf32, #tpu.memory_space<vmem>>, vector<1x16xf32>
    %c0_62 = arith.constant 0 : index
    %c0_63 = arith.constant 0 : index
    %138 = vector.load %arg14[%c0_62, %c0_63] : memref<1x16xf32, #tpu.memory_space<vmem>>, vector<1x16xf32>
    %cst_64 = arith.constant dense<0.000000e+00> : vector<256xf32>
    %139 = vector.multi_reduction <add>, %136, %cst_64 [1] : vector<256x16xf32> to vector<256xf32>
    %140 = vector.shape_cast %139 : vector<256xf32> to vector<256x1xf32>
    %cst_65 = arith.constant 1.600000e+01 : f32
    %141 = vector.broadcast %cst_65 : f32 to vector<256x1xf32>
    %142 = arith.divf %140, %141 : vector<256x1xf32>
    %143 = vector.broadcast %142 : vector<256x1xf32> to vector<256x16xf32>
    %144 = arith.subf %136, %143 : vector<256x16xf32>
    %145 = arith.mulf %144, %144 : vector<256x16xf32>
    %cst_66 = arith.constant dense<0.000000e+00> : vector<256xf32>
    %146 = vector.multi_reduction <add>, %145, %cst_66 [1] : vector<256x16xf32> to vector<256xf32>
    %147 = vector.shape_cast %146 : vector<256xf32> to vector<256x1xf32>
    %cst_67 = arith.constant 1.600000e+01 : f32
    %148 = vector.broadcast %cst_67 : f32 to vector<256x1xf32>
    %149 = arith.divf %147, %148 : vector<256x1xf32>
    %cst_68 = arith.constant 9.99999974E-6 : f32
    %150 = vector.broadcast %cst_68 : f32 to vector<256x1xf32>
    %151 = arith.addf %149, %150 : vector<256x1xf32>
    %152 = math.rsqrt %151 : vector<256x1xf32>
    %153 = vector.broadcast %152 : vector<256x1xf32> to vector<256x16xf32>
    %154 = arith.mulf %144, %153 : vector<256x16xf32>
    %155 = vector.broadcast %137 : vector<1x16xf32> to vector<256x16xf32>
    %156 = arith.mulf %154, %155 : vector<256x16xf32>
    %157 = vector.broadcast %138 : vector<1x16xf32> to vector<256x16xf32>
    %158 = arith.addf %156, %157 : vector<256x16xf32>
    %159 = vector.shape_cast %158 : vector<256x16xf32> to vector<8x32x16xf32>
    %c0_69 = arith.constant 0 : index
    %c0_70 = arith.constant 0 : index
    %c0_71 = arith.constant 0 : index
    %160 = vector.load %arg15[%c0_69, %c0_70, %c0_71] : memref<8x32x16xf32, #tpu.memory_space<vmem>>, vector<8x32x16xf32>
    tpu.vector_store %arg15[%c0_69, %c0_70, %c0_71], %159 {strides = array<i32>} : memref<8x32x16xf32, #tpu.memory_space<vmem>>, vector<8x32x16xf32>,
    return
  }
  func.func @transform_0(%arg0: i32) -> (i32, i32, i32) {
    %c0_i32 = arith.constant 0 : i32
    %c0_i32_0 = arith.constant 0 : i32
    %c0_i32_1 = arith.constant 0 : i32
    return %arg0, %c0_i32, %c0_i32_0 : i32, i32, i32
  }
  func.func @transform_1(%arg0: i32) -> (i32, i32, i32) {
    %c0_i32 = arith.constant 0 : i32
    %c0_i32_0 = arith.constant 0 : i32
    %c0_i32_1 = arith.constant 0 : i32
    return %arg0, %c0_i32, %c0_i32_0 : i32, i32, i32
  }
  func.func @transform_2(%arg0: i32) -> (i32, i32) {
    %c0_i32 = arith.constant 0 : i32
    %c0_i32_0 = arith.constant 0 : i32
    %c0_i32_1 = arith.constant 0 : i32
    return %c0_i32, %c0_i32_0 : i32, i32
  }
  func.func @transform_3(%arg0: i32) -> (i32, i32) {
    %c0_i32 = arith.constant 0 : i32
    %c0_i32_0 = arith.constant 0 : i32
    %c0_i32_1 = arith.constant 0 : i32
    return %c0_i32, %c0_i32_0 : i32, i32
  }
  func.func @transform_4(%arg0: i32) -> (i32, i32) {
    %c0_i32 = arith.constant 0 : i32
    %c0_i32_0 = arith.constant 0 : i32
    %c0_i32_1 = arith.constant 0 : i32
    return %c0_i32, %c0_i32_0 : i32, i32
  }
  func.func @transform_5(%arg0: i32) -> (i32, i32) {
    %c0_i32 = arith.constant 0 : i32
    %c0_i32_0 = arith.constant 0 : i32
    %c0_i32_1 = arith.constant 0 : i32
    return %c0_i32, %c0_i32_0 : i32, i32
  }
  func.func @transform_6(%arg0: i32) -> (i32, i32) {
    %c0_i32 = arith.constant 0 : i32
    %c0_i32_0 = arith.constant 0 : i32
    %c0_i32_1 = arith.constant 0 : i32
    return %c0_i32, %c0_i32_0 : i32, i32
  }
  func.func @transform_7(%arg0: i32) -> (i32, i32) {
    %c0_i32 = arith.constant 0 : i32
    %c0_i32_0 = arith.constant 0 : i32
    %c0_i32_1 = arith.constant 0 : i32
    return %c0_i32, %c0_i32_0 : i32, i32
  }
  func.func @transform_8(%arg0: i32) -> (i32, i32) {
    %c0_i32 = arith.constant 0 : i32
    %c0_i32_0 = arith.constant 0 : i32
    %c0_i32_1 = arith.constant 0 : i32
    return %c0_i32, %c0_i32_0 : i32, i32
  }
  func.func @transform_9(%arg0: i32) -> (i32, i32) {
    %c0_i32 = arith.constant 0 : i32
    %c0_i32_0 = arith.constant 0 : i32
    %c0_i32_1 = arith.constant 0 : i32
    return %c0_i32, %c0_i32_0 : i32, i32
  }
  func.func @transform_10(%arg0: i32) -> (i32, i32) {
    %c0_i32 = arith.constant 0 : i32
    %c0_i32_0 = arith.constant 0 : i32
    %c0_i32_1 = arith.constant 0 : i32
    return %c0_i32, %c0_i32_0 : i32, i32
  }
  func.func @transform_11(%arg0: i32) -> (i32, i32) {
    %c0_i32 = arith.constant 0 : i32
    %c0_i32_0 = arith.constant 0 : i32
    %c0_i32_1 = arith.constant 0 : i32
    return %c0_i32, %c0_i32_0 : i32, i32
  }
  func.func @transform_12(%arg0: i32) -> (i32, i32) {
    %c0_i32 = arith.constant 0 : i32
    %c0_i32_0 = arith.constant 0 : i32
    %c0_i32_1 = arith.constant 0 : i32
    return %c0_i32, %c0_i32_0 : i32, i32
  }
  func.func @transform_13(%arg0: i32) -> (i32, i32) {
    %c0_i32 = arith.constant 0 : i32
    %c0_i32_0 = arith.constant 0 : i32
    %c0_i32_1 = arith.constant 0 : i32
    return %c0_i32, %c0_i32_0 : i32, i32
  }
  func.func @transform_14(%arg0: i32) -> (i32, i32, i32) {
    %c0_i32 = arith.constant 0 : i32
    %c0_i32_0 = arith.constant 0 : i32
    %c0_i32_1 = arith.constant 0 : i32
    return %arg0, %c0_i32, %c0_i32_0 : i32, i32, i32
  }
}

module attributes {stable_mosaic.version = 11 : i64} {
  func.func @_post_kernel(%arg0: memref<16x512xf32, #tpu.memory_space<vmem>>, %arg1: memref<8x512xf32, #tpu.memory_space<vmem>>, %arg2: memref<16x512xf32, #tpu.memory_space<vmem>>, %arg3: memref<16x512xf32, #tpu.memory_space<vmem>>, %arg4: memref<32x16xf32, #tpu.memory_space<vmem>>, %arg5: memref<32x8xf32, #tpu.memory_space<vmem>>, %arg6: memref<32x1xf32, #tpu.memory_space<vmem>>, %arg7: memref<32x16xf32, #tpu.memory_space<vmem>>, %arg8: memref<32x1xf32, #tpu.memory_space<vmem>>, %arg9: memref<16x512xf32, #tpu.memory_space<vmem>>, %arg10: memref<16x512xf32, #tpu.memory_space<vmem>>) attributes {dimension_semantics = [], scalar_prefetch = 0 : i64, scratch_operands = 0 : i64, tpu.core_type = #tpu.core_type<tc>} {
    %c0 = arith.constant 0 : index
    %c0_0 = arith.constant 0 : index
    %0 = vector.load %arg4[%c0, %c0_0] : memref<32x16xf32, #tpu.memory_space<vmem>>, vector<32x16xf32>
    %c0_1 = arith.constant 0 : index
    %c0_2 = arith.constant 0 : index
    %1 = vector.load %arg0[%c0_1, %c0_2] : memref<16x512xf32, #tpu.memory_space<vmem>>, vector<16x512xf32>
    %cst = arith.constant dense<0.000000e+00> : vector<32x512xf32>
    %2 = tpu.matmul %0, %1, %cst {dimension_numbers = #tpu.dot_dimension_numbers<[1], [0], [0], [1], [0, 0, 1, 1], [], []>} : vector<32x16xf32>, vector<16x512xf32>, vector<32x512xf32> -> vector<32x512xf32>
    %c0_3 = arith.constant 0 : index
    %c0_4 = arith.constant 0 : index
    %3 = vector.load %arg5[%c0_3, %c0_4] : memref<32x8xf32, #tpu.memory_space<vmem>>, vector<32x8xf32>
    %c0_5 = arith.constant 0 : index
    %c0_6 = arith.constant 0 : index
    %4 = vector.load %arg1[%c0_5, %c0_6] : memref<8x512xf32, #tpu.memory_space<vmem>>, vector<8x512xf32>
    %cst_7 = arith.constant dense<0.000000e+00> : vector<32x512xf32>
    %5 = tpu.matmul %3, %4, %cst_7 {dimension_numbers = #tpu.dot_dimension_numbers<[1], [0], [0], [1], [0, 0, 1, 1], [], []>} : vector<32x8xf32>, vector<8x512xf32>, vector<32x512xf32> -> vector<32x512xf32>
    %6 = arith.addf %2, %5 : vector<32x512xf32>
    %c0_8 = arith.constant 0 : index
    %c0_9 = arith.constant 0 : index
    %7 = vector.load %arg6[%c0_8, %c0_9] : memref<32x1xf32, #tpu.memory_space<vmem>>, vector<32x1xf32>
    %8 = vector.broadcast %7 : vector<32x1xf32> to vector<32x512xf32>
    %9 = arith.addf %6, %8 : vector<32x512xf32>
    %10 = vector.extract_strided_slice %9 {offsets = [0, 0], sizes = [16, 512], strides = [1, 1]} : vector<32x512xf32> to vector<16x512xf32>
    %11 = arith.negf %10 : vector<16x512xf32>
    %12 = math.exp %11 : vector<16x512xf32>
    %cst_10 = arith.constant 1.000000e+00 : f32
    %13 = vector.broadcast %cst_10 : f32 to vector<16x512xf32>
    %14 = arith.addf %13, %12 : vector<16x512xf32>
    %15 = arith.divf %13, %14 : vector<16x512xf32>
    %16 = vector.extract_strided_slice %9 {offsets = [16, 0], sizes = [16, 512], strides = [1, 1]} : vector<32x512xf32> to vector<16x512xf32>
    %17 = math.tanh %16 : vector<16x512xf32>
    %18 = arith.mulf %15, %17 : vector<16x512xf32>
    %c0_11 = arith.constant 0 : index
    %c0_12 = arith.constant 0 : index
    %19 = vector.load %arg7[%c0_11, %c0_12] : memref<32x16xf32, #tpu.memory_space<vmem>>, vector<32x16xf32>
    %cst_13 = arith.constant dense<0.000000e+00> : vector<32x512xf32>
    %20 = tpu.matmul %19, %18, %cst_13 {dimension_numbers = #tpu.dot_dimension_numbers<[1], [0], [0], [1], [0, 0, 1, 1], [], []>} : vector<32x16xf32>, vector<16x512xf32>, vector<32x512xf32> -> vector<32x512xf32>
    %c0_14 = arith.constant 0 : index
    %c0_15 = arith.constant 0 : index
    %21 = vector.load %arg8[%c0_14, %c0_15] : memref<32x1xf32, #tpu.memory_space<vmem>>, vector<32x1xf32>
    %22 = vector.broadcast %21 : vector<32x1xf32> to vector<32x512xf32>
    %23 = arith.addf %20, %22 : vector<32x512xf32>
    %c0_16 = arith.constant 0 : index
    %c0_17 = arith.constant 0 : index
    %24 = vector.load %arg2[%c0_16, %c0_17] : memref<16x512xf32, #tpu.memory_space<vmem>>, vector<16x512xf32>
    %25 = vector.extract_strided_slice %23 {offsets = [0, 0], sizes = [16, 512], strides = [1, 1]} : vector<32x512xf32> to vector<16x512xf32>
    %26 = arith.addf %24, %25 : vector<16x512xf32>
    %cst_18 = arith.constant 0.707106769 : f32
    %27 = vector.broadcast %cst_18 : f32 to vector<16x512xf32>
    %28 = arith.mulf %26, %27 : vector<16x512xf32>
    %c0_19 = arith.constant 0 : index
    %c0_20 = arith.constant 0 : index
    %29 = vector.load %arg9[%c0_19, %c0_20] : memref<16x512xf32, #tpu.memory_space<vmem>>, vector<16x512xf32>
    tpu.vector_store %arg9[%c0_19, %c0_20], %28 {strides = array<i32>} : memref<16x512xf32, #tpu.memory_space<vmem>>, vector<16x512xf32>,
    %c0_21 = arith.constant 0 : index
    %c0_22 = arith.constant 0 : index
    %30 = vector.load %arg3[%c0_21, %c0_22] : memref<16x512xf32, #tpu.memory_space<vmem>>, vector<16x512xf32>
    %31 = vector.extract_strided_slice %23 {offsets = [16, 0], sizes = [16, 512], strides = [1, 1]} : vector<32x512xf32> to vector<16x512xf32>
    %32 = arith.addf %30, %31 : vector<16x512xf32>
    %c0_23 = arith.constant 0 : index
    %c0_24 = arith.constant 0 : index
    %33 = vector.load %arg10[%c0_23, %c0_24] : memref<16x512xf32, #tpu.memory_space<vmem>>, vector<16x512xf32>
    tpu.vector_store %arg10[%c0_23, %c0_24], %32 {strides = array<i32>} : memref<16x512xf32, #tpu.memory_space<vmem>>, vector<16x512xf32>,
    return
  }
}

module attributes {stable_mosaic.version = 11 : i64} {
  func.func @_head_kernel(%arg0: memref<16x512xf32, #tpu.memory_space<vmem>>, %arg1: memref<16x16xf32, #tpu.memory_space<vmem>>, %arg2: memref<16x1xf32, #tpu.memory_space<vmem>>, %arg3: memref<1x16xf32, #tpu.memory_space<vmem>>, %arg4: memref<1x1xf32, #tpu.memory_space<vmem>>, %arg5: memref<1x512xf32, #tpu.memory_space<vmem>>) attributes {dimension_semantics = [], scalar_prefetch = 0 : i64, scratch_operands = 0 : i64, tpu.core_type = #tpu.core_type<tc>} {
    %c0 = arith.constant 0 : index
    %c0_0 = arith.constant 0 : index
    %0 = vector.load %arg0[%c0, %c0_0] : memref<16x512xf32, #tpu.memory_space<vmem>>, vector<16x512xf32>
    %cst = arith.constant 0.707106769 : f32
    %1 = vector.broadcast %cst : f32 to vector<16x512xf32>
    %2 = arith.mulf %0, %1 : vector<16x512xf32>
    %c0_1 = arith.constant 0 : index
    %c0_2 = arith.constant 0 : index
    %3 = vector.load %arg1[%c0_1, %c0_2] : memref<16x16xf32, #tpu.memory_space<vmem>>, vector<16x16xf32>
    %cst_3 = arith.constant dense<0.000000e+00> : vector<16x512xf32>
    %4 = tpu.matmul %3, %2, %cst_3 {dimension_numbers = #tpu.dot_dimension_numbers<[1], [0], [0], [1], [0, 0, 1, 1], [], []>} : vector<16x16xf32>, vector<16x512xf32>, vector<16x512xf32> -> vector<16x512xf32>
    %c0_4 = arith.constant 0 : index
    %c0_5 = arith.constant 0 : index
    %5 = vector.load %arg2[%c0_4, %c0_5] : memref<16x1xf32, #tpu.memory_space<vmem>>, vector<16x1xf32>
    %6 = vector.broadcast %5 : vector<16x1xf32> to vector<16x512xf32>
    %7 = arith.addf %4, %6 : vector<16x512xf32>
    %cst_6 = arith.constant 0.000000e+00 : f32
    %8 = vector.broadcast %cst_6 : f32 to vector<16x512xf32>
    %9 = arith.maximumf %7, %8 : vector<16x512xf32>
    %c0_7 = arith.constant 0 : index
    %c0_8 = arith.constant 0 : index
    %10 = vector.load %arg3[%c0_7, %c0_8] : memref<1x16xf32, #tpu.memory_space<vmem>>, vector<1x16xf32>
    %cst_9 = arith.constant dense<0.000000e+00> : vector<1x512xf32>
    %11 = tpu.matmul %10, %9, %cst_9 {dimension_numbers = #tpu.dot_dimension_numbers<[1], [0], [0], [1], [0, 0, 1, 1], [], []>} : vector<1x16xf32>, vector<16x512xf32>, vector<1x512xf32> -> vector<1x512xf32>
    %c0_10 = arith.constant 0 : index
    %c0_11 = arith.constant 0 : index
    %12 = vector.load %arg4[%c0_10, %c0_11] : memref<1x1xf32, #tpu.memory_space<vmem>>, vector<1x1xf32>
    %13 = vector.broadcast %12 : vector<1x1xf32> to vector<1x512xf32>
    %14 = arith.addf %11, %13 : vector<1x512xf32>
    %c0_12 = arith.constant 0 : index
    %c0_13 = arith.constant 0 : index
    %15 = vector.load %arg5[%c0_12, %c0_13] : memref<1x512xf32, #tpu.memory_space<vmem>>, vector<1x512xf32>
    tpu.vector_store %arg5[%c0_12, %c0_13], %14 {strides = array<i32>} : memref<1x512xf32, #tpu.memory_space<vmem>>, vector<1x512xf32>,
    return
  }
}

module attributes {stable_mosaic.version = 11 : i64} {
  func.func @_post_kernel(%arg0: memref<16x512xf32, #tpu.memory_space<vmem>>, %arg1: memref<8x512xf32, #tpu.memory_space<vmem>>, %arg2: memref<16x512xf32, #tpu.memory_space<vmem>>, %arg3: memref<16x512xf32, #tpu.memory_space<vmem>>, %arg4: memref<32x16xf32, #tpu.memory_space<vmem>>, %arg5: memref<32x8xf32, #tpu.memory_space<vmem>>, %arg6: memref<32x1xf32, #tpu.memory_space<vmem>>, %arg7: memref<32x16xf32, #tpu.memory_space<vmem>>, %arg8: memref<32x1xf32, #tpu.memory_space<vmem>>, %arg9: memref<16x512xf32, #tpu.memory_space<vmem>>, %arg10: memref<16x512xf32, #tpu.memory_space<vmem>>) attributes {dimension_semantics = [], scalar_prefetch = 0 : i64, scratch_operands = 0 : i64, tpu.core_type = #tpu.core_type<tc>} {
    %c0 = arith.constant 0 : index
    %c0_0 = arith.constant 0 : index
    %0 = vector.load %arg4[%c0, %c0_0] : memref<32x16xf32, #tpu.memory_space<vmem>>, vector<32x16xf32>
    %c0_1 = arith.constant 0 : index
    %c0_2 = arith.constant 0 : index
    %1 = vector.load %arg0[%c0_1, %c0_2] : memref<16x512xf32, #tpu.memory_space<vmem>>, vector<16x512xf32>
    %cst = arith.constant dense<0.000000e+00> : vector<32x512xf32>
    %2 = tpu.matmul %0, %1, %cst {dimension_numbers = #tpu.dot_dimension_numbers<[1], [0], [0], [1], [0, 0, 1, 1], [], []>} : vector<32x16xf32>, vector<16x512xf32>, vector<32x512xf32> -> vector<32x512xf32>
    %c0_3 = arith.constant 0 : index
    %c0_4 = arith.constant 0 : index
    %3 = vector.load %arg5[%c0_3, %c0_4] : memref<32x8xf32, #tpu.memory_space<vmem>>, vector<32x8xf32>
    %c0_5 = arith.constant 0 : index
    %c0_6 = arith.constant 0 : index
    %4 = vector.load %arg1[%c0_5, %c0_6] : memref<8x512xf32, #tpu.memory_space<vmem>>, vector<8x512xf32>
    %cst_7 = arith.constant dense<0.000000e+00> : vector<32x512xf32>
    %5 = tpu.matmul %3, %4, %cst_7 {dimension_numbers = #tpu.dot_dimension_numbers<[1], [0], [0], [1], [0, 0, 1, 1], [], []>} : vector<32x8xf32>, vector<8x512xf32>, vector<32x512xf32> -> vector<32x512xf32>
    %6 = arith.addf %2, %5 : vector<32x512xf32>
    %c0_8 = arith.constant 0 : index
    %c0_9 = arith.constant 0 : index
    %7 = vector.load %arg6[%c0_8, %c0_9] : memref<32x1xf32, #tpu.memory_space<vmem>>, vector<32x1xf32>
    %8 = vector.broadcast %7 : vector<32x1xf32> to vector<32x512xf32>
    %9 = arith.addf %6, %8 : vector<32x512xf32>
    %10 = vector.extract_strided_slice %9 {offsets = [0, 0], sizes = [16, 512], strides = [1, 1]} : vector<32x512xf32> to vector<16x512xf32>
    %11 = arith.negf %10 : vector<16x512xf32>
    %12 = math.exp %11 : vector<16x512xf32>
    %cst_10 = arith.constant 1.000000e+00 : f32
    %13 = vector.broadcast %cst_10 : f32 to vector<16x512xf32>
    %14 = arith.addf %13, %12 : vector<16x512xf32>
    %15 = arith.divf %13, %14 : vector<16x512xf32>
    %16 = vector.extract_strided_slice %9 {offsets = [16, 0], sizes = [16, 512], strides = [1, 1]} : vector<32x512xf32> to vector<16x512xf32>
    %17 = math.tanh %16 : vector<16x512xf32>
    %18 = arith.mulf %15, %17 : vector<16x512xf32>
    %c0_11 = arith.constant 0 : index
    %c0_12 = arith.constant 0 : index
    %19 = vector.load %arg7[%c0_11, %c0_12] : memref<32x16xf32, #tpu.memory_space<vmem>>, vector<32x16xf32>
    %cst_13 = arith.constant dense<0.000000e+00> : vector<32x512xf32>
    %20 = tpu.matmul %19, %18, %cst_13 {dimension_numbers = #tpu.dot_dimension_numbers<[1], [0], [0], [1], [0, 0, 1, 1], [], []>} : vector<32x16xf32>, vector<16x512xf32>, vector<32x512xf32> -> vector<32x512xf32>
    %c0_14 = arith.constant 0 : index
    %c0_15 = arith.constant 0 : index
    %21 = vector.load %arg8[%c0_14, %c0_15] : memref<32x1xf32, #tpu.memory_space<vmem>>, vector<32x1xf32>
    %22 = vector.broadcast %21 : vector<32x1xf32> to vector<32x512xf32>
    %23 = arith.addf %20, %22 : vector<32x512xf32>
    %c0_16 = arith.constant 0 : index
    %c0_17 = arith.constant 0 : index
    %24 = vector.load %arg2[%c0_16, %c0_17] : memref<16x512xf32, #tpu.memory_space<vmem>>, vector<16x512xf32>
    %25 = vector.extract_strided_slice %23 {offsets = [0, 0], sizes = [16, 512], strides = [1, 1]} : vector<32x512xf32> to vector<16x512xf32>
    %26 = arith.addf %24, %25 : vector<16x512xf32>
    %cst_18 = arith.constant 0.707106769 : f32
    %27 = vector.broadcast %cst_18 : f32 to vector<16x512xf32>
    %28 = arith.mulf %26, %27 : vector<16x512xf32>
    %c0_19 = arith.constant 0 : index
    %c0_20 = arith.constant 0 : index
    %29 = vector.load %arg9[%c0_19, %c0_20] : memref<16x512xf32, #tpu.memory_space<vmem>>, vector<16x512xf32>
    tpu.vector_store %arg9[%c0_19, %c0_20], %28 {strides = array<i32>} : memref<16x512xf32, #tpu.memory_space<vmem>>, vector<16x512xf32>,
    %c0_21 = arith.constant 0 : index
    %c0_22 = arith.constant 0 : index
    %30 = vector.load %arg3[%c0_21, %c0_22] : memref<16x512xf32, #tpu.memory_space<vmem>>, vector<16x512xf32>
    %31 = vector.extract_strided_slice %23 {offsets = [16, 0], sizes = [16, 512], strides = [1, 1]} : vector<32x512xf32> to vector<16x512xf32>
    %32 = arith.addf %30, %31 : vector<16x512xf32>
    %c0_23 = arith.constant 0 : index
    %c0_24 = arith.constant 0 : index
    %33 = vector.load %arg10[%c0_23, %c0_24] : memref<16x512xf32, #tpu.memory_space<vmem>>, vector<16x512xf32>
    tpu.vector_store %arg10[%c0_23, %c0_24], %32 {strides = array<i32>} : memref<16x512xf32, #tpu.memory_space<vmem>>, vector<16x512xf32>,
    return
  }
}

</mosaic_0001>

<bundles_post_ra>
// kernel: diff_csdi_forward.8
= control target key start
LH: loop header
LB: loop body
LE: loop exit
PB: predicated region body
PF: predicated region fallthrough
CT: control target
= control target key end

     0   :  { %v816_v0 = vmov 0.0|0.0   ;;  %vm817_vm0 = vmmov 0   ;;  %v818_v4 = vmov 0.0   ;;  %v819_v5 = vmov 1983009808   ;;  %s1121_s4 = inlined_call_operand.vmem [shape: f32[128,128], index: 4, kind: input, shape index: {}]   ;;  %s1122_s0 = inlined_call_operand.vmem [shape: f32[2,512], index: 0, kind: input, shape index: {}]   ;;  %s1123_s1 = inlined_call_operand.vmem [shape: f32[16,2], index: 1, kind: input, shape index: {}]   ;;  %s1124_s3 = inlined_call_operand.vmem [shape: f32[2,128], index: 3, kind: input, shape index: {}]   ;;  %s1125_s6 = inlined_call_operand.vmem [shape: f32[128,128], index: 6, kind: input, shape index: {}]   ;;  %s1126_s2 = inlined_call_operand.vmem [shape: f32[16,1], index: 2, kind: input, shape index: {}]   ;;  %s1127_s5 = inlined_call_operand.vmem [shape: f32[1,128], index: 5, kind: input, shape index: {}]   ;;  %s1128_s10 = inlined_call_operand.vmem [shape: f32[16,512], index: 10, kind: output, shape index: {0}]   ;;  %s1129_s8 = inlined_call_operand.vmem [shape: f32[128,32], index: 8, kind: input, shape index: {}]   ;;  %s1130_s7 = inlined_call_operand.vmem [shape: f32[1,128], index: 7, kind: input, shape index: {}]   ;;  %s1131_s9 = inlined_call_operand.vmem [shape: f32[1,32], index: 9, kind: input, shape index: {}]   ;;  %s1132_s11 = inlined_call_operand.vmem [shape: f32[2,32], index: 11, kind: output, shape index: {1}]  }
   0x1   :  { %729 = vmatprep.subr.bf16.mxu0 %v816_v0  ;;  %v257_v1 = vld [vmem:[%s1121_s4] sm:$0xff]  ;;  %v258_v2 = vld [vmem:[%s1121_s4 + $0x8] sm:$0xff]  ;;  %v259_v3 = vld [vmem:[%s1121_s4 + $0x10] sm:$0xff]  ;;  %656 = vmatprep.mubr.msk.f32.mxu0 %vm817_vm0, %v818_v4  ;;  %v55_v6 = vunpack.c.l.s4 %v819_v5  ;;  %v57_v7 = vlaneseq  ;;  %vm77_vm1 = vcmask 1041408   ;;  %vm70_vm2 = vcmask 15360  }
   0x2   :  { %v730_v8 = vpack.c.bf16 %v258_v2, %v257_v1  ;;  %v260_v9 = vld [vmem:[%s1121_s4 + $0x18] sm:$0xff]  ;;  %150 = vmatprep.mubr.f32.mxu1 %v818_v4  ;;  %v261_v13 = vld [vmem:[%s1121_s4 + $0x20] sm:$0xff]  ;;  %v262_v14 = vld [vmem:[%s1121_s4 + $0x28] sm:$0xff]  ;;  %v820_v2 = vmov 0   ;;  %vm550_vm3 = vcmask 254976  }
   0x3   :  { %v56_v10 = vunpack.c.0.s8 %v55_v6  ;;  %v58_v11 = vshrl.u32 %v57_v7, 7  ;;  %v733_v12 = vpack.c.bf16 %v260_v9, %v259_v3  ;;  %v39_v16 = vld [vmem:[%s1122_s0] sm:$0xff]  ;;  %v736_v19 = vpack.c.bf16 %v262_v14, %v261_v13  ;;  %v263_v20 = vld [vmem:[%s1121_s4 + $0x30] sm:$0xff]  ;;  %v264_v21 = vld [vmem:[%s1121_s4 + $0x38] sm:$0xff]  ;;  %806 = vset.pattern.permute.xlu0 %v820_v2 }
   0x4   :  { %731 = vmatpush3.bf16.msra.mxu0 %v730_v8  ;;  %v53_v17 = vcombine.high %v39_v16, %v39_v16  ;;  %v37_v24 = vld [vmem:[%s1123_s1] sm:$0xff]  ;;  %v739_v26 = vpack.c.bf16 %v264_v21, %v263_v20  ;;  %v266_v28 = vld [vmem:[%s1121_s4 + $0x48] sm:$0xff]  ;;  %v267_v31 = vld [vmem:[%s1121_s4 + $0x50] sm:$0xff] }
   0x5   :  { %732 = vmatprep.subr.bf16.mxu0 %v816_v0  ;;  %v59_v15 = vsub.s32 %v56_v10, %v58_v11  ;;  %v265_v27 = vld [vmem:[%s1121_s4 + $0x40] sm:$0xff]  ;;  %v38_v29 = vld [vmem:[%s1123_s1 + $0x8] sm:$0xff]  ;;  %v268_v32 = vld [vmem:[%s1121_s4 + $0x58] sm:$0xff] }
   0x6   :  { %v742_v30 = vpack.c.bf16 %v266_v28, %v265_v27  ;;  %v745_v33 = vpack.c.bf16 %v268_v32, %v267_v31  ;;  %v269_v34 = vld [vmem:[%s1121_s4 + $0x60] sm:$0xff]  ;;  %v270_v35 = vld [vmem:[%s1121_s4 + $0x68] sm:$0xff]  ;;  %v271_v37 = vld [vmem:[%s1121_s4 + $0x70] sm:$0xff] }
   0x7   :  { %v60_v18 = vrot.slane %v39_v16, %v59_v15  ;;  %v67_v22 = vrot.slane %v53_v17, %v59_v15  ;;  %v748_v36 = vpack.c.bf16 %v270_v35, %v269_v34  ;;  %v272_v38 = vld [vmem:[%s1121_s4 + $0x78] sm:$0xff]  ;;  %v256_v40 = vld [vmem:[%s1124_s3] sm:$0x3]  ;;  %v358_v42 = vld [vmem:[%s1125_s6 + $0x8] sm:$0xff] }
   0x8   :  { %734 = vmatpush3.bf16.msra.mxu0 %v733_v12  ;;  %v751_v39 = vpack.c.bf16 %v272_v38, %v271_v37  ;;  %v357_v41 = vld [vmem:[%s1125_s6] sm:$0xff]  ;;  %v359_v44 = vld [vmem:[%s1125_s6 + $0x10] sm:$0xff]  ;;  %v360_v45 = vld [vmem:[%s1125_s6 + $0x18] sm:$0xff] }
   0x9   :  { %735 = vmatprep.subr.bf16.mxu0 %v816_v0  ;;  %v68_v23 = vcombine.high %v60_v18, %v60_v18  ;;  %v69_v25 = vcombine.high %v67_v22, %v67_v22  ;;  %v754_v43 = vpack.c.bf16 %v358_v42, %v357_v41  ;;  %v757_v46 = vpack.c.bf16 %v360_v45, %v359_v44  ;;  %v361_v47 = vld [vmem:[%s1125_s6 + $0x20] sm:$0xff]  ;;  %v362_v48 = vld [vmem:[%s1125_s6 + $0x28] sm:$0xff]  ;;  %v363_v50 = vld [vmem:[%s1125_s6 + $0x30] sm:$0xff] }
   0xa   :  { %v760_v49 = vpack.c.bf16 %v362_v48, %v361_v47  ;;  %v364_v51 = vld [vmem:[%s1125_s6 + $0x38] sm:$0xff]  ;;  %v365_v53 = vld [vmem:[%s1125_s6 + $0x40] sm:$0xff]  ;;  %v366_v54 = vld [vmem:[%s1125_s6 + $0x48] sm:$0xff] }
   0xb   :  { %560 = vmatprep.subr.msk.mxu1 %vm77_vm1, %v68_v23  ;;  %v763_v52 = vpack.c.bf16 %v364_v51, %v363_v50  ;;  %v766_v55 = vpack.c.bf16 %v366_v54, %v365_v53  ;;  %v367_v56 = vld [vmem:[%s1125_s6 + $0x50] sm:$0xff]  ;;  %v368_v57 = vld [vmem:[%s1125_s6 + $0x58] sm:$0xff]  ;;  %v369_v59 = vld [vmem:[%s1125_s6 + $0x60] sm:$0xff] }
   0xc   :  { %737 = vmatpush3.bf16.msra.mxu0 %v736_v19  ;;  %561 = vmatpush1.msk.msra.mxu1 %vm77_vm1, %v60_v18  ;;  %v769_v58 = vpack.c.bf16 %v368_v57, %v367_v56  ;;  %v370_v60 = vld [vmem:[%s1125_s6 + $0x68] sm:$0xff]  ;;  %v371_v62 = vld [vmem:[%s1125_s6 + $0x70] sm:$0xff]  ;;  %v372_v63 = vld [vmem:[%s1125_s6 + $0x78] sm:$0xff] }
   0xd   :  { %738 = vmatprep.subr.bf16.mxu0 %v816_v0  ;;  %562 = vmatmul.mubr.msk.f32.vlgmr.msra.gmra.mrb[0].mxu1 %vm70_vm2, %v37_v24  ;;  %v772_v61 = vpack.c.bf16 %v370_v60, %v369_v59  ;;  %v775_v1 = vpack.c.bf16 %v372_v63, %v371_v62  ;;  %v40_v3 = vld [vmem:[%s1126_s2] sm:$0xff]  ;;  %v458_v41 = vld [vmem:[%s1129_s8 + $0x8] sm:$0xff]  ;;  %v460_v44 = vld [vmem:[%s1129_s8 + $0x18] sm:$0xff] }
   0xe   :  { %564 = vmatprep.subr.msk.mxu1 %vm77_vm1, %v69_v25  ;;  %156 = vmatprep.mubr.f32.mxu1 %v818_v4  ;;  %v568_v13 = vld [vmem:[%s1127_s5] ss:$0 sm:$0xff]  ;;  %v462_v47 = vld [vmem:[%s1129_s8 + $0x28] sm:$0xff]  ;;  %v464_v50 = vld [vmem:[%s1129_s8 + $0x38] sm:$0xff] }
   0xf   :  { %565 = vmatpush1.msk.msra.mxu1 %vm77_vm1, %v67_v22  ;;  %44 = vperm.xlu0 %806, %v40_v3   ;;  %v466_v53 = vld [vmem:[%s1129_s8 + $0x48] sm:$0xff]  ;;  %v468_v56 = vld [vmem:[%s1129_s8 + $0x58] sm:$0xff] }
  0x10   :  { %740 = vmatpush3.bf16.msra.mxu0 %v739_v26  ;;  %753 = vmatprep.subr.bf16.mxu1 %v816_v0  ;;  %v470_v59 = vld [vmem:[%s1129_s8 + $0x68] sm:$0xff]  ;;  %v472_v62 = vld [vmem:[%s1129_s8 + $0x78] sm:$0xff] }
  0x11   :  { %741 = vmatprep.subr.bf16.mxu0 %v816_v0  ;;  %563 = vmatmul.mubr.msk.f32.gmra.mrb[2].mxu1 %vm70_vm2, %v38_v29 }
  0x12   :  { %227 = vmatprep.mubr.f32.mxu1 %v818_v4 }
  0x14   :  { %743 = vmatpush3.bf16.msra.mxu0 %v742_v30 }
  0x15   :  { %744 = vmatprep.subr.bf16.mxu0 %v816_v0  ;;  %566 = vmatmul.mubr.msk.f32.vlgmr.msra.gmra.mrb[4].mxu1 %vm70_vm2, %v37_v24 }
  0x16   :  { %233 = vmatprep.mubr.f32.mxu1 %v818_v4  ;;  %755 = vmatpush3.bf16.msra.mxu1 %v754_v43  ;;  %v459_v43 = vld [vmem:[%s1129_s8 + $0x10] sm:$0xff] }
  0x17   :  { %756 = vmatprep.subr.bf16.mxu1 %v816_v0  ;;  %v781_v45 = vpack.c.bf16 %v460_v44, %v459_v43 }
  0x18   :  { %746 = vmatpush3.bf16.msra.mxu0 %v745_v33 }
  0x19   :  { %747 = vmatprep.subr.bf16.mxu0 %v816_v0  ;;  %567 = vmatmul.mubr.msk.f32.gmra.mrb[6].mxu1 %vm70_vm2, %v38_v29 }
  0x1a   :  { %691 = vmatprep.mubr.msk.f32.mxu1 %vm817_vm0, %v818_v4  ;;  %758 = vmatpush3.bf16.msra.mxu1 %v757_v46  ;;  %v461_v46 = vld [vmem:[%s1129_s8 + $0x20] sm:$0xff] }
  0x1b   :  { %759 = vmatprep.subr.bf16.mxu1 %v816_v0  ;;  %v784_v48 = vpack.c.bf16 %v462_v47, %v461_v46 }
  0x1c   :  { %749 = vmatpush3.bf16.msra.mxu0 %v748_v36 }
  0x1d   :  { %750 = vmatprep.subr.bf16.mxu0 %v816_v0 }
  0x1e   :  { %761 = vmatpush3.bf16.msra.mxu1 %v760_v49  ;;  %v463_v49 = vld [vmem:[%s1129_s8 + $0x30] sm:$0xff] }
  0x1f   :  { %762 = vmatprep.subr.bf16.mxu1 %v816_v0  ;;  %v787_v51 = vpack.c.bf16 %v464_v50, %v463_v49 }
  0x20   :  { %752 = vmatpush3.bf16.msra.mxu0 %v751_v39 }
  0x21   :  { %777 = vmatprep.subr.bf16.mxu0 %v816_v0 }
  0x22   :  { %764 = vmatpush3.bf16.msra.mxu1 %v763_v52  ;;  %v465_v52 = vld [vmem:[%s1129_s8 + $0x40] sm:$0xff] }
  0x23   :  { %657 = vmatmul.mubr.f32.vlgmr.msra.gmra.mrb[0].mxu0 %v256_v40  ;;  %765 = vmatprep.subr.bf16.mxu1 %v816_v0  ;;  %v457_v40 = vld [vmem:[%s1129_s8] sm:$0xff]  ;;  %v790_v54 = vpack.c.bf16 %v466_v53, %v465_v52 }
  0x24   :  { %726 = vmatprep.mubr.msk.f32.mxu0 %vm817_vm0, %v818_v4  ;;  %v41_v4 = vld [vmem:[%s1126_s2 + $0x8] sm:$0xff]  ;;  %v778_v42 = vpack.c.bf16 %v458_v41, %v457_v40 }
  0x25   :  { %49 = vperm.xlu0 %806, %v41_v4  }
  0x26   :  { %767 = vmatpush3.bf16.msra.mxu1 %v766_v55  ;;  %779 = vmatpush3.bf16.msra.mxu0 %v778_v42  ;;  %v467_v55 = vld [vmem:[%s1129_s8 + $0x50] sm:$0xff] }
  0x27   :  { %768 = vmatprep.subr.bf16.mxu1 %v816_v0  ;;  %780 = vmatprep.subr.bf16.mxu0 %v816_v0  ;;  %v793_v57 = vpack.c.bf16 %v468_v56, %v467_v55 }
  0x2a   :  { %770 = vmatpush3.bf16.msra.mxu1 %v769_v58  ;;  %782 = vmatpush3.bf16.msra.mxu0 %v781_v45  ;;  %v469_v58 = vld [vmem:[%s1129_s8 + $0x60] sm:$0xff] }
  0x2b   :  { %771 = vmatprep.subr.bf16.mxu1 %v816_v0  ;;  %783 = vmatprep.subr.bf16.mxu0 %v816_v0  ;;  %v796_v60 = vpack.c.bf16 %v470_v59, %v469_v58 }
  0x2e   :  { %773 = vmatpush3.bf16.msra.mxu1 %v772_v61  ;;  %785 = vmatpush3.bf16.msra.mxu0 %v784_v48  ;;  %v471_v61 = vld [vmem:[%s1129_s8 + $0x70] sm:$0xff] }
  0x2f   :  { %774 = vmatprep.subr.bf16.mxu1 %v816_v0  ;;  %786 = vmatprep.subr.bf16.mxu0 %v816_v0  ;;  %v799_v63 = vpack.c.bf16 %v472_v62, %v471_v61 }
  0x32   :  { %776 = vmatpush3.bf16.msra.mxu1 %v775_v1  ;;  %788 = vmatpush3.bf16.msra.mxu0 %v787_v51  ;;  %v570_v1 = vld [vmem:[%s1130_s7] ss:$0 sm:$0xff] }
  0x33   :  { %789 = vmatprep.subr.bf16.mxu0 %v816_v0 }
  0x36   :  { %791 = vmatpush3.bf16.msra.mxu0 %v790_v54 }
  0x37   :  { %792 = vmatprep.subr.bf16.mxu0 %v816_v0 }
  0x3a   :  { %794 = vmatpush3.bf16.msra.mxu0 %v793_v57 }
  0x3b   :  { %795 = vmatprep.subr.bf16.mxu0 %v816_v0 }
  0x3e   :  { %797 = vmatpush3.bf16.msra.mxu0 %v796_v60 }
  0x3f   :  { %798 = vmatprep.subr.bf16.mxu0 %v816_v0 }
  0x42   :  { %800 = vmatpush3.bf16.msra.mxu0 %v799_v63 }
  0x8e   :  { %v45_v22 = vpop.permute.xlu0 %44 }
  0xa4   :  { %v50_v31 = vpop.permute.xlu0 %49 }
  0xe0   :  { %v152_v5 = vpop.f32.mrb[0].mxu1 }
  0xe1   :  { %v154_v6 = vpop.f32.mrb[1].mxu1  ;;  %v153_v23 = vadd.f32 %v152_v5, %v45_v22 }
  0xe2   :  { %v155_v24 = vadd.f32 %v154_v6, %v45_v22 }
  0xe3   :  { %v240_v27 = vmax.f32 %v153_v23, 0.0 }
  0xe4   :  { %v158_v7 = vpop.f32.mrb[2].mxu1  ;;  %v241_v28 = vmax.f32 %v155_v24, 0.0 }
  0xe5   :  { %v160_v8 = vpop.f32.mrb[3].mxu1  ;;  %248 = vst [vmem:[%s1128_s10] sm:$0xff] %v240_v27  ;;  %v159_v32 = vadd.f32 %v158_v7, %v50_v31 }
  0xe6   :  { %249 = vst [vmem:[%s1128_s10 + $0x8] sm:$0xff] %v241_v28  ;;  %v161_v33 = vadd.f32 %v160_v8, %v50_v31 }
  0xe7   :  { %v244_v36 = vmax.f32 %v159_v32, 0.0 }
  0xe8   :  { %v229_v9 = vpop.f32.mrb[4].mxu1  ;;  %v245_v37 = vmax.f32 %v161_v33, 0.0 }
  0xe9   :  { %v231_v10 = vpop.f32.mrb[5].mxu1  ;;  %v230_v25 = vadd.f32 %v229_v9, %v45_v22  ;;  %252 = vst [vmem:[%s1128_s10 + $0x20] sm:$0xff] %v244_v36  ;;  %v572_v9 = vld [vmem:[%s1131_s9] ss:$0 sm:$0xff] }
  0xea   :  { %v232_v26 = vadd.f32 %v231_v10, %v45_v22  ;;  %253 = vst [vmem:[%s1128_s10 + $0x28] sm:$0xff] %v245_v37 }
  0xeb   :  { %v242_v29 = vmax.f32 %v230_v25, 0.0 }
  0xec   :  { %v235_v11 = vpop.f32.mrb[6].mxu1  ;;  %v243_v30 = vmax.f32 %v232_v26, 0.0 }
  0xed   :  { %v237_v12 = vpop.f32.mrb[7].mxu1  ;;  %250 = vst [vmem:[%s1128_s10 + $0x10] sm:$0xff] %v242_v29  ;;  %v236_v34 = vadd.f32 %v235_v11, %v50_v31 }
  0xee   :  { %251 = vst [vmem:[%s1128_s10 + $0x18] sm:$0xff] %v243_v30  ;;  %v238_v35 = vadd.f32 %v237_v12, %v50_v31 }
  0xef   :  { %v246_v38 = vmax.f32 %v236_v34, 0.0 }
  0xf0   :  { %v247_v39 = vmax.f32 %v238_v35, 0.0 }
  0xf1   :  { %254 = vst [vmem:[%s1128_s10 + $0x30] sm:$0xff] %v246_v38 }
  0xf2   :  { %255 = vst [vmem:[%s1128_s10 + $0x38] sm:$0xff] %v247_v39 }
  0xf6   :  { %v346_v14 = vpop.f32.mrb[0].mxu0 }
  0xf7   :  { %v347_v15 = vadd.f32 %v568_v13, %v346_v14  ;;  %v658_v16 = vpop.f32.mrb[1].mxu0 }
  0xf9   :  { %v569_v17 = vmul.f32 -1.442695, %v347_v15 }
  0xfb   :  { %808 = vpow2.f32 %v569_v17 }
 0x105   :  { %v809_v18 = vpop.eup %808 }
 0x106   :  { %v353_v19 = vadd.f32 1.0, %v809_v18 }
 0x108   :  { %810 = vrcp.f32 %v353_v19 }
 0x112   :  { %v811_v20 = vpop.eup %810 }
 0x113   :  { %v356_v21 = vmul.f32 %v811_v20, %v347_v15 }
 0x115   :  { %692 = vmatmul.mubr.f32.vlgmr.msra.gmra.mrb[8].mxu1 %v356_v21 }
 0x1e8   :  { %v446_v2 = vpop.f32.mrb[8].mxu1 }
 0x1e9   :  { %v447_v3 = vadd.f32 %v570_v1, %v446_v2  ;;  %v693_v4 = vpop.f32.mrb[9].mxu1 }
 0x1eb   :  { %v571_v5 = vmul.f32 -1.442695, %v447_v3 }
 0x1ed   :  { %812 = vpow2.f32 %v571_v5 }
 0x1f7   :  { %v813_v0 = vpop.eup %812 }
 0x1f8   :  { %v453_v6 = vadd.f32 1.0, %v813_v0 }
 0x1fa   :  { %814 = vrcp.f32 %v453_v6 }
 0x204   :  { %v815_v7 = vpop.eup %814 }
 0x205   :  { %v456_v8 = vmul.f32 %v815_v7, %v447_v3 }
 0x207   :  { %727 = vmatmul.mubr.f32.vlgmr.msra.gmra.mrb[2].mxu0 %v456_v8 }
 0x2da   :  { %v546_v10 = vpop.f32.mrb[2].mxu0 }
 0x2db   :  { %v547_v11 = vadd.f32 %v572_v9, %v546_v10  ;;  %v728_v12 = vpop.f32.mrb[3].mxu0 }
 0x2dd   :  { %551 = vst.msk [vmem:[%s1132_s11] sm:$0x3] %vm550_vm3, %v547_v11 }

// kernel: diff_csdi_forward.15
= control target key start
LH: loop header
LB: loop body
LE: loop exit
PB: predicated region body
PF: predicated region fallthrough
CT: control target
= control target key end

     0   :  { %v442_v3 = vmov 0.0   ;;  %v443_v8 = vmov 0   ;;  %vm52_vm0 = vcmask 130048   ;;  %v228_v59 = vlaneseq  ;;  %s526_s0 = inlined_call_operand.vmem [shape: f32[16,512], index: 0, kind: input, shape index: {}]   ;;  %s527_s2 = inlined_call_operand.vmem [shape: f32[16,1], index: 2, kind: input, shape index: {}]   ;;  %s528_s1 = inlined_call_operand.vmem [shape: f32[16,16], index: 1, kind: input, shape index: {}]   ;;  %s529_s4 = inlined_call_operand.<no memory space> [shape: f32[1,1], index: 4, kind: input, shape index: {}]   ;;  %s530_s3 = inlined_call_operand.vmem [shape: f32[1,16], index: 3, kind: input, shape index: {}]   ;;  %s531_s5 = inlined_call_operand.vmem [shape: f32[1,512], index: 5, kind: output, shape index: {}]  }
   0x1   :  { %v23_v0 = vld [vmem:[%s526_s0 + $0x8] sm:$0xff]  ;;  %v25_v2 = vld [vmem:[%s526_s0 + $0x18] sm:$0xff]  ;;  %123 = vmatprep.mubr.f32.mxu0 %v442_v3  ;;  %200 = vmatprep.mubr.f32.mxu1 %v442_v3  ;;  %v22_v7 = vld [vmem:[%s526_s0] sm:$0xff]  ;;  %v10_v26 = vstv %s529_s4  ;;  %v444_v62 = vmov 1966171168  }
   0x2   :  { %v27_v1 = vld [vmem:[%s526_s0 + $0x28] sm:$0xff]  ;;  %v31_v4 = vmul.f32 0.70710677, %v23_v0  ;;  %v29_v6 = vld [vmem:[%s526_s0 + $0x38] sm:$0xff]  ;;  %440 = vset.pattern.permute.xlu0 %v443_v8  ;;  %441 = vset.pattern.permute.xlu1 %v443_v8  ;;  %v33_v9 = vmul.f32 0.70710677, %v25_v2  ;;  %v384_v63 = vunpack.c.l.s4 %v444_v62 }
   0x3   :  { %v35_v5 = vmul.f32 0.70710677, %v27_v1  ;;  %v37_v10 = vmul.f32 0.70710677, %v29_v6  ;;  %v26_v11 = vld [vmem:[%s526_s0 + $0x20] sm:$0xff]  ;;  %v24_v12 = vld [vmem:[%s526_s0 + $0x10] sm:$0xff] }
   0x4   :  { %v30_v14 = vmul.f32 0.70710677, %v22_v7  ;;  %v34_v15 = vmul.f32 0.70710677, %v26_v11  ;;  %v28_v16 = vld [vmem:[%s526_s0 + $0x30] sm:$0xff]  ;;  %v40_v20 = vld [vmem:[%s527_s2] sm:$0xff]  ;;  %v385_v2 = vunpack.c.0.s8 %v384_v63 }
   0x5   :  { %v421_v13 = vpack.c.bf16 %v35_v5, %v31_v4  ;;  %v425_v17 = vpack.c.bf16 %v37_v10, %v33_v9  ;;  %v32_v18 = vmul.f32 0.70710677, %v24_v12  ;;  %v36_v19 = vmul.f32 0.70710677, %v28_v16  ;;  %44 = vperm.xlu0 %440, %v40_v20   ;;  %v41_v23 = vld [vmem:[%s527_s2 + $0x8] sm:$0xff]  ;;  %v38_v24 = vld [vmem:[%s528_s1] sm:$0xff] }
   0x6   :  { %v423_v21 = vpack.c.bf16 %v34_v15, %v30_v14  ;;  %v39_v25 = vld [vmem:[%s528_s1 + $0x8] sm:$0xff]  ;;  %11 = vst [vmem:[#allocation2] sm:$0x1] %v10_v26  ;;  %v221_v58 = vld [vmem:[%s530_s3] sm:$0x1]  ;;  %v229_v60 = vshrl.u32 %v228_v59, 7 }
   0x7   :  { %422 = vmatprep.subr.bf16.mxu0 %v421_v13  ;;  %426 = vmatprep.subr.bf16.mxu1 %v425_v17  ;;  %v427_v22 = vpack.c.bf16 %v36_v19, %v32_v18  ;;  %vm408_vm1 = vcmp.lt.s32.totalorder %v228_v59, 512 }
   0x8   :  { %424 = vmatpush1.bf16.msra.mxu0 %v423_v21  ;;  %v230_v61 = vsub.s32 0, %v229_v60  ;;  %v388_v7 = vsub.s32 %v385_v2, %v229_v60 }
   0x9   :  { %428 = vmatpush1.bf16.msra.mxu1 %v427_v22  ;;  %49 = vperm.xlu0 %440, %v41_v23  }
   0xb   :  { %415 = vmatmul.mubr.msk.f32.vlgmr.msra.gmra.mrb[0].mxu0 %vm52_vm0, %v38_v24 }
   0xc   :  { %417 = vmatmul.mubr.msk.f32.vlgmr.msra.gmra.mrb[0].mxu1 %vm52_vm0, %v38_v24  ;;  %129 = vmatprep.mubr.f32.mxu0 %v442_v3 }
   0xd   :  { %206 = vmatprep.mubr.f32.mxu1 %v442_v3  ;;  %v222_v27 = vld [vmem:[#allocation2] sm:$0x1] }
   0xe   :  { %225 = vperm.xlu1 %441, %v222_v27  }
   0xf   :  { %416 = vmatmul.mubr.msk.f32.gmra.mrb[2].mxu0 %vm52_vm0, %v39_v25 }
  0x10   :  { %418 = vmatmul.mubr.msk.f32.gmra.mrb[2].mxu1 %vm52_vm0, %v39_v25  ;;  %299 = vmatprep.mubr.f32.mxu0 %v442_v3 }
  0x11   :  { %370 = vmatprep.mubr.f32.mxu1 %v442_v3 }
  0x84   :  { %v45_v28 = vpop.permute.xlu0 %44 }
  0x88   :  { %v50_v35 = vpop.permute.xlu0 %49 }
  0x8d   :  { %v226_v0 = vpop.permute.xlu1 %225 }
  0x8e   :  { %v231_v1 = vrot.slane %v226_v0, %v230_v61 }
  0xde   :  { %v125_v29 = vpop.f32.mrb[0].mxu0 }
  0xdf   :  { %v202_v30 = vpop.f32.mrb[0].mxu1  ;;  %v127_v31 = vpop.f32.mrb[1].mxu0  ;;  %v126_v33 = vadd.f32 %v125_v29, %v45_v28 }
  0xe0   :  { %v204_v32 = vpop.f32.mrb[1].mxu1  ;;  %v203_v34 = vadd.f32 %v202_v30, %v45_v28  ;;  %v128_v36 = vadd.f32 %v127_v31, %v45_v28 }
  0xe1   :  { %v205_v38 = vadd.f32 %v204_v32, %v45_v28  ;;  %v213_v45 = vmax.f32 %v126_v33, 0.0 }
  0xe2   :  { %v131_v37 = vpop.f32.mrb[2].mxu0  ;;  %v215_v48 = vmax.f32 %v203_v34, 0.0  ;;  %v214_v49 = vmax.f32 %v128_v36, 0.0 }
  0xe3   :  { %v132_v39 = vadd.f32 %v131_v37, %v50_v35  ;;  %v208_v40 = vpop.f32.mrb[2].mxu1  ;;  %v133_v41 = vpop.f32.mrb[3].mxu0  ;;  %v216_v52 = vmax.f32 %v205_v38, 0.0 }
  0xe4   :  { %v209_v42 = vadd.f32 %v208_v40, %v50_v35  ;;  %v134_v43 = vadd.f32 %v133_v41, %v50_v35  ;;  %v210_v44 = vpop.f32.mrb[3].mxu1 }
  0xe5   :  { %v217_v46 = vmax.f32 %v132_v39, 0.0  ;;  %v211_v47 = vadd.f32 %v210_v44, %v50_v35 }
  0xe6   :  { %v219_v50 = vmax.f32 %v209_v42, 0.0  ;;  %v218_v51 = vmax.f32 %v134_v43, 0.0 }
  0xe7   :  { %v431_v53 = vpack.c.bf16 %v217_v46, %v213_v45  ;;  %v220_v54 = vmax.f32 %v211_v47, 0.0 }
  0xe8   :  { %v435_v55 = vpack.c.bf16 %v219_v50, %v215_v48  ;;  %v429_v56 = vpack.c.bf16 %v218_v51, %v214_v49 }
  0xe9   :  { %v433_v57 = vpack.c.bf16 %v220_v54, %v216_v52 }
  0xea   :  { %430 = vmatprep.subr.bf16.mxu0 %v429_v56 }
  0xeb   :  { %434 = vmatprep.subr.bf16.mxu1 %v433_v57  ;;  %432 = vmatpush1.bf16.msra.mxu0 %v431_v53 }
  0xec   :  { %436 = vmatpush1.bf16.msra.mxu1 %v435_v55 }
  0xee   :  { %419 = vmatmul.mubr.msk.f32.vlgmr.msra.gmra.mrb[4].mxu0 %vm52_vm0, %v221_v58 }
  0xef   :  { %420 = vmatmul.mubr.msk.f32.vlgmr.msra.gmra.mrb[4].mxu1 %vm52_vm0, %v221_v58 }
 0x1c1   :  { %v301_v3 = vpop.f32.mrb[4].mxu0 }
 0x1c2   :  { %v302_v4 = vadd.f32 %v301_v3, %v231_v1  ;;  %v372_v5 = vpop.f32.mrb[4].mxu1  ;;  %v303_v6 = vpop.f32.mrb[5].mxu0 }
 0x1c3   :  { %v373_v8 = vadd.f32 %v372_v5, %v231_v1  ;;  %v304_v9 = vadd.f32 %v303_v6, %v231_v1  ;;  %v374_v10 = vpop.f32.mrb[5].mxu1 }
 0x1c4   :  { %v375_v11 = vadd.f32 %v374_v10, %v231_v1 }
 0x1c5   :  { %v381_v12 = vcombine.low %v302_v4, %v304_v9 }
 0x1c6   :  { %v382_v13 = vcombine.low %v373_v8, %v375_v11 }
 0x1c7   :  { %v389_v14 = vrot.slane %v381_v12, %v388_v7 }
 0x1c8   :  { %v396_v15 = vrot.slane %v382_v13, %v388_v7 }
 0x1ca   :  { %v397_v16 = vcombine.low %v389_v14, %v396_v15 }
 0x1cc   :  { %v404_v17 = vrot.slane %v397_v16, %v388_v7 }
 0x1ce   :  { %410 = vst.msk [vmem:[%s531_s5] sm:$0xf] %vm408_vm1, %v404_v17 }

// kernel: diff_csdi_forward.14
= control target key start
LH: loop header
LB: loop body
LE: loop exit
PB: predicated region body
PF: predicated region fallthrough
CT: control target
= control target key end

     0   :  { %vm55_vm0 = vcmask 64512   ;;  %v978_v5 = vmov 0.0   ;;  %v979_v19 = vmov 0   ;;  %s1273_s0 = inlined_call_operand.vmem [shape: f32[16,512], index: 0, kind: input, shape index: {}]   ;;  %s1274_s1 = inlined_call_operand.vmem [shape: f32[8,512], index: 1, kind: input, shape index: {}]   ;;  %s1275_s2 = inlined_call_operand.vmem [shape: f32[16,512], index: 2, kind: input, shape index: {}]   ;;  %s1276_s3 = inlined_call_operand.vmem [shape: f32[16,512], index: 3, kind: input, shape index: {}, may-alias: {3,10}]   ;;  %s1277_s4 = inlined_call_operand.vmem [shape: f32[32,16], index: 4, kind: input, shape index: {}]   ;;  %s1278_s5 = inlined_call_operand.vmem [shape: f32[32,8], index: 5, kind: input, shape index: {}]   ;;  %s1279_s6 = inlined_call_operand.vmem [shape: f32[32,1], index: 6, kind: input, shape index: {}]   ;;  %s1280_s7 = inlined_call_operand.vmem [shape: f32[32,16], index: 7, kind: input, shape index: {}]   ;;  %s1281_s8 = inlined_call_operand.vmem [shape: f32[32,1], index: 8, kind: input, shape index: {}]   ;;  %s1282_s9 = inlined_call_operand.hbm [shape: f32[16,512], index: 9, kind: output, shape index: {0}]   ;;  %s1283_s10 = inlined_call_operand.vmem [shape: f32[16,512], index: 10, kind: output, shape index: {1}, may-alias: {3,10}]  }
   0x1   :  { %v52_v0 = vld [vmem:[%s1274_s1 + $0x8] sm:$0xff]  ;;  %v54_v1 = vld [vmem:[%s1274_s1 + $0x18] sm:$0xff]  ;;  %v51_v2 = vld [vmem:[%s1274_s1] sm:$0xff]  ;;  %132 = vmatprep.mubr.f32.mxu0 %v978_v5  ;;  %221 = vmatprep.mubr.f32.mxu1 %v978_v5 }
   0x2   :  { %68 = vmatprep.subr.mxu0 %v52_v0  ;;  %157 = vmatprep.subr.mxu1 %v54_v1  ;;  %v53_v3 = vld [vmem:[%s1274_s1 + $0x10] sm:$0xff]  ;;  %v47_v4 = vld [vmem:[%s1278_s5] sm:$0xff]  ;;  %v40_v6 = vld [vmem:[%s1273_s0 + $0x8] sm:$0xff] }
   0x3   :  { %69 = vmatpush1.msra.mxu0 %v51_v2  ;;  %158 = vmatpush1.msra.mxu1 %v53_v3  ;;  %v44_v7 = vld [vmem:[%s1273_s0 + $0x28] sm:$0xff]  ;;  %v42_v8 = vld [vmem:[%s1273_s0 + $0x18] sm:$0xff]  ;;  %v39_v12 = vld [vmem:[%s1273_s0] sm:$0xff] }
   0x4   :  { %v46_v9 = vld [vmem:[%s1273_s0 + $0x38] sm:$0xff]  ;;  %835 = vmatmul.mubr.msk.f32.vlgmr.msra.gmra.mrb[0].mxu0 %vm55_vm0, %v47_v4  ;;  %839 = vmatmul.mubr.msk.f32.vlgmr.msra.gmra.mrb[0].mxu1 %vm55_vm0, %v47_v4  ;;  %v867_v10 = vpack.c.bf16 %v44_v7, %v40_v6  ;;  %v43_v13 = vld [vmem:[%s1273_s0 + $0x20] sm:$0xff]  ;;  %v41_v14 = vld [vmem:[%s1273_s0 + $0x10] sm:$0xff] }
   0x5   :  { %v871_v11 = vpack.c.bf16 %v46_v9, %v42_v8  ;;  %138 = vmatprep.mubr.f32.mxu0 %v978_v5  ;;  %227 = vmatprep.mubr.f32.mxu1 %v978_v5  ;;  %v48_v15 = vld [vmem:[%s1278_s5 + $0x8] sm:$0xff]  ;;  %v869_v16 = vpack.c.bf16 %v43_v13, %v39_v12  ;;  %v45_v17 = vld [vmem:[%s1273_s0 + $0x30] sm:$0xff]  ;;  %v437_v20 = vld [vmem:[%s1279_s6] sm:$0xff] }
   0x6   :  { %868 = vmatprep.subr.bf16.mxu0 %v867_v10  ;;  %v873_v18 = vpack.c.bf16 %v45_v17, %v41_v14  ;;  %904 = vset.pattern.permute.xlu0 %v979_v19  ;;  %v49_v21 = vld [vmem:[%s1278_s5 + $0x10] sm:$0xff] }
   0x7   :  { %872 = vmatprep.subr.bf16.mxu1 %v871_v11  ;;  %870 = vmatpush1.bf16.msra.mxu0 %v869_v16 }
   0x8   :  { %836 = vmatmul.mubr.msk.f32.gmra.mrb[2].mxu0 %vm55_vm0, %v48_v15  ;;  %840 = vmatmul.mubr.msk.f32.gmra.mrb[2].mxu1 %vm55_vm0, %v48_v15 }
   0x9   :  { %144 = vmatprep.mubr.f32.mxu0 %v978_v5  ;;  %233 = vmatprep.mubr.f32.mxu1 %v978_v5 }
   0xa   :  { %16 = vsyncpa [#allocation3], 0  ;;  %874 = vmatpush1.bf16.msra.mxu1 %v873_v18  ;;  %443 = vperm.xlu0 %904, %v437_v20   ;;  %v438_v22 = vld [vmem:[%s1279_s6 + $0x8] sm:$0xff]  ;;  %v439_v23 = vld [vmem:[%s1279_s6 + $0x10] sm:$0xff]  ;;  %vm246_vm1 = vcmask 130048   ;;  %s980_s0 = smov [#allocation2]  }
   0xb   :  { %905 = vset.pattern.permute.xlu1 %v979_v19  ;;  %v50_v24 = vld [vmem:[%s1278_s5 + $0x18] sm:$0xff]  ;;  %v545_v25 = vld [vmem:[%s1281_s8] sm:$0xff]  ;;  %v547_v28 = vld [vmem:[%s1281_s8 + $0x10] sm:$0xff] }
   0xc   :  { %837 = vmatmul.mubr.msk.f32.gmra.mrb[4].mxu0 %vm55_vm0, %v49_v21  ;;  %841 = vmatmul.mubr.msk.f32.gmra.mrb[4].mxu1 %vm55_vm0, %v49_v21  ;;  %v440_v26 = vld [vmem:[%s1279_s6 + $0x18] sm:$0xff]  ;;  %v35_v27 = vld [vmem:[%s1277_s4] sm:$0xff]  ;;  %v546_v29 = vld [vmem:[%s1281_s8 + $0x8] sm:$0xff] }
   0xd   :  { %150 = vmatprep.mubr.f32.mxu0 %v978_v5  ;;  %239 = vmatprep.mubr.f32.mxu1 %v978_v5  ;;  %v36_v30 = vld [vmem:[%s1277_s4 + $0x8] sm:$0xff]  ;;  %v548_v31 = vld [vmem:[%s1281_s8 + $0x18] sm:$0xff]  ;;  %v37_v32 = vld [vmem:[%s1277_s4 + $0x10] sm:$0xff] }
   0xe   :  { %448 = vperm.xlu0 %904, %v438_v22   ;;  %453 = vperm.xlu1 %905, %v439_v23   ;;  %v38_v33 = vld [vmem:[%s1277_s4 + $0x18] sm:$0xff] }
  0x10   :  { %838 = vmatmul.mubr.msk.f32.gmra.mrb[6].mxu0 %vm55_vm0, %v50_v24  ;;  %842 = vmatmul.mubr.msk.f32.gmra.mrb[6].mxu1 %vm55_vm0, %v50_v24 }
  0x11   :  { %323 = vmatprep.mubr.f32.mxu0 %v978_v5  ;;  %412 = vmatprep.mubr.f32.mxu1 %v978_v5 }
  0x12   :  { %551 = vperm.xlu0 %904, %v545_v25   ;;  %458 = vperm.xlu1 %905, %v440_v26  }
  0x14   :  { %843 = vmatmul.mubr.msk.f32.vlgmr.msra.gmra.mrb[0].mxu0 %vm246_vm1, %v35_v27  ;;  %847 = vmatmul.mubr.msk.f32.vlgmr.msra.gmra.mrb[0].mxu1 %vm246_vm1, %v35_v27 }
  0x15   :  { %329 = vmatprep.mubr.f32.mxu0 %v978_v5  ;;  %418 = vmatprep.mubr.f32.mxu1 %v978_v5 }
  0x16   :  { %561 = vperm.xlu0 %904, %v547_v28   ;;  %556 = vperm.xlu1 %905, %v546_v29  }
  0x18   :  { %844 = vmatmul.mubr.msk.f32.gmra.mrb[2].mxu0 %vm246_vm1, %v36_v30  ;;  %848 = vmatmul.mubr.msk.f32.gmra.mrb[2].mxu1 %vm246_vm1, %v36_v30 }
  0x19   :  { %335 = vmatprep.mubr.f32.mxu0 %v978_v5  ;;  %424 = vmatprep.mubr.f32.mxu1 %v978_v5 }
  0x1a   :  { %566 = vperm.xlu1 %905, %v548_v31  }
  0x1c   :  { %845 = vmatmul.mubr.msk.f32.gmra.mrb[4].mxu0 %vm246_vm1, %v37_v32  ;;  %849 = vmatmul.mubr.msk.f32.gmra.mrb[4].mxu1 %vm246_vm1, %v37_v32 }
  0x1d   :  { %341 = vmatprep.mubr.f32.mxu0 %v978_v5  ;;  %430 = vmatprep.mubr.f32.mxu1 %v978_v5 }
  0x20   :  { %846 = vmatmul.mubr.msk.f32.gmra.mrb[6].mxu0 %vm246_vm1, %v38_v33  ;;  %850 = vmatmul.mubr.msk.f32.gmra.mrb[6].mxu1 %vm246_vm1, %v38_v33 }
  0x21   :  { %645 = vmatprep.mubr.f32.mxu0 %v978_v5  ;;  %734 = vmatprep.mubr.f32.mxu1 %v978_v5 }
  0x89   :  { %v444_v34 = vpop.permute.xlu0 %443 }
  0x8d   :  { %v449_v43 = vpop.permute.xlu0 %448  ;;  %v454_v46 = vpop.permute.xlu1 %453 }
  0x91   :  { %v459_v3 = vpop.permute.xlu1 %458 }
  0xe7   :  { %v325_v35 = vpop.f32.mrb[0].mxu0  ;;  %v414_v36 = vpop.f32.mrb[0].mxu1 }
  0xe8   :  { %v461_v37 = vadd.f32 %v444_v34, %v325_v35  ;;  %v463_v38 = vadd.f32 %v444_v34, %v414_v36  ;;  %v327_v39 = vpop.f32.mrb[1].mxu0  ;;  %v416_v40 = vpop.f32.mrb[1].mxu1 }
  0xe9   :  { %v462_v41 = vadd.f32 %v444_v34, %v327_v39  ;;  %v464_v42 = vadd.f32 %v444_v34, %v416_v40 }
  0xea   :  { %v851_v44 = vmul.f32 -1.442695, %v461_v37  ;;  %v853_v45 = vmul.f32 -1.442695, %v463_v38 }
  0xeb   :  { %v852_v47 = vmul.f32 -1.442695, %v462_v41  ;;  %v854_v48 = vmul.f32 -1.442695, %v464_v42  ;;  %v331_v49 = vpop.f32.mrb[2].mxu0  ;;  %v420_v50 = vpop.f32.mrb[2].mxu1 }
  0xec   :  { %906 = vpow2.f32 %v851_v44  ;;  %v465_v51 = vadd.f32 %v449_v43, %v331_v49  ;;  %v467_v52 = vadd.f32 %v449_v43, %v420_v50  ;;  %v333_v53 = vpop.f32.mrb[3].mxu0  ;;  %v422_v54 = vpop.f32.mrb[3].mxu1 }
  0xed   :  { %908 = vpow2.f32 %v853_v45  ;;  %v466_v55 = vadd.f32 %v449_v43, %v333_v53  ;;  %v468_v56 = vadd.f32 %v449_v43, %v422_v54 }
  0xee   :  { %910 = vpow2.f32 %v852_v47  ;;  %v855_v57 = vmul.f32 -1.442695, %v465_v51  ;;  %v857_v58 = vmul.f32 -1.442695, %v467_v52 }
  0xef   :  { %912 = vpow2.f32 %v854_v48  ;;  %v856_v59 = vmul.f32 -1.442695, %v466_v55  ;;  %v858_v60 = vmul.f32 -1.442695, %v468_v56  ;;  %v337_v61 = vpop.f32.mrb[4].mxu0  ;;  %v426_v62 = vpop.f32.mrb[4].mxu1 }
  0xf0   :  { %914 = vpow2.f32 %v855_v57  ;;  %v469_v63 = vadd.f32 %v454_v46, %v337_v61  ;;  %v339_v0 = vpop.f32.mrb[5].mxu0  ;;  %v428_v1 = vpop.f32.mrb[5].mxu1  ;;  %v471_v2 = vadd.f32 %v454_v46, %v426_v62  ;;  %v543_v61 = vld [vmem:[%s1280_s7 + $0x10] sm:$0xff]  ;;  %v544_v62 = vld [vmem:[%s1280_s7 + $0x18] sm:$0xff] }
  0xf1   :  { %916 = vpow2.f32 %v857_v58  ;;  %v470_v4 = vadd.f32 %v454_v46, %v339_v0  ;;  %v472_v6 = vadd.f32 %v454_v46, %v428_v1  ;;  %v759_v1 = vld [vmem:[%s1275_s2] sm:$0xff] }
  0xf2   :  { %918 = vpow2.f32 %v856_v59  ;;  %v541_v59 = vld [vmem:[%s1280_s7] sm:$0xff] }
  0xf3   :  { %920 = vpow2.f32 %v858_v60  ;;  %v343_v7 = vpop.f32.mrb[6].mxu0  ;;  %v432_v8 = vpop.f32.mrb[6].mxu1  ;;  %v542_v60 = vld [vmem:[%s1280_s7 + $0x8] sm:$0xff] }
  0xf4   :  { %922 = vtanh.f32 %v469_v63  ;;  %v473_v9 = vadd.f32 %v459_v3, %v343_v7  ;;  %v345_v10 = vpop.f32.mrb[7].mxu0  ;;  %v434_v11 = vpop.f32.mrb[7].mxu1  ;;  %v475_v27 = vadd.f32 %v459_v3, %v432_v8 }
  0xf5   :  { %924 = vtanh.f32 %v471_v2  ;;  %v474_v30 = vadd.f32 %v459_v3, %v345_v10  ;;  %v476_v32 = vadd.f32 %v459_v3, %v434_v11  ;;  %v552_v63 = vpop.permute.xlu0 %551  ;;  %v762_v10 = vld [vmem:[%s1275_s2 + $0x18] sm:$0xff] }
  0xf6   :  { %v907_v12 = vpop.eup %906  ;;  %926 = vtanh.f32 %v470_v4  ;;  %v761_v4 = vld [vmem:[%s1275_s2 + $0x10] sm:$0xff] }
  0xf7   :  { %v909_v13 = vpop.eup %908  ;;  %v501_v14 = vadd.f32 1.0, %v907_v12  ;;  %928 = vtanh.f32 %v472_v6 }
  0xf8   :  { %v911_v15 = vpop.eup %910  ;;  %v503_v16 = vadd.f32 1.0, %v909_v13  ;;  %930 = vtanh.f32 %v473_v9  ;;  %v557_v13 = vpop.permute.xlu1 %556 }
  0xf9   :  { %v913_v17 = vpop.eup %912  ;;  %932 = vrcp.f32 %v501_v14  ;;  %v502_v18 = vadd.f32 1.0, %v911_v15 }
  0xfa   :  { %v915_v19 = vpop.eup %914  ;;  %934 = vrcp.f32 %v503_v16  ;;  %v504_v20 = vadd.f32 1.0, %v913_v17  ;;  %v763_v17 = vld [vmem:[%s1275_s2 + $0x20] sm:$0xff] }
  0xfb   :  { %v917_v21 = vpop.eup %916  ;;  %936 = vrcp.f32 %v502_v18  ;;  %v505_v22 = vadd.f32 1.0, %v915_v19  ;;  %v765_v18 = vld [vmem:[%s1275_s2 + $0x30] sm:$0xff] }
  0xfc   :  { %v919_v23 = vpop.eup %918  ;;  %938 = vrcp.f32 %v504_v20  ;;  %v507_v24 = vadd.f32 1.0, %v917_v21 }
  0xfd   :  { %v921_v25 = vpop.eup %920  ;;  %940 = vrcp.f32 %v505_v22  ;;  %v506_v26 = vadd.f32 1.0, %v919_v23 }
  0xfe   :  { %v923_v28 = vpop.eup %922  ;;  %942 = vrcp.f32 %v507_v24  ;;  %v508_v29 = vadd.f32 1.0, %v921_v25  ;;  %v764_v24 = vld [vmem:[%s1275_s2 + $0x28] sm:$0xff] }
  0xff   :  { %v925_v31 = vpop.eup %924  ;;  %944 = vrcp.f32 %v506_v26 }
 0x100   :  { %v927_v33 = vpop.eup %926  ;;  %946 = vrcp.f32 %v508_v29 }
 0x101   :  { %v929_v34 = vpop.eup %928  ;;  %948 = vtanh.f32 %v475_v27 }
 0x102   :  { %v931_v35 = vpop.eup %930  ;;  %950 = vtanh.f32 %v474_v30  ;;  %v766_v30 = vld [vmem:[%s1275_s2 + $0x38] sm:$0xff] }
 0x103   :  { %v933_v36 = vpop.eup %932  ;;  %952 = vtanh.f32 %v476_v32 }
 0x104   :  { %v935_v37 = vpop.eup %934  ;;  %v533_v38 = vmul.f32 %v933_v36, %v923_v28 }
 0x105   :  { %v937_v39 = vpop.eup %936  ;;  %v535_v40 = vmul.f32 %v935_v37, %v925_v31 }
 0x106   :  { %v939_v41 = vpop.eup %938  ;;  %v534_v42 = vmul.f32 %v937_v39, %v927_v33  ;;  %v793_v39 = vld [vmem:[%s1276_s3 + $0x10] sm:$0xff] }
 0x107   :  { %v941_v43 = vpop.eup %940  ;;  %v536_v44 = vmul.f32 %v939_v41, %v929_v34  ;;  %v562_v34 = vpop.permute.xlu0 %561 }
 0x108   :  { %v943_v45 = vpop.eup %942  ;;  %v537_v46 = vmul.f32 %v941_v43, %v931_v35 }
 0x109   :  { %v945_v47 = vpop.eup %944 }
 0x10a   :  { %v947_v48 = vpop.eup %946  ;;  %v877_v49 = vpack.c.bf16 %v537_v46, %v533_v38  ;;  %v791_v38 = vld [vmem:[%s1276_s3] sm:$0xff]  ;;  %v794_v46 = vld [vmem:[%s1276_s3 + $0x18] sm:$0xff] }
 0x10b   :  { %v949_v50 = vpop.eup %948 }
 0x10c   :  { %v951_v51 = vpop.eup %950  ;;  %v539_v52 = vmul.f32 %v949_v50, %v943_v45  ;;  %v792_v45 = vld [vmem:[%s1276_s3 + $0x8] sm:$0xff] }
 0x10d   :  { %v953_v53 = vpop.eup %952  ;;  %v538_v54 = vmul.f32 %v951_v51, %v945_v47 }
 0x10e   :  { %v540_v55 = vmul.f32 %v953_v53, %v947_v48  ;;  %v881_v56 = vpack.c.bf16 %v539_v52, %v535_v40 }
 0x10f   :  { %v875_v57 = vpack.c.bf16 %v538_v54, %v534_v42 }
 0x110   :  { %v879_v58 = vpack.c.bf16 %v540_v55, %v536_v44  ;;  %v567_v55 = vpop.permute.xlu1 %566 }
 0x111   :  { %876 = vmatprep.subr.bf16.mxu0 %v875_v57 }
 0x112   :  { %880 = vmatprep.subr.bf16.mxu1 %v879_v58  ;;  %878 = vmatpush1.bf16.msra.mxu0 %v877_v49 }
 0x113   :  { %882 = vmatpush1.bf16.msra.mxu1 %v881_v56 }
 0x115   :  { %859 = vmatmul.mubr.msk.f32.vlgmr.msra.gmra.mrb[8].mxu0 %vm246_vm1, %v541_v59 }
 0x116   :  { %863 = vmatmul.mubr.msk.f32.vlgmr.msra.gmra.mrb[8].mxu1 %vm246_vm1, %v541_v59  ;;  %651 = vmatprep.mubr.f32.mxu0 %v978_v5  ;;  %v795_v59 = vld [vmem:[%s1276_s3 + $0x20] sm:$0xff] }
 0x117   :  { %740 = vmatprep.mubr.f32.mxu1 %v978_v5 }
 0x119   :  { %860 = vmatmul.mubr.msk.f32.gmra.mrb[10].mxu0 %vm246_vm1, %v542_v60 }
 0x11a   :  { %864 = vmatmul.mubr.msk.f32.gmra.mrb[10].mxu1 %vm246_vm1, %v542_v60  ;;  %657 = vmatprep.mubr.f32.mxu0 %v978_v5 }
 0x11b   :  { %746 = vmatprep.mubr.f32.mxu1 %v978_v5 }
 0x11d   :  { %861 = vmatmul.mubr.msk.f32.gmra.mrb[12].mxu0 %vm246_vm1, %v543_v61 }
 0x11e   :  { %865 = vmatmul.mubr.msk.f32.gmra.mrb[12].mxu1 %vm246_vm1, %v543_v61  ;;  %663 = vmatprep.mubr.f32.mxu0 %v978_v5 }
 0x11f   :  { %752 = vmatprep.mubr.f32.mxu1 %v978_v5  ;;  %v760_v5 = vld [vmem:[%s1275_s2 + $0x8] sm:$0xff]  ;;  %s820_s2 = sshll.u32 %s980_s0, 4  ;;  %s1218_s2 = int_to_ptr.vmem [resolvable:$true] %s820_s2 }
 0x120   :  { %s954_s17 = scalar_lea.vmem %s1218_s2, 1024  ;;  %p959_p1 = scmp.lt.s32.totalorder %s1218_s2, %s1218_s2 }
 0x121   :  { %862 = vmatmul.mubr.msk.f32.gmra.mrb[14].mxu0 %vm246_vm1, %v544_v62  ;;  %p955_p0 = scmp.ne.s32.totalorder %s1218_s2, %s954_s17  ;;  %p960_p2 = scmp.lt.s32.totalorder %s954_s17, %s954_s17 }
 0x122   :  { %866 = vmatmul.mubr.msk.f32.gmra.mrb[14].mxu1 %vm246_vm1, %v544_v62 }
 0x123   :  { %p961_p3 = por %p960_p2, %p959_p1 }
 0x125   :  { %p962_p4 = pnand %p961_p3, %p955_p0 }
 0x1e8   :  { %v647_v0 = vpop.f32.mrb[8].mxu0 }
 0x1e9   :  { %v648_v2 = vadd.f32 %v647_v0, %v552_v63  ;;  %v736_v3 = vpop.f32.mrb[8].mxu1  ;;  %v649_v6 = vpop.f32.mrb[9].mxu0 }
 0x1ea   :  { %v737_v7 = vadd.f32 %v736_v3, %v552_v63  ;;  %v650_v8 = vadd.f32 %v649_v6, %v552_v63  ;;  %v738_v9 = vpop.f32.mrb[9].mxu1 }
 0x1eb   :  { %v767_v11 = vadd.f32 %v759_v1, %v648_v2  ;;  %v739_v12 = vadd.f32 %v738_v9, %v552_v63 }
 0x1ec   :  { %v769_v14 = vadd.f32 %v761_v4, %v737_v7  ;;  %v768_v15 = vadd.f32 %v760_v5, %v650_v8  ;;  %v653_v16 = vpop.f32.mrb[10].mxu0 }
 0x1ed   :  { %v775_v19 = vmul.f32 0.70710677, %v767_v11  ;;  %v770_v20 = vadd.f32 %v762_v10, %v739_v12  ;;  %v654_v21 = vadd.f32 %v653_v16, %v557_v13  ;;  %v742_v22 = vpop.f32.mrb[10].mxu1  ;;  %v655_v23 = vpop.f32.mrb[11].mxu0 }
 0x1ee   :  { %v777_v25 = vmul.f32 0.70710677, %v769_v14  ;;  %v776_v26 = vmul.f32 0.70710677, %v768_v15  ;;  %v743_v27 = vadd.f32 %v742_v22, %v557_v13  ;;  %v656_v28 = vadd.f32 %v655_v23, %v557_v13  ;;  %v744_v29 = vpop.f32.mrb[11].mxu1 }
 0x1ef   :  { %783 = vst [vmem:[#allocation2] sm:$0xff] %v775_v19  ;;  %v778_v31 = vmul.f32 0.70710677, %v770_v20  ;;  %v771_v32 = vadd.f32 %v763_v17, %v654_v21  ;;  %v745_v33 = vadd.f32 %v744_v29, %v557_v13 }
 0x1f0   :  { %785 = vst [vmem:[#allocation2 + $0x10] sm:$0xff] %v777_v25  ;;  %784 = vst [vmem:[#allocation2 + $0x8] sm:$0xff] %v776_v26  ;;  %v773_v35 = vadd.f32 %v765_v18, %v743_v27  ;;  %v772_v36 = vadd.f32 %v764_v24, %v656_v28  ;;  %v659_v37 = vpop.f32.mrb[12].mxu0 }
 0x1f1   :  { %786 = vst [vmem:[#allocation2 + $0x18] sm:$0xff] %v778_v31  ;;  %v779_v40 = vmul.f32 0.70710677, %v771_v32  ;;  %v774_v41 = vadd.f32 %v766_v30, %v745_v33  ;;  %v660_v42 = vadd.f32 %v659_v37, %v562_v34  ;;  %v748_v43 = vpop.f32.mrb[12].mxu1  ;;  %v661_v44 = vpop.f32.mrb[13].mxu0 }
 0x1f2   :  { %v781_v47 = vmul.f32 0.70710677, %v773_v35  ;;  %v780_v48 = vmul.f32 0.70710677, %v772_v36  ;;  %v749_v49 = vadd.f32 %v748_v43, %v562_v34  ;;  %v662_v50 = vadd.f32 %v661_v44, %v562_v34  ;;  %v750_v51 = vpop.f32.mrb[13].mxu1 }
 0x1f3   :  { %787 = vst [vmem:[#allocation2 + $0x20] sm:$0xff] %v779_v40  ;;  %v782_v52 = vmul.f32 0.70710677, %v774_v41  ;;  %v799_v53 = vadd.f32 %v791_v38, %v660_v42  ;;  %v751_v54 = vadd.f32 %v750_v51, %v562_v34 }
 0x1f4   :  { %789 = vst [vmem:[#allocation2 + $0x30] sm:$0xff] %v781_v47  ;;  %788 = vst [vmem:[#allocation2 + $0x28] sm:$0xff] %v780_v48  ;;  %v801_v56 = vadd.f32 %v793_v39, %v749_v49  ;;  %v800_v57 = vadd.f32 %v792_v45, %v662_v50  ;;  %v665_v58 = vpop.f32.mrb[14].mxu0 }
 0x1f5   :  { %790 = vst [vmem:[#allocation2 + $0x38] sm:$0xff] %v782_v52  ;;  %807 = vst [vmem:[%s1283_s10] sm:$0xff] %v799_v53  ;;  %v802_v60 = vadd.f32 %v794_v46, %v751_v54  ;;  %v666_v61 = vadd.f32 %v665_v58, %v567_v55  ;;  %v754_v62 = vpop.f32.mrb[14].mxu1  ;;  %v667_v0 = vpop.f32.mrb[15].mxu0 }
 0x1f6   :  { %v755_v3 = vadd.f32 %v754_v62, %v567_v55  ;;  %v668_v4 = vadd.f32 %v667_v0, %v567_v55  ;;  %v756_v6 = vpop.f32.mrb[15].mxu1 }
 0x1fc   :  { %v797_v63 = vld [vmem:[%s1276_s3 + $0x30] sm:$0xff]  ;;  %v796_v1 = vld [vmem:[%s1276_s3 + $0x28] sm:$0xff]  ;;  %v798_v2 = vld [vmem:[%s1276_s3 + $0x38] sm:$0xff] }
 0x1fd   :  { %809 = vst [vmem:[%s1283_s10 + $0x10] sm:$0xff] %v801_v56  ;;  %808 = vst [vmem:[%s1283_s10 + $0x8] sm:$0xff] %v800_v57 }
 0x1fe   :  { %965 = shalt.err (!%p962_p4)
}
 0x1ff   :  { %s966_s19 = scalar_lea.hbm %s1282_s9, 1024 }
 0x200   :  { %p967_p5 = scmp.ne.s32.totalorder %s1282_s9, %s966_s19  ;;  %p970_p6 = scmp.lt.u32.totalorder %s966_s19, %s1282_s9 }
 0x202   :  { %p972_p7 = pnand %p970_p6, %p967_p5 }
 0x204   :  { %975 = shalt.err (!%p972_p7)
}
 0x205   :  { %s981_s4 = smov 512   ;;  %s982_s0 = smov 32   ;;  %810 = vst [vmem:[%s1283_s10 + $0x18] sm:$0xff] %v802_v60  ;;  %v803_v5 = vadd.f32 %v795_v59, %v666_v61  ;;  %v757_v7 = vadd.f32 %v756_v6, %v567_v55  ;;  %v805_v8 = vadd.f32 %v797_v63, %v755_v3  ;;  %v804_v9 = vadd.f32 %v796_v1, %v668_v4 }
 0x206   :  { %826 = dma.vmem_to_hbm [thread:$0]  %s1218_s2, 1024, %s1282_s9, [#allocation3], %s981_s4, %s981_s4, %s982_s0  }
 0x207   :  { %811 = vst [vmem:[%s1283_s10 + $0x20] sm:$0xff] %v803_v5  ;;  %v806_v10 = vadd.f32 %v798_v2, %v757_v7  ;;  %813 = vst [vmem:[%s1283_s10 + $0x30] sm:$0xff] %v805_v8 }
 0x208   :  { %812 = vst [vmem:[%s1283_s10 + $0x28] sm:$0xff] %v804_v9 }
 0x209   :  { %814 = vst [vmem:[%s1283_s10 + $0x38] sm:$0xff] %v806_v10 }
 0x20a   :  { %976 = dma.done.wait [#allocation3], 1024  }
 0x20b   :  { %977 = vsyncadd [#allocation3], 4294966272 }
 0x20c   :  { %834 = vsyncpa [#allocation3], 1 }

// kernel: diff_csdi_forward.11
= control target key start
LH: loop header
LB: loop body
LE: loop exit
PB: predicated region body
PF: predicated region fallthrough
CT: control target
= control target key end

     0   :  { %v938_v3 = vmov 0.0   ;;  %vm54_vm0 = vcmask 64512   ;;  %v939_v18 = vmov 0   ;;  %vm245_vm1 = vcmask 130048   ;;  %s1235_s1 = inlined_call_operand.vmem [shape: f32[8,512], index: 1, kind: input, shape index: {}]   ;;  %s1236_s5 = inlined_call_operand.vmem [shape: f32[32,8], index: 5, kind: input, shape index: {}]   ;;  %s1237_s0 = inlined_call_operand.vmem [shape: f32[16,512], index: 0, kind: input, shape index: {}]   ;;  %s1238_s6 = inlined_call_operand.vmem [shape: f32[32,1], index: 6, kind: input, shape index: {}]   ;;  %s1239_s8 = inlined_call_operand.vmem [shape: f32[32,1], index: 8, kind: input, shape index: {}]   ;;  %s1240_s4 = inlined_call_operand.vmem [shape: f32[32,16], index: 4, kind: input, shape index: {}]   ;;  %s1241_s7 = inlined_call_operand.vmem [shape: f32[32,16], index: 7, kind: input, shape index: {}]   ;;  %s1242_s2 = inlined_call_operand.vmem [shape: f32[16,512], index: 2, kind: input, shape index: {}]   ;;  %s1243_s9 = inlined_call_operand.vmem [shape: f32[16,512], index: 9, kind: output, shape index: {0}]   ;;  %s1244_s3 = inlined_call_operand.vmem [shape: f32[16,512], index: 3, kind: input, shape index: {}, may-alias: {3,10}]   ;;  %s1245_s10 = inlined_call_operand.vmem [shape: f32[16,512], index: 10, kind: output, shape index: {1}, may-alias: {3,10}]  }
   0x1   :  { %v51_v0 = vld [vmem:[%s1235_s1 + $0x8] sm:$0xff]  ;;  %v53_v1 = vld [vmem:[%s1235_s1 + $0x18] sm:$0xff]  ;;  %v50_v2 = vld [vmem:[%s1235_s1] sm:$0xff]  ;;  %131 = vmatprep.mubr.f32.mxu0 %v938_v3  ;;  %220 = vmatprep.mubr.f32.mxu1 %v938_v3 }
   0x2   :  { %67 = vmatprep.subr.mxu0 %v51_v0  ;;  %156 = vmatprep.subr.mxu1 %v53_v1  ;;  %v52_v4 = vld [vmem:[%s1235_s1 + $0x10] sm:$0xff]  ;;  %v46_v5 = vld [vmem:[%s1236_s5] sm:$0xff]  ;;  %v47_v6 = vld [vmem:[%s1236_s5 + $0x8] sm:$0xff] }
   0x3   :  { %68 = vmatpush1.msra.mxu0 %v50_v2  ;;  %157 = vmatpush1.msra.mxu1 %v52_v4  ;;  %v39_v7 = vld [vmem:[%s1237_s0 + $0x8] sm:$0xff]  ;;  %v41_v9 = vld [vmem:[%s1237_s0 + $0x18] sm:$0xff]  ;;  %v38_v13 = vld [vmem:[%s1237_s0] sm:$0xff] }
   0x4   :  { %822 = vmatmul.mubr.msk.f32.vlgmr.msra.gmra.mrb[0].mxu0 %vm54_vm0, %v46_v5  ;;  %826 = vmatmul.mubr.msk.f32.vlgmr.msra.gmra.mrb[0].mxu1 %vm54_vm0, %v46_v5  ;;  %v43_v8 = vld [vmem:[%s1237_s0 + $0x28] sm:$0xff]  ;;  %v45_v10 = vld [vmem:[%s1237_s0 + $0x38] sm:$0xff]  ;;  %v42_v14 = vld [vmem:[%s1237_s0 + $0x20] sm:$0xff] }
   0x5   :  { %137 = vmatprep.mubr.f32.mxu0 %v938_v3  ;;  %226 = vmatprep.mubr.f32.mxu1 %v938_v3  ;;  %v854_v11 = vpack.c.bf16 %v43_v8, %v39_v7  ;;  %v858_v12 = vpack.c.bf16 %v45_v10, %v41_v9  ;;  %v40_v15 = vld [vmem:[%s1237_s0 + $0x10] sm:$0xff]  ;;  %v856_v16 = vpack.c.bf16 %v42_v14, %v38_v13  ;;  %v436_v20 = vld [vmem:[%s1238_s6] sm:$0xff]  ;;  %v437_v23 = vld [vmem:[%s1238_s6 + $0x8] sm:$0xff] }
   0x6   :  { %v44_v17 = vld [vmem:[%s1237_s0 + $0x30] sm:$0xff]  ;;  %888 = vset.pattern.permute.xlu0 %v939_v18  ;;  %889 = vset.pattern.permute.xlu1 %v939_v18  ;;  %v439_v24 = vld [vmem:[%s1238_s6 + $0x18] sm:$0xff]  ;;  %v544_v26 = vld [vmem:[%s1239_s8] sm:$0xff] }
   0x7   :  { %855 = vmatprep.subr.bf16.mxu0 %v854_v11  ;;  %859 = vmatprep.subr.bf16.mxu1 %v858_v12  ;;  %v860_v19 = vpack.c.bf16 %v44_v17, %v40_v15  ;;  %v48_v21 = vld [vmem:[%s1236_s5 + $0x10] sm:$0xff]  ;;  %v49_v25 = vld [vmem:[%s1236_s5 + $0x18] sm:$0xff]  ;;  %v545_v27 = vld [vmem:[%s1239_s8 + $0x8] sm:$0xff] }
   0x8   :  { %823 = vmatmul.mubr.msk.f32.gmra.mrb[2].mxu0 %vm54_vm0, %v47_v6  ;;  %827 = vmatmul.mubr.msk.f32.gmra.mrb[2].mxu1 %vm54_vm0, %v47_v6  ;;  %v438_v22 = vld [vmem:[%s1238_s6 + $0x10] sm:$0xff]  ;;  %v34_v28 = vld [vmem:[%s1240_s4] sm:$0xff]  ;;  %v547_v30 = vld [vmem:[%s1239_s8 + $0x18] sm:$0xff] }
   0x9   :  { %143 = vmatprep.mubr.f32.mxu0 %v938_v3  ;;  %232 = vmatprep.mubr.f32.mxu1 %v938_v3  ;;  %v546_v29 = vld [vmem:[%s1239_s8 + $0x10] sm:$0xff]  ;;  %v35_v31 = vld [vmem:[%s1240_s4 + $0x8] sm:$0xff]  ;;  %v37_v33 = vld [vmem:[%s1240_s4 + $0x18] sm:$0xff] }
   0xa   :  { %857 = vmatpush1.bf16.msra.mxu0 %v856_v16  ;;  %861 = vmatpush1.bf16.msra.mxu1 %v860_v19  ;;  %v36_v32 = vld [vmem:[%s1240_s4 + $0x10] sm:$0xff] }
   0xb   :  { %442 = vperm.xlu0 %888, %v436_v20   ;;  %452 = vperm.xlu1 %889, %v438_v22  }
   0xc   :  { %824 = vmatmul.mubr.msk.f32.gmra.mrb[4].mxu0 %vm54_vm0, %v48_v21  ;;  %828 = vmatmul.mubr.msk.f32.gmra.mrb[4].mxu1 %vm54_vm0, %v48_v21 }
   0xd   :  { %149 = vmatprep.mubr.f32.mxu0 %v938_v3  ;;  %238 = vmatprep.mubr.f32.mxu1 %v938_v3 }
   0xf   :  { %447 = vperm.xlu0 %888, %v437_v23   ;;  %457 = vperm.xlu1 %889, %v439_v24  }
  0x10   :  { %825 = vmatmul.mubr.msk.f32.gmra.mrb[6].mxu0 %vm54_vm0, %v49_v25  ;;  %829 = vmatmul.mubr.msk.f32.gmra.mrb[6].mxu1 %vm54_vm0, %v49_v25 }
  0x11   :  { %322 = vmatprep.mubr.f32.mxu0 %v938_v3  ;;  %411 = vmatprep.mubr.f32.mxu1 %v938_v3 }
  0x13   :  { %550 = vperm.xlu0 %888, %v544_v26   ;;  %555 = vperm.xlu1 %889, %v545_v27  }
  0x14   :  { %830 = vmatmul.mubr.msk.f32.vlgmr.msra.gmra.mrb[0].mxu0 %vm245_vm1, %v34_v28  ;;  %834 = vmatmul.mubr.msk.f32.vlgmr.msra.gmra.mrb[0].mxu1 %vm245_vm1, %v34_v28 }
  0x15   :  { %328 = vmatprep.mubr.f32.mxu0 %v938_v3  ;;  %417 = vmatprep.mubr.f32.mxu1 %v938_v3 }
  0x17   :  { %560 = vperm.xlu0 %888, %v546_v29   ;;  %565 = vperm.xlu1 %889, %v547_v30  }
  0x18   :  { %831 = vmatmul.mubr.msk.f32.gmra.mrb[2].mxu0 %vm245_vm1, %v35_v31  ;;  %835 = vmatmul.mubr.msk.f32.gmra.mrb[2].mxu1 %vm245_vm1, %v35_v31 }
  0x19   :  { %334 = vmatprep.mubr.f32.mxu0 %v938_v3  ;;  %423 = vmatprep.mubr.f32.mxu1 %v938_v3 }
  0x1c   :  { %832 = vmatmul.mubr.msk.f32.gmra.mrb[4].mxu0 %vm245_vm1, %v36_v32  ;;  %836 = vmatmul.mubr.msk.f32.gmra.mrb[4].mxu1 %vm245_vm1, %v36_v32 }
  0x1d   :  { %340 = vmatprep.mubr.f32.mxu0 %v938_v3  ;;  %429 = vmatprep.mubr.f32.mxu1 %v938_v3 }
  0x20   :  { %833 = vmatmul.mubr.msk.f32.gmra.mrb[6].mxu0 %vm245_vm1, %v37_v33  ;;  %837 = vmatmul.mubr.msk.f32.gmra.mrb[6].mxu1 %vm245_vm1, %v37_v33 }
  0x21   :  { %644 = vmatprep.mubr.f32.mxu0 %v938_v3  ;;  %733 = vmatprep.mubr.f32.mxu1 %v938_v3 }
  0x8a   :  { %v443_v34 = vpop.permute.xlu0 %442  ;;  %v453_v46 = vpop.permute.xlu1 %452 }
  0x8e   :  { %v448_v43 = vpop.permute.xlu0 %447  ;;  %v458_v4 = vpop.permute.xlu1 %457 }
  0xe7   :  { %v324_v35 = vpop.f32.mrb[0].mxu0  ;;  %v413_v36 = vpop.f32.mrb[0].mxu1 }
  0xe8   :  { %v460_v37 = vadd.f32 %v443_v34, %v324_v35  ;;  %v462_v38 = vadd.f32 %v443_v34, %v413_v36  ;;  %v326_v39 = vpop.f32.mrb[1].mxu0  ;;  %v415_v40 = vpop.f32.mrb[1].mxu1 }
  0xe9   :  { %v461_v41 = vadd.f32 %v443_v34, %v326_v39  ;;  %v463_v42 = vadd.f32 %v443_v34, %v415_v40 }
  0xea   :  { %v838_v44 = vmul.f32 -1.442695, %v460_v37  ;;  %v840_v45 = vmul.f32 -1.442695, %v462_v38 }
  0xeb   :  { %v839_v47 = vmul.f32 -1.442695, %v461_v41  ;;  %v841_v48 = vmul.f32 -1.442695, %v463_v42  ;;  %v330_v49 = vpop.f32.mrb[2].mxu0  ;;  %v419_v50 = vpop.f32.mrb[2].mxu1 }
  0xec   :  { %890 = vpow2.f32 %v838_v44  ;;  %v464_v51 = vadd.f32 %v448_v43, %v330_v49  ;;  %v466_v52 = vadd.f32 %v448_v43, %v419_v50  ;;  %v332_v53 = vpop.f32.mrb[3].mxu0  ;;  %v421_v54 = vpop.f32.mrb[3].mxu1 }
  0xed   :  { %892 = vpow2.f32 %v840_v45  ;;  %v465_v55 = vadd.f32 %v448_v43, %v332_v53  ;;  %v467_v56 = vadd.f32 %v448_v43, %v421_v54 }
  0xee   :  { %894 = vpow2.f32 %v839_v47  ;;  %v842_v57 = vmul.f32 -1.442695, %v464_v51  ;;  %v844_v58 = vmul.f32 -1.442695, %v466_v52 }
  0xef   :  { %896 = vpow2.f32 %v841_v48  ;;  %v843_v59 = vmul.f32 -1.442695, %v465_v55  ;;  %v845_v60 = vmul.f32 -1.442695, %v467_v56  ;;  %v336_v61 = vpop.f32.mrb[4].mxu0  ;;  %v425_v62 = vpop.f32.mrb[4].mxu1 }
  0xf0   :  { %898 = vpow2.f32 %v842_v57  ;;  %v468_v63 = vadd.f32 %v453_v46, %v336_v61  ;;  %v338_v0 = vpop.f32.mrb[5].mxu0  ;;  %v427_v1 = vpop.f32.mrb[5].mxu1  ;;  %v470_v2 = vadd.f32 %v453_v46, %v425_v62  ;;  %v542_v61 = vld [vmem:[%s1241_s7 + $0x10] sm:$0xff]  ;;  %v543_v62 = vld [vmem:[%s1241_s7 + $0x18] sm:$0xff] }
  0xf1   :  { %900 = vpow2.f32 %v844_v58  ;;  %v469_v5 = vadd.f32 %v453_v46, %v338_v0  ;;  %v471_v6 = vadd.f32 %v453_v46, %v427_v1  ;;  %v758_v1 = vld [vmem:[%s1242_s2] sm:$0xff] }
  0xf2   :  { %902 = vpow2.f32 %v843_v59  ;;  %v540_v59 = vld [vmem:[%s1241_s7] sm:$0xff] }
  0xf3   :  { %904 = vpow2.f32 %v845_v60  ;;  %v342_v7 = vpop.f32.mrb[6].mxu0  ;;  %v431_v8 = vpop.f32.mrb[6].mxu1  ;;  %v541_v60 = vld [vmem:[%s1241_s7 + $0x8] sm:$0xff] }
  0xf4   :  { %906 = vtanh.f32 %v468_v63  ;;  %v472_v9 = vadd.f32 %v458_v4, %v342_v7  ;;  %v344_v10 = vpop.f32.mrb[7].mxu0  ;;  %v433_v11 = vpop.f32.mrb[7].mxu1  ;;  %v474_v27 = vadd.f32 %v458_v4, %v431_v8 }
  0xf5   :  { %908 = vtanh.f32 %v470_v2  ;;  %v473_v30 = vadd.f32 %v458_v4, %v344_v10  ;;  %v475_v32 = vadd.f32 %v458_v4, %v433_v11  ;;  %v551_v63 = vpop.permute.xlu0 %550  ;;  %v761_v10 = vld [vmem:[%s1242_s2 + $0x18] sm:$0xff] }
  0xf6   :  { %v891_v12 = vpop.eup %890  ;;  %910 = vtanh.f32 %v469_v5  ;;  %v760_v5 = vld [vmem:[%s1242_s2 + $0x10] sm:$0xff] }
  0xf7   :  { %v893_v13 = vpop.eup %892  ;;  %v500_v14 = vadd.f32 1.0, %v891_v12  ;;  %912 = vtanh.f32 %v471_v6 }
  0xf8   :  { %v895_v15 = vpop.eup %894  ;;  %v502_v16 = vadd.f32 1.0, %v893_v13  ;;  %914 = vtanh.f32 %v472_v9  ;;  %v556_v13 = vpop.permute.xlu1 %555 }
  0xf9   :  { %v897_v17 = vpop.eup %896  ;;  %916 = vrcp.f32 %v500_v14  ;;  %v501_v18 = vadd.f32 1.0, %v895_v15 }
  0xfa   :  { %v899_v19 = vpop.eup %898  ;;  %918 = vrcp.f32 %v502_v16  ;;  %v503_v20 = vadd.f32 1.0, %v897_v17  ;;  %v762_v17 = vld [vmem:[%s1242_s2 + $0x20] sm:$0xff] }
  0xfb   :  { %v901_v21 = vpop.eup %900  ;;  %920 = vrcp.f32 %v501_v18  ;;  %v504_v22 = vadd.f32 1.0, %v899_v19 }
  0xfc   :  { %v903_v23 = vpop.eup %902  ;;  %922 = vrcp.f32 %v503_v20  ;;  %v506_v24 = vadd.f32 1.0, %v901_v21 }
  0xfd   :  { %v905_v25 = vpop.eup %904  ;;  %924 = vrcp.f32 %v504_v22  ;;  %v505_v26 = vadd.f32 1.0, %v903_v23  ;;  %v764_v22 = vld [vmem:[%s1242_s2 + $0x30] sm:$0xff] }
  0xfe   :  { %v907_v28 = vpop.eup %906  ;;  %926 = vrcp.f32 %v506_v24  ;;  %v507_v29 = vadd.f32 1.0, %v905_v25  ;;  %v763_v24 = vld [vmem:[%s1242_s2 + $0x28] sm:$0xff] }
  0xff   :  { %v909_v31 = vpop.eup %908  ;;  %928 = vrcp.f32 %v505_v26 }
 0x100   :  { %v911_v33 = vpop.eup %910  ;;  %930 = vrcp.f32 %v507_v29 }
 0x101   :  { %v913_v34 = vpop.eup %912  ;;  %932 = vtanh.f32 %v474_v27 }
 0x102   :  { %v915_v35 = vpop.eup %914  ;;  %934 = vtanh.f32 %v473_v30  ;;  %v765_v30 = vld [vmem:[%s1242_s2 + $0x38] sm:$0xff] }
 0x103   :  { %v917_v36 = vpop.eup %916  ;;  %936 = vtanh.f32 %v475_v32 }
 0x104   :  { %v919_v37 = vpop.eup %918  ;;  %v532_v38 = vmul.f32 %v917_v36, %v907_v28 }
 0x105   :  { %v921_v39 = vpop.eup %920  ;;  %v534_v40 = vmul.f32 %v919_v37, %v909_v31 }
 0x106   :  { %v923_v41 = vpop.eup %922  ;;  %v533_v42 = vmul.f32 %v921_v39, %v911_v33 }
 0x107   :  { %v925_v43 = vpop.eup %924  ;;  %v535_v44 = vmul.f32 %v923_v41, %v913_v34  ;;  %v561_v34 = vpop.permute.xlu0 %560 }
 0x108   :  { %v927_v45 = vpop.eup %926  ;;  %v536_v46 = vmul.f32 %v925_v43, %v915_v35  ;;  %v792_v43 = vld [vmem:[%s1244_s3 + $0x10] sm:$0xff] }
 0x109   :  { %v929_v47 = vpop.eup %928 }
 0x10a   :  { %v931_v48 = vpop.eup %930  ;;  %v864_v49 = vpack.c.bf16 %v536_v46, %v532_v38  ;;  %v790_v38 = vld [vmem:[%s1244_s3] sm:$0xff] }
 0x10b   :  { %v933_v50 = vpop.eup %932 }
 0x10c   :  { %v935_v51 = vpop.eup %934  ;;  %v538_v52 = vmul.f32 %v933_v50, %v927_v45  ;;  %v791_v45 = vld [vmem:[%s1244_s3 + $0x8] sm:$0xff] }
 0x10d   :  { %v937_v53 = vpop.eup %936  ;;  %v537_v54 = vmul.f32 %v935_v51, %v929_v47  ;;  %v793_v51 = vld [vmem:[%s1244_s3 + $0x18] sm:$0xff] }
 0x10e   :  { %v539_v55 = vmul.f32 %v937_v53, %v931_v48  ;;  %v868_v56 = vpack.c.bf16 %v538_v52, %v534_v40 }
 0x10f   :  { %v862_v57 = vpack.c.bf16 %v537_v54, %v533_v42 }
 0x110   :  { %v866_v58 = vpack.c.bf16 %v539_v55, %v535_v44  ;;  %v566_v55 = vpop.permute.xlu1 %565 }
 0x111   :  { %863 = vmatprep.subr.bf16.mxu0 %v862_v57 }
 0x112   :  { %867 = vmatprep.subr.bf16.mxu1 %v866_v58  ;;  %865 = vmatpush1.bf16.msra.mxu0 %v864_v49 }
 0x113   :  { %869 = vmatpush1.bf16.msra.mxu1 %v868_v56 }
 0x115   :  { %846 = vmatmul.mubr.msk.f32.vlgmr.msra.gmra.mrb[8].mxu0 %vm245_vm1, %v540_v59 }
 0x116   :  { %850 = vmatmul.mubr.msk.f32.vlgmr.msra.gmra.mrb[8].mxu1 %vm245_vm1, %v540_v59  ;;  %650 = vmatprep.mubr.f32.mxu0 %v938_v3  ;;  %v794_v59 = vld [vmem:[%s1244_s3 + $0x20] sm:$0xff] }
 0x117   :  { %739 = vmatprep.mubr.f32.mxu1 %v938_v3 }
 0x119   :  { %847 = vmatmul.mubr.msk.f32.gmra.mrb[10].mxu0 %vm245_vm1, %v541_v60 }
 0x11a   :  { %851 = vmatmul.mubr.msk.f32.gmra.mrb[10].mxu1 %vm245_vm1, %v541_v60  ;;  %656 = vmatprep.mubr.f32.mxu0 %v938_v3 }
 0x11b   :  { %745 = vmatprep.mubr.f32.mxu1 %v938_v3 }
 0x11d   :  { %848 = vmatmul.mubr.msk.f32.gmra.mrb[12].mxu0 %vm245_vm1, %v542_v61 }
 0x11e   :  { %852 = vmatmul.mubr.msk.f32.gmra.mrb[12].mxu1 %vm245_vm1, %v542_v61  ;;  %662 = vmatprep.mubr.f32.mxu0 %v938_v3 }
 0x11f   :  { %751 = vmatprep.mubr.f32.mxu1 %v938_v3  ;;  %v759_v3 = vld [vmem:[%s1242_s2 + $0x8] sm:$0xff] }
 0x121   :  { %849 = vmatmul.mubr.msk.f32.gmra.mrb[14].mxu0 %vm245_vm1, %v543_v62 }
 0x122   :  { %853 = vmatmul.mubr.msk.f32.gmra.mrb[14].mxu1 %vm245_vm1, %v543_v62 }
 0x1e8   :  { %v646_v0 = vpop.f32.mrb[8].mxu0 }
 0x1e9   :  { %v647_v2 = vadd.f32 %v646_v0, %v551_v63  ;;  %v735_v4 = vpop.f32.mrb[8].mxu1  ;;  %v648_v6 = vpop.f32.mrb[9].mxu0 }
 0x1ea   :  { %v736_v7 = vadd.f32 %v735_v4, %v551_v63  ;;  %v649_v8 = vadd.f32 %v648_v6, %v551_v63  ;;  %v737_v9 = vpop.f32.mrb[9].mxu1 }
 0x1eb   :  { %v766_v11 = vadd.f32 %v758_v1, %v647_v2  ;;  %v738_v12 = vadd.f32 %v737_v9, %v551_v63 }
 0x1ec   :  { %v768_v14 = vadd.f32 %v760_v5, %v736_v7  ;;  %v767_v15 = vadd.f32 %v759_v3, %v649_v8  ;;  %v652_v16 = vpop.f32.mrb[10].mxu0 }
 0x1ed   :  { %v774_v18 = vmul.f32 0.70710677, %v766_v11  ;;  %v769_v19 = vadd.f32 %v761_v10, %v738_v12  ;;  %v653_v20 = vadd.f32 %v652_v16, %v556_v13  ;;  %v741_v21 = vpop.f32.mrb[10].mxu1  ;;  %v654_v23 = vpop.f32.mrb[11].mxu0 }
 0x1ee   :  { %v776_v25 = vmul.f32 0.70710677, %v768_v14  ;;  %v775_v26 = vmul.f32 0.70710677, %v767_v15  ;;  %v742_v27 = vadd.f32 %v741_v21, %v556_v13  ;;  %v655_v28 = vadd.f32 %v654_v23, %v556_v13  ;;  %v743_v29 = vpop.f32.mrb[11].mxu1 }
 0x1ef   :  { %782 = vst [vmem:[%s1243_s9] sm:$0xff] %v774_v18  ;;  %v777_v31 = vmul.f32 0.70710677, %v769_v19  ;;  %v770_v32 = vadd.f32 %v762_v17, %v653_v20  ;;  %v744_v33 = vadd.f32 %v743_v29, %v556_v13 }
 0x1f0   :  { %784 = vst [vmem:[%s1243_s9 + $0x10] sm:$0xff] %v776_v25  ;;  %783 = vst [vmem:[%s1243_s9 + $0x8] sm:$0xff] %v775_v26  ;;  %v772_v35 = vadd.f32 %v764_v22, %v742_v27  ;;  %v771_v36 = vadd.f32 %v763_v24, %v655_v28  ;;  %v658_v37 = vpop.f32.mrb[12].mxu0 }
 0x1f1   :  { %785 = vst [vmem:[%s1243_s9 + $0x18] sm:$0xff] %v777_v31  ;;  %v778_v39 = vmul.f32 0.70710677, %v770_v32  ;;  %v773_v40 = vadd.f32 %v765_v30, %v744_v33  ;;  %v659_v41 = vadd.f32 %v658_v37, %v561_v34  ;;  %v747_v42 = vpop.f32.mrb[12].mxu1  ;;  %v660_v44 = vpop.f32.mrb[13].mxu0 }
 0x1f2   :  { %v780_v46 = vmul.f32 0.70710677, %v772_v35  ;;  %v779_v47 = vmul.f32 0.70710677, %v771_v36  ;;  %v748_v48 = vadd.f32 %v747_v42, %v561_v34  ;;  %v661_v49 = vadd.f32 %v660_v44, %v561_v34  ;;  %v749_v50 = vpop.f32.mrb[13].mxu1 }
 0x1f3   :  { %786 = vst [vmem:[%s1243_s9 + $0x20] sm:$0xff] %v778_v39  ;;  %v781_v52 = vmul.f32 0.70710677, %v773_v40  ;;  %v798_v53 = vadd.f32 %v790_v38, %v659_v41  ;;  %v750_v54 = vadd.f32 %v749_v50, %v561_v34 }
 0x1f4   :  { %788 = vst [vmem:[%s1243_s9 + $0x30] sm:$0xff] %v780_v46  ;;  %787 = vst [vmem:[%s1243_s9 + $0x28] sm:$0xff] %v779_v47  ;;  %v800_v56 = vadd.f32 %v792_v43, %v748_v48  ;;  %v799_v57 = vadd.f32 %v791_v45, %v661_v49  ;;  %v664_v58 = vpop.f32.mrb[14].mxu0 }
 0x1f5   :  { %789 = vst [vmem:[%s1243_s9 + $0x38] sm:$0xff] %v781_v52  ;;  %806 = vst [vmem:[%s1245_s10] sm:$0xff] %v798_v53  ;;  %v801_v60 = vadd.f32 %v793_v51, %v750_v54  ;;  %v665_v61 = vadd.f32 %v664_v58, %v566_v55  ;;  %v753_v62 = vpop.f32.mrb[14].mxu1  ;;  %v666_v0 = vpop.f32.mrb[15].mxu0 }
 0x1f6   :  { %v754_v2 = vadd.f32 %v753_v62, %v566_v55  ;;  %v667_v4 = vadd.f32 %v666_v0, %v566_v55  ;;  %v755_v5 = vpop.f32.mrb[15].mxu1 }
 0x1f7   :  { %v802_v3 = vadd.f32 %v794_v59, %v665_v61  ;;  %v756_v7 = vadd.f32 %v755_v5, %v566_v55 }
 0x1fc   :  { %v796_v63 = vld [vmem:[%s1244_s3 + $0x30] sm:$0xff]  ;;  %v795_v1 = vld [vmem:[%s1244_s3 + $0x28] sm:$0xff] }
 0x1fd   :  { %808 = vst [vmem:[%s1245_s10 + $0x10] sm:$0xff] %v800_v56  ;;  %807 = vst [vmem:[%s1245_s10 + $0x8] sm:$0xff] %v799_v57  ;;  %v804_v8 = vadd.f32 %v796_v63, %v754_v2  ;;  %v803_v9 = vadd.f32 %v795_v1, %v667_v4 }
 0x204   :  { %v797_v6 = vld [vmem:[%s1244_s3 + $0x38] sm:$0xff] }
 0x205   :  { %809 = vst [vmem:[%s1245_s10 + $0x18] sm:$0xff] %v801_v60  ;;  %810 = vst [vmem:[%s1245_s10 + $0x20] sm:$0xff] %v802_v3  ;;  %v805_v10 = vadd.f32 %v797_v6, %v756_v7 }
 0x206   :  { %812 = vst [vmem:[%s1245_s10 + $0x30] sm:$0xff] %v804_v8  ;;  %811 = vst [vmem:[%s1245_s10 + $0x28] sm:$0xff] %v803_v9 }
 0x207   :  { %813 = vst [vmem:[%s1245_s10 + $0x38] sm:$0xff] %v805_v10 }

// kernel: diff_csdi_forward.9
= control target key start
LH: loop header
LB: loop body
LE: loop exit
PB: predicated region body
PF: predicated region fallthrough
CT: control target
= control target key end

     0   :  { %s11650_s29 = smov 0   ;;  %s15697_s0 = inlined_call_operand.vmem [shape: f32[16,32,16], index: 0, kind: input, shape index: {}]   ;;  %s15698_s1 = inlined_call_operand.vmem [shape: f32[16,32,1], index: 1, kind: input, shape index: {}]   ;;  %s15699_s2 = inlined_call_operand.vmem [shape: f32[16,48], index: 2, kind: input, shape index: {}]   ;;  %s15700_s3 = inlined_call_operand.vmem [shape: f32[1,48], index: 3, kind: input, shape index: {}]   ;;  %s15701_s4 = inlined_call_operand.vmem [shape: f32[16,16], index: 4, kind: input, shape index: {}]   ;;  %s15702_s5 = inlined_call_operand.vmem [shape: f32[1,16], index: 5, kind: input, shape index: {}]   ;;  %s15703_s6 = inlined_call_operand.vmem [shape: f32[1,16], index: 6, kind: input, shape index: {}]   ;;  %s15704_s7 = inlined_call_operand.vmem [shape: f32[1,16], index: 7, kind: input, shape index: {}]   ;;  %s15705_s8 = inlined_call_operand.vmem [shape: f32[16,64], index: 8, kind: input, shape index: {}]   ;;  %s15706_s9 = inlined_call_operand.vmem [shape: f32[1,64], index: 9, kind: input, shape index: {}]   ;;  %s15707_s10 = inlined_call_operand.vmem [shape: f32[64,16], index: 10, kind: input, shape index: {}]   ;;  %s15708_s11 = inlined_call_operand.vmem [shape: f32[1,16], index: 11, kind: input, shape index: {}]   ;;  %s15709_s12 = inlined_call_operand.vmem [shape: f32[1,16], index: 12, kind: input, shape index: {}]   ;;  %s15710_s13 = inlined_call_operand.vmem [shape: f32[1,16], index: 13, kind: input, shape index: {}]   ;;  %s15711_s14 = inlined_call_operand.vmem [shape: f32[16,32,16], index: 14, kind: output, shape index: {}]  }
   0x1 LB: > { %s8811_s30 = sadd.s32 4294967295, %s11567_s29   ;;  %p8815_p0 = scmp.ge.s32.totalorder %s11567_s29, 1  ;;  %s11567_s29 = sphi %s11650_s29, %s24_s29  }
   0x2   : > { %p426_p1 = scmp.lt.s32.totalorder %s11567_s29, 3 }
   0x4   : > { %p427_p2 = pnand %p8815_p0, %p426_p1 }
   0x6   : > { %430 = sbr.rel (%p427_p2) target bundleno = 3507 (0xdb3), region = 76 }
   0xd   : > { %s8816_s15 = sshll.u32 %s8811_s30, 3  ;;  %v11569_v0 = vmov 0   ;;  %v757_v9 = vld [vmem:[%s15699_s2] sm:$0xff]  ;;  %v758_v10 = vld [vmem:[%s15699_s2 + $0x8] sm:$0xff]  ;;  %vm766_vm0 = vcmask 130048   ;;  %vm1102_vm1 = vcmask 64512  }
   0xe   : > { %10727 = vset.pattern.permute.xlu1 %v11569_v0  ;;  %10726 = vset.pattern.permute.xlu0 %v11569_v0  ;;  %p481_p3 = scmp.lt.s32.totalorder %s8816_s15, 15  ;;  %v10336_v11 = vpack.c.bf16 %v758_v10, %v757_v9  ;;  %s11570_s30 = smov 112   ;;  %vm12131_vm2 = vmpackc.low %vm1102_vm1, %vm1102_vm1  ;;  %vm2027_vm3 = vcmask 261120  }
   0xf   : > { %s11572_s17 = smov 104   ;;  %s11573_s18 = smov 120  }
  0x10   : > { %s16157_s15 = smov (!%p481_p3, %s8816_s15), 15  ;;  %10337 = vmatprep.subr.bf16.mxu0 %v10336_v11 }
  0x11   : > { %s11658_s16 = sshll.u32 %s16157_s15, 5  ;;  %10339 = vmatpush3.bf16.msra.mxu0 %v10336_v11  ;;  %s11571_s15 = smov 96  }
  0x12   : > { %s11664_s19 = scalar_lea.vmem %s15698_s1, %s11658_s16  ;;  %s11708_s26 = scalar_lea.vmem %s15697_s0, %s11658_s16 }
  0x13   : > { %v535_v1 = vld [vmem:[%s11664_s19 + $0x10] sm:$0xff]  ;;  %v533_v2 = vld [vmem:[%s11664_s19] sm:$0xff]  ;;  %v536_v3 = vld [vmem:[%s11664_s19 + $0x18] sm:$0xff]  ;;  %s15535_s20 = scalar_lea.vmem %s15711_s14, %s11658_s16 }
  0x14   : > { %577 = vperm.xlu1 %10727, %v535_v1   ;;  %567 = vperm.xlu0 %10726, %v533_v2   ;;  %v534_v4 = vld [vmem:[%s11664_s19 + $0x8] sm:$0xff]  ;;  %v537_v6 = vld [vmem:[%s11664_s19 + $0x20] sm:$0xff]  ;;  %v540_v7 = vld [vmem:[%s11664_s19 + $0x38] sm:$0xff] }
  0x15   : > { %v538_v5 = vld [vmem:[%s11664_s19 + $0x28] sm:$0xff]  ;;  %v539_v8 = vld [vmem:[%s11664_s19 + $0x30] sm:$0xff]  ;;  %v541_v13 = vld [vmem:[%s11664_s19 + $0x40] sm:$0xff] }
  0x16   : > { %v542_v12 = vld [vmem:[%s11664_s19 + $0x48] sm:$0xff]  ;;  %v544_v14 = vld [vmem:[%s11664_s19 + $0x58] sm:$0xff]  ;;  %v543_v15 = vld [vmem:[%s11664_s19 + $0x50] sm:$0xff] }
  0x17   : > { %v546_v16 = vld [vmem:[%s11664_s19 + $0x68] sm:$0xff]  ;;  %v545_v17 = vld [vmem:[%s11664_s19 + $0x60] sm:$0xff]  ;;  %v548_v18 = vld [vmem:[%s11664_s19 + $0x78] sm:$0xff] }
  0x18   : > { %582 = vperm.xlu1 %10727, %v536_v3   ;;  %572 = vperm.xlu0 %10726, %v534_v4   ;;  %v547_v19 = vld [vmem:[%s11664_s19 + $0x70] sm:$0xff]  ;;  %v550_v20 = vld [vmem:[%s11664_s19 + $0x88] sm:$0xff]  ;;  %v549_v21 = vld [vmem:[%s11664_s19 + $0x80] sm:$0xff] }
  0x19   : > { %v552_v22 = vld [vmem:[%s11664_s19 + $0x98] sm:$0xff]  ;;  %v551_v23 = vld [vmem:[%s11664_s19 + $0x90] sm:$0xff]  ;;  %v554_v24 = vld [vmem:[%s11664_s19 + $0xa8] sm:$0xff] }
  0x1a   : > { %v553_v25 = vld [vmem:[%s11664_s19 + $0xa0] sm:$0xff]  ;;  %v556_v26 = vld [vmem:[%s11664_s19 + $0xb8] sm:$0xff]  ;;  %v555_v27 = vld [vmem:[%s11664_s19 + $0xb0] sm:$0xff] }
  0x1b   : > { %v558_v28 = vld [vmem:[%s11664_s19 + $0xc8] sm:$0xff]  ;;  %v557_v29 = vld [vmem:[%s11664_s19 + $0xc0] sm:$0xff]  ;;  %v560_v30 = vld [vmem:[%s11664_s19 + $0xd8] sm:$0xff] }
  0x1c   : > { %592 = vperm.xlu1 %10727, %v538_v5   ;;  %587 = vperm.xlu0 %10726, %v537_v6   ;;  %v559_v31 = vld [vmem:[%s11664_s19 + $0xd0] sm:$0xff]  ;;  %v562_v32 = vld [vmem:[%s11664_s19 + $0xe8] sm:$0xff]  ;;  %v561_v33 = vld [vmem:[%s11664_s19 + $0xe0] sm:$0xff] }
  0x1d   : > { %v564_v34 = vld [vmem:[%s11664_s19 + $0xf8] sm:$0xff]  ;;  %v563_v35 = vld [vmem:[%s11664_s19 + $0xf0] sm:$0xff]  ;;  %v501_v36 = vld [vmem:[%s11708_s26] sm:$0xff]  ;;  %s11574_s19 = smov 88  }
  0x1e   : > { %v503_v39 = vld [vmem:[%s11708_s26 + $0x10] sm:$0xff]  ;;  %v502_v41 = vld [vmem:[%s11708_s26 + $0x8] sm:$0xff]  ;;  %v504_v44 = vld [vmem:[%s11708_s26 + $0x18] sm:$0xff] }
  0x1f   : > { %v505_v47 = vld [vmem:[%s11708_s26 + $0x20] sm:$0xff]  ;;  %v506_v52 = vld [vmem:[%s11708_s26 + $0x28] sm:$0xff]  ;;  %v507_v53 = vld [vmem:[%s11708_s26 + $0x30] sm:$0xff] }
  0x20   : > { %602 = vperm.xlu1 %10727, %v540_v7   ;;  %597 = vperm.xlu0 %10726, %v539_v8   ;;  %v508_v58 = vld [vmem:[%s11708_s26 + $0x38] sm:$0xff]  ;;  %v509_v59 = vld [vmem:[%s11708_s26 + $0x40] sm:$0xff]  ;;  %v510_v0 = vld [vmem:[%s11708_s26 + $0x48] sm:$0xff] }
  0x21   : > { %v511_v1 = vld [vmem:[%s11708_s26 + $0x50] sm:$0xff]  ;;  %v512_v6 = vld [vmem:[%s11708_s26 + $0x58] sm:$0xff]  ;;  %v513_v7 = vld [vmem:[%s11708_s26 + $0x60] sm:$0xff] }
  0x24   : > { %612 = vperm.xlu1 %10727, %v542_v12   ;;  %607 = vperm.xlu0 %10726, %v541_v13   ;;  %v514_v12 = vld [vmem:[%s11708_s26 + $0x68] sm:$0xff]  ;;  %v515_v13 = vld [vmem:[%s11708_s26 + $0x70] sm:$0xff] }
  0x28   : > { %622 = vperm.xlu1 %10727, %v544_v14   ;;  %617 = vperm.xlu0 %10726, %v543_v15  }
  0x2c   : > { %632 = vperm.xlu1 %10727, %v546_v16   ;;  %627 = vperm.xlu0 %10726, %v545_v17  }
  0x30   : > { %642 = vperm.xlu1 %10727, %v548_v18   ;;  %637 = vperm.xlu0 %10726, %v547_v19   ;;  %v516_v18 = vld [vmem:[%s11708_s26 + $0x78] sm:$0xff]  ;;  %v517_v19 = vld [vmem:[%s11708_s26 + $0x80] sm:$0xff] }
  0x34   : > { %652 = vperm.xlu1 %10727, %v550_v20   ;;  %647 = vperm.xlu0 %10726, %v549_v21  }
  0x38   : > { %662 = vperm.xlu1 %10727, %v552_v22   ;;  %657 = vperm.xlu0 %10726, %v551_v23  }
  0x3c   : > { %672 = vperm.xlu1 %10727, %v554_v24   ;;  %667 = vperm.xlu0 %10726, %v553_v25   ;;  %v518_v24 = vld [vmem:[%s11708_s26 + $0x88] sm:$0xff]  ;;  %v519_v25 = vld [vmem:[%s11708_s26 + $0x90] sm:$0xff] }
  0x40   : > { %682 = vperm.xlu1 %10727, %v556_v26   ;;  %677 = vperm.xlu0 %10726, %v555_v27  }
  0x44   : > { %692 = vperm.xlu1 %10727, %v558_v28   ;;  %687 = vperm.xlu0 %10726, %v557_v29  }
  0x48   : > { %702 = vperm.xlu1 %10727, %v560_v30   ;;  %697 = vperm.xlu0 %10726, %v559_v31   ;;  %v520_v30 = vld [vmem:[%s11708_s26 + $0x98] sm:$0xff]  ;;  %v521_v31 = vld [vmem:[%s11708_s26 + $0xa0] sm:$0xff] }
  0x4c   : > { %712 = vperm.xlu1 %10727, %v562_v32   ;;  %707 = vperm.xlu0 %10726, %v561_v33  }
  0x50   : > { %722 = vperm.xlu1 %10727, %v564_v34   ;;  %717 = vperm.xlu0 %10726, %v563_v35  }
  0x93   : > { %v578_v37 = vpop.permute.xlu1 %577  ;;  %v568_v38 = vpop.permute.xlu0 %567 }
  0x94   : > { %v11712_v40 = vadd.f32 %v568_v38, %v501_v36  ;;  %v11717_v42 = vadd.f32 %v578_v37, %v503_v39  ;;  %v522_v36 = vld [vmem:[%s11708_s26 + $0xa8] sm:$0xff]  ;;  %v523_v37 = vld [vmem:[%s11708_s26 + $0xb0] sm:$0xff] }
  0x96   : > { %15828 = vst [vmem:[#allocation2_spill] sm:$0xff] %v11712_v40  ;;  %9624 = vmatprep.mubr.msk.f32.mxu0 %vm766_vm0, %v11712_v40  ;;  %15829 = vst [vmem:[#allocation3_spill] sm:$0xff] %v11717_v42 }
  0x97   : > { %v583_v43 = vpop.permute.xlu1 %582  ;;  %v573_v45 = vpop.permute.xlu0 %572 }
  0x98   : > { %v11720_v46 = vadd.f32 %v573_v45, %v502_v41  ;;  %v11723_v48 = vadd.f32 %v583_v43, %v504_v44  ;;  %v524_v44 = vld [vmem:[%s11708_s26 + $0xb8] sm:$0xff]  ;;  %v525_v45 = vld [vmem:[%s11708_s26 + $0xc0] sm:$0xff] }
  0x9a   : > { %15830 = vst [vmem:[#allocation4_spill] sm:$0xff] %v11720_v46  ;;  %15831 = vst [vmem:[#allocation5_spill] sm:$0xff] %v11723_v48  ;;  %9625 = vmatmul.mubr.msk.f32.vlgmr.msra.gmra.mrb[0].mxu0 %vm766_vm0, %v11720_v46 }
  0x9b   : > { %v593_v49 = vpop.permute.xlu1 %592  ;;  %v588_v50 = vpop.permute.xlu0 %587  ;;  %9627 = vmatprep.mubr.msk.f32.mxu0 %vm766_vm0, %v11717_v42 }
  0x9c   : > { %v11729_v51 = vadd.f32 %v588_v50, %v505_v47  ;;  %v11737_v56 = vadd.f32 %v593_v49, %v506_v52 }
  0x9e   : > { %15832 = vst [vmem:[#allocation6_spill] sm:$0xff] %v11729_v51  ;;  %9628 = vmatmul.mubr.msk.f32.gmra.mrb[2].mxu0 %vm766_vm0, %v11723_v48  ;;  %15833 = vst [vmem:[#allocation7_spill] sm:$0xff] %v11737_v56 }
  0x9f   : > { %v603_v54 = vpop.permute.xlu1 %602  ;;  %v598_v55 = vpop.permute.xlu0 %597  ;;  %9630 = vmatprep.mubr.msk.f32.mxu0 %vm766_vm0, %v11729_v51 }
  0xa0   : > { %v11739_v57 = vadd.f32 %v598_v55, %v507_v53  ;;  %v11747_v62 = vadd.f32 %v603_v54, %v508_v58  ;;  %v526_v53 = vld [vmem:[%s11708_s26 + $0xc8] sm:$0xff]  ;;  %v527_v54 = vld [vmem:[%s11708_s26 + $0xd0] sm:$0xff] }
  0xa2   : > { %15834 = vst [vmem:[#allocation8_spill] sm:$0xff] %v11739_v57  ;;  %9631 = vmatmul.mubr.msk.f32.gmra.mrb[4].mxu0 %vm766_vm0, %v11737_v56  ;;  %15835 = vst [vmem:[#allocation9_spill] sm:$0xff] %v11747_v62 }
  0xa3   : > { %v613_v60 = vpop.permute.xlu1 %612  ;;  %v608_v61 = vpop.permute.xlu0 %607  ;;  %9633 = vmatprep.mubr.msk.f32.mxu0 %vm766_vm0, %v11739_v57 }
  0xa4   : > { %v11749_v63 = vadd.f32 %v608_v61, %v509_v59  ;;  %v11757_v4 = vadd.f32 %v613_v60, %v510_v0  ;;  %v528_v61 = vld [vmem:[%s11708_s26 + $0xd8] sm:$0xff]  ;;  %v529_v0 = vld [vmem:[%s11708_s26 + $0xe0] sm:$0xff] }
  0xa6   : > { %15836 = vst [vmem:[#allocation10_spill] sm:$0xff] %v11749_v63  ;;  %9634 = vmatmul.mubr.msk.f32.gmra.mrb[6].mxu0 %vm766_vm0, %v11747_v62  ;;  %15837 = vst [vmem:[#allocation11_spill] sm:$0xff] %v11757_v4 }
  0xa7   : > { %v623_v2 = vpop.permute.xlu1 %622  ;;  %v618_v3 = vpop.permute.xlu0 %617  ;;  %9636 = vmatprep.mubr.msk.f32.mxu0 %vm766_vm0, %v11749_v63 }
  0xa8   : > { %v11759_v5 = vadd.f32 %v618_v3, %v511_v1  ;;  %v11767_v10 = vadd.f32 %v623_v2, %v512_v6 }
  0xaa   : > { %15838 = vst [vmem:[#allocation12_spill] sm:$0xff] %v11759_v5  ;;  %9637 = vmatmul.mubr.msk.f32.gmra.mrb[8].mxu0 %vm766_vm0, %v11757_v4  ;;  %15839 = vst [vmem:[#allocation13_spill] sm:$0xff] %v11767_v10 }
  0xab   : > { %v633_v8 = vpop.permute.xlu1 %632  ;;  %v628_v9 = vpop.permute.xlu0 %627  ;;  %9639 = vmatprep.mubr.msk.f32.mxu0 %vm766_vm0, %v11759_v5 }
  0xac   : > { %v11769_v11 = vadd.f32 %v628_v9, %v513_v7  ;;  %v11777_v16 = vadd.f32 %v633_v8, %v514_v12  ;;  %v530_v7 = vld [vmem:[%s11708_s26 + $0xe8] sm:$0xff]  ;;  %v531_v8 = vld [vmem:[%s11708_s26 + $0xf0] sm:$0xff] }
  0xae   : > { %15840 = vst [vmem:[#allocation14_spill] sm:$0xff] %v11769_v11  ;;  %9640 = vmatmul.mubr.msk.f32.gmra.mrb[10].mxu0 %vm766_vm0, %v11767_v10  ;;  %15841 = vst [vmem:[#allocation15_spill] sm:$0xff] %v11777_v16 }
  0xaf   : > { %v643_v14 = vpop.permute.xlu1 %642  ;;  %v638_v15 = vpop.permute.xlu0 %637  ;;  %9642 = vmatprep.mubr.msk.f32.mxu0 %vm766_vm0, %v11769_v11 }
  0xb0   : > { %v11779_v17 = vadd.f32 %v638_v15, %v515_v13  ;;  %v11787_v22 = vadd.f32 %v643_v14, %v516_v18  ;;  %v532_v15 = vld [vmem:[%s11708_s26 + $0xf8] sm:$0xff] }
  0xb2   : > { %15842 = vst [vmem:[#allocation16_spill] sm:$0xff] %v11779_v17  ;;  %9643 = vmatmul.mubr.msk.f32.gmra.mrb[12].mxu0 %vm766_vm0, %v11777_v16  ;;  %15843 = vst [vmem:[#allocation17_spill] sm:$0xff] %v11787_v22 }
  0xb3   : > { %v653_v20 = vpop.permute.xlu1 %652  ;;  %v648_v21 = vpop.permute.xlu0 %647  ;;  %9645 = vmatprep.mubr.msk.f32.mxu0 %vm766_vm0, %v11779_v17 }
  0xb4   : > { %v11789_v23 = vadd.f32 %v648_v21, %v517_v19  ;;  %v11797_v28 = vadd.f32 %v653_v20, %v518_v24  ;;  %v11873_v19 = vld [vmem:[%s15700_s3] ss:$0 sm:$0xff] }
  0xb6   : > { %15844 = vst [vmem:[#allocation18_spill] sm:$0xff] %v11789_v23  ;;  %9646 = vmatmul.mubr.msk.f32.gmra.mrb[14].mxu0 %vm766_vm0, %v11787_v22  ;;  %15845 = vst [vmem:[#allocation19_spill] sm:$0xff] %v11797_v28 }
  0xb7   : > { %v663_v26 = vpop.permute.xlu1 %662  ;;  %v658_v27 = vpop.permute.xlu0 %657  ;;  %9648 = vmatprep.mubr.msk.f32.mxu0 %vm766_vm0, %v11789_v23 }
  0xb8   : > { %v11799_v29 = vadd.f32 %v658_v27, %v519_v25  ;;  %v11807_v34 = vadd.f32 %v663_v26, %v520_v30 }
  0xba   : > { %15846 = vst [vmem:[#allocation20_spill] sm:$0xff] %v11799_v29  ;;  %9649 = vmatmul.mubr.msk.f32.gmra.mrb[16].mxu0 %vm766_vm0, %v11797_v28  ;;  %15847 = vst [vmem:[#allocation21_spill] sm:$0xff] %v11807_v34 }
  0xbb   : > { %v673_v32 = vpop.permute.xlu1 %672  ;;  %v668_v33 = vpop.permute.xlu0 %667  ;;  %9651 = vmatprep.mubr.msk.f32.mxu0 %vm766_vm0, %v11799_v29 }
  0xbc   : > { %v11809_v35 = vadd.f32 %v668_v33, %v521_v31  ;;  %v11817_v41 = vadd.f32 %v673_v32, %v522_v36 }
  0xbe   : > { %15848 = vst [vmem:[#allocation22_spill] sm:$0xff] %v11809_v35  ;;  %9652 = vmatmul.mubr.msk.f32.gmra.mrb[18].mxu0 %vm766_vm0, %v11807_v34  ;;  %15849 = vst [vmem:[#allocation23_spill] sm:$0xff] %v11817_v41 }
  0xbf   : > { %v683_v38 = vpop.permute.xlu1 %682  ;;  %v678_v39 = vpop.permute.xlu0 %677  ;;  %9654 = vmatprep.mubr.msk.f32.mxu0 %vm766_vm0, %v11809_v35 }
  0xc0   : > { %v11819_v43 = vadd.f32 %v678_v39, %v523_v37  ;;  %v11827_v50 = vadd.f32 %v683_v38, %v524_v44 }
  0xc2   : > { %15850 = vst [vmem:[#allocation24_spill] sm:$0xff] %v11819_v43  ;;  %9655 = vmatmul.mubr.msk.f32.gmra.mrb[20].mxu0 %vm766_vm0, %v11817_v41  ;;  %15851 = vst [vmem:[#allocation25_spill] sm:$0xff] %v11827_v50 }
  0xc3   : > { %v693_v47 = vpop.permute.xlu1 %692  ;;  %v688_v49 = vpop.permute.xlu0 %687  ;;  %9657 = vmatprep.mubr.msk.f32.mxu0 %vm766_vm0, %v11819_v43 }
  0xc4   : > { %v11829_v52 = vadd.f32 %v688_v49, %v525_v45  ;;  %v11837_v59 = vadd.f32 %v693_v47, %v526_v53 }
  0xc6   : > { %15852 = vst [vmem:[#allocation26_spill] sm:$0xff] %v11829_v52  ;;  %9658 = vmatmul.mubr.msk.f32.gmra.mrb[22].mxu0 %vm766_vm0, %v11827_v50  ;;  %15853 = vst [vmem:[#allocation27_spill] sm:$0xff] %v11837_v59 }
  0xc7   : > { %v703_v55 = vpop.permute.xlu1 %702  ;;  %v698_v58 = vpop.permute.xlu0 %697  ;;  %9660 = vmatprep.mubr.msk.f32.mxu0 %vm766_vm0, %v11829_v52 }
  0xc8   : > { %v11839_v60 = vadd.f32 %v698_v58, %v527_v54  ;;  %v11847_v3 = vadd.f32 %v703_v55, %v528_v61 }
  0xca   : > { %15854 = vst [vmem:[#allocation28_spill] sm:$0xff] %v11839_v60  ;;  %9661 = vmatmul.mubr.msk.f32.gmra.mrb[24].mxu0 %vm766_vm0, %v11837_v59  ;;  %15855 = vst [vmem:[#allocation29_spill] sm:$0xff] %v11847_v3 }
  0xcb   : > { %v713_v1 = vpop.permute.xlu1 %712  ;;  %v708_v2 = vpop.permute.xlu0 %707  ;;  %9663 = vmatprep.mubr.msk.f32.mxu0 %vm766_vm0, %v11839_v60 }
  0xcc   : > { %v11849_v6 = vadd.f32 %v708_v2, %v529_v0  ;;  %v11857_v12 = vadd.f32 %v713_v1, %v530_v7 }
  0xce   : > { %15856 = vst [vmem:[#allocation30_spill] sm:$0xff] %v11849_v6  ;;  %9664 = vmatmul.mubr.msk.f32.gmra.mrb[26].mxu0 %vm766_vm0, %v11847_v3  ;;  %15857 = vst [vmem:[#allocation31_spill] sm:$0xff] %v11857_v12 }
  0xcf   : > { %v718_v9 = vpop.permute.xlu0 %717  ;;  %9666 = vmatprep.mubr.msk.f32.mxu0 %vm766_vm0, %v11849_v6  ;;  %v723_v14 = vpop.permute.xlu1 %722 }
  0xd0   : > { %v11859_v13 = vadd.f32 %v718_v9, %v531_v8  ;;  %v11866_v18 = vadd.f32 %v723_v14, %v532_v15 }
  0xd2   : > { %15858 = vst [vmem:[#allocation32_spill] sm:$0xff] %v11859_v13  ;;  %9667 = vmatmul.mubr.msk.f32.gmra.mrb[28].mxu0 %vm766_vm0, %v11857_v12  ;;  %15859 = vst [vmem:[#allocation33_spill] sm:$0xff] %v11866_v18 }
  0xd3   : > { %9669 = vmatprep.mubr.msk.f32.mxu0 %vm766_vm0, %v11859_v13 }
  0xd6   : > { %9670 = vmatmul.mubr.msk.f32.gmra.mrb[30].mxu0 %vm766_vm0, %v11866_v18 }
 0x16d   : > { %v9626_v20 = vpop.f32.mrb[0].mxu0 }
 0x16e   : > { %v11876_v21 = vadd.f32 %v9626_v20, %v11873_v19  ;;  %v929_v24 = vpop.f32.mrb[1].mxu0 }
 0x16f   : > { %v11879_v25 = vadd.f32 %v11873_v19, %v929_v24 }
 0x171   : > { %v9629_v26 = vpop.f32.mrb[2].mxu0  ;;  %9680 = vmatprep.mubr.msk.f32.mxu1 %vm1102_vm1, %v11879_v25  ;;  %v11885_v27 = vpack.i.bf16 %v11876_v21, %v11879_v25 }
 0x172   : > { %v11888_v30 = vadd.f32 %v9629_v26, %v11873_v19  ;;  %v939_v31 = vpop.f32.mrb[3].mxu0 }
 0x173   : > { %15860 = vst [vmem:[#allocation34_spill] sm:$0xff] %v11885_v27  ;;  %v11891_v32 = vadd.f32 %v11873_v19, %v939_v31  ;;  %10729 = vrot.lane.b32.xlu0 %v11885_v27, %s11570_s30 }
 0x175   : > { %v9632_v33 = vpop.f32.mrb[4].mxu0  ;;  %v11897_v36 = vpack.i.bf16 %v11888_v30, %v11891_v32 }
 0x176   : > { %v11900_v37 = vadd.f32 %v9632_v33, %v11873_v19  ;;  %v949_v38 = vpop.f32.mrb[5].mxu0 }
 0x177   : > { %15861 = vst [vmem:[#allocation35_spill] sm:$0xff] %v11897_v36  ;;  %v11903_v39 = vadd.f32 %v11873_v19, %v949_v38  ;;  %10734 = vrot.lane.b32.xlu1 %v11897_v36, %s11570_s30 }
 0x179   : > { %v9635_v44 = vpop.f32.mrb[6].mxu0  ;;  %v11909_v45 = vpack.i.bf16 %v11900_v37, %v11903_v39 }
 0x17a   : > { %v11912_v47 = vadd.f32 %v9635_v44, %v11873_v19  ;;  %v959_v49 = vpop.f32.mrb[7].mxu0 }
 0x17b   : > { %15862 = vst [vmem:[#allocation36_spill] sm:$0xff] %v11909_v45  ;;  %v11915_v53 = vadd.f32 %v11873_v19, %v959_v49  ;;  %10739 = vrot.lane.b32.xlu0 %v11909_v45, %s11570_s30 }
 0x17d   : > { %v9638_v54 = vpop.f32.mrb[8].mxu0  ;;  %v11921_v55 = vpack.i.bf16 %v11912_v47, %v11915_v53 }
 0x17e   : > { %v11924_v58 = vadd.f32 %v9638_v54, %v11873_v19  ;;  %v969_v61 = vpop.f32.mrb[9].mxu0 }
 0x17f   : > { %15863 = vst [vmem:[#allocation37_spill] sm:$0xff] %v11921_v55  ;;  %v11927_v0 = vadd.f32 %v11873_v19, %v969_v61  ;;  %10744 = vrot.lane.b32.xlu1 %v11921_v55, %s11570_s30 }
 0x181   : > { %v9641_v1 = vpop.f32.mrb[10].mxu0  ;;  %v11933_v2 = vpack.i.bf16 %v11924_v58, %v11927_v0 }
 0x182   : > { %v11936_v7 = vadd.f32 %v9641_v1, %v11873_v19  ;;  %v979_v8 = vpop.f32.mrb[11].mxu0 }
 0x183   : > { %15864 = vst [vmem:[#allocation38_spill] sm:$0xff] %v11933_v2  ;;  %v11939_v9 = vadd.f32 %v11873_v19, %v979_v8  ;;  %10749 = vrot.lane.b32.xlu0 %v11933_v2, %s11570_s30 }
 0x185   : > { %v9644_v14 = vpop.f32.mrb[12].mxu0  ;;  %v11945_v15 = vpack.i.bf16 %v11936_v7, %v11939_v9 }
 0x186   : > { %v11948_v20 = vadd.f32 %v9644_v14, %v11873_v19  ;;  %v989_v24 = vpop.f32.mrb[13].mxu0 }
 0x187   : > { %15865 = vst [vmem:[#allocation39_spill] sm:$0xff] %v11945_v15  ;;  %v11951_v26 = vadd.f32 %v11873_v19, %v989_v24  ;;  %10754 = vrot.lane.b32.xlu1 %v11945_v15, %s11570_s30 }
 0x189   : > { %v9647_v31 = vpop.f32.mrb[14].mxu0  ;;  %v11957_v33 = vpack.i.bf16 %v11948_v20, %v11951_v26 }
 0x18a   : > { %v11960_v38 = vadd.f32 %v9647_v31, %v11873_v19  ;;  %v999_v44 = vpop.f32.mrb[15].mxu0 }
 0x18b   : > { %15866 = vst [vmem:[#allocation40_spill] sm:$0xff] %v11957_v33  ;;  %v11963_v49 = vadd.f32 %v11873_v19, %v999_v44  ;;  %10759 = vrot.lane.b32.xlu0 %v11957_v33, %s11570_s30 }
 0x18d   : > { %v9650_v54 = vpop.f32.mrb[16].mxu0  ;;  %v11969_v61 = vpack.i.bf16 %v11960_v38, %v11963_v49 }
 0x18e   : > { %v11972_v1 = vadd.f32 %v9650_v54, %v11873_v19  ;;  %v1009_v8 = vpop.f32.mrb[17].mxu0 }
 0x18f   : > { %15867 = vst [vmem:[#allocation41_spill] sm:$0xff] %v11969_v61  ;;  %v11975_v14 = vadd.f32 %v11873_v19, %v1009_v8  ;;  %10764 = vrot.lane.b32.xlu1 %v11969_v61, %s11570_s30 }
 0x191   : > { %v9653_v24 = vpop.f32.mrb[18].mxu0  ;;  %9736 = vmatprep.mubr.msk.f32.mxu0 %vm1102_vm1, %v11975_v14  ;;  %v11983_v31 = vpack.i.bf16 %v11972_v1, %v11975_v14 }
 0x192   : > { %v11986_v44 = vadd.f32 %v9653_v24, %v11873_v19  ;;  %v1019_v54 = vpop.f32.mrb[19].mxu0 }
 0x193   : > { %15868 = vst [vmem:[#allocation42_spill] sm:$0xff] %v11983_v31  ;;  %v11989_v13 = vadd.f32 %v11873_v19, %v1019_v54  ;;  %10769 = vrot.lane.b32.xlu0 %v11983_v31, %s11570_s30 }
 0x194   : > { %15869 = vst [vmem:[#allocation43_spill] sm:$0xff] %v11986_v44 }
 0x195   : > { %v9656_v8 = vpop.f32.mrb[20].mxu0  ;;  %v11995_v18 = vpack.i.bf16 %v11986_v44, %v11989_v13 }
 0x196   : > { %v11998_v6 = vadd.f32 %v9656_v8, %v11873_v19  ;;  %v1029_v12 = vpop.f32.mrb[21].mxu0 }
 0x197   : > { %v12001_v60 = vadd.f32 %v11873_v19, %v1029_v12  ;;  %10774 = vrot.lane.b32.xlu1 %v11995_v18, %s11570_s30 }
 0x198   : > { %15870 = vst [vmem:[#allocation44_spill] sm:$0xff] %v11998_v6 }
 0x199   : > { %15871 = vst [vmem:[#allocation45_spill] sm:$0xff] %v12001_v60  ;;  %v9659_v24 = vpop.f32.mrb[22].mxu0  ;;  %v12007_v54 = vpack.i.bf16 %v11998_v6, %v12001_v60 }
 0x19a   : > { %v12010_v3 = vadd.f32 %v9659_v24, %v11873_v19  ;;  %v1039_v52 = vpop.f32.mrb[23].mxu0 }
 0x19b   : > { %v12013_v59 = vadd.f32 %v11873_v19, %v1039_v52  ;;  %10779 = vrot.lane.b32.xlu0 %v12007_v54, %s11570_s30 }
 0x19c   : > { %15872 = vst [vmem:[#allocation46_spill] sm:$0xff] %v12010_v3 }
 0x19d   : > { %15873 = vst [vmem:[#allocation47_spill] sm:$0xff] %v12013_v59  ;;  %v9662_v12 = vpop.f32.mrb[24].mxu0  ;;  %v12019_v8 = vpack.i.bf16 %v12010_v3, %v12013_v59 }
 0x19e   : > { %v12022_v43 = vadd.f32 %v9662_v12, %v11873_v19  ;;  %v1049_v50 = vpop.f32.mrb[25].mxu0 }
 0x19f   : > { %v12025_v35 = vadd.f32 %v11873_v19, %v1049_v50  ;;  %10784 = vrot.lane.b32.xlu1 %v12019_v8, %s11570_s30 }
 0x1a0   : > { %15874 = vst [vmem:[#allocation48_spill] sm:$0xff] %v12022_v43 }
 0x1a1   : > { %15875 = vst [vmem:[#allocation49_spill] sm:$0xff] %v12025_v35  ;;  %v9665_v52 = vpop.f32.mrb[26].mxu0  ;;  %v12031_v24 = vpack.i.bf16 %v12022_v43, %v12025_v35 }
 0x1a2   : > { %v12034_v41 = vadd.f32 %v9665_v52, %v11873_v19  ;;  %v1059_v29 = vpop.f32.mrb[27].mxu0 }
 0x1a3   : > { %v12037_v34 = vadd.f32 %v11873_v19, %v1059_v29  ;;  %10789 = vrot.lane.b32.xlu0 %v12031_v24, %s11570_s30 }
 0x1a4   : > { %15876 = vst [vmem:[#allocation50_spill] sm:$0xff] %v12034_v41 }
 0x1a5   : > { %15877 = vst [vmem:[#allocation51_spill] sm:$0xff] %v12037_v34  ;;  %v9668_v50 = vpop.f32.mrb[28].mxu0  ;;  %v12043_v12 = vpack.i.bf16 %v12034_v41, %v12037_v34 }
 0x1a6   : > { %v12046_v23 = vadd.f32 %v9668_v50, %v11873_v19  ;;  %v1069_v28 = vpop.f32.mrb[29].mxu0 }
 0x1a7   : > { %15878 = vst [vmem:[#allocation52_spill] sm:$0xff] %v12043_v12  ;;  %v12049_v17 = vadd.f32 %v11873_v19, %v1069_v28  ;;  %10794 = vrot.lane.b32.xlu1 %v12043_v12, %s11570_s30 }
 0x1a8   : > { %15879 = vst [vmem:[#allocation53_spill] sm:$0xff] %v12046_v23 }
 0x1a9   : > { %15880 = vst [vmem:[#allocation54_spill] sm:$0xff] %v12049_v17  ;;  %v9671_v29 = vpop.f32.mrb[30].mxu0  ;;  %v12055_v52 = vpack.i.bf16 %v12046_v23, %v12049_v17 }
 0x1aa   : > { %v12058_v22 = vadd.f32 %v9671_v29, %v11873_v19  ;;  %v1079_v11 = vpop.f32.mrb[31].mxu0 }
 0x1ab   : > { %15881 = vst [vmem:[#allocation55_spill] sm:$0xff] %v12055_v52  ;;  %v12061_v16 = vadd.f32 %v11873_v19, %v1079_v11  ;;  %10799 = vrot.lane.b32.xlu0 %v12055_v52, %s11570_s30 }
 0x1ac   : > { %15882 = vst [vmem:[#allocation56_spill] sm:$0xff] %v12058_v22 }
 0x1ad   : > { %15883 = vst [vmem:[#allocation57_spill] sm:$0xff] %v12061_v16  ;;  %v12067_v28 = vpack.i.bf16 %v12058_v22, %v12061_v16 }
 0x1af   : > { %15884 = vst [vmem:[#allocation58_spill] sm:$0xff] %v12067_v28  ;;  %10804 = vrot.lane.b32.xlu1 %v12067_v28, %s11570_s30  ;;  %10814 = vrot.lane.b32.xlu0 %v11897_v36, %s11571_s15 }
 0x1b3   : > { %10809 = vrot.lane.b32.xlu1 %v11885_v27, %s11571_s15  ;;  %10824 = vrot.lane.b32.xlu0 %v11933_v2, %s11571_s15 }
 0x1b7   : > { %10819 = vrot.lane.b32.xlu1 %v11909_v45, %s11571_s15  ;;  %10834 = vrot.lane.b32.xlu0 %v11945_v15, %s11571_s15 }
 0x1bb   : > { %10829 = vrot.lane.b32.xlu1 %v11921_v55, %s11571_s15  ;;  %10844 = vrot.lane.b32.xlu0 %v11983_v31, %s11571_s15 }
 0x1bf   : > { %10839 = vrot.lane.b32.xlu1 %v11957_v33, %s11571_s15  ;;  %10854 = vrot.lane.b32.xlu0 %v11995_v18, %s11571_s15 }
 0x1c3   : > { %10849 = vrot.lane.b32.xlu1 %v11969_v61, %s11571_s15  ;;  %10864 = vrot.lane.b32.xlu0 %v12031_v24, %s11571_s15 }
 0x1c7   : > { %10859 = vrot.lane.b32.xlu1 %v12007_v54, %s11571_s15  ;;  %10879 = vrot.lane.b32.xlu0 %v12055_v52, %s11571_s15 }
 0x1cb   : > { %10869 = vrot.lane.b32.xlu1 %v12019_v8, %s11571_s15  ;;  %10884 = vrot.lane.b32.xlu0 %v11885_v27, %s11572_s17 }
 0x1cf   : > { %10874 = vrot.lane.b32.xlu1 %v12043_v12, %s11571_s15  ;;  %10894 = vrot.lane.b32.xlu0 %v11909_v45, %s11572_s17 }
 0x1d3   : > { %10889 = vrot.lane.b32.xlu1 %v11897_v36, %s11572_s17  ;;  %10904 = vrot.lane.b32.xlu0 %v11933_v2, %s11572_s17 }
 0x1d7   : > { %10899 = vrot.lane.b32.xlu1 %v11921_v55, %s11572_s17  ;;  %3254 = vrot.lane.b32.xlu0 %v11876_v21, %s11573_s18 }
 0x1db   : > { %3252 = vrot.lane.b32.xlu1 %v11879_v25, %s11573_s18  ;;  %3258 = vrot.lane.b32.xlu0 %v11888_v30, %s11573_s18  ;;  %v15885_v25 = vmov 0 }
 0x1dc   : > { %v15886_v25 = vsel %vm12131_vm2, 4294967295, %v15885_v25 }
 0x1dd   : > { %15887 = vst [vmem:[#allocation59_spill] sm:$0xff] %v15886_v25 }
 0x1df   : > { %3256 = vrot.lane.b32.xlu1 %v11891_v32, %s11573_s18  ;;  %10914 = vrot.lane.b32.xlu0 %v11957_v33, %s11572_s17 }
 0x1e3   : > { %10909 = vrot.lane.b32.xlu1 %v11945_v15, %s11572_s17  ;;  %3371 = vrot.lane.b32.xlu0 %v11900_v37, %s11573_s18 }
 0x1e5   : > { %v10730_v11 = vpop.permute.xlu0 %10729 }
 0x1e6   : > { %v10732_v19 = vunpack.i.h.bf16 %v10730_v11  ;;  %v10731_v50 = vunpack.i.l.bf16 %v10730_v11 }
 0x1e7   : > { %3369 = vrot.lane.b32.xlu1 %v11903_v39, %s11573_s18  ;;  %3375 = vrot.lane.b32.xlu0 %v11912_v47, %s11573_s18 }
 0x1e8   : > { %v10340_v29 = vpack.c.bf16 %v10732_v19, %v10731_v50 }
 0x1e9   : > { %v10735_v5 = vpop.permute.xlu1 %10734 }
 0x1ea   : > { %v10737_v10 = vunpack.i.h.bf16 %v10735_v5  ;;  %v10736_v63 = vunpack.i.l.bf16 %v10735_v5  ;;  %10342 = vmatprep.subr.msk.bf16.mxu1 %vm12131_vm2, %v10340_v29 }
 0x1eb   : > { %3373 = vrot.lane.b32.xlu1 %v11915_v53, %s11573_s18  ;;  %10924 = vrot.lane.b32.xlu0 %v11983_v31, %s11572_s17 }
 0x1ec   : > { %v10346_v11 = vpack.c.bf16 %v10737_v10, %v10736_v63  ;;  %10345 = vmatpush3.bf16.xpose.msk.msra.mxu1 %vm12131_vm2, %v10340_v29 }
 0x1ed   : > { %v10740_v4 = vpop.permute.xlu0 %10739 }
 0x1ee   : > { %10348 = vmatprep.subr.msk.bf16.mxu1 %vm12131_vm2, %v10346_v11  ;;  %v10742_v19 = vunpack.i.h.bf16 %v10740_v4  ;;  %v10741_v50 = vunpack.i.l.bf16 %v10740_v4 }
 0x1ef   : > { %10919 = vrot.lane.b32.xlu1 %v11969_v61, %s11572_s17 }
 0x1f0   : > { %v10352_v5 = vpack.c.bf16 %v10742_v19, %v10741_v50 }
 0x1f1   : > { %v10745_v57 = vpop.permute.xlu1 %10744 }
 0x1f2   : > { %v10747_v63 = vunpack.i.h.bf16 %v10745_v57  ;;  %v10746_v10 = vunpack.i.l.bf16 %v10745_v57 }
 0x1f3   : > { %3486 = vrot.lane.b32.xlu1 %v11927_v0, %s11573_s18 }
 0x1f4   : > { %10351 = vmatpush3.bf16.xpose.msk.msra.mxu1 %vm12131_vm2, %v10346_v11  ;;  %v10358_v4 = vpack.c.bf16 %v10747_v63, %v10746_v10 }
 0x1f5   : > { %10354 = vmatprep.subr.msk.bf16.mxu1 %vm12131_vm2, %v10352_v5  ;;  %v10750_v29 = vpop.permute.xlu0 %10749 }
 0x1f6   : > { %v10752_v11 = vunpack.i.h.bf16 %v10750_v29  ;;  %v10751_v19 = vunpack.i.l.bf16 %v10750_v29 }
 0x1f7   : > { %10929 = vrot.lane.b32.xlu1 %v12067_v28, %s11571_s15 }
 0x1f8   : > { %v10364_v50 = vpack.c.bf16 %v10752_v11, %v10751_v19 }
 0x1f9   : > { %v10755_v57 = vpop.permute.xlu1 %10754 }
 0x1fa   : > { %v10757_v29 = vunpack.i.h.bf16 %v10755_v57  ;;  %v10756_v62 = vunpack.i.l.bf16 %v10755_v57 }
 0x1fb   : > { %9681 = vmatmul.mubr.msk.f32.vlgmr.msra.gmra.mrb[0].mxu1 %vm1102_vm1, %v11876_v21 }
 0x1fc   : > { %9683 = vmatprep.mubr.msk.f32.mxu1 %vm1102_vm1, %v11891_v32  ;;  %10357 = vmatpush3.bf16.xpose.msk.msra.mxu1 %vm12131_vm2, %v10352_v5 }
 0x1fd   : > { %10360 = vmatprep.subr.msk.bf16.mxu1 %vm12131_vm2, %v10358_v4  ;;  %v10760_v21 = vpop.permute.xlu0 %10759 }
 0x1fe   : > { %v10761_v11 = vunpack.i.l.bf16 %v10760_v21 }
 0x1ff   : > { %9684 = vmatmul.mubr.msk.f32.gmra.mrb[2].mxu1 %vm1102_vm1, %v11888_v30 }
 0x200   : > { %9694 = vmatprep.mubr.msk.f32.mxu1 %vm1102_vm1, %v11903_v39  ;;  %v10370_v39 = vpack.c.bf16 %v10757_v29, %v10756_v62  ;;  %v10762_v62 = vunpack.i.h.bf16 %v10760_v21 }
 0x201   : > { %v10765_v32 = vpop.permute.xlu1 %10764 }
 0x202   : > { %v10767_v57 = vunpack.i.h.bf16 %v10765_v32 }
 0x204   : > { %10363 = vmatpush3.bf16.xpose.msk.msra.mxu1 %vm12131_vm2, %v10358_v4 }
 0x205   : > { %10366 = vmatprep.subr.msk.bf16.mxu1 %vm12131_vm2, %v10364_v50  ;;  %v10770_v5 = vpop.permute.xlu0 %10769 }
 0x206   : > { %v10772_v63 = vunpack.i.h.bf16 %v10770_v5  ;;  %v10771_v10 = vunpack.i.l.bf16 %v10770_v5 }
 0x208   : > { %v10388_v51 = vpack.c.bf16 %v10772_v63, %v10771_v10 }
 0x209   : > { %v10775_v30 = vpop.permute.xlu1 %10774 }
 0x20a   : > { %v10777_v56 = vunpack.i.h.bf16 %v10775_v30  ;;  %v10776_v42 = vunpack.i.l.bf16 %v10775_v30  ;;  %10390 = vmatprep.subr.msk.bf16.mxu0 %vm12131_vm2, %v10388_v51 }
 0x20b   : > { %9695 = vmatmul.mubr.msk.f32.vlgmr.msra.gmra.mrb[4].mxu1 %vm1102_vm1, %v11900_v37  ;;  %10393 = vmatpush3.bf16.xpose.msk.msra.mxu0 %vm12131_vm2, %v10388_v51  ;;  %v10376_v51 = vpack.c.bf16 %v10762_v62, %v10761_v11 }
 0x20c   : > { %v10394_v4 = vpack.c.bf16 %v10777_v56, %v10776_v42  ;;  %9697 = vmatprep.mubr.msk.f32.mxu1 %vm1102_vm1, %v11915_v53  ;;  %10369 = vmatpush3.bf16.xpose.msk.msra.mxu1 %vm12131_vm2, %v10364_v50 }
 0x20d   : > { %10372 = vmatprep.subr.msk.bf16.mxu1 %vm12131_vm2, %v10370_v39  ;;  %v10780_v42 = vpop.permute.xlu0 %10779 }
 0x20e   : > { %10396 = vmatprep.subr.msk.bf16.mxu0 %vm12131_vm2, %v10394_v4  ;;  %v10781_v29 = vunpack.i.l.bf16 %v10780_v42 }
 0x20f   : > { %9698 = vmatmul.mubr.msk.f32.gmra.mrb[6].mxu1 %vm1102_vm1, %v11912_v47  ;;  %v10766_v47 = vunpack.i.l.bf16 %v10765_v32  ;;  %v10782_v32 = vunpack.i.h.bf16 %v10780_v42 }
 0x210   : > { %9708 = vmatprep.mubr.msk.f32.mxu1 %vm1102_vm1, %v11927_v0 }
 0x211   : > { %v10785_v56 = vpop.permute.xlu1 %10784  ;;  %v10382_v63 = vpack.c.bf16 %v10767_v57, %v10766_v47 }
 0x213   : > { %10399 = vmatpush3.bf16.xpose.msk.msra.mxu0 %vm12131_vm2, %v10394_v4  ;;  %v10400_v4 = vpack.c.bf16 %v10782_v32, %v10781_v29 }
 0x214   : > { %10375 = vmatpush3.bf16.xpose.msk.msra.mxu1 %vm12131_vm2, %v10370_v39 }
 0x215   : > { %10378 = vmatprep.subr.msk.bf16.mxu1 %vm12131_vm2, %v10376_v51  ;;  %v10790_v37 = vpop.permute.xlu0 %10789 }
 0x216   : > { %v10792_v53 = vunpack.i.h.bf16 %v10790_v37  ;;  %v10791_v19 = vunpack.i.l.bf16 %v10790_v37  ;;  %v10787_v37 = vunpack.i.h.bf16 %v10785_v56 }
 0x218   : > { %v10412_v21 = vpack.c.bf16 %v10792_v53, %v10791_v19  ;;  %v10786_v53 = vunpack.i.l.bf16 %v10785_v56 }
 0x219   : > { %v10795_v50 = vpop.permute.xlu1 %10794 }
 0x21a   : > { %v10797_v0 = vunpack.i.h.bf16 %v10795_v50  ;;  %v10796_v5 = vunpack.i.l.bf16 %v10795_v50  ;;  %9737 = vmatmul.mubr.msk.f32.vlgmr.msra.gmra.mrb[32].mxu0 %vm1102_vm1, %v11972_v1  ;;  %10414 = vmatprep.subr.msk.bf16.mxu0 %vm12131_vm2, %v10412_v21  ;;  %v10406_v50 = vpack.c.bf16 %v10787_v37, %v10786_v53 }
 0x21b   : > { %9709 = vmatmul.mubr.msk.f32.vlgmr.msra.gmra.mrb[8].mxu1 %vm1102_vm1, %v11924_v58  ;;  %9739 = vmatprep.mubr.msk.f32.mxu0 %vm1102_vm1, %v11989_v13 }
 0x21c   : > { %v10418_v10 = vpack.c.bf16 %v10797_v0, %v10796_v5  ;;  %9711 = vmatprep.mubr.msk.f32.mxu1 %vm1102_vm1, %v11939_v9  ;;  %10381 = vmatpush3.bf16.xpose.msk.msra.mxu1 %vm12131_vm2, %v10376_v51 }
 0x21d   : > { %10417 = vmatpush3.bf16.xpose.msk.msra.mxu0 %vm12131_vm2, %v10412_v21  ;;  %10384 = vmatprep.subr.msk.bf16.mxu1 %vm12131_vm2, %v10382_v63  ;;  %v10800_v30 = vpop.permute.xlu0 %10799 }
 0x21e   : > { %9740 = vmatmul.mubr.msk.f32.gmra.mrb[34].mxu0 %vm1102_vm1, %v11986_v44  ;;  %10420 = vmatprep.subr.msk.bf16.mxu0 %vm12131_vm2, %v10418_v10 }
 0x21f   : > { %9712 = vmatmul.mubr.msk.f32.gmra.mrb[10].mxu1 %vm1102_vm1, %v11936_v7  ;;  %9764 = vmatprep.mubr.msk.f32.mxu0 %vm1102_vm1, %v12025_v35 }
 0x220   : > { %9722 = vmatprep.mubr.msk.f32.mxu1 %vm1102_vm1, %v11951_v26 }
 0x221   : > { %v10805_v39 = vpop.permute.xlu1 %10804  ;;  %v10815_v11 = vpop.permute.xlu0 %10814 }
 0x222   : > { %v10817_v57 = vunpack.i.h.bf16 %v10815_v11  ;;  %v10816_v47 = vunpack.i.l.bf16 %v10815_v11 }
 0x224   : > { %10387 = vmatpush3.bf16.xpose.msk.msra.mxu1 %vm12131_vm2, %v10382_v63  ;;  %v10440_v56 = vpack.c.bf16 %v10817_v57, %v10816_v47  ;;  %v10802_v63 = vunpack.i.h.bf16 %v10800_v30 }
 0x225   : > { %10423 = vmatpush3.bf16.xpose.msk.msra.mxu0 %vm12131_vm2, %v10418_v10  ;;  %10402 = vmatprep.subr.msk.bf16.mxu1 %vm12131_vm2, %v10400_v4  ;;  %v10810_v62 = vpop.permute.xlu1 %10809  ;;  %v10801_v10 = vunpack.i.l.bf16 %v10800_v30  ;;  %v10806_v30 = vunpack.i.l.bf16 %v10805_v39  ;;  %v10825_v11 = vpop.permute.xlu0 %10824 }
 0x226   : > { %v10812_v42 = vunpack.i.h.bf16 %v10810_v62  ;;  %v10811_v51 = vunpack.i.l.bf16 %v10810_v62 }
 0x227   : > { %v10424_v29 = vpack.c.bf16 %v10802_v63, %v10801_v10 }
 0x228   : > { %v10436_v19 = vpack.c.bf16 %v10812_v42, %v10811_v51  ;;  %v10827_v42 = vunpack.i.h.bf16 %v10825_v11  ;;  %v10826_v51 = vunpack.i.l.bf16 %v10825_v11 }
 0x229   : > { %v10820_v21 = vpop.permute.xlu1 %10819 }
 0x22a   : > { %10437 = vmatprep.subr.bf16.mxu0 %v10436_v19  ;;  %v10822_v0 = vunpack.i.h.bf16 %v10820_v21  ;;  %v10821_v5 = vunpack.i.l.bf16 %v10820_v21  ;;  %v10452_v37 = vpack.c.bf16 %v10827_v42, %v10826_v51 }
 0x22b   : > { %9723 = vmatmul.mubr.msk.f32.vlgmr.msra.gmra.mrb[12].mxu1 %vm1102_vm1, %v11948_v20 }
 0x22c   : > { %9765 = vmatmul.mubr.msk.f32.vlgmr.msra.gmra.mrb[36].mxu0 %vm1102_vm1, %v12022_v43  ;;  %9725 = vmatprep.mubr.msk.f32.mxu1 %vm1102_vm1, %v11963_v49  ;;  %v12245_v32 = vpack.c.bf16 %v10822_v0, %v10821_v5 }
 0x22d   : > { %10405 = vmatpush3.bf16.xpose.msk.msra.mxu1 %vm12131_vm2, %v10400_v4  ;;  %9767 = vmatprep.mubr.msk.f32.mxu0 %vm1102_vm1, %v12037_v34  ;;  %v10807_v4 = vunpack.i.h.bf16 %v10805_v39  ;;  %v10835_v39 = vpop.permute.xlu0 %10834  ;;  %v12327_v55 = vpop.permute.xlu1 %10829 }
 0x22e   : > { %10439 = vmatpush3.bf16.msra.mxu0 %v10436_v19  ;;  %10408 = vmatprep.subr.msk.bf16.mxu1 %vm12131_vm2, %v10406_v50  ;;  %v10837_v53 = vunpack.i.h.bf16 %v10835_v39  ;;  %v10836_v19 = vunpack.i.l.bf16 %v10835_v39 }
 0x22f   : > { %10441 = vmatprep.subr.bf16.mxu0 %v10440_v56  ;;  %9726 = vmatmul.mubr.msk.f32.gmra.mrb[14].mxu1 %vm1102_vm1, %v11960_v38  ;;  %v10430_v62 = vpack.c.bf16 %v10807_v4, %v10806_v30 }
 0x230   : > { %9768 = vmatmul.mubr.msk.f32.gmra.mrb[38].mxu0 %vm1102_vm1, %v12034_v41  ;;  %9750 = vmatprep.mubr.msk.f32.mxu1 %vm1102_vm1, %v12001_v60 }
 0x231   : > { %v10845_v57 = vpop.permute.xlu0 %10844  ;;  %v12345_v27 = vpop.permute.xlu1 %10839 }
 0x232   : > { %10443 = vmatpush3.bf16.msra.mxu0 %v10440_v56  ;;  %v10847_v47 = vunpack.i.h.bf16 %v10845_v57  ;;  %v10846_v21 = vunpack.i.l.bf16 %v10845_v57 }
 0x233   : > { %10445 = vmatprep.subr.bf16.mxu0 %v12245_v32 }
 0x234   : > { %v12272_v0 = vpack.c.bf16 %v10847_v47, %v10846_v21 }
 0x235   : > { %10411 = vmatpush3.bf16.xpose.msk.msra.mxu1 %vm12131_vm2, %v10406_v50  ;;  %v10456_v50 = vpack.c.bf16 %v10837_v53, %v10836_v19  ;;  %v12393_v43 = vpop.permute.xlu0 %10854 }
 0x236   : > { %10426 = vmatprep.subr.msk.bf16.mxu1 %vm12131_vm2, %v10424_v29  ;;  %15888 = vst [vmem:[#allocation60_spill] sm:$0xff] %v12272_v0  ;;  %15890 = vst [vmem:[#allocation62_spill] sm:$0xff] %v12393_v43 }
 0x23c   : > { %9751 = vmatmul.mubr.msk.f32.vlgmr.msra.gmra.mrb[16].mxu1 %vm1102_vm1, %v11998_v6 }
 0x23d   : > { %9753 = vmatprep.mubr.msk.f32.mxu1 %vm1102_vm1, %v12013_v59  ;;  %10429 = vmatpush3.bf16.xpose.msk.msra.mxu1 %vm12131_vm2, %v10424_v29 }
 0x23e   : > { %10432 = vmatprep.subr.msk.bf16.mxu1 %vm12131_vm2, %v10430_v62 }
 0x240   : > { %9754 = vmatmul.mubr.msk.f32.gmra.mrb[18].mxu1 %vm1102_vm1, %v12010_v3 }
 0x241   : > { %9778 = vmatprep.mubr.msk.f32.mxu1 %vm1102_vm1, %v12049_v17 }
 0x245   : > { %10435 = vmatpush3.bf16.xpose.msk.msra.mxu1 %vm12131_vm2, %v10430_v62 }
 0x246   : > { %10453 = vmatprep.subr.bf16.mxu1 %v10452_v37 }
 0x24c   : > { %9779 = vmatmul.mubr.msk.f32.vlgmr.msra.gmra.mrb[20].mxu1 %vm1102_vm1, %v12046_v23 }
 0x24d   : > { %9781 = vmatprep.mubr.msk.f32.mxu1 %vm1102_vm1, %v12061_v16  ;;  %10455 = vmatpush3.bf16.msra.mxu1 %v10452_v37  ;;  %v12355_v16 = vpop.permute.xlu1 %10849 }
 0x24e   : > { %10457 = vmatprep.subr.bf16.mxu1 %v10456_v50 }
 0x250   : > { %9782 = vmatmul.mubr.msk.f32.gmra.mrb[22].mxu1 %vm1102_vm1, %v12058_v22 }
 0x251   : > { %10459 = vmatpush3.bf16.msra.mxu1 %v10456_v50 }
 0x252   : > { %10469 = vmatprep.subr.bf16.mxu1 %v12272_v0 }
 0x2ce   : > { %v9682_v5 = vpop.f32.mrb[0].mxu1 }
 0x2cf   : > { %v12275_v56 = vmul.f32 0.35355338, %v9682_v5  ;;  %v1185_v63 = vpop.f32.mrb[1].mxu1 }
 0x2d0   : > { %v12277_v10 = vmul.f32 0.35355338, %v1185_v63 }
 0x2d1   : > { %v2031_v29 = vsel %vm2027_vm3, %v12275_v56, -inf }
 0x2d2   : > { %2032 = vmax.xlane.f32.xlu1 %v2031_v29  ;;  %v9685_v4 = vpop.f32.mrb[2].mxu1  ;;  %v2028_v30 = vsel %vm2027_vm3, %v12277_v10, -inf }
 0x2d3   : > { %v12283_v62 = vmul.f32 0.35355338, %v9685_v4  ;;  %2029 = vmax.xlane.f32.xlu0 %v2028_v30  ;;  %v1195_v11 = vpop.f32.mrb[3].mxu1 }
 0x2d4   : > { %v12287_v51 = vmul.f32 0.35355338, %v1195_v11 }
 0x2d5   : > { %v2037_v42 = vsel %vm2027_vm3, %v12283_v62, -inf }
 0x2d6   : > { %v2034_v39 = vsel %vm2027_vm3, %v12287_v51, -inf }
 0x2d7   : > { %2038 = vmax.xlane.f32.xlu0 %v2037_v42 }
 0x2db   : > { %2035 = vmax.xlane.f32.xlu0 %v2034_v39 }
 0x2de   : > { %v9696_v37 = vpop.f32.mrb[4].mxu1 }
 0x2df   : > { %v12291_v53 = vmul.f32 0.35355338, %v9696_v37  ;;  %v1298_v19 = vpop.f32.mrb[5].mxu1 }
 0x2e0   : > { %v12293_v57 = vmul.f32 0.35355338, %v1298_v19 }
 0x2e1   : > { %v2043_v47 = vsel %vm2027_vm3, %v12291_v53, -inf }
 0x2e2   : > { %2044 = vmax.xlane.f32.xlu1 %v2043_v47  ;;  %v9699_v21 = vpop.f32.mrb[6].mxu1  ;;  %v2040_v63 = vsel %vm2027_vm3, %v12293_v57, -inf }
 0x2e3   : > { %v1308_v50 = vpop.f32.mrb[7].mxu1  ;;  %v12297_v5 = vmul.f32 0.35355338, %v9699_v21 }
 0x2e4   : > { %v12301_v29 = vmul.f32 0.35355338, %v1308_v50 }
 0x2e5   : > { %v2049_v4 = vsel %vm2027_vm3, %v12297_v5, -inf }
 0x2e6   : > { %2041 = vmax.xlane.f32.xlu1 %v2040_v63  ;;  %v2046_v11 = vsel %vm2027_vm3, %v12301_v29, -inf }
 0x2ea   : > { %2050 = vmax.xlane.f32.xlu1 %v2049_v4 }
 0x2ed   : > { %v9738_v30 = vpop.f32.mrb[32].mxu0 }
 0x2ee   : > { %2047 = vmax.xlane.f32.xlu1 %v2046_v11  ;;  %v9710_v42 = vpop.f32.mrb[8].mxu1  ;;  %v1637_v39 = vpop.f32.mrb[33].mxu0  ;;  %v12309_v47 = vmul.f32 0.35355338, %v9738_v30 }
 0x2ef   : > { %v12307_v37 = vmul.f32 0.35355338, %v9710_v42  ;;  %v1411_v19 = vpop.f32.mrb[9].mxu1  ;;  %v12317_v46 = vmul.f32 0.35355338, %v1637_v39 }
 0x2f0   : > { %v12313_v40 = vmul.f32 0.35355338, %v1411_v19  ;;  %v2079_v11 = vsel %vm2027_vm3, %v12309_v47, -inf }
 0x2f1   : > { %v9741_v21 = vpop.f32.mrb[34].mxu0  ;;  %v2055_v50 = vsel %vm2027_vm3, %v12307_v37, -inf }
 0x2f2   : > { %2056 = vmax.xlane.f32.xlu0 %v2055_v50  ;;  %v9713_v63 = vpop.f32.mrb[10].mxu1  ;;  %v1647_v48 = vpop.f32.mrb[35].mxu0  ;;  %v2052_v30 = vsel %vm2027_vm3, %v12313_v40, -inf  ;;  %v2076_v50 = vsel %vm2027_vm3, %v12317_v46, -inf  ;;  %v12329_v39 = vmul.f32 0.35355338, %v9741_v21 }
 0x2f3   : > { %v1421_v4 = vpop.f32.mrb[11].mxu1  ;;  %v12321_v42 = vmul.f32 0.35355338, %v9713_v63 }
 0x2f4   : > { %v12337_v45 = vmul.f32 0.35355338, %v1421_v4 }
 0x2f5   : > { %v2061_v63 = vsel %vm2027_vm3, %v12321_v42, -inf }
 0x2f6   : > { %2080 = vmax.xlane.f32.xlu0 %v2079_v11  ;;  %v2058_v4 = vsel %vm2027_vm3, %v12337_v45, -inf }
 0x2fa   : > { %2053 = vmax.xlane.f32.xlu0 %v2052_v30 }
 0x2fe   : > { %2077 = vmax.xlane.f32.xlu0 %v2076_v50  ;;  %v9724_v61 = vpop.f32.mrb[12].mxu1 }
 0x2ff   : > { %v9766_v31 = vpop.f32.mrb[36].mxu0  ;;  %v12325_v19 = vmul.f32 0.35355338, %v9724_v61  ;;  %v1524_v15 = vpop.f32.mrb[13].mxu1 }
 0x300   : > { %v1863_v33 = vpop.f32.mrb[37].mxu0  ;;  %v12331_v11 = vmul.f32 0.35355338, %v1524_v15  ;;  %v2085_v15 = vsel %vm2027_vm3, %v12329_v39, -inf  ;;  %v12357_v22 = vmul.f32 0.35355338, %v9766_v31 }
 0x301   : > { %v2067_v30 = vsel %vm2027_vm3, %v12325_v19, -inf  ;;  %v12339_v36 = vmul.f32 0.35355338, %v1863_v33 }
 0x302   : > { %2062 = vmax.xlane.f32.xlu0 %v2061_v63  ;;  %2068 = vmax.xlane.f32.xlu1 %v2067_v30  ;;  %v9727_v50 = vpop.f32.mrb[14].mxu1  ;;  %v2064_v21 = vsel %vm2027_vm3, %v12331_v11, -inf  ;;  %v12347_v63 = vmul.f32 0.35355338, %v1647_v48  ;;  %v2103_v31 = vsel %vm2027_vm3, %v12357_v22, -inf }
 0x303   : > { %v9769_v25 = vpop.f32.mrb[38].mxu0  ;;  %v1534_v61 = vpop.f32.mrb[15].mxu1  ;;  %v2100_v33 = vsel %vm2027_vm3, %v12339_v36, -inf  ;;  %v12365_v23 = vmul.f32 0.35355338, %v9727_v50 }
 0x304   : > { %v1873_v2 = vpop.f32.mrb[39].mxu0  ;;  %v12349_v30 = vmul.f32 0.35355338, %v1534_v61  ;;  %v2082_v48 = vsel %vm2027_vm3, %v12347_v63, -inf }
 0x305   : > { %v2073_v50 = vsel %vm2027_vm3, %v12365_v23, -inf }
 0x306   : > { %2086 = vmax.xlane.f32.xlu0 %v2085_v15  ;;  %2065 = vmax.xlane.f32.xlu1 %v2064_v21  ;;  %v12359_v15 = vmul.f32 0.35355338, %v1873_v2  ;;  %v2070_v61 = vsel %vm2027_vm3, %v12349_v30, -inf }
 0x308   : > { %v2106_v2 = vsel %vm2027_vm3, %v12359_v15, -inf }
 0x30a   : > { %2059 = vmax.xlane.f32.xlu0 %v2058_v4  ;;  %2101 = vmax.xlane.f32.xlu1 %v2100_v33  ;;  %v12373_v33 = vpop.permute.xlu1 %10859 }
 0x30e   : > { %2083 = vmax.xlane.f32.xlu0 %v2082_v48  ;;  %2071 = vmax.xlane.f32.xlu1 %v2070_v61  ;;  %v12375_v48 = vmul.f32 0.35355338, %v9769_v25  ;;  %v12383_v35 = vpop.permute.xlu1 %10869 }
 0x30f   : > { %v9752_v21 = vpop.f32.mrb[16].mxu1  ;;  %15889 = vst [vmem:[#allocation61_spill] sm:$0xff] %v12383_v35  ;;  %v12401_v35 = vpop.permute.xlu0 %10864 }
 0x310   : > { %v1750_v17 = vpop.f32.mrb[17].mxu1  ;;  %v12367_v4 = vmul.f32 0.35355338, %v9752_v21  ;;  %v2109_v25 = vsel %vm2027_vm3, %v12375_v48, -inf  ;;  %15892 = vst [vmem:[#allocation64_spill] sm:$0xff] %v12401_v35 }
 0x311   : > { %v12377_v61 = vmul.f32 0.35355338, %v1750_v17 }
 0x312   : > { %2104 = vmax.xlane.f32.xlu0 %v2103_v31  ;;  %2107 = vmax.xlane.f32.xlu1 %v2106_v2  ;;  %v2091_v21 = vsel %vm2027_vm3, %v12367_v4, -inf }
 0x313   : > { %v9755_v34 = vpop.f32.mrb[18].mxu1  ;;  %v2088_v17 = vsel %vm2027_vm3, %v12377_v61, -inf }
 0x314   : > { %v1760_v41 = vpop.f32.mrb[19].mxu1  ;;  %v12385_v31 = vmul.f32 0.35355338, %v9755_v34  ;;  %v12399_v34 = vpop.permute.xlu1 %10874 }
 0x315   : > { %v12387_v2 = vmul.f32 0.35355338, %v1760_v41  ;;  %15891 = vst [vmem:[#allocation63_spill] sm:$0xff] %v12399_v34 }
 0x316   : > { %2074 = vmax.xlane.f32.xlu0 %v2073_v50  ;;  %2092 = vmax.xlane.f32.xlu1 %v2091_v21  ;;  %v2097_v50 = vsel %vm2027_vm3, %v12385_v31, -inf }
 0x317   : > { %v2094_v21 = vsel %vm2027_vm3, %v12387_v2, -inf }
 0x318   : > { %v12413_v34 = vpop.permute.xlu1 %10889 }
 0x319   : > { %15893 = vst [vmem:[#allocation65_spill] sm:$0xff] %v12413_v34 }
 0x31a   : > { %2110 = vmax.xlane.f32.xlu0 %v2109_v25  ;;  %2089 = vmax.xlane.f32.xlu1 %v2088_v17 }
 0x31c   : > { %v12423_v6 = vpop.permute.xlu1 %10899 }
 0x31d   : > { %15895 = vst [vmem:[#allocation67_spill] sm:$0xff] %v12423_v6 }
 0x31e   : > { %2098 = vmax.xlane.f32.xlu0 %v2097_v50  ;;  %2095 = vmax.xlane.f32.xlu1 %v2094_v21 }
 0x31f   : > { %v9780_v41 = vpop.f32.mrb[20].mxu1 }
 0x320   : > { %v12403_v0 = vmul.f32 0.35355338, %v9780_v41  ;;  %v1976_v3 = vpop.f32.mrb[21].mxu1  ;;  %v12417_v41 = vpop.permute.xlu0 %10879 }
 0x321   : > { %v12405_v28 = vmul.f32 0.35355338, %v1976_v3  ;;  %15894 = vst [vmem:[#allocation66_spill] sm:$0xff] %v12417_v41 }
 0x322   : > { %v2115_v25 = vsel %vm2027_vm3, %v12403_v0, -inf }
 0x323   : > { %2116 = vmax.xlane.f32.xlu0 %v2115_v25  ;;  %v9783_v17 = vpop.f32.mrb[22].mxu1  ;;  %v2112_v43 = vsel %vm2027_vm3, %v12405_v28, -inf }
 0x324   : > { %v12411_v50 = vmul.f32 0.35355338, %v9783_v17  ;;  %2113 = vmax.xlane.f32.xlu1 %v2112_v43  ;;  %v1986_v21 = vpop.f32.mrb[23].mxu1  ;;  %v12425_v17 = vpop.permute.xlu0 %10884 }
 0x325   : > { %v12415_v35 = vmul.f32 0.35355338, %v1986_v21  ;;  %15896 = vst [vmem:[#allocation68_spill] sm:$0xff] %v12425_v17  ;;  %v12427_v43 = vpop.permute.xlu1 %3252 }
 0x326   : > { %v2121_v3 = vsel %vm2027_vm3, %v12411_v50, -inf  ;;  %15897 = vst [vmem:[#allocation69_spill] sm:$0xff] %v12427_v43 }
 0x327   : > { %2122 = vmax.xlane.f32.xlu0 %v2121_v3  ;;  %v2118_v25 = vsel %vm2027_vm3, %v12415_v35, -inf }
 0x328   : > { %2119 = vmax.xlane.f32.xlu1 %v2118_v25  ;;  %v12429_v59 = vpop.permute.xlu0 %10894 }
 0x329   : > { %15898 = vst [vmem:[#allocation70_spill] sm:$0xff] %v12429_v59  ;;  %v12431_v21 = vpop.permute.xlu1 %3256 }
 0x32a   : > { %15899 = vst [vmem:[#allocation71_spill] sm:$0xff] %v12431_v21 }
 0x32c   : > { %v12433_v34 = vpop.permute.xlu0 %10904 }
 0x32d   : > { %15900 = vst [vmem:[#allocation72_spill] sm:$0xff] %v12433_v34  ;;  %v12435_v41 = vpop.permute.xlu1 %10909 }
 0x32e   : > { %15901 = vst [vmem:[#allocation73_spill] sm:$0xff] %v12435_v41 }
 0x330   : > { %v12437_v52 = vpop.permute.xlu0 %3254 }
 0x331   : > { %15902 = vst [vmem:[#allocation74_spill] sm:$0xff] %v12437_v52  ;;  %v12439_v3 = vpop.permute.xlu1 %3369 }
 0x332   : > { %15903 = vst [vmem:[#allocation75_spill] sm:$0xff] %v12439_v3 }
 0x334   : > { %v12441_v60 = vpop.permute.xlu0 %3258 }
 0x335   : > { %15904 = vst [vmem:[#allocation76_spill] sm:$0xff] %v12441_v60  ;;  %v12443_v25 = vpop.permute.xlu1 %3373 }
 0x336   : > { %15905 = vst [vmem:[#allocation77_spill] sm:$0xff] %v12443_v25 }
 0x338   : > { %v12445_v6 = vpop.permute.xlu0 %10914 }
 0x339   : > { %15906 = vst [vmem:[#allocation78_spill] sm:$0xff] %v12445_v6  ;;  %v12447_v17 = vpop.permute.xlu1 %10919 }
 0x33a   : > { %15907 = vst [vmem:[#allocation79_spill] sm:$0xff] %v12447_v17 }
 0x33c   : > { %v12449_v43 = vpop.permute.xlu0 %3371 }
 0x33d   : > { %15908 = vst [vmem:[#allocation80_spill] sm:$0xff] %v12449_v43  ;;  %v12451_v59 = vpop.permute.xlu1 %3486 }
 0x33e   : > { %15909 = vst [vmem:[#allocation81_spill] sm:$0xff] %v12451_v59 }
 0x340   : > { %v12453_v21 = vpop.permute.xlu0 %3375 }
 0x341   : > { %15910 = vst [vmem:[#allocation82_spill] sm:$0xff] %v12453_v21  ;;  %v12455_v34 = vpop.permute.xlu1 %10929 }
 0x342   : > { %15911 = vst [vmem:[#allocation83_spill] sm:$0xff] %v12455_v34 }
 0x344   : > { %v12457_v41 = vpop.permute.xlu0 %10924 }
 0x345   : > { %15912 = vst [vmem:[#allocation84_spill] sm:$0xff] %v12457_v41 }
 0x35f   : > { %v2033_v52 = vpop.xlane.xlu1 %2032 }
 0x360   : > { %v2125_v3 = vsub.f32 %v12275_v56, %v2033_v52  ;;  %v2030_v60 = vpop.xlane.xlu0 %2029 }
 0x361   : > { %v2124_v25 = vsub.f32 %v12277_v10, %v2030_v60 }
 0x362   : > { %v2158_v44 = vmul.f32 1.442695, %v2125_v3 }
 0x363   : > { %v2156_v6 = vmul.f32 1.442695, %v2124_v25 }
 0x364   : > { %11048 = vpow2.f32 %v2158_v44  ;;  %v2039_v17 = vpop.xlane.xlu0 %2038 }
 0x365   : > { %11050 = vpow2.f32 %v2156_v6  ;;  %v2127_v43 = vsub.f32 %v12283_v62, %v2039_v17 }
 0x367   : > { %v2162_v59 = vmul.f32 1.442695, %v2127_v43 }
 0x368   : > { %v2036_v12 = vpop.xlane.xlu0 %2035 }
 0x369   : > { %11052 = vpow2.f32 %v2162_v59  ;;  %v2126_v21 = vsub.f32 %v12287_v51, %v2036_v12 }
 0x36b   : > { %v2160_v34 = vmul.f32 1.442695, %v2126_v21 }
 0x36d   : > { %11054 = vpow2.f32 %v2160_v34 }
 0x36e   : > { %v12463_v41 = vpop.eup %11048 }
 0x36f   : > { %v12465_v52 = vpop.eup %11050  ;;  %v2045_v56 = vpop.xlane.xlu1 %2044  ;;  %v2223_v60 = vsel %vm2027_vm3, %v12463_v41, 0.0 }
 0x370   : > { %v2129_v44 = vsub.f32 %v12291_v53, %v2045_v56  ;;  %2224 = vadd.xlane.f32.xlu0 %v2223_v60  ;;  %v2220_v6 = vsel %vm2027_vm3, %v12465_v52, 0.0 }
 0x371   : > { %2221 = vadd.xlane.f32.xlu1 %v2220_v6 }
 0x372   : > { %v2166_v59 = vmul.f32 1.442695, %v2129_v44 }
 0x373   : > { %v12472_v10 = vpop.eup %11052  ;;  %v2042_v12 = vpop.xlane.xlu1 %2041 }
 0x374   : > { %11056 = vpow2.f32 %v2166_v59  ;;  %v2128_v62 = vsub.f32 %v12293_v57, %v2042_v12  ;;  %v2229_v51 = vsel %vm2027_vm3, %v12472_v10, 0.0 }
 0x375   : > { %2230 = vadd.xlane.f32.xlu0 %v2229_v51 }
 0x376   : > { %v2164_v34 = vmul.f32 1.442695, %v2128_v62 }
 0x377   : > { %v12477_v17 = vpop.eup %11054  ;;  %v2051_v53 = vpop.xlane.xlu1 %2050 }
 0x378   : > { %11058 = vpow2.f32 %v2164_v34  ;;  %v2131_v43 = vsub.f32 %v12297_v5, %v2051_v53  ;;  %v2226_v21 = vsel %vm2027_vm3, %v12477_v17, 0.0 }
 0x379   : > { %2227 = vadd.xlane.f32.xlu1 %v2226_v21 }
 0x37a   : > { %v2170_v3 = vmul.f32 1.442695, %v2131_v43 }
 0x37b   : > { %v2048_v25 = vpop.xlane.xlu1 %2047 }
 0x37c   : > { %11060 = vpow2.f32 %v2170_v3  ;;  %v2130_v57 = vsub.f32 %v12301_v29, %v2048_v25 }
 0x37e   : > { %v12483_v56 = vpop.eup %11056  ;;  %v2168_v60 = vmul.f32 1.442695, %v2130_v57 }
 0x37f   : > { %v2057_v44 = vpop.xlane.xlu0 %2056  ;;  %v2235_v6 = vsel %vm2027_vm3, %v12483_v56, 0.0 }
 0x380   : > { %11062 = vpow2.f32 %v2168_v60  ;;  %v2133_v59 = vsub.f32 %v12307_v37, %v2057_v44  ;;  %2236 = vadd.xlane.f32.xlu1 %v2235_v6 }
 0x382   : > { %v12488_v5 = vpop.eup %11058  ;;  %v2174_v12 = vmul.f32 1.442695, %v2133_v59 }
 0x383   : > { %v2081_v62 = vpop.xlane.xlu0 %2080  ;;  %v2232_v51 = vsel %vm2027_vm3, %v12488_v5, 0.0 }
 0x384   : > { %11064 = vpow2.f32 %v2174_v12  ;;  %v2141_v29 = vsub.f32 %v12309_v47, %v2081_v62  ;;  %2233 = vadd.xlane.f32.xlu1 %v2232_v51 }
 0x386   : > { %v12493_v34 = vpop.eup %11060  ;;  %v2190_v53 = vmul.f32 1.442695, %v2141_v29 }
 0x387   : > { %v2054_v43 = vpop.xlane.xlu0 %2053  ;;  %v2241_v21 = vsel %vm2027_vm3, %v12493_v34, 0.0 }
 0x388   : > { %11066 = vpow2.f32 %v2190_v53  ;;  %v2132_v37 = vsub.f32 %v12313_v40, %v2054_v43  ;;  %2242 = vadd.xlane.f32.xlu1 %v2241_v21 }
 0x38a   : > { %v12498_v3 = vpop.eup %11062  ;;  %v2172_v25 = vmul.f32 1.442695, %v2132_v37 }
 0x38b   : > { %v2078_v57 = vpop.xlane.xlu0 %2077  ;;  %v2238_v60 = vsel %vm2027_vm3, %v12498_v3, 0.0 }
 0x38c   : > { %11068 = vpow2.f32 %v2172_v25  ;;  %v2140_v47 = vsub.f32 %v12317_v46, %v2078_v57  ;;  %2239 = vadd.xlane.f32.xlu1 %v2238_v60 }
 0x38e   : > { %v12503_v44 = vpop.eup %11064  ;;  %v2188_v6 = vmul.f32 1.442695, %v2140_v47 }
 0x38f   : > { %v2063_v59 = vpop.xlane.xlu0 %2062  ;;  %v2069_v12 = vpop.xlane.xlu1 %2068  ;;  %v2247_v40 = vsel %vm2027_vm3, %v12503_v44, 0.0 }
 0x390   : > { %11070 = vpow2.f32 %v2188_v6  ;;  %v2135_v62 = vsub.f32 %v12321_v42, %v2063_v59  ;;  %2248 = vadd.xlane.f32.xlu0 %v2247_v40  ;;  %v2137_v53 = vsub.f32 %v12325_v19, %v2069_v12 }
 0x392   : > { %v12508_v51 = vpop.eup %11066  ;;  %v2178_v29 = vmul.f32 1.442695, %v2135_v62  ;;  %v2182_v57 = vmul.f32 1.442695, %v2137_v53 }
 0x393   : > { %v2087_v43 = vpop.xlane.xlu0 %2086  ;;  %v2066_v46 = vpop.xlane.xlu1 %2065  ;;  %v2271_v21 = vsel %vm2027_vm3, %v12508_v51, 0.0 }
 0x394   : > { %11072 = vpow2.f32 %v2178_v29  ;;  %v2143_v37 = vsub.f32 %v12329_v39, %v2087_v43  ;;  %2272 = vadd.xlane.f32.xlu0 %v2271_v21 }
 0x396   : > { %v12514_v25 = vpop.eup %11068  ;;  %v2194_v60 = vmul.f32 1.442695, %v2143_v37 }
 0x397   : > { %v2060_v42 = vpop.xlane.xlu0 %2059  ;;  %v2102_v47 = vpop.xlane.xlu1 %2101  ;;  %v2244_v6 = vsel %vm2027_vm3, %v12514_v25, 0.0 }
 0x398   : > { %11074 = vpow2.f32 %v2194_v60  ;;  %v2134_v19 = vsub.f32 %v12337_v45, %v2060_v42  ;;  %2245 = vadd.xlane.f32.xlu0 %v2244_v6  ;;  %v2148_v39 = vsub.f32 %v12339_v36, %v2102_v47  ;;  %v2136_v45 = vsub.f32 %v12331_v11, %v2066_v46 }
 0x399   : > { %11076 = vpow2.f32 %v2182_v57 }
 0x39a   : > { %v12519_v59 = vpop.eup %11070  ;;  %v2176_v12 = vmul.f32 1.442695, %v2134_v19  ;;  %v2204_v21 = vmul.f32 1.442695, %v2148_v39  ;;  %v2180_v6 = vmul.f32 1.442695, %v2136_v45 }
 0x39b   : > { %v2084_v40 = vpop.xlane.xlu0 %2083  ;;  %v2072_v62 = vpop.xlane.xlu1 %2071  ;;  %v2268_v29 = vsel %vm2027_vm3, %v12519_v59, 0.0 }
 0x39c   : > { %11078 = vpow2.f32 %v2176_v12  ;;  %v2142_v53 = vsub.f32 %v12347_v63, %v2084_v40  ;;  %2269 = vadd.xlane.f32.xlu0 %v2268_v29  ;;  %v2138_v63 = vsub.f32 %v12349_v30, %v2072_v62 }
 0x39e   : > { %v12525_v43 = vpop.eup %11072  ;;  %v2192_v37 = vmul.f32 1.442695, %v2142_v53  ;;  %v2184_v53 = vmul.f32 1.442695, %v2138_v63 }
 0x39f   : > { %v2105_v60 = vpop.xlane.xlu0 %2104  ;;  %v2108_v57 = vpop.xlane.xlu1 %2107  ;;  %v2253_v36 = vsel %vm2027_vm3, %v12525_v43, 0.0 }
 0x3a0   : > { %11080 = vpow2.f32 %v2192_v37  ;;  %v2149_v42 = vsub.f32 %v12357_v22, %v2105_v60  ;;  %2254 = vadd.xlane.f32.xlu0 %v2253_v36  ;;  %v2150_v22 = vsub.f32 %v12359_v15, %v2108_v57 }
 0x3a1   : > { %11082 = vpow2.f32 %v2204_v21 }
 0x3a2   : > { %v12531_v47 = vpop.eup %11074  ;;  %v2206_v19 = vmul.f32 1.442695, %v2149_v42  ;;  %v2208_v15 = vmul.f32 1.442695, %v2150_v22 }
 0x3a3   : > { %v2075_v12 = vpop.xlane.xlu0 %2074  ;;  %v2093_v11 = vpop.xlane.xlu1 %2092  ;;  %v2277_v46 = vsel %vm2027_vm3, %v12531_v47, 0.0 }
 0x3a4   : > { %v12536_v39 = vpop.eup %11076  ;;  %11084 = vpow2.f32 %v2206_v19  ;;  %v2139_v40 = vsub.f32 %v12365_v23, %v2075_v12  ;;  %2278 = vadd.xlane.f32.xlu1 %v2277_v46  ;;  %v2145_v30 = vsub.f32 %v12367_v4, %v2093_v11 }
 0x3a5   : > { %11086 = vpow2.f32 %v2180_v6  ;;  %v2259_v60 = vsel %vm2027_vm3, %v12536_v39, 0.0 }
 0x3a6   : > { %v12540_v29 = vpop.eup %11078  ;;  %v2186_v45 = vmul.f32 1.442695, %v2139_v40  ;;  %v2198_v4 = vmul.f32 1.442695, %v2145_v30 }
 0x3a7   : > { %v2111_v62 = vpop.xlane.xlu0 %2110  ;;  %v2090_v21 = vpop.xlane.xlu1 %2089  ;;  %v2250_v37 = vsel %vm2027_vm3, %v12540_v29, 0.0 }
 0x3a8   : > { %11088 = vpow2.f32 %v2186_v45  ;;  %v2151_v23 = vsub.f32 %v12375_v48, %v2111_v62  ;;  %2251 = vadd.xlane.f32.xlu0 %v2250_v37  ;;  %2260 = vadd.xlane.f32.xlu1 %v2259_v60  ;;  %v2144_v57 = vsub.f32 %v12377_v61, %v2090_v21 }
 0x3a9   : > { %11090 = vpow2.f32 %v2184_v53 }
 0x3aa   : > { %v12549_v36 = vpop.eup %11080  ;;  %v2210_v42 = vmul.f32 1.442695, %v2151_v23  ;;  %v2196_v11 = vmul.f32 1.442695, %v2144_v57 }
 0x3ab   : > { %v2099_v6 = vpop.xlane.xlu0 %2098  ;;  %v2096_v63 = vpop.xlane.xlu1 %2095  ;;  %v2274_v19 = vsel %vm2027_vm3, %v12549_v36, 0.0 }
 0x3ac   : > { %v12553_v12 = vpop.eup %11082  ;;  %11092 = vpow2.f32 %v2210_v42  ;;  %v2146_v48 = vsub.f32 %v12387_v2, %v2096_v63  ;;  %2275 = vadd.xlane.f32.xlu0 %v2274_v19  ;;  %v2147_v61 = vsub.f32 %v12385_v31, %v2099_v6 }
 0x3ad   : > { %11094 = vpow2.f32 %v2208_v15  ;;  %v2292_v22 = vsel %vm2027_vm3, %v12553_v12, 0.0 }
 0x3ae   : > { %v12557_v46 = vpop.eup %11084  ;;  %11096 = vpow2.f32 %v2198_v4  ;;  %v2200_v40 = vmul.f32 1.442695, %v2146_v48  ;;  %v2202_v2 = vmul.f32 1.442695, %v2147_v61 }
 0x3af   : > { %v2295_v53 = vsel %vm2027_vm3, %v12557_v46, 0.0  ;;  %v12563_v45 = vpop.eup %11086  ;;  %11098 = vpow2.f32 %v2196_v11 }
 0x3b0   : > { %v2117_v30 = vpop.xlane.xlu0 %2116  ;;  %2293 = vadd.xlane.f32.xlu0 %v2292_v22  ;;  %2296 = vadd.xlane.f32.xlu1 %v2295_v53  ;;  %11100 = vpow2.f32 %v2200_v40  ;;  %v2256_v23 = vsel %vm2027_vm3, %v12563_v45, 0.0 }
 0x3b1   : > { %v2114_v62 = vpop.xlane.xlu1 %2113  ;;  %v2153_v31 = vsub.f32 %v12403_v0, %v2117_v30  ;;  %11102 = vpow2.f32 %v2202_v2 }
 0x3b2   : > { %v12565_v21 = vpop.eup %11088  ;;  %v2152_v37 = vsub.f32 %v12405_v28, %v2114_v62 }
 0x3b3   : > { %v2265_v60 = vsel %vm2027_vm3, %v12565_v21, 0.0  ;;  %v12573_v15 = vpop.eup %11090  ;;  %v2214_v42 = vmul.f32 1.442695, %v2153_v31 }
 0x3b4   : > { %v2212_v57 = vmul.f32 1.442695, %v2152_v37  ;;  %2266 = vadd.xlane.f32.xlu0 %v2265_v60  ;;  %2257 = vadd.xlane.f32.xlu1 %v2256_v23  ;;  %v2262_v28 = vsel %vm2027_vm3, %v12573_v15, 0.0 }
 0x3b5   : > { %v2120_v60 = vpop.xlane.xlu1 %2119 }
 0x3b6   : > { %v12575_v4 = vpop.eup %11092  ;;  %11104 = vpow2.f32 %v2212_v57  ;;  %v2154_v23 = vsub.f32 %v12415_v35, %v2120_v60  ;;  %v2123_v57 = vpop.xlane.xlu0 %2122  ;;  %v10831_v60 = vunpack.i.l.bf16 %v12327_v55 }
 0x3b7   : > { %v12577_v6 = vpop.eup %11094  ;;  %v2301_v0 = vsel %vm2027_vm3, %v12575_v4, 0.0  ;;  %11106 = vpow2.f32 %v2214_v42  ;;  %v2155_v42 = vsub.f32 %v12411_v50, %v2123_v57 }
 0x3b8   : > { %v12583_v63 = vpop.eup %11096  ;;  %2263 = vadd.xlane.f32.xlu0 %v2262_v28  ;;  %2302 = vadd.xlane.f32.xlu1 %v2301_v0  ;;  %v2298_v48 = vsel %vm2027_vm3, %v12577_v6, 0.0  ;;  %v2216_v28 = vmul.f32 1.442695, %v2154_v23 }
 0x3b9   : > { %v12585_v19 = vpop.eup %11098  ;;  %v2283_v11 = vsel %vm2027_vm3, %v12583_v63, 0.0  ;;  %v2218_v0 = vmul.f32 1.442695, %v2155_v42  ;;  %v10842_v42 = vunpack.i.h.bf16 %v12345_v27 }
 0x3ba   : > { %v12591_v61 = vpop.eup %11100  ;;  %v2280_v53 = vsel %vm2027_vm3, %v12585_v19, 0.0  ;;  %11108 = vpow2.f32 %v2216_v28  ;;  %v10841_v28 = vunpack.i.l.bf16 %v12345_v27 }
 0x3bb   : > { %v12593_v40 = vpop.eup %11102  ;;  %v2286_v22 = vsel %vm2027_vm3, %v12591_v61, 0.0  ;;  %11110 = vpow2.f32 %v2218_v0 }
 0x3bc   : > { %2299 = vadd.xlane.f32.xlu0 %v2298_v48  ;;  %2284 = vadd.xlane.f32.xlu1 %v2283_v11  ;;  %v2289_v62 = vsel %vm2027_vm3, %v12593_v40, 0.0 }
 0x3c0   : > { %v12599_v30 = vpop.eup %11104  ;;  %2287 = vadd.xlane.f32.xlu0 %v2286_v22  ;;  %2281 = vadd.xlane.f32.xlu1 %v2280_v53 }
 0x3c1   : > { %v2304_v2 = vsel %vm2027_vm3, %v12599_v30, 0.0  ;;  %v12605_v31 = vpop.eup %11106 }
 0x3c2   : > { %v2307_v37 = vsel %vm2027_vm3, %v12605_v31, 0.0 }
 0x3c4   : > { %2305 = vadd.xlane.f32.xlu0 %v2304_v2  ;;  %2290 = vadd.xlane.f32.xlu1 %v2289_v62  ;;  %v12615_v48 = vpop.eup %11108 }
 0x3c5   : > { %v2310_v11 = vsel %vm2027_vm3, %v12615_v48, 0.0  ;;  %v12619_v22 = vpop.eup %11110 }
 0x3c8   : > { %2308 = vadd.xlane.f32.xlu1 %v2307_v37  ;;  %v10832_v37 = vunpack.i.h.bf16 %v12327_v55 }
 0x3d9   : > { %3490 = vrot.lane.b32.xlu1 %v11939_v9, %s11573_s18 }
 0x3da   : > { %3488 = vrot.lane.b32.xlu0 %v11924_v58, %s11573_s18  ;;  %v2313_v58 = vsel %vm2027_vm3, %v12619_v22, 0.0 }
 0x3f9   : > { %2311 = vadd.xlane.f32.xlu0 %v2310_v11  ;;  %v10448_v11 = vpack.c.bf16 %v10832_v37, %v10831_v60  ;;  %v15913_v37 = vld [vmem:[#allocation52_spill] sm:$0xff]  ;;  %v15914_v60 = vld [vmem:[#allocation43_spill] sm:$0xff] }
 0x3fd   : > { %v2225_v9 = vpop.xlane.xlu0 %2224  ;;  %2314 = vadd.xlane.f32.xlu1 %v2313_v58  ;;  %v10460_v58 = vpack.c.bf16 %v10842_v42, %v10841_v28 }
 0x3fe   : > { %11112 = vrcp.f32 %v2225_v9  ;;  %v2222_v35 = vpop.xlane.xlu1 %2221  ;;  %v10852_v9 = vunpack.i.h.bf16 %v12355_v16 }
 0x3ff   : > { %11114 = vrcp.f32 %v2222_v35  ;;  %v10851_v35 = vunpack.i.l.bf16 %v12355_v16 }
 0x401   : > { %v10464_v16 = vpack.c.bf16 %v10852_v9, %v10851_v35  ;;  %v15924_v35 = vld [vmem:[#allocation48_spill] sm:$0xff] }
 0x402   : > { %v2231_v50 = vpop.xlane.xlu0 %2230 }
 0x403   : > { %11116 = vrcp.f32 %v2231_v50 }
 0x406   : > { %v2228_v53 = vpop.xlane.xlu1 %2227 }
 0x407   : > { %11118 = vrcp.f32 %v2228_v53  ;;  %v10861_v53 = vunpack.i.l.bf16 %v12373_v33 }
 0x408   : > { %v11113_v2 = vpop.eup %11112 }
 0x409   : > { %v11115_v62 = vpop.eup %11114  ;;  %v2349_v57 = vmul.f32 %v11113_v2, %v12463_v41 }
 0x40a   : > { %v2348_v23 = vmul.f32 %v11115_v62, %v12465_v52 }
 0x40c   : > { %9792 = vmatprep.mubr.msk.f32.mxu0 %vm2027_vm3, %v2348_v23 }
 0x40d   : > { %9793 = vmatmul.mubr.msk.f32.vlgmr.msra.gmra.mrb[40].mxu0 %vm2027_vm3, %v2349_v57  ;;  %v2237_v0 = vpop.xlane.xlu1 %2236  ;;  %v11117_v55 = vpop.eup %11116  ;;  %v15917_v57 = vld [vmem:[#allocation47_spill] sm:$0xff] }
 0x40e   : > { %10447 = vmatpush3.bf16.msra.mxu0 %v12245_v32  ;;  %10934 = vrot.lane.b32.xlu1 %v11995_v18, %s11572_s17  ;;  %11120 = vrcp.f32 %v2237_v0  ;;  %v2351_v32 = vmul.f32 %v11117_v55, %v12472_v10  ;;  %v15919_v0 = vld [vmem:[#allocation62_spill] sm:$0xff] }
 0x40f   : > { %10449 = vmatprep.subr.bf16.mxu0 %v10448_v11  ;;  %3492 = vrot.lane.b32.xlu0 %v11936_v7, %s11573_s18  ;;  %v10856_v55 = vunpack.i.l.bf16 %v15919_v0 }
 0x411   : > { %v11119_v41 = vpop.eup %11118  ;;  %v2234_v52 = vpop.xlane.xlu1 %2233 }
 0x412   : > { %10451 = vmatpush3.bf16.msra.mxu0 %v10448_v11  ;;  %11122 = vrcp.f32 %v2234_v52  ;;  %3603 = vrot.lane.b32.xlu1 %v11951_v26, %s11573_s18  ;;  %v2350_v27 = vmul.f32 %v11119_v41, %v12477_v17  ;;  %v10857_v11 = vunpack.i.h.bf16 %v15919_v0  ;;  %v15931_v0 = vld [vmem:[#allocation57_spill] sm:$0xff] }
 0x413   : > { %10461 = vmatprep.subr.bf16.mxu0 %v10460_v58  ;;  %10939 = vrot.lane.b32.xlu0 %v12007_v54, %s11572_s17 }
 0x414   : > { %9795 = vmatprep.mubr.msk.f32.mxu0 %vm2027_vm3, %v2350_v27  ;;  %v15920_v27 = vld [vmem:[#allocation58_spill] sm:$0xff]  ;;  %v10472_v9 = vpack.c.bf16 %v10857_v11, %v10856_v55 }
 0x415   : > { %9796 = vmatmul.mubr.msk.f32.gmra.mrb[42].mxu0 %vm2027_vm3, %v2351_v32  ;;  %v2243_v7 = vpop.xlane.xlu1 %2242 }
 0x416   : > { %3607 = vrot.lane.b32.xlu1 %v11963_v49, %s11573_s18  ;;  %11124 = vrcp.f32 %v2243_v7  ;;  %v15921_v7 = vld [vmem:[#allocation46_spill] sm:$0xff] }
 0x417   : > { %3605 = vrot.lane.b32.xlu0 %v11948_v20, %s11573_s18 }
 0x418   : > { %v11121_v17 = vpop.eup %11120 }
 0x419   : > { %v2240_v26 = vpop.xlane.xlu1 %2239  ;;  %v2353_v20 = vmul.f32 %v11121_v17, %v12483_v56 }
 0x41a   : > { %11126 = vrcp.f32 %v2240_v26  ;;  %10944 = vrot.lane.b32.xlu1 %v12019_v8, %s11572_s17  ;;  %v15922_v26 = vld [vmem:[#allocation64_spill] sm:$0xff] }
 0x41b   : > { %3609 = vrot.lane.b32.xlu0 %v11960_v38, %s11573_s18  ;;  %v10862_v38 = vunpack.i.h.bf16 %v12373_v33  ;;  %v10867_v17 = vunpack.i.h.bf16 %v15922_v26 }
 0x41c   : > { %v11123_v10 = vpop.eup %11122 }
 0x41d   : > { %v2249_v50 = vpop.xlane.xlu0 %2248  ;;  %v2352_v49 = vmul.f32 %v11123_v10, %v12488_v5  ;;  %v12668_v5 = vpack.c.bf16 %v10862_v38, %v10861_v53  ;;  %v10866_v10 = vunpack.i.l.bf16 %v15922_v26  ;;  %v15926_v53 = vld [vmem:[#allocation50_spill] sm:$0xff]  ;;  %v15934_v26 = vld [vmem:[#allocation35_spill] sm:$0xff] }
 0x41e   : > { %3720 = vrot.lane.b32.xlu1 %v11975_v14, %s11573_s18  ;;  %11128 = vrcp.f32 %v2249_v50  ;;  %v15925_v50 = vld [vmem:[#allocation49_spill] sm:$0xff] }
 0x41f   : > { %10949 = vrot.lane.b32.xlu0 %v12031_v24, %s11572_s17  ;;  %9806 = vmatprep.mubr.msk.f32.mxu0 %vm2027_vm3, %v2352_v49  ;;  %v10484_v49 = vpack.c.bf16 %v10867_v17, %v10866_v10 }
 0x420   : > { %9807 = vmatmul.mubr.msk.f32.vlgmr.msra.gmra.mrb[44].mxu0 %vm2027_vm3, %v2353_v20  ;;  %v11125_v56 = vpop.eup %11124 }
 0x421   : > { %10463 = vmatpush3.bf16.msra.mxu0 %v10460_v58  ;;  %v2273_v2 = vpop.xlane.xlu0 %2272 }
 0x422   : > { %10465 = vmatprep.subr.bf16.mxu0 %v10464_v16  ;;  %3724 = vrot.lane.b32.xlu1 %v11989_v13, %s11573_s18  ;;  %v2355_v13 = vmul.f32 %v11125_v56, %v12493_v34  ;;  %v15918_v34 = vld [vmem:[#allocation44_spill] sm:$0xff] }
 0x423   : > { %3722 = vrot.lane.b32.xlu0 %v11972_v1, %s11573_s18  ;;  %v15915_v1 = vld [vmem:[#allocation45_spill] sm:$0xff] }
 0x424   : > { %v11127_v14 = vpop.eup %11126 }
 0x425   : > { %10467 = vmatpush3.bf16.msra.mxu0 %v10464_v16  ;;  %v2246_v62 = vpop.xlane.xlu0 %2245  ;;  %v2354_v33 = vmul.f32 %v11127_v14, %v12498_v3  ;;  %v15916_v3 = vld [vmem:[#allocation55_spill] sm:$0xff] }
 0x426   : > { %11130 = vrcp.f32 %v2246_v62  ;;  %10477 = vmatprep.subr.bf16.mxu0 %v12668_v5  ;;  %10954 = vrot.lane.b32.xlu1 %v15913_v37, %s11572_s17  ;;  %v15927_v16 = vld [vmem:[#allocation51_spill] sm:$0xff] }
 0x427   : > { %3726 = vrot.lane.b32.xlu0 %v15914_v60, %s11573_s18  ;;  %9809 = vmatprep.mubr.msk.f32.mxu0 %vm2027_vm3, %v2354_v33  ;;  %v15928_v33 = vld [vmem:[#allocation53_spill] sm:$0xff] }
 0x428   : > { %9810 = vmatmul.mubr.msk.f32.gmra.mrb[46].mxu0 %vm2027_vm3, %v2355_v13  ;;  %v11129_v42 = vpop.eup %11128  ;;  %v15929_v13 = vld [vmem:[#allocation54_spill] sm:$0xff] }
 0x429   : > { %v2270_v23 = vpop.xlane.xlu0 %2269  ;;  %v2357_v58 = vmul.f32 %v11129_v42, %v12503_v44  ;;  %v15930_v42 = vld [vmem:[#allocation56_spill] sm:$0xff] }
 0x42a   : > { %3837 = vrot.lane.b32.xlu1 %v15915_v1, %s11573_s18  ;;  %11132 = vrcp.f32 %v2270_v23 }
 0x42b   : > { %10959 = vrot.lane.b32.xlu0 %v15916_v3, %s11572_s17 }
 0x42d   : > { %v2255_v41 = vpop.xlane.xlu0 %2254 }
 0x42e   : > { %3841 = vrot.lane.b32.xlu1 %v15917_v57, %s11573_s18  ;;  %11134 = vrcp.f32 %v2255_v41  ;;  %v15932_v41 = vld [vmem:[#allocation63_spill] sm:$0xff] }
 0x42f   : > { %3839 = vrot.lane.b32.xlu0 %v15918_v34, %s11573_s18 }
 0x430   : > { %v11131_v28 = vpop.eup %11130 }
 0x431   : > { %v2356_v52 = vmul.f32 %v11131_v28, %v12514_v25  ;;  %v2279_v32 = vpop.xlane.xlu1 %2278  ;;  %v15923_v25 = vld [vmem:[#allocation60_spill] sm:$0xff] }
 0x432   : > { %10964 = vrot.lane.b32.xlu1 %v15920_v27, %s11572_s17 }
 0x433   : > { %9820 = vmatprep.mubr.msk.f32.mxu1 %vm2027_vm3, %v2356_v52  ;;  %3843 = vrot.lane.b32.xlu0 %v15921_v7, %s11573_s18  ;;  %v10877_v52 = vunpack.i.h.bf16 %v15932_v41  ;;  %v15933_v7 = vld [vmem:[#allocation34_spill] sm:$0xff] }
 0x434   : > { %9821 = vmatmul.mubr.msk.f32.vlgmr.msra.gmra.mrb[24].mxu1 %vm2027_vm3, %v2357_v58  ;;  %v11133_v62 = vpop.eup %11132 }
 0x435   : > { %10471 = vmatpush3.bf16.msra.mxu1 %v15923_v25  ;;  %v2252_v44 = vpop.xlane.xlu0 %2251  ;;  %v2261_v20 = vpop.xlane.xlu1 %2260  ;;  %v2364_v11 = vmul.f32 %v11133_v62, %v12519_v59  ;;  %v15938_v62 = vld [vmem:[#allocation61_spill] sm:$0xff] }
 0x436   : > { %10473 = vmatprep.subr.bf16.mxu1 %v10472_v9  ;;  %11136 = vrcp.f32 %v2252_v44  ;;  %3956 = vrot.lane.b32.xlu1 %v15924_v35, %s11573_s18 }
 0x437   : > { %3954 = vrot.lane.b32.xlu0 %v15925_v50, %s11573_s18  ;;  %11138 = vrcp.f32 %v2273_v2 }
 0x438   : > { %v11135_v2 = vpop.eup %11134 }
 0x439   : > { %10475 = vmatpush3.bf16.msra.mxu1 %v10472_v9  ;;  %v2276_v38 = vpop.xlane.xlu0 %2275  ;;  %v2359_v34 = vmul.f32 %v11135_v2, %v12525_v43  ;;  %v15935_v9 = vld [vmem:[#allocation68_spill] sm:$0xff]  ;;  %v10871_v2 = vunpack.i.l.bf16 %v15938_v62 }
 0x43a   : > { %10485 = vmatprep.subr.bf16.mxu1 %v10484_v49  ;;  %11140 = vrcp.f32 %v2276_v38  ;;  %3960 = vrot.lane.b32.xlu1 %v15926_v53, %s11573_s18  ;;  %v10887_v25 = vunpack.i.h.bf16 %v15935_v9  ;;  %v10886_v44 = vunpack.i.l.bf16 %v15935_v9  ;;  %v15937_v53 = vld [vmem:[#allocation38_spill] sm:$0xff] }
 0x43b   : > { %3958 = vrot.lane.b32.xlu0 %v15927_v16, %s11573_s18  ;;  %11142 = vrcp.f32 %v2279_v32 }
 0x43d   : > { %v2294_v56 = vpop.xlane.xlu0 %2293  ;;  %v2297_v14 = vpop.xlane.xlu1 %2296 }
 0x43e   : > { %11144 = vrcp.f32 %v2294_v56  ;;  %4073 = vrot.lane.b32.xlu1 %v15928_v33, %s11573_s18  ;;  %v10872_v33 = vunpack.i.h.bf16 %v15938_v62 }
 0x43f   : > { %4071 = vrot.lane.b32.xlu0 %v15929_v13, %s11573_s18  ;;  %11146 = vrcp.f32 %v2297_v14 }
 0x440   : > { %v11137_v60 = vpop.eup %11136  ;;  %11148 = vrcp.f32 %v2261_v20  ;;  %v15936_v20 = vld [vmem:[#allocation36_spill] sm:$0xff] }
 0x441   : > { %v2267_v1 = vpop.xlane.xlu0 %2266  ;;  %v2258_v23 = vpop.xlane.xlu1 %2257  ;;  %v2358_v57 = vmul.f32 %v11137_v60, %v12540_v29  ;;  %v10876_v29 = vunpack.i.l.bf16 %v15932_v41 }
 0x442   : > { %4077 = vrot.lane.b32.xlu1 %v15930_v42, %s11573_s18  ;;  %v11139_v28 = vpop.eup %11138  ;;  %11150 = vrcp.f32 %v2258_v23 }
 0x443   : > { %9823 = vmatprep.mubr.msk.f32.mxu1 %vm2027_vm3, %v2358_v57  ;;  %4075 = vrot.lane.b32.xlu0 %v15931_v0, %s11573_s18  ;;  %11152 = vrcp.f32 %v2267_v1  ;;  %v2365_v32 = vmul.f32 %v11139_v28, %v12508_v51  ;;  %v10488_v35 = vpack.c.bf16 %v10877_v52, %v10876_v29  ;;  %v15943_v52 = vld [vmem:[#allocation65_spill] sm:$0xff] }
 0x444   : > { %v11141_v55 = vpop.eup %11140  ;;  %9824 = vmatmul.mubr.msk.f32.gmra.mrb[26].mxu1 %vm2027_vm3, %v2359_v34  ;;  %v15941_v34 = vld [vmem:[#allocation40_spill] sm:$0xff]  ;;  %v10892_v29 = vunpack.i.h.bf16 %v15943_v52 }
 0x445   : > { %9848 = vmatprep.mubr.msk.f32.mxu1 %vm2027_vm3, %v2364_v11  ;;  %v2264_v43 = vpop.xlane.xlu0 %2263  ;;  %v2303_v58 = vpop.xlane.xlu1 %2302  ;;  %v2366_v17 = vmul.f32 %v11141_v55, %v12549_v36 }
 0x446   : > { %11154 = vrcp.f32 %v2264_v43  ;;  %10969 = vrot.lane.b32.xlu1 %v15933_v7, %s11574_s19  ;;  %v11143_v59 = vpop.eup %11142  ;;  %v10891_v43 = vunpack.i.l.bf16 %v15943_v52 }
 0x447   : > { %10974 = vrot.lane.b32.xlu0 %v15934_v26, %s11574_s19  ;;  %v2367_v36 = vmul.f32 %v11143_v59, %v12531_v47 }
 0x448   : > { %v11145_v10 = vpop.eup %11144  ;;  %9849 = vmatmul.mubr.msk.f32.vlgmr.msra.gmra.mrb[28].mxu1 %vm2027_vm3, %v2365_v32  ;;  %v15945_v32 = vld [vmem:[#allocation42_spill] sm:$0xff] }
 0x449   : > { %10487 = vmatpush3.bf16.msra.mxu1 %v10484_v49  ;;  %9851 = vmatprep.mubr.msk.f32.mxu1 %vm2027_vm3, %v2366_v17  ;;  %v2300_v51 = vpop.xlane.xlu0 %2299  ;;  %v2285_v50 = vpop.xlane.xlu1 %2284  ;;  %v2372_v16 = vmul.f32 %v11145_v10, %v12553_v12  ;;  %v10500_v49 = vpack.c.bf16 %v10887_v25, %v10886_v44  ;;  %v15940_v12 = vld [vmem:[#allocation37_spill] sm:$0xff]  ;;  %v10506_v10 = vpack.c.bf16 %v10892_v29, %v10891_v43 }
 0x44a   : > { %10489 = vmatprep.subr.bf16.mxu1 %v10488_v35  ;;  %11156 = vrcp.f32 %v2300_v51  ;;  %10979 = vrot.lane.b32.xlu1 %v15936_v20, %s11574_s19  ;;  %v11147_v38 = vpop.eup %11146  ;;  %v15948_v20 = vld [vmem:[#allocation72_spill] sm:$0xff] }
 0x44b   : > { %11158 = vrcp.f32 %v2303_v58  ;;  %10989 = vrot.lane.b32.xlu0 %v15937_v53, %s11574_s19  ;;  %v11149_v56 = vpop.eup %11148  ;;  %v2373_v60 = vmul.f32 %v11147_v38, %v12557_v46  ;;  %v15942_v46 = vld [vmem:[#allocation66_spill] sm:$0xff]  ;;  %v15944_v58 = vld [vmem:[#allocation39_spill] sm:$0xff]  ;;  %v10906_v38 = vunpack.i.l.bf16 %v15948_v20 }
 0x44c   : > { %9852 = vmatmul.mubr.msk.f32.gmra.mrb[30].mxu1 %vm2027_vm3, %v2367_v36  ;;  %v11151_v14 = vpop.eup %11150  ;;  %11160 = vrcp.f32 %v2285_v50  ;;  %v2361_v42 = vmul.f32 %v11149_v56, %v12536_v39  ;;  %v10882_v0 = vunpack.i.h.bf16 %v15942_v46  ;;  %v10881_v11 = vunpack.i.l.bf16 %v15942_v46  ;;  %v15955_v46 = vld [vmem:[#allocation84_spill] sm:$0xff] }
 0x44d   : > { %10491 = vmatpush3.bf16.msra.mxu1 %v10488_v35  ;;  %v2288_v13 = vpop.xlane.xlu0 %2287  ;;  %9876 = vmatprep.mubr.msk.f32.mxu1 %vm2027_vm3, %v2372_v16  ;;  %v2282_v47 = vpop.xlane.xlu1 %2281  ;;  %v2360_v23 = vmul.f32 %v11151_v14, %v12563_v45  ;;  %v10480_v45 = vpack.c.bf16 %v10872_v33, %v10871_v2  ;;  %v15947_v35 = vld [vmem:[#allocation83_spill] sm:$0xff]  ;;  %v10907_v36 = vunpack.i.h.bf16 %v15948_v20  ;;  %v15950_v14 = vld [vmem:[#allocation70_spill] sm:$0xff] }
 0x44e   : > { %10502 = vmatprep.subr.msk.bf16.mxu1 %vm12131_vm2, %v10500_v49  ;;  %11162 = vrcp.f32 %v2288_v13  ;;  %10984 = vrot.lane.b32.xlu1 %v15940_v12, %s11574_s19  ;;  %v11153_v57 = vpop.eup %11152  ;;  %v10492_v26 = vpack.c.bf16 %v10882_v0, %v10881_v11  ;;  %v10932_v51 = vunpack.i.h.bf16 %v15947_v35  ;;  %v10931_v50 = vunpack.i.l.bf16 %v15947_v35 }
 0x44f   : > { %11164 = vrcp.f32 %v2282_v47  ;;  %10999 = vrot.lane.b32.xlu0 %v15941_v34, %s11574_s19  ;;  %9834 = vmatprep.mubr.msk.f32.mxu0 %vm2027_vm3, %v2360_v23  ;;  %v2363_v7 = vmul.f32 %v11153_v57, %v12565_v21  ;;  %v15946_v21 = vld [vmem:[#allocation41_spill] sm:$0xff]  ;;  %v10897_v62 = vunpack.i.h.bf16 %v15950_v14  ;;  %v10896_v33 = vunpack.i.l.bf16 %v15950_v14  ;;  %v15954_v34 = vld [vmem:[#allocation71_spill] sm:$0xff]  ;;  %v15961_v14 = vld [vmem:[#allocation80_spill] sm:$0xff] }
 0x450   : > { %v11155_v28 = vpop.eup %11154  ;;  %9877 = vmatmul.mubr.msk.f32.vlgmr.msra.gmra.mrb[32].mxu1 %vm2027_vm3, %v2373_v60  ;;  %9835 = vmatmul.mubr.msk.f32.vlgmr.msra.gmra.mrb[48].mxu0 %vm2027_vm3, %v2361_v42  ;;  %v15951_v60 = vld [vmem:[#allocation73_spill] sm:$0xff]  ;;  %v10927_v0 = vunpack.i.h.bf16 %v15955_v46  ;;  %v10926_v11 = vunpack.i.l.bf16 %v15955_v46 }
 0x451   : > { %v2306_v55 = vpop.xlane.xlu0 %2305  ;;  %v2291_v41 = vpop.xlane.xlu1 %2290  ;;  %v2362_v39 = vmul.f32 %v11155_v28, %v12573_v15  ;;  %10479 = vmatpush3.bf16.msra.mxu0 %v12668_v5  ;;  %v10512_v13 = vpack.c.bf16 %v10897_v62, %v10896_v33  ;;  %v10912_v12 = vunpack.i.h.bf16 %v15951_v60  ;;  %v10911_v23 = vunpack.i.l.bf16 %v15951_v60 }
 0x452   : > { %11166 = vrcp.f32 %v2306_v55  ;;  %10994 = vrot.lane.b32.xlu1 %v15944_v58, %s11574_s19  ;;  %10481 = vmatprep.subr.bf16.mxu0 %v10480_v45  ;;  %v15956_v55 = vld [vmem:[#allocation76_spill] sm:$0xff]  ;;  %v10548_v29 = vpack.c.bf16 %v10927_v0, %v10926_v11 }
 0x453   : > { %11168 = vrcp.f32 %v2291_v41  ;;  %11009 = vrot.lane.b32.xlu0 %v15945_v32, %s11574_s19  ;;  %9837 = vmatprep.mubr.msk.f32.mxu0 %vm2027_vm3, %v2362_v39  ;;  %v10530_v42 = vpack.c.bf16 %v10912_v12, %v10911_v23  ;;  %v15958_v41 = vld [vmem:[#allocation78_spill] sm:$0xff] }
 0x454   : > { %v11157_v59 = vpop.eup %11156  ;;  %9838 = vmatmul.mubr.msk.f32.gmra.mrb[50].mxu0 %vm2027_vm3, %v2363_v7  ;;  %v10917_v39 = vunpack.i.h.bf16 %v15958_v41  ;;  %v10916_v52 = vunpack.i.l.bf16 %v15958_v41 }
 0x455   : > { %v11159_v15 = vpop.eup %11158  ;;  %v2309_v17 = vpop.xlane.xlu1 %2308  ;;  %v2374_v5 = vmul.f32 %v11157_v59, %v12577_v6  ;;  %10483 = vmatpush3.bf16.msra.mxu0 %v10480_v45  ;;  %v15957_v45 = vld [vmem:[#allocation81_spill] sm:$0xff] }
 0x456   : > { %10505 = vmatpush3.bf16.xpose.msk.msra.mxu1 %vm12131_vm2, %v10500_v49  ;;  %11170 = vrcp.f32 %v2309_v17  ;;  %v11161_v9 = vpop.eup %11160  ;;  %10493 = vmatprep.subr.bf16.mxu0 %v10492_v26  ;;  %v2375_v6 = vmul.f32 %v11159_v15, %v12575_v4  ;;  %v10536_v43 = vpack.c.bf16 %v10917_v39, %v10916_v52  ;;  %v3489_v58 = vpop.permute.xlu0 %3488 }
 0x457   : > { %11004 = vrot.lane.b32.xlu1 %v15946_v21, %s11574_s19  ;;  %10508 = vmatprep.subr.msk.bf16.mxu1 %vm12131_vm2, %v10506_v10  ;;  %v2369_v16 = vmul.f32 %v11161_v9, %v12583_v63  ;;  %v10524_v63 = vpack.c.bf16 %v10907_v36, %v10906_v38  ;;  %v15959_v36 = vld [vmem:[#allocation79_spill] sm:$0xff] }
 0x458   : > { %v11163_v25 = vpop.eup %11162  ;;  %11019 = vrot.lane.b32.xlu0 %v12007_v54, %s11574_s19  ;;  %9879 = vmatprep.mubr.msk.f32.mxu1 %vm2027_vm3, %v2374_v5  ;;  %v15949_v54 = vld [vmem:[#allocation69_spill] sm:$0xff]  ;;  %v10922_v38 = vunpack.i.h.bf16 %v15959_v36 }
 0x459   : > { %v11165_v44 = vpop.eup %11164  ;;  %9880 = vmatmul.mubr.msk.f32.gmra.mrb[34].mxu1 %vm2027_vm3, %v2375_v6  ;;  %v2370_v56 = vmul.f32 %v11163_v25, %v12591_v61  ;;  %v3491_v32 = vpop.permute.xlu1 %3490 }
 0x45a   : > { %v2368_v53 = vmul.f32 %v11165_v44, %v12585_v19  ;;  %9904 = vmatprep.mubr.msk.f32.mxu1 %vm1102_vm1, %v15949_v54  ;;  %v10496_v19 = vpack.c.bf16 %v10932_v51, %v10931_v50 }
 0x45b   : > { %11014 = vrot.lane.b32.xlu1 %v11995_v18, %s11574_s19 }
 0x45c   : > { %v11167_v4 = vpop.eup %11166  ;;  %9862 = vmatprep.mubr.msk.f32.mxu0 %vm2027_vm3, %v2368_v53  ;;  %v10921_v53 = vunpack.i.l.bf16 %v15959_v36 }
 0x45d   : > { %v11169_v49 = vpop.eup %11168  ;;  %9863 = vmatmul.mubr.msk.f32.vlgmr.msra.gmra.mrb[52].mxu0 %vm2027_vm3, %v2369_v16  ;;  %v2376_v61 = vmul.f32 %v11167_v4, %v12599_v30 }
 0x45e   : > { %10495 = vmatpush3.bf16.msra.mxu0 %v10492_v26  ;;  %9865 = vmatprep.mubr.msk.f32.mxu0 %vm2027_vm3, %v2370_v56  ;;  %v2371_v2 = vmul.f32 %v11169_v49, %v12593_v40  ;;  %v15952_v40 = vld [vmem:[#allocation67_spill] sm:$0xff]  ;;  %v10542_v49 = vpack.c.bf16 %v10922_v38, %v10921_v53 }
 0x45f   : > { %10497 = vmatprep.subr.bf16.mxu0 %v10496_v19  ;;  %10511 = vmatpush3.bf16.xpose.msk.msra.mxu1 %vm12131_vm2, %v10506_v10  ;;  %v10902_v57 = vunpack.i.h.bf16 %v15952_v40  ;;  %v10901_v30 = vunpack.i.l.bf16 %v15952_v40 }
 0x460   : > { %v11171_v18 = vpop.eup %11170  ;;  %10526 = vmatprep.subr.msk.bf16.mxu1 %vm12131_vm2, %v10524_v63 }
 0x461   : > { %v2377_v47 = vmul.f32 %v11171_v18, %v12605_v31  ;;  %9866 = vmatmul.mubr.msk.f32.gmra.mrb[54].mxu0 %vm2027_vm3, %v2371_v2  ;;  %v15953_v31 = vld [vmem:[#allocation74_spill] sm:$0xff]  ;;  %v10518_v28 = vpack.c.bf16 %v10902_v57, %v10901_v30 }
 0x462   : > { %10499 = vmatpush3.bf16.msra.mxu0 %v10496_v19  ;;  %9890 = vmatprep.mubr.msk.f32.mxu0 %vm2027_vm3, %v2376_v61  ;;  %v15963_v18 = vld [vmem:[#allocation82_spill] sm:$0xff] }
 0x463   : > { %10514 = vmatprep.subr.msk.bf16.mxu0 %vm12131_vm2, %v10512_v13 }
 0x465   : > { %9891 = vmatmul.mubr.msk.f32.vlgmr.msra.gmra.mrb[56].mxu0 %vm2027_vm3, %v2377_v47 }
 0x466   : > { %9905 = vmatmul.mubr.msk.f32.vlgmr.msra.gmra.mrb[36].mxu1 %vm1102_vm1, %v15953_v31 }
 0x467   : > { %9907 = vmatprep.mubr.msk.f32.mxu1 %vm1102_vm1, %v15954_v34  ;;  %10529 = vmatpush3.bf16.xpose.msk.msra.mxu1 %vm12131_vm2, %v10524_v63 }
 0x468   : > { %10532 = vmatprep.subr.msk.bf16.mxu1 %vm12131_vm2, %v10530_v42 }
 0x46a   : > { %9908 = vmatmul.mubr.msk.f32.gmra.mrb[38].mxu1 %vm1102_vm1, %v15956_v55 }
 0x46b   : > { %10517 = vmatpush3.bf16.xpose.msk.msra.mxu0 %vm12131_vm2, %v10512_v13  ;;  %9932 = vmatprep.mubr.msk.f32.mxu1 %vm1102_vm1, %v15957_v45 }
 0x46c   : > { %10520 = vmatprep.subr.msk.bf16.mxu0 %vm12131_vm2, %v10518_v28 }
 0x46f   : > { %10535 = vmatpush3.bf16.xpose.msk.msra.mxu1 %vm12131_vm2, %v10530_v42 }
 0x470   : > { %10550 = vmatprep.subr.msk.bf16.mxu1 %vm12131_vm2, %v10548_v29 }
 0x473   : > { %10523 = vmatpush3.bf16.xpose.msk.msra.mxu0 %vm12131_vm2, %v10518_v28 }
 0x474   : > { %10538 = vmatprep.subr.msk.bf16.mxu0 %vm12131_vm2, %v10536_v43 }
 0x476   : > { %9933 = vmatmul.mubr.msk.f32.vlgmr.msra.gmra.mrb[40].mxu1 %vm1102_vm1, %v3489_v58 }
 0x477   : > { %9935 = vmatprep.mubr.msk.f32.mxu1 %vm1102_vm1, %v3491_v32  ;;  %10553 = vmatpush3.bf16.xpose.msk.msra.mxu1 %vm12131_vm2, %v10548_v29 }
 0x486   : > { %v2312_v7 = vpop.xlane.xlu0 %2311 }
 0x487   : > { %11172 = vrcp.f32 %v2312_v7 }
 0x48a   : > { %v3493_v59 = vpop.permute.xlu0 %3492  ;;  %v2315_v15 = vpop.xlane.xlu1 %2314 }
 0x48b   : > { %11174 = vrcp.f32 %v2315_v15  ;;  %9936 = vmatmul.mubr.msk.f32.gmra.mrb[42].mxu1 %vm1102_vm1, %v3493_v59 }
 0x48e   : > { %v10940_v26 = vpop.permute.xlu0 %10939  ;;  %v10935_v17 = vpop.permute.xlu1 %10934 }
 0x48f   : > { %v10937_v5 = vunpack.i.h.bf16 %v10935_v17  ;;  %v10936_v10 = vunpack.i.l.bf16 %v10935_v17  ;;  %v10942_v63 = vunpack.i.h.bf16 %v10940_v26  ;;  %v10941_v2 = vunpack.i.l.bf16 %v10940_v26 }
 0x491   : > { %v11173_v9 = vpop.eup %11172  ;;  %v10554_v21 = vpack.c.bf16 %v10937_v5, %v10936_v10  ;;  %v10560_v47 = vpack.c.bf16 %v10942_v63, %v10941_v2 }
 0x492   : > { %v3606_v25 = vpop.permute.xlu0 %3605  ;;  %v3604_v6 = vpop.permute.xlu1 %3603  ;;  %v2378_v44 = vmul.f32 %v11173_v9, %v12615_v48  ;;  %v15960_v48 = vld [vmem:[#allocation75_spill] sm:$0xff] }
 0x493   : > { %10556 = vmatprep.subr.msk.bf16.mxu1 %vm12131_vm2, %v10554_v21 }
 0x494   : > { %9893 = vmatprep.mubr.msk.f32.mxu0 %vm2027_vm3, %v2378_v44  ;;  %10559 = vmatpush3.bf16.xpose.msk.msra.mxu1 %vm12131_vm2, %v10554_v21 }
 0x495   : > { %v11175_v35 = vpop.eup %11174 }
 0x496   : > { %v3610_v51 = vpop.permute.xlu0 %3609  ;;  %v3608_v50 = vpop.permute.xlu1 %3607  ;;  %v2379_v20 = vmul.f32 %v11175_v35, %v12619_v22  ;;  %v15962_v22 = vld [vmem:[#allocation77_spill] sm:$0xff] }
 0x498   : > { %9894 = vmatmul.mubr.msk.f32.gmra.mrb[58].mxu0 %vm2027_vm3, %v2379_v20 }
 0x499   : > { %9918 = vmatprep.mubr.msk.f32.mxu0 %vm1102_vm1, %v15960_v48 }
 0x49a   : > { %v10950_v16 = vpop.permute.xlu0 %10949  ;;  %v10945_v54 = vpop.permute.xlu1 %10944 }
 0x49b   : > { %v10952_v4 = vunpack.i.h.bf16 %v10950_v16  ;;  %v10951_v56 = vunpack.i.l.bf16 %v10950_v16  ;;  %v10947_v57 = vunpack.i.h.bf16 %v10945_v54  ;;  %v10946_v30 = vunpack.i.l.bf16 %v10945_v54 }
 0x49c   : > { %9919 = vmatmul.mubr.msk.f32.vlgmr.msra.gmra.mrb[60].mxu0 %vm1102_vm1, %v15961_v14 }
 0x49d   : > { %v10572_v62 = vpack.c.bf16 %v10952_v4, %v10951_v56  ;;  %10541 = vmatpush3.bf16.xpose.msk.msra.mxu0 %vm12131_vm2, %v10536_v43  ;;  %9921 = vmatprep.mubr.msk.f32.mxu0 %vm1102_vm1, %v15962_v22  ;;  %v10566_v28 = vpack.c.bf16 %v10947_v57, %v10946_v30 }
 0x49e   : > { %10544 = vmatprep.subr.msk.bf16.mxu0 %vm12131_vm2, %v10542_v49  ;;  %v3723_v33 = vpop.permute.xlu0 %3722  ;;  %v3721_v19 = vpop.permute.xlu1 %3720 }
 0x49f   : > { %9960 = vmatprep.mubr.msk.f32.mxu1 %vm1102_vm1, %v3721_v19  ;;  %10574 = vmatprep.subr.msk.bf16.mxu1 %vm12131_vm2, %v10572_v62 }
 0x4a0   : > { %9922 = vmatmul.mubr.msk.f32.gmra.mrb[62].mxu0 %vm1102_vm1, %v15963_v18  ;;  %9961 = vmatmul.mubr.msk.f32.vlgmr.msra.gmra.mrb[44].mxu1 %vm1102_vm1, %v3723_v33 }
 0x4a1   : > { %10577 = vmatpush3.bf16.xpose.msk.msra.mxu1 %vm12131_vm2, %v10572_v62  ;;  %9946 = vmatprep.mubr.msk.f32.mxu0 %vm1102_vm1, %v3604_v6 }
 0x4a2   : > { %v3727_v61 = vpop.permute.xlu0 %3726  ;;  %v3725_v13 = vpop.permute.xlu1 %3724 }
 0x4a3   : > { %9963 = vmatprep.mubr.msk.f32.mxu1 %vm1102_vm1, %v3725_v13 }
 0x4a4   : > { %9964 = vmatmul.mubr.msk.f32.gmra.mrb[46].mxu1 %vm1102_vm1, %v3727_v61 }
 0x4a5   : > { %10547 = vmatpush3.bf16.xpose.msk.msra.mxu0 %vm12131_vm2, %v10542_v49 }
 0x4a6   : > { %10562 = vmatprep.subr.msk.bf16.mxu0 %vm12131_vm2, %v10560_v47  ;;  %v10960_v60 = vpop.permute.xlu0 %10959  ;;  %v10955_v12 = vpop.permute.xlu1 %10954 }
 0x4a7   : > { %v10957_v23 = vunpack.i.h.bf16 %v10955_v12  ;;  %v10956_v40 = vunpack.i.l.bf16 %v10955_v12  ;;  %v10962_v11 = vunpack.i.h.bf16 %v10960_v60  ;;  %v10961_v55 = vunpack.i.l.bf16 %v10960_v60 }
 0x4a9   : > { %v10578_v42 = vpack.c.bf16 %v10957_v23, %v10956_v40  ;;  %v10584_v39 = vpack.c.bf16 %v10962_v11, %v10961_v55 }
 0x4aa   : > { %v3840_v31 = vpop.permute.xlu0 %3839  ;;  %v3838_v34 = vpop.permute.xlu1 %3837 }
 0x4ab   : > { %10580 = vmatprep.subr.msk.bf16.mxu1 %vm12131_vm2, %v10578_v42 }
 0x4ac   : > { %9947 = vmatmul.mubr.msk.f32.vlgmr.msra.gmra.mrb[64].mxu0 %vm1102_vm1, %v3606_v25  ;;  %10583 = vmatpush3.bf16.xpose.msk.msra.mxu1 %vm12131_vm2, %v10578_v42 }
 0x4ad   : > { %9949 = vmatprep.mubr.msk.f32.mxu0 %vm1102_vm1, %v3608_v50  ;;  %10565 = vmatpush3.bf16.xpose.msk.msra.mxu0 %vm12131_vm2, %v10560_v47 }
 0x4ae   : > { %10568 = vmatprep.subr.msk.bf16.mxu0 %vm12131_vm2, %v10566_v28  ;;  %v3844_v46 = vpop.permute.xlu0 %3843  ;;  %v3842_v0 = vpop.permute.xlu1 %3841 }
 0x4b0   : > { %9950 = vmatmul.mubr.msk.f32.gmra.mrb[66].mxu0 %vm1102_vm1, %v3610_v51 }
 0x4b1   : > { %9974 = vmatprep.mubr.msk.f32.mxu0 %vm1102_vm1, %v3838_v34 }
 0x4b2   : > { %v3955_v45 = vpop.permute.xlu0 %3954  ;;  %v10965_v41 = vpop.permute.xlu1 %10964 }
 0x4b3   : > { %9988 = vmatprep.mubr.msk.f32.mxu1 %vm1102_vm1, %v3955_v45  ;;  %v10967_v43 = vunpack.i.h.bf16 %v10965_v41  ;;  %v10966_v58 = vunpack.i.l.bf16 %v10965_v41 }
 0x4b5   : > { %10571 = vmatpush3.bf16.xpose.msk.msra.mxu0 %vm12131_vm2, %v10566_v28  ;;  %v10590_v59 = vpack.c.bf16 %v10967_v43, %v10966_v58 }
 0x4b6   : > { %10586 = vmatprep.subr.msk.bf16.mxu0 %vm12131_vm2, %v10584_v39  ;;  %v3959_v52 = vpop.permute.xlu0 %3958  ;;  %v3957_v29 = vpop.permute.xlu1 %3956 }
 0x4b7   : > { %9989 = vmatmul.mubr.msk.f32.vlgmr.msra.gmra.mrb[48].mxu1 %vm1102_vm1, %v3957_v29 }
 0x4b8   : > { %9991 = vmatprep.mubr.msk.f32.mxu1 %vm1102_vm1, %v3959_v52 }
 0x4ba   : > { %v4072_v32 = vpop.permute.xlu0 %4071  ;;  %v3961_v7 = vpop.permute.xlu1 %3960 }
 0x4bb   : > { %9992 = vmatmul.mubr.msk.f32.gmra.mrb[50].mxu1 %vm1102_vm1, %v3961_v7 }
 0x4bc   : > { %9975 = vmatmul.mubr.msk.f32.vlgmr.msra.gmra.mrb[68].mxu0 %vm1102_vm1, %v3840_v31 }
 0x4bd   : > { %9977 = vmatprep.mubr.msk.f32.mxu0 %vm1102_vm1, %v3842_v0  ;;  %10589 = vmatpush3.bf16.xpose.msk.msra.mxu0 %vm12131_vm2, %v10584_v39 }
 0x4be   : > { %10592 = vmatprep.subr.msk.bf16.mxu0 %vm12131_vm2, %v10590_v59  ;;  %v4076_v15 = vpop.permute.xlu0 %4075  ;;  %v4074_v26 = vpop.permute.xlu1 %4073 }
 0x4c0   : > { %9978 = vmatmul.mubr.msk.f32.gmra.mrb[70].mxu0 %vm1102_vm1, %v3844_v46 }
 0x4c1   : > { %10002 = vmatprep.mubr.msk.f32.mxu0 %vm1102_vm1, %v4072_v32 }
 0x4c2   : > { %v10975_v17 = vpop.permute.xlu0 %10974  ;;  %v4078_v5 = vpop.permute.xlu1 %4077 }
 0x4c3   : > { %v10977_v10 = vunpack.i.h.bf16 %v10975_v17  ;;  %v10976_v9 = vunpack.i.l.bf16 %v10975_v17 }
 0x4c5   : > { %10595 = vmatpush3.bf16.xpose.msk.msra.mxu0 %vm12131_vm2, %v10590_v59  ;;  %v10600_v50 = vpack.c.bf16 %v10977_v10, %v10976_v9 }
 0x4c6   : > { %v10970_v21 = vpop.permute.xlu1 %10969  ;;  %v10990_v25 = vpop.permute.xlu0 %10989 }
 0x4c7   : > { %v10972_v6 = vunpack.i.h.bf16 %v10970_v21  ;;  %v10971_v44 = vunpack.i.l.bf16 %v10970_v21  ;;  %v10992_v20 = vunpack.i.h.bf16 %v10990_v25  ;;  %v10991_v36 = vunpack.i.l.bf16 %v10990_v25 }
 0x4c9   : > { %v10596_v35 = vpack.c.bf16 %v10972_v6, %v10971_v44  ;;  %v12913_v56 = vpack.c.bf16 %v10992_v20, %v10991_v36 }
 0x4ca   : > { %v10980_v51 = vpop.permute.xlu1 %10979  ;;  %v11000_v48 = vpop.permute.xlu0 %10999 }
 0x4cb   : > { %v10982_v38 = vunpack.i.h.bf16 %v10980_v51  ;;  %v10981_v53 = vunpack.i.l.bf16 %v10980_v51  ;;  %10597 = vmatprep.subr.bf16.mxu1 %v10596_v35  ;;  %v11002_v49 = vunpack.i.h.bf16 %v11000_v48  ;;  %v11001_v14 = vunpack.i.l.bf16 %v11000_v48 }
 0x4cc   : > { %10003 = vmatmul.mubr.msk.f32.vlgmr.msra.gmra.mrb[72].mxu0 %vm1102_vm1, %v4074_v26  ;;  %10599 = vmatpush3.bf16.msra.mxu1 %v10596_v35 }
 0x4cd   : > { %10005 = vmatprep.mubr.msk.f32.mxu0 %vm1102_vm1, %v4076_v15  ;;  %10601 = vmatprep.subr.bf16.mxu1 %v10600_v50  ;;  %v10604_v1 = vpack.c.bf16 %v10982_v38, %v10981_v53  ;;  %v12917_v22 = vpack.c.bf16 %v11002_v49, %v11001_v14 }
 0x4ce   : > { %v10985_v16 = vpop.permute.xlu1 %10984 }
 0x4cf   : > { %v10987_v54 = vunpack.i.h.bf16 %v10985_v16  ;;  %v10986_v4 = vunpack.i.l.bf16 %v10985_v16  ;;  %10605 = vmatprep.subr.bf16.mxu0 %v10604_v1 }
 0x4d0   : > { %10006 = vmatmul.mubr.msk.f32.gmra.mrb[74].mxu0 %vm1102_vm1, %v4078_v5  ;;  %10603 = vmatpush3.bf16.msra.mxu1 %v10600_v50 }
 0x4d1   : > { %10607 = vmatpush3.bf16.msra.mxu0 %v10604_v1  ;;  %10613 = vmatprep.subr.bf16.mxu1 %v12913_v56  ;;  %v10608_v62 = vpack.c.bf16 %v10987_v54, %v10986_v4 }
 0x4d3   : > { %10609 = vmatprep.subr.bf16.mxu0 %v10608_v62 }
 0x4d5   : > { %10611 = vmatpush3.bf16.msra.mxu0 %v10608_v62 }
 0x4d6   : > { %10621 = vmatprep.subr.bf16.mxu0 %v12917_v22 }
 0x4e0   : > { %v12920_v33 = vpop.f32.mrb[40].mxu0 }
 0x4e1   : > { %v12922_v19 = vpop.f32.mrb[41].mxu0 }
 0x4e8   : > { %v12924_v63 = vpop.f32.mrb[42].mxu0 }
 0x4e9   : > { %v12926_v2 = vpop.f32.mrb[43].mxu0 }
 0x4f3   : > { %v12928_v18 = vpop.f32.mrb[44].mxu0 }
 0x4f4   : > { %v12930_v61 = vpop.f32.mrb[45].mxu0 }
 0x4fb   : > { %v12932_v13 = vpop.f32.mrb[46].mxu0 }
 0x4fc   : > { %v12934_v47 = vpop.f32.mrb[47].mxu0 }
 0x507   : > { %v12936_v60 = vpop.f32.mrb[24].mxu1 }
 0x508   : > { %15964 = vst [vmem:[#allocation52_spill] sm:$0xff] %v12936_v60  ;;  %v12938_v12 = vpop.f32.mrb[25].mxu1 }
 0x509   : > { %15965 = vst [vmem:[#allocation43_spill] sm:$0xff] %v12938_v12 }
 0x517   : > { %v12940_v23 = vpop.f32.mrb[26].mxu1 }
 0x518   : > { %15966 = vst [vmem:[#allocation45_spill] sm:$0xff] %v12940_v23  ;;  %v12942_v40 = vpop.f32.mrb[27].mxu1 }
 0x519   : > { %15967 = vst [vmem:[#allocation55_spill] sm:$0xff] %v12942_v40 }
 0x51b   : > { %v12944_v57 = vpop.f32.mrb[28].mxu1 }
 0x51c   : > { %15968 = vst [vmem:[#allocation47_spill] sm:$0xff] %v12944_v57  ;;  %v12946_v30 = vpop.f32.mrb[29].mxu1 }
 0x51d   : > { %15969 = vst [vmem:[#allocation44_spill] sm:$0xff] %v12946_v30 }
 0x51f   : > { %v12948_v42 = vpop.f32.mrb[30].mxu1 }
 0x520   : > { %15970 = vst [vmem:[#allocation62_spill] sm:$0xff] %v12948_v42  ;;  %v12950_v31 = vpop.f32.mrb[31].mxu1 }
 0x521   : > { %15971 = vst [vmem:[#allocation58_spill] sm:$0xff] %v12950_v31 }
 0x523   : > { %v12952_v34 = vpop.f32.mrb[32].mxu1  ;;  %v12954_v28 = vpop.f32.mrb[48].mxu0 }
 0x524   : > { %15972 = vst [vmem:[#allocation46_spill] sm:$0xff] %v12952_v34  ;;  %15973 = vst [vmem:[#allocation64_spill] sm:$0xff] %v12954_v28  ;;  %v12956_v46 = vpop.f32.mrb[33].mxu1  ;;  %v12958_v0 = vpop.f32.mrb[49].mxu0 }
 0x525   : > { %15974 = vst [vmem:[#allocation60_spill] sm:$0xff] %v12956_v46  ;;  %15975 = vst [vmem:[#allocation48_spill] sm:$0xff] %v12958_v0 }
 0x527   : > { %v12960_v11 = vpop.f32.mrb[50].mxu0 }
 0x528   : > { %15976 = vst [vmem:[#allocation49_spill] sm:$0xff] %v12960_v11  ;;  %v12962_v55 = vpop.f32.mrb[51].mxu0 }
 0x529   : > { %15977 = vst [vmem:[#allocation50_spill] sm:$0xff] %v12962_v55 }
 0x52c   : > { %v12964_v45 = vpop.f32.mrb[34].mxu1 }
 0x52d   : > { %15978 = vst [vmem:[#allocation51_spill] sm:$0xff] %v12964_v45  ;;  %v12966_v41 = vpop.f32.mrb[35].mxu1 }
 0x52e   : > { %15979 = vst [vmem:[#allocation53_spill] sm:$0xff] %v12966_v41 }
 0x530   : > { %v12968_v39 = vpop.f32.mrb[52].mxu0 }
 0x531   : > { %15980 = vst [vmem:[#allocation54_spill] sm:$0xff] %v12968_v39  ;;  %v12970_v52 = vpop.f32.mrb[53].mxu0 }
 0x532   : > { %15981 = vst [vmem:[#allocation56_spill] sm:$0xff] %v12970_v52 }
 0x534   : > { %v12972_v29 = vpop.f32.mrb[54].mxu0 }
 0x535   : > { %15982 = vst [vmem:[#allocation57_spill] sm:$0xff] %v12972_v29  ;;  %v12974_v43 = vpop.f32.mrb[55].mxu0 }
 0x536   : > { %15983 = vst [vmem:[#allocation63_spill] sm:$0xff] %v12974_v43 }
 0x538   : > { %v12976_v58 = vpop.f32.mrb[56].mxu0 }
 0x539   : > { %15984 = vst [vmem:[#allocation34_spill] sm:$0xff] %v12976_v58  ;;  %v9906_v32 = vpop.f32.mrb[36].mxu1  ;;  %v12978_v7 = vpop.f32.mrb[57].mxu0 }
 0x53a   : > { %15985 = vst [vmem:[#allocation35_spill] sm:$0xff] %v12978_v7  ;;  %v12980_v59 = vmul.f32 0.35355338, %v9906_v32  ;;  %v3350_v15 = vpop.f32.mrb[37].mxu1 }
 0x53b   : > { %v12982_v26 = vmul.f32 0.35355338, %v3350_v15 }
 0x53c   : > { %v4223_v17 = vsel %vm2027_vm3, %v12980_v59, -inf }
 0x53d   : > { %4224 = vmax.xlane.f32.xlu1 %v4223_v17  ;;  %v9909_v5 = vpop.f32.mrb[38].mxu1  ;;  %v4220_v10 = vsel %vm2027_vm3, %v12982_v26, -inf }
 0x53e   : > { %v12988_v9 = vmul.f32 0.35355338, %v9909_v5  ;;  %4221 = vmax.xlane.f32.xlu0 %v4220_v10  ;;  %v3360_v21 = vpop.f32.mrb[39].mxu1 }
 0x53f   : > { %v12992_v6 = vmul.f32 0.35355338, %v3360_v21 }
 0x540   : > { %v4229_v25 = vsel %vm2027_vm3, %v12988_v9, -inf }
 0x541   : > { %v4226_v44 = vsel %vm2027_vm3, %v12992_v6, -inf }
 0x542   : > { %4230 = vmax.xlane.f32.xlu0 %v4229_v25 }
 0x546   : > { %4227 = vmax.xlane.f32.xlu0 %v4226_v44 }
 0x549   : > { %v9934_v35 = vpop.f32.mrb[40].mxu1 }
 0x54a   : > { %v12996_v51 = vmul.f32 0.35355338, %v9934_v35  ;;  %v3584_v50 = vpop.f32.mrb[41].mxu1 }
 0x54b   : > { %v12998_v20 = vmul.f32 0.35355338, %v3584_v50 }
 0x54c   : > { %v4247_v36 = vsel %vm2027_vm3, %v12996_v51, -inf }
 0x54d   : > { %4248 = vmax.xlane.f32.xlu0 %v4247_v36  ;;  %v4244_v38 = vsel %vm2027_vm3, %v12998_v20, -inf }
 0x54e   : > { %4245 = vmax.xlane.f32.xlu1 %v4244_v38 }
 0x55e   : > { %v9937_v53 = vpop.f32.mrb[42].mxu1 }
 0x55f   : > { %v13004_v48 = vmul.f32 0.35355338, %v9937_v53  ;;  %v3594_v1 = vpop.f32.mrb[43].mxu1 }
 0x560   : > { %v13006_v16 = vmul.f32 0.35355338, %v3594_v1 }
 0x561   : > { %v4253_v54 = vsel %vm2027_vm3, %v13004_v48, -inf }
 0x562   : > { %4254 = vmax.xlane.f32.xlu0 %v4253_v54  ;;  %v4250_v4 = vsel %vm2027_vm3, %v13006_v16, -inf }
 0x563   : > { %4251 = vmax.xlane.f32.xlu1 %v4250_v4 }
 0x56b   : > { %v13012_v49 = vpop.f32.mrb[58].mxu0 }
 0x56c   : > { %15986 = vst [vmem:[#allocation68_spill] sm:$0xff] %v13012_v49  ;;  %v13014_v14 = vpop.f32.mrb[59].mxu0 }
 0x56d   : > { %15987 = vst [vmem:[#allocation36_spill] sm:$0xff] %v13014_v14 }
 0x56f   : > { %v9920_v62 = vpop.f32.mrb[60].mxu0 }
 0x570   : > { %v13016_v32 = vmul.f32 0.35355338, %v9920_v62  ;;  %v3467_v15 = vpop.f32.mrb[61].mxu0 }
 0x571   : > { %v13018_v17 = vmul.f32 0.35355338, %v3467_v15 }
 0x572   : > { %v4235_v5 = vsel %vm2027_vm3, %v13016_v32, -inf }
 0x573   : > { %4236 = vmax.xlane.f32.xlu0 %v4235_v5  ;;  %v9923_v10 = vpop.f32.mrb[62].mxu0  ;;  %v9962_v21 = vpop.f32.mrb[44].mxu1  ;;  %v4232_v25 = vsel %vm2027_vm3, %v13018_v17, -inf }
 0x574   : > { %v13024_v44 = vmul.f32 0.35355338, %v9923_v10  ;;  %4233 = vmax.xlane.f32.xlu1 %v4232_v25  ;;  %v3477_v35 = vpop.f32.mrb[63].mxu0  ;;  %v3818_v50 = vpop.f32.mrb[45].mxu1  ;;  %v13028_v38 = vmul.f32 0.35355338, %v9962_v21 }
 0x575   : > { %v13026_v36 = vmul.f32 0.35355338, %v3477_v35  ;;  %v13032_v1 = vmul.f32 0.35355338, %v3818_v50 }
 0x576   : > { %v4241_v53 = vsel %vm2027_vm3, %v13024_v44, -inf  ;;  %v4271_v5 = vsel %vm2027_vm3, %v13028_v38, -inf }
 0x577   : > { %4242 = vmax.xlane.f32.xlu0 %v4241_v53  ;;  %v9965_v54 = vpop.f32.mrb[46].mxu1  ;;  %v4238_v4 = vsel %vm2027_vm3, %v13026_v36, -inf  ;;  %v4268_v21 = vsel %vm2027_vm3, %v13032_v1, -inf }
 0x578   : > { %4239 = vmax.xlane.f32.xlu1 %v4238_v4  ;;  %v3828_v62 = vpop.f32.mrb[47].mxu1  ;;  %v13036_v15 = vmul.f32 0.35355338, %v9965_v54 }
 0x579   : > { %v13040_v10 = vmul.f32 0.35355338, %v3828_v62 }
 0x57a   : > { %v4277_v25 = vsel %vm2027_vm3, %v13036_v15, -inf }
 0x57b   : > { %4272 = vmax.xlane.f32.xlu0 %v4271_v5  ;;  %v4274_v50 = vsel %vm2027_vm3, %v13040_v10, -inf }
 0x57c   : > { %4269 = vmax.xlane.f32.xlu1 %v4268_v21 }
 0x57f   : > { %v9948_v35 = vpop.f32.mrb[64].mxu0  ;;  %4278 = vmax.xlane.f32.xlu0 %v4277_v25 }
 0x580   : > { %v13048_v53 = vmul.f32 0.35355338, %v9948_v35  ;;  %v3701_v54 = vpop.f32.mrb[65].mxu0  ;;  %4275 = vmax.xlane.f32.xlu1 %v4274_v50 }
 0x581   : > { %v13050_v4 = vmul.f32 0.35355338, %v3701_v54 }
 0x582   : > { %v4259_v62 = vsel %vm2027_vm3, %v13048_v53, -inf }
 0x583   : > { %v9951_v5 = vpop.f32.mrb[66].mxu0  ;;  %4260 = vmax.xlane.f32.xlu0 %v4259_v62  ;;  %v4256_v21 = vsel %vm2027_vm3, %v13050_v4, -inf }
 0x584   : > { %v13056_v49 = vmul.f32 0.35355338, %v9951_v5  ;;  %v3711_v25 = vpop.f32.mrb[67].mxu0  ;;  %4257 = vmax.xlane.f32.xlu1 %v4256_v21 }
 0x585   : > { %v13058_v14 = vmul.f32 0.35355338, %v3711_v25 }
 0x586   : > { %v4265_v35 = vsel %vm2027_vm3, %v13056_v49, -inf }
 0x587   : > { %4266 = vmax.xlane.f32.xlu0 %v4265_v35  ;;  %v4262_v50 = vsel %vm2027_vm3, %v13058_v14, -inf }
 0x588   : > { %4263 = vmax.xlane.f32.xlu1 %v4262_v50 }
 0x58a   : > { %v9990_v54 = vpop.f32.mrb[48].mxu1 }
 0x58b   : > { %v13064_v58 = vmul.f32 0.35355338, %v9990_v54  ;;  %v4052_v62 = vpop.f32.mrb[49].mxu1 }
 0x58c   : > { %v13066_v7 = vmul.f32 0.35355338, %v4052_v62 }
 0x58d   : > { %v4295_v5 = vsel %vm2027_vm3, %v13064_v58, -inf }
 0x58e   : > { %4296 = vmax.xlane.f32.xlu0 %v4295_v5  ;;  %v9993_v21 = vpop.f32.mrb[50].mxu1  ;;  %v4292_v25 = vsel %vm2027_vm3, %v13066_v7, -inf }
 0x58f   : > { %v9976_v45 = vpop.f32.mrb[68].mxu0  ;;  %v13072_v35 = vmul.f32 0.35355338, %v9993_v21  ;;  %4293 = vmax.xlane.f32.xlu1 %v4292_v25  ;;  %v4062_v41 = vpop.f32.mrb[51].mxu1 }
 0x590   : > { %v3935_v50 = vpop.f32.mrb[69].mxu0  ;;  %v13074_v34 = vmul.f32 0.35355338, %v4062_v41  ;;  %v13076_v54 = vmul.f32 0.35355338, %v9976_v45 }
 0x591   : > { %v4301_v62 = vsel %vm2027_vm3, %v13072_v35, -inf  ;;  %v13080_v46 = vmul.f32 0.35355338, %v3935_v50 }
 0x592   : > { %4302 = vmax.xlane.f32.xlu0 %v4301_v62  ;;  %v4298_v5 = vsel %vm2027_vm3, %v13074_v34, -inf  ;;  %v4283_v41 = vsel %vm2027_vm3, %v13076_v54, -inf }
 0x593   : > { %v9979_v29 = vpop.f32.mrb[70].mxu0  ;;  %4299 = vmax.xlane.f32.xlu1 %v4298_v5  ;;  %v4280_v45 = vsel %vm2027_vm3, %v13080_v46, -inf }
 0x594   : > { %v3945_v21 = vpop.f32.mrb[71].mxu0  ;;  %v13084_v43 = vmul.f32 0.35355338, %v9979_v29 }
 0x595   : > { %v13088_v25 = vmul.f32 0.35355338, %v3945_v21 }
 0x596   : > { %4284 = vmax.xlane.f32.xlu0 %v4283_v41  ;;  %v4289_v50 = vsel %vm2027_vm3, %v13084_v43, -inf }
 0x597   : > { %4281 = vmax.xlane.f32.xlu1 %v4280_v45  ;;  %v4286_v62 = vsel %vm2027_vm3, %v13088_v25, -inf }
 0x59a   : > { %4290 = vmax.xlane.f32.xlu0 %v4289_v50 }
 0x59b   : > { %4287 = vmax.xlane.f32.xlu1 %v4286_v62 }
 0x59f   : > { %v10004_v29 = vpop.f32.mrb[72].mxu0 }
 0x5a0   : > { %v13096_v5 = vmul.f32 0.35355338, %v10004_v29  ;;  %v4169_v39 = vpop.f32.mrb[73].mxu0  ;;  %v13114_v29 = vpop.permute.xlu1 %10994 }
 0x5a1   : > { %v13098_v52 = vmul.f32 0.35355338, %v4169_v39 }
 0x5a2   : > { %v4307_v21 = vsel %vm2027_vm3, %v13096_v5, -inf }
 0x5a3   : > { %v10007_v41 = vpop.f32.mrb[74].mxu0  ;;  %4308 = vmax.xlane.f32.xlu0 %v4307_v21  ;;  %v4304_v45 = vsel %vm2027_vm3, %v13098_v52, -inf }
 0x5a4   : > { %v13104_v42 = vmul.f32 0.35355338, %v10007_v41  ;;  %v4179_v50 = vpop.f32.mrb[75].mxu0  ;;  %4305 = vmax.xlane.f32.xlu1 %v4304_v45  ;;  %v13116_v21 = vpop.permute.xlu1 %11004 }
 0x5a5   : > { %v13106_v31 = vmul.f32 0.35355338, %v4179_v50  ;;  %v13118_v41 = vpop.permute.xlu0 %11009 }
 0x5a6   : > { %v4313_v62 = vsel %vm2027_vm3, %v13104_v42, -inf }
 0x5a7   : > { %4314 = vmax.xlane.f32.xlu0 %v4313_v62  ;;  %v4310_v39 = vsel %vm2027_vm3, %v13106_v31, -inf }
 0x5a8   : > { %4311 = vmax.xlane.f32.xlu1 %v4310_v39  ;;  %v13120_v45 = vpop.permute.xlu1 %11014 }
 0x5a9   : > { %v13122_v50 = vpop.permute.xlu0 %11019 }
 0x5b9   : > { %11024 = vrot.lane.b32.xlu1 %v12019_v8, %s11574_s19 }
 0x5ca   : > { %v4225_v57 = vpop.xlane.xlu1 %4224 }
 0x5cb   : > { %v4317_v62 = vsub.f32 %v12980_v59, %v4225_v57  ;;  %v4222_v30 = vpop.xlane.xlu0 %4221 }
 0x5cc   : > { %v4316_v11 = vsub.f32 %v12982_v26, %v4222_v30 }
 0x5cd   : > { %v4350_v39 = vmul.f32 1.442695, %v4317_v62 }
 0x5ce   : > { %v4348_v55 = vmul.f32 1.442695, %v4316_v11 }
 0x5cf   : > { %11176 = vpow2.f32 %v4350_v39  ;;  %v4231_v8 = vpop.xlane.xlu0 %4230 }
 0x5d0   : > { %11178 = vpow2.f32 %v4348_v55  ;;  %v4319_v28 = vsub.f32 %v12988_v9, %v4231_v8 }
 0x5d2   : > { %v4354_v0 = vmul.f32 1.442695, %v4319_v28 }
 0x5d3   : > { %v4228_v23 = vpop.xlane.xlu0 %4227 }
 0x5d4   : > { %11180 = vpow2.f32 %v4354_v0  ;;  %v4318_v40 = vsub.f32 %v12992_v6, %v4228_v23 }
 0x5d6   : > { %v4352_v60 = vmul.f32 1.442695, %v4318_v40 }
 0x5d8   : > { %11182 = vpow2.f32 %v4352_v60 }
 0x5d9   : > { %v13128_v12 = vpop.eup %11176 }
 0x5da   : > { %v13130_v57 = vpop.eup %11178  ;;  %v4249_v59 = vpop.xlane.xlu0 %4248  ;;  %v4415_v30 = vsel %vm2027_vm3, %v13128_v12, 0.0 }
 0x5db   : > { %v4325_v11 = vsub.f32 %v12996_v51, %v4249_v59  ;;  %v4246_v55 = vpop.xlane.xlu1 %4245  ;;  %4416 = vadd.xlane.f32.xlu0 %v4415_v30  ;;  %v4412_v0 = vsel %vm2027_vm3, %v13130_v57, 0.0 }
 0x5dc   : > { %v4324_v28 = vsub.f32 %v12998_v20, %v4246_v55 }
 0x5dd   : > { %v4366_v23 = vmul.f32 1.442695, %v4325_v11  ;;  %4413 = vadd.xlane.f32.xlu1 %v4412_v0 }
 0x5de   : > { %v13138_v60 = vpop.eup %11180  ;;  %v4364_v40 = vmul.f32 1.442695, %v4324_v28 }
 0x5df   : > { %11184 = vpow2.f32 %v4366_v23  ;;  %v4421_v26 = vsel %vm2027_vm3, %v13138_v60, 0.0 }
 0x5e0   : > { %11186 = vpow2.f32 %v4364_v40  ;;  %4422 = vadd.xlane.f32.xlu0 %v4421_v26 }
 0x5e2   : > { %v13142_v9 = vpop.eup %11182 }
 0x5e3   : > { %v4418_v6 = vsel %vm2027_vm3, %v13142_v9, 0.0 }
 0x5e4   : > { %4419 = vadd.xlane.f32.xlu1 %v4418_v6 }
 0x5e9   : > { %v13146_v51 = vpop.eup %11184 }
 0x5ea   : > { %v13148_v20 = vpop.eup %11186  ;;  %v4439_v62 = vsel %vm2027_vm3, %v13146_v51, 0.0 }
 0x5eb   : > { %4440 = vadd.xlane.f32.xlu0 %v4439_v62  ;;  %v4436_v39 = vsel %vm2027_vm3, %v13148_v20, 0.0 }
 0x5ec   : > { %4437 = vadd.xlane.f32.xlu1 %v4436_v39 }
 0x5ef   : > { %v4255_v8 = vpop.xlane.xlu0 %4254 }
 0x5f0   : > { %v4327_v59 = vsub.f32 %v13004_v48, %v4255_v8  ;;  %v4252_v30 = vpop.xlane.xlu1 %4251 }
 0x5f1   : > { %v4326_v11 = vsub.f32 %v13006_v16, %v4252_v30 }
 0x5f2   : > { %v4370_v55 = vmul.f32 1.442695, %v4327_v59 }
 0x5f3   : > { %v4368_v28 = vmul.f32 1.442695, %v4326_v11 }
 0x5f4   : > { %11188 = vpow2.f32 %v4370_v55 }
 0x5f5   : > { %11190 = vpow2.f32 %v4368_v28 }
 0x5fe   : > { %v13156_v0 = vpop.eup %11188 }
 0x5ff   : > { %v4445_v23 = vsel %vm2027_vm3, %v13156_v0, 0.0  ;;  %v13160_v40 = vpop.eup %11190 }
 0x600   : > { %v4237_v26 = vpop.xlane.xlu0 %4236  ;;  %4446 = vadd.xlane.f32.xlu0 %v4445_v23  ;;  %v4442_v16 = vsel %vm2027_vm3, %v13160_v40, 0.0 }
 0x601   : > { %v4321_v6 = vsub.f32 %v13016_v32, %v4237_v26  ;;  %v4234_v62 = vpop.xlane.xlu1 %4233 }
 0x602   : > { %v4320_v48 = vsub.f32 %v13018_v17, %v4234_v62 }
 0x603   : > { %v4358_v39 = vmul.f32 1.442695, %v4321_v6 }
 0x604   : > { %v4356_v8 = vmul.f32 1.442695, %v4320_v48  ;;  %v4243_v59 = vpop.xlane.xlu0 %4242  ;;  %4443 = vadd.xlane.f32.xlu0 %v4442_v16 }
 0x605   : > { %11192 = vpow2.f32 %v4358_v39  ;;  %v4323_v30 = vsub.f32 %v13024_v44, %v4243_v59  ;;  %v4240_v11 = vpop.xlane.xlu1 %4239 }
 0x606   : > { %11194 = vpow2.f32 %v4356_v8  ;;  %v4322_v55 = vsub.f32 %v13026_v36, %v4240_v11 }
 0x607   : > { %v4362_v28 = vmul.f32 1.442695, %v4323_v30 }
 0x608   : > { %v4360_v23 = vmul.f32 1.442695, %v4322_v55  ;;  %v4273_v32 = vpop.xlane.xlu0 %4272 }
 0x609   : > { %11196 = vpow2.f32 %v4362_v28  ;;  %v4333_v17 = vsub.f32 %v13028_v38, %v4273_v32  ;;  %v4270_v26 = vpop.xlane.xlu1 %4269 }
 0x60a   : > { %11198 = vpow2.f32 %v4360_v23  ;;  %v4332_v6 = vsub.f32 %v13032_v1, %v4270_v26 }
 0x60b   : > { %v4382_v62 = vmul.f32 1.442695, %v4333_v17 }
 0x60c   : > { %v4380_v48 = vmul.f32 1.442695, %v4332_v6  ;;  %v4279_v16 = vpop.xlane.xlu0 %4278 }
 0x60d   : > { %11200 = vpow2.f32 %v4382_v62  ;;  %v4335_v44 = vsub.f32 %v13036_v15, %v4279_v16  ;;  %v4276_v39 = vpop.xlane.xlu1 %4275 }
 0x60e   : > { %11202 = vpow2.f32 %v4380_v48  ;;  %v4334_v36 = vsub.f32 %v13040_v10, %v4276_v39 }
 0x60f   : > { %v13172_v8 = vpop.eup %11192  ;;  %v4386_v59 = vmul.f32 1.442695, %v4335_v44 }
 0x610   : > { %v13174_v30 = vpop.eup %11194  ;;  %v4384_v38 = vmul.f32 1.442695, %v4334_v36  ;;  %v4261_v11 = vpop.xlane.xlu0 %4260  ;;  %v4427_v1 = vsel %vm2027_vm3, %v13172_v8, 0.0 }
 0x611   : > { %11204 = vpow2.f32 %v4386_v59  ;;  %v4329_v55 = vsub.f32 %v13048_v53, %v4261_v11  ;;  %v4258_v28 = vpop.xlane.xlu1 %4257  ;;  %4428 = vadd.xlane.f32.xlu0 %v4427_v1  ;;  %v4424_v15 = vsel %vm2027_vm3, %v13174_v30, 0.0 }
 0x612   : > { %11206 = vpow2.f32 %v4384_v38  ;;  %v4328_v10 = vsub.f32 %v13050_v4, %v4258_v28  ;;  %4425 = vadd.xlane.f32.xlu1 %v4424_v15 }
 0x613   : > { %v13182_v23 = vpop.eup %11196  ;;  %v4374_v32 = vmul.f32 1.442695, %v4329_v55 }
 0x614   : > { %v13184_v17 = vpop.eup %11198  ;;  %v4372_v26 = vmul.f32 1.442695, %v4328_v10  ;;  %v4267_v6 = vpop.xlane.xlu0 %4266  ;;  %v4433_v62 = vsel %vm2027_vm3, %v13182_v23, 0.0 }
 0x615   : > { %11208 = vpow2.f32 %v4374_v32  ;;  %v4331_v53 = vsub.f32 %v13056_v49, %v4267_v6  ;;  %v4264_v48 = vpop.xlane.xlu1 %4263  ;;  %4434 = vadd.xlane.f32.xlu0 %v4433_v62  ;;  %v4430_v16 = vsel %vm2027_vm3, %v13184_v17, 0.0 }
 0x616   : > { %11210 = vpow2.f32 %v4372_v26  ;;  %v4330_v4 = vsub.f32 %v13058_v14, %v4264_v48  ;;  %4431 = vadd.xlane.f32.xlu1 %v4430_v16 }
 0x617   : > { %v13192_v44 = vpop.eup %11200  ;;  %v4378_v39 = vmul.f32 1.442695, %v4331_v53 }
 0x618   : > { %v13194_v36 = vpop.eup %11202  ;;  %v4376_v59 = vmul.f32 1.442695, %v4330_v4  ;;  %v4463_v38 = vsel %vm2027_vm3, %v13192_v44, 0.0 }
 0x619   : > { %11212 = vpow2.f32 %v4378_v39  ;;  %v4460_v49 = vsel %vm2027_vm3, %v13194_v36, 0.0 }
 0x61a   : > { %4461 = vadd.xlane.f32.xlu0 %v4460_v49  ;;  %4464 = vadd.xlane.f32.xlu1 %v4463_v38  ;;  %11214 = vpow2.f32 %v4376_v59 }
 0x61b   : > { %v13200_v11 = vpop.eup %11204  ;;  %v4297_v1 = vpop.xlane.xlu0 %4296 }
 0x61c   : > { %v13202_v14 = vpop.eup %11206  ;;  %v4341_v55 = vsub.f32 %v13064_v58, %v4297_v1  ;;  %v4294_v28 = vpop.xlane.xlu1 %4293  ;;  %v4469_v15 = vsel %vm2027_vm3, %v13200_v11, 0.0 }
 0x61d   : > { %v4340_v10 = vsub.f32 %v13066_v7, %v4294_v28  ;;  %v4466_v32 = vsel %vm2027_vm3, %v13202_v14, 0.0 }
 0x61e   : > { %v4398_v26 = vmul.f32 1.442695, %v4341_v55  ;;  %4467 = vadd.xlane.f32.xlu0 %v4466_v32  ;;  %4470 = vadd.xlane.f32.xlu1 %v4469_v15 }
 0x61f   : > { %v13210_v6 = vpop.eup %11208  ;;  %v4396_v62 = vmul.f32 1.442695, %v4340_v10  ;;  %v4303_v53 = vpop.xlane.xlu0 %4302 }
 0x620   : > { %v13212_v48 = vpop.eup %11210  ;;  %11216 = vpow2.f32 %v4398_v26  ;;  %v4343_v58 = vsub.f32 %v13072_v35, %v4303_v53  ;;  %v4300_v16 = vpop.xlane.xlu1 %4299  ;;  %v4451_v4 = vsel %vm2027_vm3, %v13210_v6, 0.0 }
 0x621   : > { %11218 = vpow2.f32 %v4396_v62  ;;  %v4342_v7 = vsub.f32 %v13074_v34, %v4300_v16  ;;  %v4448_v39 = vsel %vm2027_vm3, %v13212_v48, 0.0 }
 0x622   : > { %v4402_v59 = vmul.f32 1.442695, %v4343_v58  ;;  %4452 = vadd.xlane.f32.xlu0 %v4451_v4  ;;  %4449 = vadd.xlane.f32.xlu1 %v4448_v39 }
 0x623   : > { %v13220_v38 = vpop.eup %11212  ;;  %v4400_v49 = vmul.f32 1.442695, %v4342_v7  ;;  %v4285_v1 = vpop.xlane.xlu0 %4284 }
 0x624   : > { %11220 = vpow2.f32 %v4402_v59  ;;  %v4337_v35 = vsub.f32 %v13076_v54, %v4285_v1  ;;  %v4282_v55 = vpop.xlane.xlu1 %4281  ;;  %v4457_v28 = vsel %vm2027_vm3, %v13220_v38, 0.0  ;;  %v13226_v15 = vpop.eup %11214 }
 0x625   : > { %11222 = vpow2.f32 %v4400_v49  ;;  %v4336_v34 = vsub.f32 %v13080_v46, %v4282_v55  ;;  %v4454_v58 = vsel %vm2027_vm3, %v13226_v15, 0.0 }
 0x626   : > { %v4390_v10 = vmul.f32 1.442695, %v4337_v35  ;;  %4458 = vadd.xlane.f32.xlu0 %v4457_v28 }
 0x627   : > { %v4388_v32 = vmul.f32 1.442695, %v4336_v34  ;;  %v4291_v26 = vpop.xlane.xlu0 %4290 }
 0x628   : > { %11224 = vpow2.f32 %v4390_v10  ;;  %v4339_v62 = vsub.f32 %v13084_v43, %v4291_v26  ;;  %v4288_v53 = vpop.xlane.xlu1 %4287 }
 0x629   : > { %11226 = vpow2.f32 %v4388_v32  ;;  %v4338_v54 = vsub.f32 %v13088_v25, %v4288_v53 }
 0x62a   : > { %v13232_v16 = vpop.eup %11216  ;;  %v4394_v4 = vmul.f32 1.442695, %v4339_v62  ;;  %4455 = vadd.xlane.f32.xlu0 %v4454_v58 }
 0x62b   : > { %v13234_v46 = vpop.eup %11218  ;;  %v4392_v7 = vmul.f32 1.442695, %v4338_v54  ;;  %v4487_v39 = vsel %vm2027_vm3, %v13232_v16, 0.0 }
 0x62c   : > { %11228 = vpow2.f32 %v4394_v4  ;;  %4488 = vadd.xlane.f32.xlu1 %v4487_v39  ;;  %v4484_v43 = vsel %vm2027_vm3, %v13234_v46, 0.0 }
 0x62d   : > { %11230 = vpow2.f32 %v4392_v7 }
 0x62e   : > { %v13240_v25 = vpop.eup %11220  ;;  %4485 = vadd.xlane.f32.xlu0 %v4484_v43 }
 0x62f   : > { %v13242_v59 = vpop.eup %11222  ;;  %v4493_v49 = vsel %vm2027_vm3, %v13240_v25, 0.0 }
 0x630   : > { %v4309_v1 = vpop.xlane.xlu0 %4308  ;;  %4494 = vadd.xlane.f32.xlu1 %v4493_v49  ;;  %v4490_v35 = vsel %vm2027_vm3, %v13242_v59, 0.0 }
 0x631   : > { %v4345_v55 = vsub.f32 %v13096_v5, %v4309_v1  ;;  %v4306_v28 = vpop.xlane.xlu1 %4305 }
 0x632   : > { %v13249_v34 = vpop.eup %11224  ;;  %v4344_v10 = vsub.f32 %v13098_v52, %v4306_v28  ;;  %4491 = vadd.xlane.f32.xlu0 %v4490_v35 }
 0x633   : > { %v13252_v32 = vpop.eup %11226  ;;  %v4406_v26 = vmul.f32 1.442695, %v4345_v55  ;;  %v4475_v62 = vsel %vm2027_vm3, %v13249_v34, 0.0 }
 0x634   : > { %v4404_v53 = vmul.f32 1.442695, %v4344_v10  ;;  %v4315_v54 = vpop.xlane.xlu0 %4314  ;;  %4476 = vadd.xlane.f32.xlu1 %v4475_v62  ;;  %v4472_v58 = vsel %vm2027_vm3, %v13252_v32, 0.0 }
 0x635   : > { %11232 = vpow2.f32 %v4406_v26  ;;  %v4347_v5 = vsub.f32 %v13104_v42, %v4315_v54  ;;  %v4312_v4 = vpop.xlane.xlu1 %4311 }
 0x636   : > { %v13259_v7 = vpop.eup %11228  ;;  %11234 = vpow2.f32 %v4404_v53  ;;  %v4346_v52 = vsub.f32 %v13106_v31, %v4312_v4  ;;  %4473 = vadd.xlane.f32.xlu0 %v4472_v58 }
 0x637   : > { %v13262_v39 = vpop.eup %11230  ;;  %v4410_v43 = vmul.f32 1.442695, %v4347_v5  ;;  %v4481_v49 = vsel %vm2027_vm3, %v13259_v7, 0.0 }
 0x638   : > { %v4408_v1 = vmul.f32 1.442695, %v4346_v52  ;;  %4482 = vadd.xlane.f32.xlu1 %v4481_v49  ;;  %v4478_v35 = vsel %vm2027_vm3, %v13262_v39, 0.0  ;;  %v10996_v49 = vunpack.i.l.bf16 %v13114_v29 }
 0x639   : > { %11236 = vpow2.f32 %v4410_v43  ;;  %v13292_v54 = vpop.permute.xlu1 %11024 }
 0x63a   : > { %11238 = vpow2.f32 %v4408_v1  ;;  %4479 = vadd.xlane.f32.xlu0 %v4478_v35  ;;  %v11012_v35 = vunpack.i.h.bf16 %v13118_v41 }
 0x63f   : > { %v13268_v42 = vpop.eup %11232 }
 0x640   : > { %v13270_v55 = vpop.eup %11234  ;;  %v4499_v31 = vsel %vm2027_vm3, %v13268_v42, 0.0 }
 0x641   : > { %4500 = vadd.xlane.f32.xlu1 %v4499_v31  ;;  %v4496_v28 = vsel %vm2027_vm3, %v13270_v55, 0.0  ;;  %v11011_v31 = vunpack.i.l.bf16 %v13118_v41 }
 0x642   : > { %4497 = vadd.xlane.f32.xlu0 %v4496_v28 }
 0x643   : > { %v13276_v10 = vpop.eup %11236 }
 0x644   : > { %v13278_v26 = vpop.eup %11238  ;;  %v4505_v62 = vsel %vm2027_vm3, %v13276_v10, 0.0 }
 0x645   : > { %4506 = vadd.xlane.f32.xlu1 %v4505_v62  ;;  %v4502_v53 = vsel %vm2027_vm3, %v13278_v26, 0.0 }
 0x646   : > { %4503 = vadd.xlane.f32.xlu0 %v4502_v53  ;;  %v10628_v53 = vpack.c.bf16 %v11012_v35, %v11011_v31 }
 0x656   : > { %11034 = vrot.lane.b32.xlu1 %v15913_v37, %s11574_s19 }
 0x65a   : > { %11039 = vrot.lane.b32.xlu1 %v15916_v3, %s11574_s19  ;;  %v10997_v3 = vunpack.i.h.bf16 %v13114_v29 }
 0x65c   : > { %11029 = vrot.lane.b32.xlu0 %v12031_v24, %s11574_s19  ;;  %v10616_v62 = vpack.c.bf16 %v10997_v3, %v10996_v49 }
 0x65e   : > { %11044 = vrot.lane.b32.xlu1 %v15920_v27, %s11574_s19 }
 0x668   : > { %v4417_v58 = vpop.xlane.xlu0 %4416 }
 0x669   : > { %11240 = vrcp.f32 %v4417_v58 }
 0x66a   : > { %v4414_v5 = vpop.xlane.xlu1 %4413 }
 0x66b   : > { %11242 = vrcp.f32 %v4414_v5 }
 0x66d   : > { %v4423_v4 = vpop.xlane.xlu0 %4422 }
 0x66e   : > { %11244 = vrcp.f32 %v4423_v4  ;;  %v11017_v4 = vunpack.i.h.bf16 %v13120_v45 }
 0x671   : > { %v4420_v52 = vpop.xlane.xlu1 %4419 }
 0x672   : > { %11246 = vrcp.f32 %v4420_v52 }
 0x673   : > { %v11241_v37 = vpop.eup %11240 }
 0x674   : > { %v4541_v27 = vmul.f32 %v11241_v37, %v13128_v12 }
 0x675   : > { %v11243_v43 = vpop.eup %11242 }
 0x676   : > { %v4540_v24 = vmul.f32 %v11243_v43, %v13130_v57 }
 0x678   : > { %v4441_v1 = vpop.xlane.xlu0 %4440  ;;  %10016 = vmatprep.mubr.msk.f32.mxu1 %vm2027_vm3, %v4540_v24  ;;  %v11245_v29 = vpop.eup %11244 }
 0x679   : > { %11248 = vrcp.f32 %v4441_v1  ;;  %v4438_v28 = vpop.xlane.xlu1 %4437  ;;  %10017 = vmatmul.mubr.msk.f32.vlgmr.msra.gmra.mrb[52].mxu1 %vm2027_vm3, %v4541_v27  ;;  %v4543_v58 = vmul.f32 %v11245_v29, %v13138_v60 }
 0x67a   : > { %11250 = vrcp.f32 %v4438_v28  ;;  %10615 = vmatpush3.bf16.msra.mxu1 %v12913_v56  ;;  %v11016_v56 = vunpack.i.l.bf16 %v13120_v45 }
 0x67b   : > { %10617 = vmatprep.subr.bf16.mxu1 %v10616_v62 }
 0x67c   : > { %v11247_v57 = vpop.eup %11246  ;;  %v10632_v60 = vpack.c.bf16 %v11017_v4, %v11016_v56  ;;  %v11021_v4 = vunpack.i.l.bf16 %v13122_v50 }
 0x67d   : > { %v4542_v12 = vmul.f32 %v11247_v57, %v13142_v9 }
 0x67e   : > { %10619 = vmatpush3.bf16.msra.mxu1 %v10616_v62  ;;  %v11007_v62 = vunpack.i.h.bf16 %v13116_v21 }
 0x67f   : > { %10019 = vmatprep.mubr.msk.f32.mxu1 %vm2027_vm3, %v4542_v12  ;;  %10629 = vmatprep.subr.bf16.mxu1 %v10628_v53 }
 0x680   : > { %10020 = vmatmul.mubr.msk.f32.gmra.mrb[54].mxu1 %vm2027_vm3, %v4543_v58 }
 0x683   : > { %v11249_v41 = vpop.eup %11248 }
 0x684   : > { %v11251_v5 = vpop.eup %11250  ;;  %v4549_v37 = vmul.f32 %v11249_v41, %v13146_v51 }
 0x685   : > { %v4548_v52 = vmul.f32 %v11251_v5, %v13148_v20  ;;  %v11022_v5 = vunpack.i.h.bf16 %v13122_v50 }
 0x687   : > { %10044 = vmatprep.mubr.msk.f32.mxu1 %vm2027_vm3, %v4548_v52  ;;  %v10636_v50 = vpack.c.bf16 %v11022_v5, %v11021_v4 }
 0x688   : > { %10045 = vmatmul.mubr.msk.f32.vlgmr.msra.gmra.mrb[56].mxu1 %vm2027_vm3, %v4549_v37 }
 0x689   : > { %10631 = vmatpush3.bf16.msra.mxu1 %v10628_v53 }
 0x68a   : > { %10633 = vmatprep.subr.bf16.mxu1 %v10632_v60 }
 0x68d   : > { %10635 = vmatpush3.bf16.msra.mxu1 %v10632_v60  ;;  %v4447_v9 = vpop.xlane.xlu0 %4446 }
 0x68e   : > { %11252 = vrcp.f32 %v4447_v9 }
 0x691   : > { %v4444_v43 = vpop.xlane.xlu0 %4443 }
 0x692   : > { %11254 = vrcp.f32 %v4444_v43 }
 0x698   : > { %v11253_v3 = vpop.eup %11252 }
 0x699   : > { %v4551_v20 = vmul.f32 %v11253_v3, %v13156_v0  ;;  %v11006_v0 = vunpack.i.l.bf16 %v13116_v21 }
 0x69b   : > { %v10624_v56 = vpack.c.bf16 %v11007_v62, %v11006_v0 }
 0x69c   : > { %v11255_v49 = vpop.eup %11254 }
 0x69d   : > { %v4550_v45 = vmul.f32 %v11255_v49, %v13160_v40 }
 0x69e   : > { %v4429_v24 = vpop.xlane.xlu0 %4428 }
 0x69f   : > { %11256 = vrcp.f32 %v4429_v24  ;;  %10047 = vmatprep.mubr.msk.f32.mxu1 %vm2027_vm3, %v4550_v45  ;;  %v4426_v51 = vpop.xlane.xlu1 %4425 }
 0x6a0   : > { %11258 = vrcp.f32 %v4426_v51  ;;  %10048 = vmatmul.mubr.msk.f32.gmra.mrb[58].mxu1 %vm2027_vm3, %v4551_v20  ;;  %v11027_v20 = vunpack.i.h.bf16 %v13292_v54  ;;  %v11026_v51 = vunpack.i.l.bf16 %v13292_v54 }
 0x6a2   : > { %v4435_v27 = vpop.xlane.xlu0 %4434 }
 0x6a3   : > { %11260 = vrcp.f32 %v4435_v27  ;;  %v4432_v1 = vpop.xlane.xlu1 %4431 }
 0x6a4   : > { %11262 = vrcp.f32 %v4432_v1 }
 0x6a7   : > { %v4462_v35 = vpop.xlane.xlu0 %4461  ;;  %v4465_v31 = vpop.xlane.xlu1 %4464 }
 0x6a8   : > { %11264 = vrcp.f32 %v4462_v35 }
 0x6a9   : > { %v11257_v28 = vpop.eup %11256  ;;  %11266 = vrcp.f32 %v4465_v31  ;;  %v10640_v31 = vpack.c.bf16 %v11027_v20, %v11026_v51  ;;  %v1089_v20 = vld [vmem:[%s15701_s4 + $0x8] sm:$0xff] }
 0x6aa   : > { %v11259_v40 = vpop.eup %11258  ;;  %v4545_v53 = vmul.f32 %v11257_v28, %v13172_v8 }
 0x6ab   : > { %v4468_v29 = vpop.xlane.xlu0 %4467  ;;  %v4471_v57 = vpop.xlane.xlu1 %4470  ;;  %v4544_v12 = vmul.f32 %v11259_v40, %v13174_v30 }
 0x6ac   : > { %11268 = vrcp.f32 %v4468_v29 }
 0x6ad   : > { %v11261_v58 = vpop.eup %11260  ;;  %11270 = vrcp.f32 %v4471_v57  ;;  %10030 = vmatprep.mubr.msk.f32.mxu0 %vm2027_vm3, %v4544_v12 }
 0x6ae   : > { %v11263_v41 = vpop.eup %11262  ;;  %10031 = vmatmul.mubr.msk.f32.vlgmr.msra.gmra.mrb[76].mxu0 %vm2027_vm3, %v4545_v53  ;;  %v4547_v8 = vmul.f32 %v11261_v58, %v13182_v23 }
 0x6af   : > { %10623 = vmatpush3.bf16.msra.mxu0 %v12917_v22  ;;  %v4453_v21 = vpop.xlane.xlu0 %4452  ;;  %v4450_v52 = vpop.xlane.xlu1 %4449  ;;  %v4546_v30 = vmul.f32 %v11263_v41, %v13184_v17 }
 0x6b0   : > { %11272 = vrcp.f32 %v4453_v21  ;;  %10625 = vmatprep.subr.bf16.mxu0 %v10624_v56 }
 0x6b1   : > { %11274 = vrcp.f32 %v4450_v52  ;;  %10033 = vmatprep.mubr.msk.f32.mxu0 %vm2027_vm3, %v4546_v30 }
 0x6b2   : > { %v11265_v37 = vpop.eup %11264  ;;  %10034 = vmatmul.mubr.msk.f32.gmra.mrb[78].mxu0 %vm2027_vm3, %v4547_v8 }
 0x6b3   : > { %v11267_v60 = vpop.eup %11266  ;;  %10627 = vmatpush3.bf16.msra.mxu0 %v10624_v56  ;;  %v4459_v9 = vpop.xlane.xlu0 %4458  ;;  %v4556_v22 = vmul.f32 %v11265_v37, %v13194_v36 }
 0x6b4   : > { %v4557_v43 = vmul.f32 %v11267_v60, %v13192_v44  ;;  %10637 = vmatprep.subr.bf16.mxu0 %v10636_v50  ;;  %11276 = vrcp.f32 %v4459_v9 }
 0x6b5   : > { %10072 = vmatprep.mubr.msk.f32.mxu1 %vm2027_vm3, %v4556_v22 }
 0x6b6   : > { %v11269_v17 = vpop.eup %11268  ;;  %10073 = vmatmul.mubr.msk.f32.vlgmr.msra.gmra.mrb[60].mxu1 %vm2027_vm3, %v4557_v43 }
 0x6b7   : > { %v11271_v23 = vpop.eup %11270  ;;  %v4456_v3 = vpop.xlane.xlu0 %4455  ;;  %v4558_v49 = vmul.f32 %v11269_v17, %v13202_v14 }
 0x6b8   : > { %11278 = vrcp.f32 %v4456_v3  ;;  %v4559_v45 = vmul.f32 %v11271_v23, %v13200_v11 }
 0x6b9   : > { %10075 = vmatprep.mubr.msk.f32.mxu1 %vm2027_vm3, %v4558_v49  ;;  %v4489_v24 = vpop.xlane.xlu1 %4488 }
 0x6ba   : > { %v11273_v36 = vpop.eup %11272  ;;  %10076 = vmatmul.mubr.msk.f32.gmra.mrb[62].mxu1 %vm2027_vm3, %v4559_v45 }
 0x6bb   : > { %v11275_v44 = vpop.eup %11274  ;;  %v4553_v27 = vmul.f32 %v11273_v36, %v13210_v6  ;;  %v4486_v1 = vpop.xlane.xlu0 %4485 }
 0x6bc   : > { %11280 = vrcp.f32 %v4486_v1  ;;  %v4552_v14 = vmul.f32 %v11275_v44, %v13212_v48 }
 0x6bd   : > { %v4495_v35 = vpop.xlane.xlu1 %4494 }
 0x6be   : > { %10058 = vmatprep.mubr.msk.f32.mxu0 %vm2027_vm3, %v4552_v14  ;;  %v11277_v28 = vpop.eup %11276 }
 0x6bf   : > { %10059 = vmatmul.mubr.msk.f32.vlgmr.msra.gmra.mrb[80].mxu0 %vm2027_vm3, %v4553_v27  ;;  %v4492_v11 = vpop.xlane.xlu0 %4491  ;;  %v4555_v48 = vmul.f32 %v11277_v28, %v13220_v38 }
 0x6c0   : > { %10639 = vmatpush3.bf16.msra.mxu0 %v10636_v50 }
 0x6c1   : > { %10641 = vmatprep.subr.bf16.mxu0 %v10640_v31  ;;  %v4477_v40 = vpop.xlane.xlu1 %4476 }
 0x6c2   : > { %v11279_v62 = vpop.eup %11278  ;;  %11282 = vrcp.f32 %v4477_v40 }
 0x6c3   : > { %v4474_v54 = vpop.xlane.xlu0 %4473  ;;  %v4554_v6 = vmul.f32 %v11279_v62, %v13226_v15 }
 0x6c4   : > { %10643 = vmatpush3.bf16.msra.mxu0 %v10640_v31  ;;  %11284 = vrcp.f32 %v4474_v54 }
 0x6c5   : > { %10061 = vmatprep.mubr.msk.f32.mxu0 %vm2027_vm3, %v4554_v6  ;;  %v4483_v0 = vpop.xlane.xlu1 %4482 }
 0x6c6   : > { %v11281_v29 = vpop.eup %11280  ;;  %10062 = vmatmul.mubr.msk.f32.gmra.mrb[82].mxu0 %vm2027_vm3, %v4555_v48  ;;  %11286 = vrcp.f32 %v4483_v0 }
 0x6c7   : > { %v4480_v57 = vpop.xlane.xlu0 %4479  ;;  %v4564_v12 = vmul.f32 %v11281_v29, %v13234_v46 }
 0x6c8   : > { %11288 = vrcp.f32 %v4480_v57 }
 0x6c9   : > { %10100 = vmatprep.mubr.msk.f32.mxu1 %vm2027_vm3, %v4564_v12 }
 0x6cc   : > { %v11283_v53 = vpop.eup %11282 }
 0x6cd   : > { %v4561_v38 = vmul.f32 %v11283_v53, %v13249_v34 }
 0x6ce   : > { %v11285_v58 = vpop.eup %11284  ;;  %v4501_v15 = vpop.xlane.xlu1 %4500 }
 0x6cf   : > { %v4498_v41 = vpop.xlane.xlu0 %4497  ;;  %v4560_v5 = vmul.f32 %v11285_v58, %v13252_v32 }
 0x6d0   : > { %11290 = vrcp.f32 %v4498_v41  ;;  %v11287_v4 = vpop.eup %11286 }
 0x6d1   : > { %10086 = vmatprep.mubr.msk.f32.mxu0 %vm2027_vm3, %v4560_v5  ;;  %11292 = vrcp.f32 %v4489_v24  ;;  %v4563_v30 = vmul.f32 %v11287_v4, %v13259_v7 }
 0x6d2   : > { %v11289_v56 = vpop.eup %11288  ;;  %v4507_v21 = vpop.xlane.xlu1 %4506  ;;  %10087 = vmatmul.mubr.msk.f32.vlgmr.msra.gmra.mrb[84].mxu0 %vm2027_vm3, %v4561_v38  ;;  %11294 = vrcp.f32 %v4495_v35 }
 0x6d3   : > { %v4504_v46 = vpop.xlane.xlu0 %4503  ;;  %v4562_v52 = vmul.f32 %v11289_v56, %v13262_v39  ;;  %11296 = vrcp.f32 %v4492_v11 }
 0x6d4   : > { %11298 = vrcp.f32 %v4501_v15 }
 0x6d5   : > { %10089 = vmatprep.mubr.msk.f32.mxu0 %vm2027_vm3, %v4562_v52  ;;  %11300 = vrcp.f32 %v4504_v46 }
 0x6d6   : > { %v11035_v32 = vpop.permute.xlu1 %11034  ;;  %10090 = vmatmul.mubr.msk.f32.gmra.mrb[86].mxu0 %vm2027_vm3, %v4563_v30  ;;  %11302 = vrcp.f32 %v4507_v21 }
 0x6d7   : > { %v11030_v34 = vpop.permute.xlu0 %11029  ;;  %v11037_v8 = vunpack.i.h.bf16 %v11035_v32  ;;  %v11036_v37 = vunpack.i.l.bf16 %v11035_v32 }
 0x6d8   : > { %v11032_v50 = vunpack.i.h.bf16 %v11030_v34  ;;  %v11031_v60 = vunpack.i.l.bf16 %v11030_v34 }
 0x6d9   : > { %v10648_v23 = vpack.c.bf16 %v11037_v8, %v11036_v37 }
 0x6da   : > { %v11291_v9 = vpop.eup %11290  ;;  %v11040_v22 = vpop.permute.xlu1 %11039  ;;  %v10644_v39 = vpack.c.bf16 %v11032_v50, %v11031_v60 }
 0x6db   : > { %v11042_v43 = vunpack.i.h.bf16 %v11040_v22  ;;  %v11041_v17 = vunpack.i.l.bf16 %v11040_v22  ;;  %v4568_v7 = vmul.f32 %v11291_v9, %v13270_v55  ;;  %v11293_v49 = vpop.eup %11292 }
 0x6dc   : > { %10645 = vmatprep.subr.bf16.mxu1 %v10644_v39  ;;  %v11295_v24 = vpop.eup %11294  ;;  %v4565_v1 = vmul.f32 %v11293_v49, %v13232_v16  ;;  %v16002_v49 = vld [vmem:[#allocation63_spill] sm:$0xff] }
 0x6dd   : > { %10647 = vmatpush3.bf16.msra.mxu1 %v10644_v39  ;;  %10114 = vmatprep.mubr.msk.f32.mxu0 %vm2027_vm3, %v4568_v7  ;;  %v10652_v3 = vpack.c.bf16 %v11042_v43, %v11041_v17  ;;  %v11297_v51 = vpop.eup %11296  ;;  %v4567_v28 = vmul.f32 %v11295_v24, %v13240_v25  ;;  %v15996_v39 = vld [vmem:[#allocation44_spill] sm:$0xff]  ;;  %v15997_v43 = vld [vmem:[#allocation47_spill] sm:$0xff]  ;;  %v15998_v17 = vld [vmem:[#allocation58_spill] sm:$0xff] }
 0x6de   : > { %v11045_v45 = vpop.permute.xlu1 %11044  ;;  %10649 = vmatprep.subr.bf16.mxu1 %v10648_v23  ;;  %v11299_v55 = vpop.eup %11298  ;;  %v4566_v35 = vmul.f32 %v11297_v51, %v13242_v59  ;;  %v1088_v59 = vld [vmem:[%s15701_s4] sm:$0xff]  ;;  %v16004_v24 = vld [vmem:[#allocation60_spill] sm:$0xff]  ;;  %v16008_v51 = vld [vmem:[#allocation35_spill] sm:$0xff] }
 0x6df   : > { %v11047_v36 = vunpack.i.h.bf16 %v11045_v45  ;;  %v11046_v44 = vunpack.i.l.bf16 %v11045_v45  ;;  %10653 = vmatprep.subr.bf16.mxu0 %v10652_v3  ;;  %v11301_v14 = vpop.eup %11300  ;;  %v4569_v11 = vmul.f32 %v11299_v55, %v13268_v42  ;;  %v15999_v7 = vld [vmem:[#allocation62_spill] sm:$0xff]  ;;  %v16003_v45 = vld [vmem:[#allocation57_spill] sm:$0xff] }
 0x6e0   : > { %10655 = vmatpush3.bf16.msra.mxu0 %v10652_v3  ;;  %v11303_v31 = vpop.eup %11302  ;;  %v4570_v40 = vmul.f32 %v11301_v14, %v13278_v26  ;;  %v16001_v3 = vld [vmem:[#allocation54_spill] sm:$0xff] }
 0x6e1   : > { %10651 = vmatpush3.bf16.msra.mxu1 %v10648_v23  ;;  %v10656_v27 = vpack.c.bf16 %v11047_v36, %v11046_v44  ;;  %v4571_v16 = vmul.f32 %v11303_v31, %v13276_v10  ;;  %v16000_v23 = vld [vmem:[#allocation56_spill] sm:$0xff]  ;;  %v16005_v36 = vld [vmem:[#allocation46_spill] sm:$0xff]  ;;  %v16006_v44 = vld [vmem:[#allocation53_spill] sm:$0xff] }
 0x6e2   : > { %10120 = vmatprep.subr.mxu1 %v1089_v20  ;;  %v16009_v55 = vld [vmem:[#allocation34_spill] sm:$0xff] }
 0x6e3   : > { %10657 = vmatprep.subr.bf16.mxu0 %v10656_v27  ;;  %v13477_v14 = vld [vmem:[%s15702_s5] ss:$0 sm:$0xff] }
 0x6e4   : > { %10101 = vmatmul.mubr.msk.f32.vlgmr.msra.gmra.mrb[64].mxu1 %vm2027_vm3, %v4565_v1  ;;  %10659 = vmatpush3.bf16.msra.mxu0 %v10656_v27  ;;  %v16010_v27 = vld [vmem:[#allocation36_spill] sm:$0xff] }
 0x6e5   : > { %10103 = vmatprep.mubr.msk.f32.mxu1 %vm2027_vm3, %v4566_v35  ;;  %10121 = vmatpush3.msra.mxu1 %v1089_v20  ;;  %v16007_v20 = vld [vmem:[#allocation51_spill] sm:$0xff]  ;;  %v16011_v1 = vld [vmem:[#allocation68_spill] sm:$0xff] }
 0x6e6   : > { %10170 = vmatprep.subr.mxu1 %v1088_v59 }
 0x6e7   : > { %10115 = vmatmul.mubr.msk.f32.vlgmr.msra.gmra.mrb[88].mxu0 %vm2027_vm3, %v4569_v11 }
 0x6e8   : > { %10104 = vmatmul.mubr.msk.f32.gmra.mrb[66].mxu1 %vm2027_vm3, %v4567_v28  ;;  %10117 = vmatprep.mubr.msk.f32.mxu0 %vm2027_vm3, %v4570_v40  ;;  %v16012_v40 = vld [vmem:[#allocation4_spill] sm:$0xff] }
 0x6eb   : > { %10118 = vmatmul.mubr.msk.f32.gmra.mrb[90].mxu0 %vm2027_vm3, %v4571_v16 }
 0x74c   : > { %v10018_v42 = vpop.f32.mrb[52].mxu1 }
 0x74d   : > { %v4662_v62 = vpop.f32.mrb[53].mxu1 }
 0x74e   : > { %10122 = vmatprep.mubr.msk.f32.mxu1 %vm1102_vm1, %v4662_v62 }
 0x74f   : > { %10123 = vmatmul.mubr.msk.f32.vlgmr.msra.gmra.mrb[68].mxu1 %vm1102_vm1, %v10018_v42 }
 0x750   : > { %10171 = vmatpush3.msra.mxu1 %v1088_v59  ;;  %v16013_v59 = vld [vmem:[#allocation2_spill] sm:$0xff] }
 0x753   : > { %v10021_v25 = vpop.f32.mrb[54].mxu1 }
 0x754   : > { %v4672_v26 = vpop.f32.mrb[55].mxu1 }
 0x755   : > { %10125 = vmatprep.mubr.msk.f32.mxu1 %vm1102_vm1, %v4672_v26 }
 0x756   : > { %10126 = vmatmul.mubr.msk.f32.gmra.mrb[70].mxu1 %vm1102_vm1, %v10021_v25 }
 0x75b   : > { %v10046_v10 = vpop.f32.mrb[56].mxu1 }
 0x75c   : > { %v4880_v54 = vpop.f32.mrb[57].mxu1 }
 0x773   : > { %v10049_v6 = vpop.f32.mrb[58].mxu1 }
 0x774   : > { %v4890_v48 = vpop.f32.mrb[59].mxu1 }
 0x781   : > { %v10032_v0 = vpop.f32.mrb[76].mxu0 }
 0x782   : > { %v4771_v29 = vpop.f32.mrb[77].mxu0 }
 0x783   : > { %10128 = vmatprep.mubr.msk.f32.mxu1 %vm1102_vm1, %v4771_v29  ;;  %v16015_v29 = vld [vmem:[#allocation3_spill] sm:$0xff] }
 0x784   : > { %10129 = vmatmul.mubr.msk.f32.gmra.mrb[72].mxu1 %vm1102_vm1, %v10032_v0 }
 0x785   : > { %v10035_v57 = vpop.f32.mrb[78].mxu0 }
 0x786   : > { %v4781_v12 = vpop.f32.mrb[79].mxu0 }
 0x787   : > { %10131 = vmatprep.mubr.msk.f32.mxu1 %vm1102_vm1, %v4781_v12 }
 0x788   : > { %10132 = vmatmul.mubr.msk.f32.gmra.mrb[74].mxu1 %vm1102_vm1, %v10035_v57 }
 0x789   : > { %v10074_v53 = vpop.f32.mrb[60].mxu1  ;;  %10134 = vmatprep.mubr.msk.f32.mxu1 %vm1102_vm1, %v4880_v54 }
 0x78a   : > { %v5098_v58 = vpop.f32.mrb[61].mxu1 }
 0x78c   : > { %10135 = vmatmul.mubr.msk.f32.gmra.mrb[76].mxu1 %vm1102_vm1, %v10046_v10 }
 0x78d   : > { %v10077_v15 = vpop.f32.mrb[62].mxu1  ;;  %10137 = vmatprep.mubr.msk.f32.mxu1 %vm1102_vm1, %v4890_v48  ;;  %v16014_v48 = vld [vmem:[#allocation5_spill] sm:$0xff] }
 0x78e   : > { %v5108_v41 = vpop.f32.mrb[63].mxu1 }
 0x790   : > { %10138 = vmatmul.mubr.msk.f32.gmra.mrb[78].mxu1 %vm1102_vm1, %v10049_v6 }
 0x792   : > { %v10060_v5 = vpop.f32.mrb[80].mxu0 }
 0x793   : > { %v4989_v38 = vpop.f32.mrb[81].mxu0 }
 0x794   : > { %10140 = vmatprep.mubr.msk.f32.mxu1 %vm1102_vm1, %v4989_v38  ;;  %v16016_v38 = vld [vmem:[#allocation7_spill] sm:$0xff] }
 0x795   : > { %10141 = vmatmul.mubr.msk.f32.gmra.mrb[80].mxu1 %vm1102_vm1, %v10060_v5 }
 0x799   : > { %v10063_v4 = vpop.f32.mrb[82].mxu0 }
 0x79a   : > { %v4999_v56 = vpop.f32.mrb[83].mxu0 }
 0x79b   : > { %10143 = vmatprep.mubr.msk.f32.mxu1 %vm1102_vm1, %v4999_v56  ;;  %v16017_v56 = vld [vmem:[#allocation6_spill] sm:$0xff] }
 0x79c   : > { %10144 = vmatmul.mubr.msk.f32.gmra.mrb[82].mxu1 %vm1102_vm1, %v10063_v4 }
 0x79d   : > { %10146 = vmatprep.mubr.msk.f32.mxu1 %vm1102_vm1, %v5098_v58 }
 0x7a0   : > { %10147 = vmatmul.mubr.msk.f32.gmra.mrb[84].mxu1 %vm1102_vm1, %v10074_v53 }
 0x7a1   : > { %10149 = vmatprep.mubr.msk.f32.mxu1 %vm1102_vm1, %v5108_v41 }
 0x7a4   : > { %10150 = vmatmul.mubr.msk.f32.gmra.mrb[86].mxu1 %vm1102_vm1, %v10077_v15 }
 0x7a5   : > { %v10088_v21 = vpop.f32.mrb[84].mxu0 }
 0x7a6   : > { %v5207_v46 = vpop.f32.mrb[85].mxu0 }
 0x7a7   : > { %10152 = vmatprep.mubr.msk.f32.mxu1 %vm1102_vm1, %v5207_v46 }
 0x7a8   : > { %10153 = vmatmul.mubr.msk.f32.gmra.mrb[88].mxu1 %vm1102_vm1, %v10088_v21 }
 0x7a9   : > { %v10091_v52 = vpop.f32.mrb[86].mxu0 }
 0x7aa   : > { %v5217_v30 = vpop.f32.mrb[87].mxu0 }
 0x7ab   : > { %10155 = vmatprep.mubr.msk.f32.mxu1 %vm1102_vm1, %v5217_v30 }
 0x7ac   : > { %10156 = vmatmul.mubr.msk.f32.gmra.mrb[90].mxu1 %vm1102_vm1, %v10091_v52 }
 0x7b7   : > { %v10102_v32 = vpop.f32.mrb[64].mxu1 }
 0x7b8   : > { %v5316_v34 = vpop.f32.mrb[65].mxu1 }
 0x7b9   : > { %10158 = vmatprep.mubr.msk.f32.mxu1 %vm1102_vm1, %v5316_v34 }
 0x7ba   : > { %v10116_v8 = vpop.f32.mrb[88].mxu0  ;;  %10159 = vmatmul.mubr.msk.f32.gmra.mrb[92].mxu1 %vm1102_vm1, %v10102_v32 }
 0x7bb   : > { %v10105_v37 = vpop.f32.mrb[66].mxu1  ;;  %v5425_v50 = vpop.f32.mrb[89].mxu0 }
 0x7bc   : > { %v5326_v60 = vpop.f32.mrb[67].mxu1 }
 0x7bd   : > { %10161 = vmatprep.mubr.msk.f32.mxu1 %vm1102_vm1, %v5326_v60  ;;  %v16019_v60 = vld [vmem:[#allocation8_spill] sm:$0xff] }
 0x7be   : > { %v10119_v9 = vpop.f32.mrb[90].mxu0  ;;  %10162 = vmatmul.mubr.msk.f32.gmra.mrb[94].mxu1 %vm1102_vm1, %v10105_v37  ;;  %v16018_v37 = vld [vmem:[#allocation9_spill] sm:$0xff] }
 0x7bf   : > { %v5435_v22 = vpop.f32.mrb[91].mxu0  ;;  %10164 = vmatprep.mubr.msk.f32.mxu1 %vm1102_vm1, %v5425_v50 }
 0x7c2   : > { %10165 = vmatmul.mubr.msk.f32.gmra.mrb[96].mxu1 %vm1102_vm1, %v10116_v8 }
 0x7c3   : > { %10167 = vmatprep.mubr.msk.f32.mxu1 %vm1102_vm1, %v5435_v22 }
 0x7c6   : > { %10168 = vmatmul.mubr.msk.f32.gmra.mrb[98].mxu1 %vm1102_vm1, %v10119_v9 }
 0x7c7   : > { %10172 = vmatprep.mubr.msk.f32.mxu1 %vm1102_vm1, %v12922_v19  ;;  %v15988_v19 = vld [vmem:[#allocation43_spill] sm:$0xff] }
 0x7ca   : > { %10173 = vmatmul.mubr.msk.f32.vlgmr.msra.gmra.mrb[68].mxu1 %vm1102_vm1, %v12920_v33  ;;  %v15989_v33 = vld [vmem:[#allocation52_spill] sm:$0xff] }
 0x7cb   : > { %10175 = vmatprep.mubr.msk.f32.mxu1 %vm1102_vm1, %v12926_v2  ;;  %v15990_v2 = vld [vmem:[#allocation55_spill] sm:$0xff] }
 0x7ce   : > { %10176 = vmatmul.mubr.msk.f32.gmra.mrb[70].mxu1 %vm1102_vm1, %v12924_v63  ;;  %v15991_v63 = vld [vmem:[#allocation45_spill] sm:$0xff] }
 0x7cf   : > { %10178 = vmatprep.mubr.msk.f32.mxu1 %vm1102_vm1, %v12930_v61  ;;  %v15992_v61 = vld [vmem:[#allocation48_spill] sm:$0xff] }
 0x7d2   : > { %10179 = vmatmul.mubr.msk.f32.gmra.mrb[72].mxu1 %vm1102_vm1, %v12928_v18  ;;  %v15993_v18 = vld [vmem:[#allocation64_spill] sm:$0xff] }
 0x7d3   : > { %10181 = vmatprep.mubr.msk.f32.mxu1 %vm1102_vm1, %v12934_v47  ;;  %v15994_v47 = vld [vmem:[#allocation50_spill] sm:$0xff] }
 0x7d6   : > { %10182 = vmatmul.mubr.msk.f32.gmra.mrb[74].mxu1 %vm1102_vm1, %v12932_v13  ;;  %v15995_v13 = vld [vmem:[#allocation49_spill] sm:$0xff] }
 0x7d7   : > { %10184 = vmatprep.mubr.msk.f32.mxu1 %vm1102_vm1, %v15988_v19 }
 0x7da   : > { %10185 = vmatmul.mubr.msk.f32.gmra.mrb[76].mxu1 %vm1102_vm1, %v15989_v33 }
 0x7db   : > { %10187 = vmatprep.mubr.msk.f32.mxu1 %vm1102_vm1, %v15990_v2 }
 0x7de   : > { %10188 = vmatmul.mubr.msk.f32.gmra.mrb[78].mxu1 %vm1102_vm1, %v15991_v63 }
 0x7df   : > { %10190 = vmatprep.mubr.msk.f32.mxu1 %vm1102_vm1, %v15992_v61 }
 0x7e2   : > { %10191 = vmatmul.mubr.msk.f32.gmra.mrb[80].mxu1 %vm1102_vm1, %v15993_v18  ;;  %v16020_v18 = vld [vmem:[#allocation11_spill] sm:$0xff] }
 0x7e3   : > { %10193 = vmatprep.mubr.msk.f32.mxu1 %vm1102_vm1, %v15994_v47 }
 0x7e6   : > { %10194 = vmatmul.mubr.msk.f32.gmra.mrb[82].mxu1 %vm1102_vm1, %v15995_v13  ;;  %v16021_v13 = vld [vmem:[#allocation10_spill] sm:$0xff] }
 0x7e7   : > { %10196 = vmatprep.mubr.msk.f32.mxu1 %vm1102_vm1, %v15996_v39 }
 0x7ea   : > { %10197 = vmatmul.mubr.msk.f32.gmra.mrb[84].mxu1 %vm1102_vm1, %v15997_v43 }
 0x7eb   : > { %10199 = vmatprep.mubr.msk.f32.mxu1 %vm1102_vm1, %v15998_v17 }
 0x7ee   : > { %10200 = vmatmul.mubr.msk.f32.gmra.mrb[86].mxu1 %vm1102_vm1, %v15999_v7 }
 0x7ef   : > { %10202 = vmatprep.mubr.msk.f32.mxu1 %vm1102_vm1, %v16000_v23 }
 0x7f2   : > { %10203 = vmatmul.mubr.msk.f32.gmra.mrb[88].mxu1 %vm1102_vm1, %v16001_v3 }
 0x7f3   : > { %10205 = vmatprep.mubr.msk.f32.mxu1 %vm1102_vm1, %v16002_v49 }
 0x7f6   : > { %10206 = vmatmul.mubr.msk.f32.gmra.mrb[90].mxu1 %vm1102_vm1, %v16003_v45  ;;  %v16022_v45 = vld [vmem:[#allocation13_spill] sm:$0xff] }
 0x7f7   : > { %10208 = vmatprep.mubr.msk.f32.mxu1 %vm1102_vm1, %v16004_v24 }
 0x7fa   : > { %10209 = vmatmul.mubr.msk.f32.gmra.mrb[92].mxu1 %vm1102_vm1, %v16005_v36  ;;  %v16023_v36 = vld [vmem:[#allocation12_spill] sm:$0xff] }
 0x7fb   : > { %10211 = vmatprep.mubr.msk.f32.mxu1 %vm1102_vm1, %v16006_v44 }
 0x7fe   : > { %10212 = vmatmul.mubr.msk.f32.gmra.mrb[94].mxu1 %vm1102_vm1, %v16007_v20 }
 0x7ff   : > { %10214 = vmatprep.mubr.msk.f32.mxu1 %vm1102_vm1, %v16008_v51 }
 0x802   : > { %10215 = vmatmul.mubr.msk.f32.gmra.mrb[96].mxu1 %vm1102_vm1, %v16009_v55 }
 0x803   : > { %10217 = vmatprep.mubr.msk.f32.mxu1 %vm1102_vm1, %v16010_v27 }
 0x806   : > { %10218 = vmatmul.mubr.msk.f32.gmra.mrb[98].mxu1 %vm1102_vm1, %v16011_v1 }
 0x89d   : > { %v10174_v35 = vpop.f32.mrb[68].mxu1 }
 0x89e   : > { %v6094_v11 = vadd.f32 %v10174_v35, %v13477_v14  ;;  %v5927_v31 = vpop.f32.mrb[69].mxu1 }
 0x89f   : > { %v6093_v28 = vadd.f32 %v13477_v14, %v5927_v31 }
 0x8a0   : > { %v13482_v16 = vadd.f32 %v6094_v11, %v16012_v40  ;;  %v16024_v11 = vld [vmem:[#allocation15_spill] sm:$0xff] }
 0x8a1   : > { %v13485_v42 = vadd.f32 %v6093_v28, %v16013_v59  ;;  %v10177_v62 = vpop.f32.mrb[70].mxu1  ;;  %v16025_v28 = vld [vmem:[#allocation14_spill] sm:$0xff] }
 0x8a2   : > { %v6096_v25 = vadd.f32 %v10177_v62, %v13477_v14  ;;  %v5937_v26 = vpop.f32.mrb[71].mxu1  ;;  %v6162_v10 = vsel %vm766_vm0, %v13482_v16, 0.0 }
 0x8a3   : > { %v6095_v54 = vadd.f32 %v13477_v14, %v5937_v26  ;;  %6163 = vadd.xlane.f32.xlu0 %v6162_v10  ;;  %v6159_v6 = vsel %vm766_vm0, %v13485_v42, 0.0 }
 0x8a4   : > { %v13494_v0 = vadd.f32 %v6096_v25, %v16014_v48  ;;  %6160 = vadd.xlane.f32.xlu1 %v6159_v6  ;;  %v16026_v6 = vld [vmem:[#allocation17_spill] sm:$0xff] }
 0x8a5   : > { %v13497_v57 = vadd.f32 %v6095_v54, %v16015_v29  ;;  %v10180_v12 = vpop.f32.mrb[72].mxu1  ;;  %v16027_v29 = vld [vmem:[#allocation16_spill] sm:$0xff] }
 0x8a6   : > { %v6098_v53 = vadd.f32 %v10180_v12, %v13477_v14  ;;  %v5947_v58 = vpop.f32.mrb[73].mxu1  ;;  %v6168_v15 = vsel %vm766_vm0, %v13494_v0, 0.0 }
 0x8a7   : > { %v6097_v41 = vadd.f32 %v13477_v14, %v5947_v58  ;;  %6169 = vadd.xlane.f32.xlu0 %v6168_v15  ;;  %v6165_v5 = vsel %vm766_vm0, %v13497_v57, 0.0 }
 0x8a8   : > { %v13506_v4 = vadd.f32 %v6098_v53, %v16016_v38  ;;  %6166 = vadd.xlane.f32.xlu1 %v6165_v5 }
 0x8a9   : > { %v13509_v21 = vadd.f32 %v6097_v41, %v16017_v56  ;;  %v10183_v46 = vpop.f32.mrb[74].mxu1  ;;  %v16028_v56 = vld [vmem:[#allocation19_spill] sm:$0xff] }
 0x8aa   : > { %v6100_v52 = vadd.f32 %v10183_v46, %v13477_v14  ;;  %v5957_v30 = vpop.f32.mrb[75].mxu1  ;;  %v6174_v32 = vsel %vm766_vm0, %v13506_v4, 0.0 }
 0x8ab   : > { %v6099_v34 = vadd.f32 %v13477_v14, %v5957_v30  ;;  %6175 = vadd.xlane.f32.xlu0 %v6174_v32  ;;  %v6171_v8 = vsel %vm766_vm0, %v13509_v21, 0.0 }
 0x8ac   : > { %v13518_v50 = vadd.f32 %v6100_v52, %v16018_v37  ;;  %6172 = vadd.xlane.f32.xlu1 %v6171_v8  ;;  %v16029_v52 = vld [vmem:[#allocation18_spill] sm:$0xff] }
 0x8ad   : > { %v13521_v9 = vadd.f32 %v6099_v34, %v16019_v60  ;;  %v10186_v22 = vpop.f32.mrb[76].mxu1 }
 0x8ae   : > { %v6102_v19 = vadd.f32 %v10186_v22, %v13477_v14  ;;  %v5967_v33 = vpop.f32.mrb[77].mxu1  ;;  %v6180_v2 = vsel %vm766_vm0, %v13518_v50, 0.0 }
 0x8af   : > { %v6101_v63 = vadd.f32 %v13477_v14, %v5967_v33  ;;  %6181 = vadd.xlane.f32.xlu0 %v6180_v2  ;;  %v6177_v61 = vsel %vm766_vm0, %v13521_v9, 0.0  ;;  %v16031_v2 = vld [vmem:[#allocation20_spill] sm:$0xff] }
 0x8b0   : > { %v13530_v47 = vadd.f32 %v6102_v19, %v16020_v18  ;;  %6178 = vadd.xlane.f32.xlu1 %v6177_v61  ;;  %v16030_v19 = vld [vmem:[#allocation21_spill] sm:$0xff] }
 0x8b1   : > { %v13533_v39 = vadd.f32 %v6101_v63, %v16021_v13  ;;  %v10189_v43 = vpop.f32.mrb[78].mxu1 }
 0x8b2   : > { %v6104_v17 = vadd.f32 %v10189_v43, %v13477_v14  ;;  %v5977_v7 = vpop.f32.mrb[79].mxu1  ;;  %v6186_v23 = vsel %vm766_vm0, %v13530_v47, 0.0 }
 0x8b3   : > { %v6103_v3 = vadd.f32 %v13477_v14, %v5977_v7  ;;  %6187 = vadd.xlane.f32.xlu0 %v6186_v23  ;;  %v6183_v49 = vsel %vm766_vm0, %v13533_v39, 0.0  ;;  %v16032_v23 = vld [vmem:[#allocation23_spill] sm:$0xff] }
 0x8b4   : > { %v13542_v24 = vadd.f32 %v6104_v17, %v16022_v45  ;;  %6184 = vadd.xlane.f32.xlu1 %v6183_v49  ;;  %v16033_v49 = vld [vmem:[#allocation22_spill] sm:$0xff] }
 0x8b5   : > { %v13545_v44 = vadd.f32 %v6103_v3, %v16023_v36  ;;  %v10192_v20 = vpop.f32.mrb[80].mxu1 }
 0x8b6   : > { %v6106_v51 = vadd.f32 %v10192_v20, %v13477_v14  ;;  %v5987_v55 = vpop.f32.mrb[81].mxu1  ;;  %v6192_v27 = vsel %vm766_vm0, %v13542_v24, 0.0 }
 0x8b7   : > { %v6105_v1 = vadd.f32 %v13477_v14, %v5987_v55  ;;  %6193 = vadd.xlane.f32.xlu0 %v6192_v27  ;;  %v6189_v35 = vsel %vm766_vm0, %v13545_v44, 0.0 }
 0x8b8   : > { %v13554_v31 = vadd.f32 %v6106_v51, %v16024_v11  ;;  %6190 = vadd.xlane.f32.xlu1 %v6189_v35  ;;  %v16034_v35 = vld [vmem:[#allocation25_spill] sm:$0xff] }
 0x8b9   : > { %v13557_v40 = vadd.f32 %v6105_v1, %v16025_v28  ;;  %v10195_v59 = vpop.f32.mrb[82].mxu1  ;;  %v16035_v28 = vld [vmem:[#allocation24_spill] sm:$0xff] }
 0x8ba   : > { %v6108_v62 = vadd.f32 %v10195_v59, %v13477_v14  ;;  %v5997_v25 = vpop.f32.mrb[83].mxu1  ;;  %v6198_v26 = vsel %vm766_vm0, %v13554_v31, 0.0 }
 0x8bb   : > { %v6107_v10 = vadd.f32 %v13477_v14, %v5997_v25  ;;  %6199 = vadd.xlane.f32.xlu0 %v6198_v26  ;;  %v6195_v54 = vsel %vm766_vm0, %v13557_v40, 0.0 }
 0x8bc   : > { %v13566_v48 = vadd.f32 %v6108_v62, %v16026_v6  ;;  %6196 = vadd.xlane.f32.xlu1 %v6195_v54 }
 0x8bd   : > { %v13569_v12 = vadd.f32 %v6107_v10, %v16027_v29  ;;  %v10198_v53 = vpop.f32.mrb[84].mxu1  ;;  %v16036_v29 = vld [vmem:[#allocation27_spill] sm:$0xff] }
 0x8be   : > { %v6110_v58 = vadd.f32 %v10198_v53, %v13477_v14  ;;  %v6007_v15 = vpop.f32.mrb[85].mxu1  ;;  %v6204_v41 = vsel %vm766_vm0, %v13566_v48, 0.0 }
 0x8bf   : > { %v6109_v5 = vadd.f32 %v13477_v14, %v6007_v15  ;;  %6205 = vadd.xlane.f32.xlu0 %v6204_v41  ;;  %v6201_v38 = vsel %vm766_vm0, %v13569_v12, 0.0 }
 0x8c0   : > { %v13578_v46 = vadd.f32 %v6110_v58, %v16028_v56  ;;  %6202 = vadd.xlane.f32.xlu1 %v6201_v38  ;;  %v16037_v58 = vld [vmem:[#allocation26_spill] sm:$0xff] }
 0x8c1   : > { %v13581_v30 = vadd.f32 %v6109_v5, %v16029_v52  ;;  %v10201_v32 = vpop.f32.mrb[86].mxu1 }
 0x8c2   : > { %v6112_v34 = vadd.f32 %v10201_v32, %v13477_v14  ;;  %v6017_v8 = vpop.f32.mrb[87].mxu1  ;;  %v6210_v37 = vsel %vm766_vm0, %v13578_v46, 0.0 }
 0x8c3   : > { %v6111_v60 = vadd.f32 %v13477_v14, %v6017_v8  ;;  %6211 = vadd.xlane.f32.xlu0 %v6210_v37  ;;  %v6207_v22 = vsel %vm766_vm0, %v13581_v30, 0.0  ;;  %v16039_v37 = vld [vmem:[#allocation28_spill] sm:$0xff] }
 0x8c4   : > { %v13590_v33 = vadd.f32 %v6112_v34, %v16030_v19  ;;  %6208 = vadd.xlane.f32.xlu1 %v6207_v22  ;;  %v16038_v34 = vld [vmem:[#allocation29_spill] sm:$0xff] }
 0x8c5   : > { %v13593_v63 = vadd.f32 %v6111_v60, %v16031_v2  ;;  %v10204_v61 = vpop.f32.mrb[88].mxu1 }
 0x8c6   : > { %v6114_v18 = vadd.f32 %v10204_v61, %v13477_v14  ;;  %v6027_v13 = vpop.f32.mrb[89].mxu1  ;;  %v6216_v43 = vsel %vm766_vm0, %v13590_v33, 0.0 }
 0x8c7   : > { %v6113_v17 = vadd.f32 %v13477_v14, %v6027_v13  ;;  %6217 = vadd.xlane.f32.xlu0 %v6216_v43  ;;  %v6213_v7 = vsel %vm766_vm0, %v13593_v63, 0.0  ;;  %v16040_v43 = vld [vmem:[#allocation31_spill] sm:$0xff] }
 0x8c8   : > { %v13602_v3 = vadd.f32 %v6114_v18, %v16032_v23  ;;  %6214 = vadd.xlane.f32.xlu1 %v6213_v7  ;;  %v16041_v7 = vld [vmem:[#allocation30_spill] sm:$0xff] }
 0x8c9   : > { %v13605_v45 = vadd.f32 %v6113_v17, %v16033_v49  ;;  %v10207_v36 = vpop.f32.mrb[90].mxu1 }
 0x8ca   : > { %v6116_v20 = vadd.f32 %v10207_v36, %v13477_v14  ;;  %v6037_v51 = vpop.f32.mrb[91].mxu1  ;;  %v6222_v55 = vsel %vm766_vm0, %v13602_v3, 0.0 }
 0x8cb   : > { %v6115_v27 = vadd.f32 %v13477_v14, %v6037_v51  ;;  %6223 = vadd.xlane.f32.xlu0 %v6222_v55  ;;  %v6219_v1 = vsel %vm766_vm0, %v13605_v45, 0.0 }
 0x8cc   : > { %v13614_v11 = vadd.f32 %v6116_v20, %v16034_v35  ;;  %6220 = vadd.xlane.f32.xlu1 %v6219_v1  ;;  %v16042_v1 = vld [vmem:[#allocation33_spill] sm:$0xff] }
 0x8cd   : > { %v13617_v59 = vadd.f32 %v6115_v27, %v16035_v28  ;;  %v10210_v62 = vpop.f32.mrb[92].mxu1  ;;  %v16043_v28 = vld [vmem:[#allocation32_spill] sm:$0xff] }
 0x8ce   : > { %v6118_v25 = vadd.f32 %v10210_v62, %v13477_v14  ;;  %v6047_v26 = vpop.f32.mrb[93].mxu1  ;;  %v6228_v10 = vsel %vm766_vm0, %v13614_v11, 0.0 }
 0x8cf   : > { %v6117_v54 = vadd.f32 %v13477_v14, %v6047_v26  ;;  %6229 = vadd.xlane.f32.xlu0 %v6228_v10  ;;  %v6225_v6 = vsel %vm766_vm0, %v13617_v59, 0.0 }
 0x8d0   : > { %v13626_v53 = vadd.f32 %v6118_v25, %v16036_v29  ;;  %6226 = vadd.xlane.f32.xlu1 %v6225_v6 }
 0x8d1   : > { %v13629_v15 = vadd.f32 %v6117_v54, %v16037_v58  ;;  %v10213_v41 = vpop.f32.mrb[94].mxu1 }
 0x8d2   : > { %v6120_v5 = vadd.f32 %v10213_v41, %v13477_v14  ;;  %v6057_v38 = vpop.f32.mrb[95].mxu1  ;;  %v6234_v56 = vsel %vm766_vm0, %v13626_v53, 0.0 }
 0x8d3   : > { %v6119_v52 = vadd.f32 %v13477_v14, %v6057_v38  ;;  %6235 = vadd.xlane.f32.xlu0 %v6234_v56  ;;  %v6231_v32 = vsel %vm766_vm0, %v13629_v15, 0.0 }
 0x8d4   : > { %v13638_v8 = vadd.f32 %v6120_v5, %v16038_v34  ;;  %6232 = vadd.xlane.f32.xlu1 %v6231_v32 }
 0x8d5   : > { %v13641_v60 = vadd.f32 %v6119_v52, %v16039_v37  ;;  %v10216_v22 = vpop.f32.mrb[96].mxu1 }
 0x8d6   : > { %v6122_v19 = vadd.f32 %v10216_v22, %v13477_v14  ;;  %v6067_v2 = vpop.f32.mrb[97].mxu1  ;;  %v6240_v61 = vsel %vm766_vm0, %v13638_v8, 0.0 }
 0x8d7   : > { %v6121_v18 = vadd.f32 %v13477_v14, %v6067_v2  ;;  %6241 = vadd.xlane.f32.xlu0 %v6240_v61  ;;  %v6237_v13 = vsel %vm766_vm0, %v13641_v60, 0.0 }
 0x8d8   : > { %v13650_v17 = vadd.f32 %v6122_v19, %v16040_v43  ;;  %6238 = vadd.xlane.f32.xlu1 %v6237_v13 }
 0x8d9   : > { %v13653_v23 = vadd.f32 %v6121_v18, %v16041_v7  ;;  %v10219_v49 = vpop.f32.mrb[98].mxu1 }
 0x8da   : > { %v6124_v36 = vadd.f32 %v10219_v49, %v13477_v14  ;;  %v6077_v20 = vpop.f32.mrb[99].mxu1  ;;  %v6246_v51 = vsel %vm766_vm0, %v13650_v17, 0.0 }
 0x8db   : > { %v6123_v55 = vadd.f32 %v13477_v14, %v6077_v20  ;;  %6247 = vadd.xlane.f32.xlu0 %v6246_v51  ;;  %v6243_v27 = vsel %vm766_vm0, %v13653_v23, 0.0 }
 0x8dc   : > { %v13662_v35 = vadd.f32 %v6124_v36, %v16042_v1  ;;  %6244 = vadd.xlane.f32.xlu1 %v6243_v27 }
 0x8dd   : > { %v13665_v62 = vadd.f32 %v6123_v55, %v16043_v28 }
 0x8de   : > { %v6252_v25 = vsel %vm766_vm0, %v13662_v35, 0.0 }
 0x8df   : > { %6253 = vadd.xlane.f32.xlu0 %v6252_v25  ;;  %v6249_v26 = vsel %vm766_vm0, %v13665_v62, 0.0 }
 0x8e0   : > { %6250 = vadd.xlane.f32.xlu1 %v6249_v26 }
 0x930   : > { %v6164_v14 = vpop.xlane.xlu0 %6163 }
 0x931   : > { %v6257_v10 = vmul.f32 0.0625, %v6164_v14  ;;  %v6161_v54 = vpop.xlane.xlu1 %6160 }
 0x932   : > { %v6256_v6 = vmul.f32 0.0625, %v6161_v54 }
 0x933   : > { %v13672_v29 = vsub.f32 %v13482_v16, %v6257_v10 }
 0x934   : > { %v13675_v58 = vsub.f32 %v13485_v42, %v6256_v6  ;;  %v6170_v41 = vpop.xlane.xlu0 %6169 }
 0x935   : > { %v6259_v5 = vmul.f32 0.0625, %v6170_v41  ;;  %v6167_v38 = vpop.xlane.xlu1 %6166  ;;  %v6321_v56 = vmul.f32 %v13672_v29, %v13672_v29 }
 0x936   : > { %v6258_v52 = vmul.f32 0.0625, %v6167_v38  ;;  %v6320_v32 = vmul.f32 %v13675_v58, %v13675_v58 }
 0x937   : > { %v13682_v34 = vsub.f32 %v13494_v0, %v6259_v5  ;;  %v6355_v37 = vsel %vm766_vm0, %v6321_v56, 0.0 }
 0x938   : > { %v13686_v16 = vsub.f32 %v13497_v57, %v6258_v52  ;;  %v6176_v42 = vpop.xlane.xlu0 %6175  ;;  %6356 = vadd.xlane.f32.xlu0 %v6355_v37  ;;  %v6352_v22 = vsel %vm766_vm0, %v6320_v32, 0.0 }
 0x939   : > { %v6261_v19 = vmul.f32 0.0625, %v6176_v42  ;;  %v6173_v2 = vpop.xlane.xlu1 %6172  ;;  %6353 = vadd.xlane.f32.xlu1 %v6352_v22  ;;  %v6323_v61 = vmul.f32 %v13682_v34, %v13682_v34 }
 0x93a   : > { %v6260_v18 = vmul.f32 0.0625, %v6173_v2  ;;  %v6322_v0 = vmul.f32 %v13686_v16, %v13686_v16 }
 0x93b   : > { %v13694_v13 = vsub.f32 %v13506_v4, %v6261_v19  ;;  %v6361_v57 = vsel %vm766_vm0, %v6323_v61, 0.0 }
 0x93c   : > { %v13698_v43 = vsub.f32 %v13509_v21, %v6260_v18  ;;  %v6182_v7 = vpop.xlane.xlu0 %6181  ;;  %6362 = vadd.xlane.f32.xlu0 %v6361_v57  ;;  %v6358_v49 = vsel %vm766_vm0, %v6322_v0, 0.0 }
 0x93d   : > { %v6263_v36 = vmul.f32 0.0625, %v6182_v7  ;;  %v6179_v20 = vpop.xlane.xlu1 %6178  ;;  %6359 = vadd.xlane.f32.xlu1 %v6358_v49  ;;  %v6325_v51 = vmul.f32 %v13694_v13, %v13694_v13 }
 0x93e   : > { %v6262_v55 = vmul.f32 0.0625, %v6179_v20  ;;  %v6324_v4 = vmul.f32 %v13698_v43, %v13698_v43 }
 0x93f   : > { %v13706_v27 = vsub.f32 %v13518_v50, %v6263_v36  ;;  %v6367_v21 = vsel %vm766_vm0, %v6325_v51, 0.0 }
 0x940   : > { %v13710_v1 = vsub.f32 %v13521_v9, %v6262_v55  ;;  %v6188_v28 = vpop.xlane.xlu0 %6187  ;;  %6368 = vadd.xlane.f32.xlu0 %v6367_v21  ;;  %v6364_v25 = vsel %vm766_vm0, %v6324_v4, 0.0 }
 0x941   : > { %v6265_v26 = vmul.f32 0.0625, %v6188_v28  ;;  %v6185_v14 = vpop.xlane.xlu1 %6184  ;;  %6365 = vadd.xlane.f32.xlu1 %v6364_v25  ;;  %v6327_v10 = vmul.f32 %v13706_v27, %v13706_v27 }
 0x942   : > { %v6264_v54 = vmul.f32 0.0625, %v6185_v14  ;;  %v6326_v50 = vmul.f32 %v13710_v1, %v13710_v1 }
 0x943   : > { %v13718_v6 = vsub.f32 %v13530_v47, %v6265_v26  ;;  %v6373_v9 = vsel %vm766_vm0, %v6327_v10, 0.0 }
 0x944   : > { %v13722_v41 = vsub.f32 %v13533_v39, %v6264_v54  ;;  %v6194_v5 = vpop.xlane.xlu0 %6193  ;;  %6374 = vadd.xlane.f32.xlu0 %v6373_v9  ;;  %v6370_v38 = vsel %vm766_vm0, %v6326_v50, 0.0 }
 0x945   : > { %v6267_v56 = vmul.f32 0.0625, %v6194_v5  ;;  %v6191_v52 = vpop.xlane.xlu1 %6190  ;;  %6371 = vadd.xlane.f32.xlu1 %v6370_v38  ;;  %v6329_v32 = vmul.f32 %v13718_v6, %v13718_v6 }
 0x946   : > { %v6266_v37 = vmul.f32 0.0625, %v6191_v52  ;;  %v6328_v47 = vmul.f32 %v13722_v41, %v13722_v41 }
 0x947   : > { %v13730_v42 = vsub.f32 %v13542_v24, %v6267_v56  ;;  %v6379_v39 = vsel %vm766_vm0, %v6329_v32, 0.0 }
 0x948   : > { %v13734_v22 = vsub.f32 %v13545_v44, %v6266_v37  ;;  %v6200_v19 = vpop.xlane.xlu0 %6199  ;;  %6380 = vadd.xlane.f32.xlu0 %v6379_v39  ;;  %v6376_v2 = vsel %vm766_vm0, %v6328_v47, 0.0 }
 0x949   : > { %v6269_v61 = vmul.f32 0.0625, %v6200_v19  ;;  %v6197_v18 = vpop.xlane.xlu1 %6196  ;;  %6377 = vadd.xlane.f32.xlu1 %v6376_v2  ;;  %v6331_v0 = vmul.f32 %v13730_v42, %v13730_v42 }
 0x94a   : > { %v6268_v57 = vmul.f32 0.0625, %v6197_v18  ;;  %v6330_v24 = vmul.f32 %v13734_v22, %v13734_v22 }
 0x94b   : > { %v13742_v7 = vsub.f32 %v13554_v31, %v6269_v61  ;;  %v6385_v44 = vsel %vm766_vm0, %v6331_v0, 0.0  ;;  %v6652_v0 = vld [vmem:[%s15705_s8] sm:$0xff] }
 0x94c   : > { %v13746_v49 = vsub.f32 %v13557_v40, %v6268_v57  ;;  %v6206_v36 = vpop.xlane.xlu0 %6205  ;;  %6386 = vadd.xlane.f32.xlu0 %v6385_v44  ;;  %v6382_v20 = vsel %vm766_vm0, %v6330_v24, 0.0  ;;  %v6653_v57 = vld [vmem:[%s15705_s8 + $0x8] sm:$0xff] }
 0x94d   : > { %v6271_v51 = vmul.f32 0.0625, %v6206_v36  ;;  %v6203_v55 = vpop.xlane.xlu1 %6202  ;;  %6383 = vadd.xlane.f32.xlu1 %v6382_v20  ;;  %v6333_v4 = vmul.f32 %v13742_v7, %v13742_v7 }
 0x94e   : > { %v6270_v21 = vmul.f32 0.0625, %v6203_v55  ;;  %v6332_v31 = vmul.f32 %v13746_v49, %v13746_v49 }
 0x94f   : > { %v13754_v28 = vsub.f32 %v13566_v48, %v6271_v51  ;;  %v6391_v40 = vsel %vm766_vm0, %v6333_v4, 0.0 }
 0x950   : > { %v13758_v25 = vsub.f32 %v13569_v12, %v6270_v21  ;;  %v6212_v26 = vpop.xlane.xlu0 %6211  ;;  %6392 = vadd.xlane.f32.xlu0 %v6391_v40  ;;  %v6388_v14 = vsel %vm766_vm0, %v6332_v31, 0.0 }
 0x951   : > { %v6273_v10 = vmul.f32 0.0625, %v6212_v26  ;;  %v6209_v54 = vpop.xlane.xlu1 %6208  ;;  %6389 = vadd.xlane.f32.xlu1 %v6388_v14  ;;  %v6335_v50 = vmul.f32 %v13754_v28, %v13754_v28 }
 0x952   : > { %v6272_v9 = vmul.f32 0.0625, %v6209_v54  ;;  %v6334_v48 = vmul.f32 %v13758_v25, %v13758_v25 }
 0x953   : > { %v13766_v5 = vsub.f32 %v13578_v46, %v6273_v10  ;;  %v6397_v12 = vsel %vm766_vm0, %v6335_v50, 0.0 }
 0x954   : > { %v13770_v38 = vsub.f32 %v13581_v30, %v6272_v9  ;;  %v6218_v56 = vpop.xlane.xlu0 %6217  ;;  %6398 = vadd.xlane.f32.xlu0 %v6397_v12  ;;  %v6394_v52 = vsel %vm766_vm0, %v6334_v48, 0.0 }
 0x955   : > { %v6275_v32 = vmul.f32 0.0625, %v6218_v56  ;;  %v6215_v37 = vpop.xlane.xlu1 %6214  ;;  %6395 = vadd.xlane.f32.xlu1 %v6394_v52  ;;  %v6337_v47 = vmul.f32 %v13766_v5, %v13766_v5 }
 0x956   : > { %v6274_v39 = vmul.f32 0.0625, %v6215_v37  ;;  %v6336_v46 = vmul.f32 %v13770_v38, %v13770_v38 }
 0x957   : > { %v13778_v19 = vsub.f32 %v13590_v33, %v6275_v32  ;;  %v6403_v30 = vsel %vm766_vm0, %v6337_v47, 0.0 }
 0x958   : > { %v13782_v2 = vsub.f32 %v13593_v63, %v6274_v39  ;;  %v6224_v61 = vpop.xlane.xlu0 %6223  ;;  %6404 = vadd.xlane.f32.xlu0 %v6403_v30  ;;  %v6400_v18 = vsel %vm766_vm0, %v6336_v46, 0.0  ;;  %v10660_v63 = vpack.c.bf16 %v6653_v57, %v6652_v0 }
 0x959   : > { %v6277_v24 = vmul.f32 0.0625, %v6224_v61  ;;  %v6221_v33 = vpop.xlane.xlu1 %6220  ;;  %6401 = vadd.xlane.f32.xlu1 %v6400_v18  ;;  %v6339_v44 = vmul.f32 %v13778_v19, %v13778_v19 }
 0x95a   : > { %v6276_v36 = vmul.f32 0.0625, %v6221_v33  ;;  %v6338_v20 = vmul.f32 %v13782_v2, %v13782_v2  ;;  %10661 = vmatprep.subr.bf16.mxu0 %v10660_v63 }
 0x95b   : > { %v13796_v51 = vsub.f32 %v13602_v3, %v6277_v24  ;;  %v6409_v55 = vsel %vm766_vm0, %v6339_v44, 0.0  ;;  %10663 = vmatpush3.bf16.msra.mxu0 %v10660_v63 }
 0x95c   : > { %v13800_v4 = vsub.f32 %v13605_v45, %v6276_v36  ;;  %v6230_v21 = vpop.xlane.xlu0 %6229  ;;  %6410 = vadd.xlane.f32.xlu0 %v6409_v55  ;;  %v6406_v31 = vsel %vm766_vm0, %v6338_v20, 0.0 }
 0x95d   : > { %v6279_v40 = vmul.f32 0.0625, %v6230_v21  ;;  %v6227_v26 = vpop.xlane.xlu1 %6226  ;;  %6407 = vadd.xlane.f32.xlu1 %v6406_v31  ;;  %v6341_v14 = vmul.f32 %v13796_v51, %v13796_v51 }
 0x95e   : > { %v6278_v10 = vmul.f32 0.0625, %v6227_v26  ;;  %v6340_v3 = vmul.f32 %v13800_v4, %v13800_v4 }
 0x95f   : > { %v13808_v54 = vsub.f32 %v13614_v11, %v6279_v40  ;;  %v6415_v45 = vsel %vm766_vm0, %v6341_v14, 0.0 }
 0x960   : > { %v13812_v50 = vsub.f32 %v13617_v59, %v6278_v10  ;;  %v6236_v9 = vpop.xlane.xlu0 %6235  ;;  %6416 = vadd.xlane.f32.xlu0 %v6415_v45  ;;  %v6412_v48 = vsel %vm766_vm0, %v6340_v3, 0.0 }
 0x961   : > { %v6281_v12 = vmul.f32 0.0625, %v6236_v9  ;;  %v6233_v56 = vpop.xlane.xlu1 %6232  ;;  %6413 = vadd.xlane.f32.xlu1 %v6412_v48  ;;  %v6343_v52 = vmul.f32 %v13808_v54, %v13808_v54 }
 0x962   : > { %v6280_v32 = vmul.f32 0.0625, %v6233_v56  ;;  %v6342_v11 = vmul.f32 %v13812_v50, %v13812_v50 }
 0x963   : > { %v13820_v37 = vsub.f32 %v13626_v53, %v6281_v12  ;;  %v6421_v59 = vsel %vm766_vm0, %v6343_v52, 0.0 }
 0x964   : > { %v13824_v47 = vsub.f32 %v13629_v15, %v6280_v32  ;;  %v6242_v39 = vpop.xlane.xlu0 %6241  ;;  %6422 = vadd.xlane.f32.xlu0 %v6421_v59  ;;  %v6418_v46 = vsel %vm766_vm0, %v6342_v11, 0.0 }
 0x965   : > { %v6283_v30 = vmul.f32 0.0625, %v6242_v39  ;;  %v6239_v61 = vpop.xlane.xlu1 %6238  ;;  %6419 = vadd.xlane.f32.xlu1 %v6418_v46  ;;  %v6345_v18 = vmul.f32 %v13820_v37, %v13820_v37 }
 0x966   : > { %v6282_v0 = vmul.f32 0.0625, %v6239_v61  ;;  %v6344_v53 = vmul.f32 %v13824_v47, %v13824_v47 }
 0x967   : > { %v13832_v57 = vsub.f32 %v13638_v8, %v6283_v30  ;;  %v6427_v15 = vsel %vm766_vm0, %v6345_v18, 0.0 }
 0x968   : > { %v13836_v24 = vsub.f32 %v13641_v60, %v6282_v0  ;;  %v6248_v33 = vpop.xlane.xlu0 %6247  ;;  %6428 = vadd.xlane.f32.xlu0 %v6427_v15  ;;  %v6424_v44 = vsel %vm766_vm0, %v6344_v53, 0.0 }
 0x969   : > { %v6285_v63 = vmul.f32 0.0625, %v6248_v33  ;;  %v6245_v36 = vpop.xlane.xlu1 %6244  ;;  %6425 = vadd.xlane.f32.xlu1 %v6424_v44  ;;  %v6347_v20 = vmul.f32 %v13832_v57, %v13832_v57 }
 0x96a   : > { %v6284_v55 = vmul.f32 0.0625, %v6245_v36  ;;  %v6346_v8 = vmul.f32 %v13836_v24, %v13836_v24 }
 0x96b   : > { %v13844_v21 = vsub.f32 %v13650_v17, %v6285_v63  ;;  %v6433_v60 = vsel %vm766_vm0, %v6347_v20, 0.0 }
 0x96c   : > { %v13848_v31 = vsub.f32 %v13653_v23, %v6284_v55  ;;  %6434 = vadd.xlane.f32.xlu0 %v6433_v60  ;;  %v6254_v40 = vpop.xlane.xlu0 %6253  ;;  %v6430_v26 = vsel %vm766_vm0, %v6346_v8, 0.0 }
 0x96d   : > { %v6287_v14 = vmul.f32 0.0625, %v6254_v40  ;;  %6431 = vadd.xlane.f32.xlu1 %v6430_v26  ;;  %v6251_v10 = vpop.xlane.xlu1 %6250  ;;  %v6349_v3 = vmul.f32 %v13844_v21, %v13844_v21 }
 0x96e   : > { %v6286_v45 = vmul.f32 0.0625, %v6251_v10  ;;  %v6348_v17 = vmul.f32 %v13848_v31, %v13848_v31 }
 0x96f   : > { %v13856_v9 = vsub.f32 %v13662_v35, %v6287_v14  ;;  %v6439_v23 = vsel %vm766_vm0, %v6349_v3, 0.0  ;;  %v13872_v3 = vld [vmem:[%s15703_s6] ss:$0 sm:$0xff] }
 0x970   : > { %v13860_v48 = vsub.f32 %v13665_v62, %v6286_v45  ;;  %6440 = vadd.xlane.f32.xlu0 %v6439_v23  ;;  %v6436_v12 = vsel %vm766_vm0, %v6348_v17, 0.0 }
 0x971   : > { %6437 = vadd.xlane.f32.xlu1 %v6436_v12  ;;  %v6351_v56 = vmul.f32 %v13856_v9, %v13856_v9 }
 0x972   : > { %v6350_v52 = vmul.f32 %v13860_v48, %v13860_v48 }
 0x973   : > { %v6445_v32 = vsel %vm766_vm0, %v6351_v56, 0.0 }
 0x974   : > { %6446 = vadd.xlane.f32.xlu0 %v6445_v32  ;;  %v6442_v35 = vsel %vm766_vm0, %v6350_v52, 0.0 }
 0x975   : > { %6443 = vadd.xlane.f32.xlu1 %v6442_v35 }
 0x9c5   : > { %v6357_v11 = vpop.xlane.xlu0 %6356 }
 0x9c6   : > { %v6449_v59 = vmul.f32 0.0625, %v6357_v11  ;;  %v6354_v62 = vpop.xlane.xlu1 %6353  ;;  %v13879_v11 = vld [vmem:[%s15704_s7] ss:$0 sm:$0xff] }
 0x9c7   : > { %v6448_v39 = vmul.f32 0.0625, %v6354_v62 }
 0x9c8   : > { %v6481_v46 = vadd.f32 1e-05, %v6449_v59 }
 0x9c9   : > { %v6480_v30 = vadd.f32 1e-05, %v6448_v39  ;;  %v6363_v61 = vpop.xlane.xlu0 %6362 }
 0x9ca   : > { %11304 = vrsqrt.f32 %v6481_v46  ;;  %v6451_v18 = vmul.f32 0.0625, %v6363_v61  ;;  %v6360_v0 = vpop.xlane.xlu1 %6359 }
 0x9cb   : > { %11306 = vrsqrt.f32 %v6480_v30  ;;  %v6450_v53 = vmul.f32 0.0625, %v6360_v0 }
 0x9cc   : > { %v6483_v15 = vadd.f32 1e-05, %v6451_v18 }
 0x9cd   : > { %v6482_v33 = vadd.f32 1e-05, %v6450_v53  ;;  %v6369_v44 = vpop.xlane.xlu0 %6368 }
 0x9ce   : > { %11308 = vrsqrt.f32 %v6483_v15  ;;  %v6453_v63 = vmul.f32 0.0625, %v6369_v44  ;;  %v6366_v36 = vpop.xlane.xlu1 %6365 }
 0x9cf   : > { %11310 = vrsqrt.f32 %v6482_v33  ;;  %v6452_v20 = vmul.f32 0.0625, %v6366_v36 }
 0x9d0   : > { %v6485_v55 = vadd.f32 1e-05, %v6453_v63 }
 0x9d1   : > { %v6484_v8 = vadd.f32 1e-05, %v6452_v20  ;;  %v6375_v60 = vpop.xlane.xlu0 %6374 }
 0x9d2   : > { %11312 = vrsqrt.f32 %v6485_v55  ;;  %v6455_v40 = vmul.f32 0.0625, %v6375_v60  ;;  %v6372_v26 = vpop.xlane.xlu1 %6371 }
 0x9d3   : > { %11314 = vrsqrt.f32 %v6484_v8  ;;  %v6454_v14 = vmul.f32 0.0625, %v6372_v26 }
 0x9d4   : > { %v11305_v10 = vpop.eup %11304  ;;  %v6487_v45 = vadd.f32 1e-05, %v6455_v40 }
 0x9d5   : > { %v11307_v17 = vpop.eup %11306  ;;  %v6545_v23 = vmul.f32 %v11305_v10, %v13672_v29  ;;  %v6486_v12 = vadd.f32 1e-05, %v6454_v14  ;;  %v6381_v56 = vpop.xlane.xlu0 %6380 }
 0x9d6   : > { %11316 = vrsqrt.f32 %v6487_v45  ;;  %v6457_v52 = vmul.f32 0.0625, %v6381_v56  ;;  %v6378_v32 = vpop.xlane.xlu1 %6377  ;;  %v6544_v35 = vmul.f32 %v11307_v17, %v13675_v58 }
 0x9d7   : > { %v6583_v59 = vmul.f32 %v13872_v3, %v6545_v23  ;;  %11318 = vrsqrt.f32 %v6486_v12  ;;  %v6456_v62 = vmul.f32 0.0625, %v6378_v32 }
 0x9d8   : > { %v11309_v39 = vpop.eup %11308  ;;  %v6489_v46 = vadd.f32 1e-05, %v6457_v52  ;;  %v6582_v29 = vmul.f32 %v13872_v3, %v6544_v35 }
 0x9d9   : > { %v11311_v30 = vpop.eup %11310  ;;  %v6488_v61 = vadd.f32 1e-05, %v6456_v62  ;;  %v6387_v18 = vpop.xlane.xlu0 %6386  ;;  %v6547_v0 = vmul.f32 %v11309_v39, %v13682_v34  ;;  %v13889_v44 = vadd.f32 %v13879_v11, %v6583_v59 }
 0x9da   : > { %11320 = vrsqrt.f32 %v6489_v46  ;;  %v6459_v58 = vmul.f32 0.0625, %v6387_v18  ;;  %v6384_v53 = vpop.xlane.xlu1 %6383  ;;  %v13885_v15 = vadd.f32 %v13879_v11, %v6582_v29  ;;  %v6546_v33 = vmul.f32 %v11311_v30, %v13686_v16 }
 0x9db   : > { %16045 = vst [vmem:[#allocation61_spill] sm:$0xff] %v13889_v44  ;;  %11322 = vrsqrt.f32 %v6488_v61  ;;  %v6458_v63 = vmul.f32 0.0625, %v6384_v53  ;;  %v6585_v36 = vmul.f32 %v13872_v3, %v6547_v0 }
 0x9dc   : > { %16044 = vst [vmem:[#allocation38_spill] sm:$0xff] %v13885_v15  ;;  %v11313_v20 = vpop.eup %11312  ;;  %v6491_v55 = vadd.f32 1e-05, %v6459_v58  ;;  %10224 = vmatprep.mubr.msk.f32.mxu0 %vm766_vm0, %v13885_v15  ;;  %v6584_v34 = vmul.f32 %v13872_v3, %v6546_v33 }
 0x9dd   : > { %v11315_v8 = vpop.eup %11314  ;;  %v6490_v60 = vadd.f32 1e-05, %v6458_v63  ;;  %v6393_v40 = vpop.xlane.xlu0 %6392  ;;  %10225 = vmatmul.mubr.msk.f32.vlgmr.msra.gmra.mrb[92].mxu0 %vm766_vm0, %v13889_v44  ;;  %v6549_v16 = vmul.f32 %v11313_v20, %v13694_v13  ;;  %v13903_v23 = vadd.f32 %v13879_v11, %v6585_v36 }
 0x9de   : > { %11324 = vrsqrt.f32 %v6491_v55  ;;  %v6461_v26 = vmul.f32 0.0625, %v6393_v40  ;;  %v6390_v14 = vpop.xlane.xlu1 %6389  ;;  %v13899_v10 = vadd.f32 %v13879_v11, %v6584_v34  ;;  %v6548_v45 = vmul.f32 %v11315_v8, %v13698_v43 }
 0x9df   : > { %11326 = vrsqrt.f32 %v6490_v60  ;;  %v6460_v17 = vmul.f32 0.0625, %v6390_v14  ;;  %16047 = vst [vmem:[#allocation37_spill] sm:$0xff] %v13903_v23  ;;  %v6587_v12 = vmul.f32 %v13872_v3, %v6549_v16 }
 0x9e0   : > { %16046 = vst [vmem:[#allocation59_spill] sm:$0xff] %v13899_v10  ;;  %v11317_v56 = vpop.eup %11316  ;;  %v6493_v52 = vadd.f32 1e-05, %v6461_v26  ;;  %10227 = vmatprep.mubr.msk.f32.mxu0 %vm766_vm0, %v13899_v10  ;;  %v6586_v13 = vmul.f32 %v13872_v3, %v6548_v45 }
 0x9e1   : > { %v11319_v32 = vpop.eup %11318  ;;  %v6492_v35 = vadd.f32 1e-05, %v6460_v17  ;;  %v6399_v59 = vpop.xlane.xlu0 %6398  ;;  %10228 = vmatmul.mubr.msk.f32.gmra.mrb[94].mxu0 %vm766_vm0, %v13903_v23  ;;  %v6551_v43 = vmul.f32 %v11317_v56, %v13706_v27  ;;  %v13917_v61 = vadd.f32 %v13879_v11, %v6587_v12 }
 0x9e2   : > { %11328 = vrsqrt.f32 %v6493_v52  ;;  %v6463_v62 = vmul.f32 0.0625, %v6399_v59  ;;  %v6396_v39 = vpop.xlane.xlu1 %6395  ;;  %v13913_v46 = vadd.f32 %v13879_v11, %v6586_v13  ;;  %v6550_v29 = vmul.f32 %v11319_v32, %v13710_v1 }
 0x9e3   : > { %11330 = vrsqrt.f32 %v6492_v35  ;;  %v6462_v30 = vmul.f32 0.0625, %v6396_v39  ;;  %16049 = vst [vmem:[#allocation66_spill] sm:$0xff] %v13917_v61  ;;  %v6589_v18 = vmul.f32 %v13872_v3, %v6551_v43 }
 0x9e4   : > { %16048 = vst [vmem:[#allocation40_spill] sm:$0xff] %v13913_v46  ;;  %v11321_v0 = vpop.eup %11320  ;;  %v6495_v58 = vadd.f32 1e-05, %v6463_v62  ;;  %10230 = vmatprep.mubr.msk.f32.mxu0 %vm766_vm0, %v13913_v46  ;;  %v6588_v27 = vmul.f32 %v13872_v3, %v6550_v29 }
 0x9e5   : > { %v11323_v53 = vpop.eup %11322  ;;  %v6494_v33 = vadd.f32 1e-05, %v6462_v30  ;;  %v6405_v63 = vpop.xlane.xlu0 %6404  ;;  %10231 = vmatmul.mubr.msk.f32.gmra.mrb[96].mxu0 %vm766_vm0, %v13917_v61  ;;  %v6553_v1 = vmul.f32 %v11321_v0, %v13718_v6  ;;  %v13931_v60 = vadd.f32 %v13879_v11, %v6589_v18 }
 0x9e6   : > { %11332 = vrsqrt.f32 %v6495_v58  ;;  %v6465_v36 = vmul.f32 0.0625, %v6405_v63  ;;  %v6402_v20 = vpop.xlane.xlu1 %6401  ;;  %v13927_v55 = vadd.f32 %v13879_v11, %v6588_v27  ;;  %v6552_v34 = vmul.f32 %v11323_v53, %v13722_v41 }
 0x9e7   : > { %11334 = vrsqrt.f32 %v6494_v33  ;;  %v6464_v8 = vmul.f32 0.0625, %v6402_v20  ;;  %16051 = vst [vmem:[#allocation39_spill] sm:$0xff] %v13931_v60  ;;  %v6591_v40 = vmul.f32 %v13872_v3, %v6553_v1 }
 0x9e8   : > { %16050 = vst [vmem:[#allocation65_spill] sm:$0xff] %v13927_v55  ;;  %v11325_v16 = vpop.eup %11324  ;;  %v6497_v26 = vadd.f32 1e-05, %v6465_v36  ;;  %10233 = vmatprep.mubr.msk.f32.mxu0 %vm766_vm0, %v13927_v55  ;;  %v6590_v6 = vmul.f32 %v13872_v3, %v6552_v34 }
 0x9e9   : > { %v11327_v14 = vpop.eup %11326  ;;  %v6496_v45 = vadd.f32 1e-05, %v6464_v8  ;;  %v6411_v17 = vpop.xlane.xlu0 %6410  ;;  %10234 = vmatmul.mubr.msk.f32.gmra.mrb[98].mxu0 %vm766_vm0, %v13931_v60  ;;  %v6555_v41 = vmul.f32 %v11325_v16, %v13730_v42  ;;  %v13945_v35 = vadd.f32 %v13879_v11, %v6591_v40 }
 0x9ea   : > { %11336 = vrsqrt.f32 %v6497_v26  ;;  %v6467_v12 = vmul.f32 0.0625, %v6411_v17  ;;  %v6408_v56 = vpop.xlane.xlu1 %6407  ;;  %v13941_v52 = vadd.f32 %v13879_v11, %v6590_v6  ;;  %v6554_v13 = vmul.f32 %v11327_v14, %v13734_v22 }
 0x9eb   : > { %11338 = vrsqrt.f32 %v6496_v45  ;;  %v6466_v32 = vmul.f32 0.0625, %v6408_v56  ;;  %16053 = vst [vmem:[#allocation41_spill] sm:$0xff] %v13945_v35  ;;  %v6593_v59 = vmul.f32 %v13872_v3, %v6555_v41 }
 0x9ec   : > { %16052 = vst [vmem:[#allocation42_spill] sm:$0xff] %v13941_v52  ;;  %v11329_v43 = vpop.eup %11328  ;;  %v6499_v62 = vadd.f32 1e-05, %v6467_v12  ;;  %10236 = vmatprep.mubr.msk.f32.mxu0 %vm766_vm0, %v13941_v52  ;;  %v6592_v42 = vmul.f32 %v13872_v3, %v6554_v13 }
 0x9ed   : > { %v11331_v39 = vpop.eup %11330  ;;  %v6498_v29 = vadd.f32 1e-05, %v6466_v32  ;;  %v6417_v30 = vpop.xlane.xlu0 %6416  ;;  %10237 = vmatmul.mubr.msk.f32.gmra.mrb[100].mxu0 %vm766_vm0, %v13945_v35  ;;  %v6557_v22 = vmul.f32 %v11329_v43, %v13742_v7  ;;  %v13959_v33 = vadd.f32 %v13879_v11, %v6593_v59 }
 0x9ee   : > { %11340 = vrsqrt.f32 %v6499_v62  ;;  %v6469_v18 = vmul.f32 0.0625, %v6417_v30  ;;  %v6414_v0 = vpop.xlane.xlu1 %6413  ;;  %v13955_v58 = vadd.f32 %v13879_v11, %v6592_v42  ;;  %v6556_v27 = vmul.f32 %v11331_v39, %v13746_v49 }
 0x9ef   : > { %11342 = vrsqrt.f32 %v6498_v29  ;;  %v6468_v53 = vmul.f32 0.0625, %v6414_v0  ;;  %16055 = vst [vmem:[#allocation72_spill] sm:$0xff] %v13959_v33  ;;  %v6595_v63 = vmul.f32 %v13872_v3, %v6557_v22 }
 0x9f0   : > { %16054 = vst [vmem:[#allocation83_spill] sm:$0xff] %v13955_v58  ;;  %v11333_v1 = vpop.eup %11332  ;;  %v6501_v36 = vadd.f32 1e-05, %v6469_v18  ;;  %10239 = vmatprep.mubr.msk.f32.mxu0 %vm766_vm0, %v13955_v58  ;;  %v6594_v7 = vmul.f32 %v13872_v3, %v6556_v27 }
 0x9f1   : > { %v11335_v20 = vpop.eup %11334  ;;  %v6500_v34 = vadd.f32 1e-05, %v6468_v53  ;;  %v6423_v8 = vpop.xlane.xlu0 %6422  ;;  %10240 = vmatmul.mubr.msk.f32.gmra.mrb[102].mxu0 %vm766_vm0, %v13959_v33  ;;  %v6559_v49 = vmul.f32 %v11333_v1, %v13754_v28  ;;  %v13973_v45 = vadd.f32 %v13879_v11, %v6595_v63 }
 0x9f2   : > { %11344 = vrsqrt.f32 %v6501_v36  ;;  %v6471_v40 = vmul.f32 0.0625, %v6423_v8  ;;  %v6420_v16 = vpop.xlane.xlu1 %6419  ;;  %v13969_v26 = vadd.f32 %v13879_v11, %v6594_v7  ;;  %v6558_v6 = vmul.f32 %v11335_v20, %v13758_v25 }
 0x9f3   : > { %11346 = vrsqrt.f32 %v6500_v34  ;;  %v6470_v14 = vmul.f32 0.0625, %v6420_v16  ;;  %16057 = vst [vmem:[#allocation70_spill] sm:$0xff] %v13973_v45  ;;  %v6597_v17 = vmul.f32 %v13872_v3, %v6559_v49 }
 0x9f4   : > { %16056 = vst [vmem:[#allocation69_spill] sm:$0xff] %v13969_v26  ;;  %v11337_v41 = vpop.eup %11336  ;;  %v6503_v12 = vadd.f32 1e-05, %v6471_v40  ;;  %10242 = vmatprep.mubr.msk.f32.mxu0 %vm766_vm0, %v13969_v26  ;;  %v6596_v28 = vmul.f32 %v13872_v3, %v6558_v6 }
 0x9f5   : > { %v11339_v56 = vpop.eup %11338  ;;  %v6502_v13 = vadd.f32 1e-05, %v6470_v14  ;;  %v6429_v32 = vpop.xlane.xlu0 %6428  ;;  %10243 = vmatmul.mubr.msk.f32.gmra.mrb[104].mxu0 %vm766_vm0, %v13973_v45  ;;  %v6561_v25 = vmul.f32 %v11337_v41, %v13766_v5  ;;  %v13987_v29 = vadd.f32 %v13879_v11, %v6597_v17 }
 0x9f6   : > { %11348 = vrsqrt.f32 %v6503_v12  ;;  %v6473_v59 = vmul.f32 0.0625, %v6429_v32  ;;  %v6426_v43 = vpop.xlane.xlu1 %6425  ;;  %v13983_v62 = vadd.f32 %v13879_v11, %v6596_v28  ;;  %v6560_v42 = vmul.f32 %v11339_v56, %v13770_v38 }
 0x9f7   : > { %11350 = vrsqrt.f32 %v6502_v13  ;;  %v6472_v39 = vmul.f32 0.0625, %v6426_v43  ;;  %16059 = vst [vmem:[#allocation67_spill] sm:$0xff] %v13987_v29  ;;  %v6599_v30 = vmul.f32 %v13872_v3, %v6561_v25 }
 0x9f8   : > { %16058 = vst [vmem:[#allocation73_spill] sm:$0xff] %v13983_v62  ;;  %v11341_v22 = vpop.eup %11340  ;;  %v6505_v18 = vadd.f32 1e-05, %v6473_v59  ;;  %10245 = vmatprep.mubr.msk.f32.mxu0 %vm766_vm0, %v13983_v62  ;;  %v6598_v5 = vmul.f32 %v13872_v3, %v6560_v42 }
 0x9f9   : > { %v11343_v0 = vpop.eup %11342  ;;  %v6504_v27 = vadd.f32 1e-05, %v6472_v39  ;;  %v6435_v53 = vpop.xlane.xlu0 %6434  ;;  %10246 = vmatmul.mubr.msk.f32.gmra.mrb[106].mxu0 %vm766_vm0, %v13987_v29  ;;  %v6563_v38 = vmul.f32 %v11341_v22, %v13778_v19  ;;  %v14001_v34 = vadd.f32 %v13879_v11, %v6599_v30 }
 0x9fa   : > { %11352 = vrsqrt.f32 %v6505_v18  ;;  %v6475_v63 = vmul.f32 0.0625, %v6435_v53  ;;  %v6432_v1 = vpop.xlane.xlu1 %6431  ;;  %v13997_v36 = vadd.f32 %v13879_v11, %v6598_v5  ;;  %v6562_v7 = vmul.f32 %v11343_v0, %v13782_v2 }
 0x9fb   : > { %11354 = vrsqrt.f32 %v6504_v27  ;;  %v6474_v20 = vmul.f32 0.0625, %v6432_v1  ;;  %16061 = vst [vmem:[#allocation71_spill] sm:$0xff] %v14001_v34  ;;  %v6601_v8 = vmul.f32 %v13872_v3, %v6563_v38 }
 0x9fc   : > { %16060 = vst [vmem:[#allocation74_spill] sm:$0xff] %v13997_v36  ;;  %v11345_v49 = vpop.eup %11344  ;;  %v6507_v40 = vadd.f32 1e-05, %v6475_v63  ;;  %10248 = vmatprep.mubr.msk.f32.mxu0 %vm766_vm0, %v13997_v36  ;;  %v6600_v19 = vmul.f32 %v13872_v3, %v6562_v7 }
 0x9fd   : > { %v11347_v16 = vpop.eup %11346  ;;  %v6506_v6 = vadd.f32 1e-05, %v6474_v20  ;;  %v6441_v14 = vpop.xlane.xlu0 %6440  ;;  %10249 = vmatmul.mubr.msk.f32.gmra.mrb[108].mxu0 %vm766_vm0, %v14001_v34  ;;  %v6565_v2 = vmul.f32 %v11345_v49, %v13796_v51  ;;  %v14015_v13 = vadd.f32 %v13879_v11, %v6601_v8 }
 0x9fe   : > { %11356 = vrsqrt.f32 %v6507_v40  ;;  %v6477_v17 = vmul.f32 0.0625, %v6441_v14  ;;  %v6438_v41 = vpop.xlane.xlu1 %6437  ;;  %v14011_v12 = vadd.f32 %v13879_v11, %v6600_v19  ;;  %v6564_v28 = vmul.f32 %v11347_v16, %v13800_v4 }
 0x9ff   : > { %11358 = vrsqrt.f32 %v6506_v6  ;;  %v6476_v56 = vmul.f32 0.0625, %v6438_v41  ;;  %16063 = vst [vmem:[#allocation76_spill] sm:$0xff] %v14015_v13  ;;  %v6603_v32 = vmul.f32 %v13872_v3, %v6565_v2 }
 0xa00   : > { %16062 = vst [vmem:[#allocation84_spill] sm:$0xff] %v14011_v12  ;;  %v11349_v25 = vpop.eup %11348  ;;  %v6509_v59 = vadd.f32 1e-05, %v6477_v17  ;;  %10251 = vmatprep.mubr.msk.f32.mxu0 %vm766_vm0, %v14011_v12  ;;  %v6602_v51 = vmul.f32 %v13872_v3, %v6564_v28 }
 0xa01   : > { %v11351_v43 = vpop.eup %11350  ;;  %v6508_v42 = vadd.f32 1e-05, %v6476_v56  ;;  %v6447_v39 = vpop.xlane.xlu0 %6446  ;;  %10252 = vmatmul.mubr.msk.f32.gmra.mrb[110].mxu0 %vm766_vm0, %v14015_v13  ;;  %v6567_v4 = vmul.f32 %v11349_v25, %v13808_v54  ;;  %v14029_v27 = vadd.f32 %v13879_v11, %v6603_v32 }
 0xa02   : > { %11360 = vrsqrt.f32 %v6509_v59  ;;  %v6479_v30 = vmul.f32 0.0625, %v6447_v39  ;;  %v6444_v22 = vpop.xlane.xlu1 %6443  ;;  %v14025_v18 = vadd.f32 %v13879_v11, %v6602_v51  ;;  %v6566_v5 = vmul.f32 %v11351_v43, %v13812_v50 }
 0xa03   : > { %11362 = vrsqrt.f32 %v6508_v42  ;;  %v6478_v0 = vmul.f32 0.0625, %v6444_v22  ;;  %16065 = vst [vmem:[#allocation78_spill] sm:$0xff] %v14029_v27  ;;  %v6605_v53 = vmul.f32 %v13872_v3, %v6567_v4 }
 0xa04   : > { %16064 = vst [vmem:[#allocation81_spill] sm:$0xff] %v14025_v18  ;;  %v11353_v38 = vpop.eup %11352  ;;  %v6511_v63 = vadd.f32 1e-05, %v6479_v30  ;;  %10254 = vmatprep.mubr.msk.f32.mxu0 %vm766_vm0, %v14025_v18  ;;  %v6604_v54 = vmul.f32 %v13872_v3, %v6566_v5 }
 0xa05   : > { %v11355_v1 = vpop.eup %11354  ;;  %v6510_v7 = vadd.f32 1e-05, %v6478_v0  ;;  %10255 = vmatmul.mubr.msk.f32.gmra.mrb[112].mxu0 %vm766_vm0, %v14029_v27  ;;  %v6569_v50 = vmul.f32 %v11353_v38, %v13820_v37  ;;  %v14043_v49 = vadd.f32 %v13879_v11, %v6605_v53  ;;  %v7849_v53 = vld [vmem:[%s15707_s10 + $0x18] sm:$0xff] }
 0xa06   : > { %11364 = vrsqrt.f32 %v6511_v63  ;;  %v14039_v20 = vadd.f32 %v13879_v11, %v6604_v54  ;;  %v6568_v8 = vmul.f32 %v11355_v1, %v13824_v47  ;;  %v14118_v63 = vld [vmem:[%s15706_s9] ss:$0 sm:$0xff] }
 0xa07   : > { %11366 = vrsqrt.f32 %v6510_v7  ;;  %16067 = vst [vmem:[#allocation75_spill] sm:$0xff] %v14043_v49  ;;  %v6607_v40 = vmul.f32 %v13872_v3, %v6569_v50 }
 0xa08   : > { %16066 = vst [vmem:[#allocation79_spill] sm:$0xff] %v14039_v20  ;;  %v11357_v19 = vpop.eup %11356  ;;  %10257 = vmatprep.mubr.msk.f32.mxu0 %vm766_vm0, %v14039_v20  ;;  %v6606_v16 = vmul.f32 %v13872_v3, %v6568_v8 }
 0xa09   : > { %v11359_v6 = vpop.eup %11358  ;;  %10258 = vmatmul.mubr.msk.f32.gmra.mrb[114].mxu0 %vm766_vm0, %v14043_v49  ;;  %v6571_v37 = vmul.f32 %v11357_v19, %v13832_v57  ;;  %v14057_v2 = vadd.f32 %v13879_v11, %v6607_v40 }
 0xa0a   : > { %v14053_v47 = vadd.f32 %v13879_v11, %v6606_v16  ;;  %v6570_v14 = vmul.f32 %v11359_v6, %v13836_v24 }
 0xa0b   : > { %16069 = vst [vmem:[#allocation77_spill] sm:$0xff] %v14057_v2  ;;  %v6609_v17 = vmul.f32 %v13872_v3, %v6571_v37 }
 0xa0c   : > { %16068 = vst [vmem:[#allocation80_spill] sm:$0xff] %v14053_v47  ;;  %v11361_v41 = vpop.eup %11360  ;;  %10260 = vmatprep.mubr.msk.f32.mxu0 %vm766_vm0, %v14053_v47  ;;  %v6608_v28 = vmul.f32 %v13872_v3, %v6570_v14  ;;  %v7850_v14 = vld [vmem:[%s15707_s10 + $0x20] sm:$0xff] }
 0xa0d   : > { %v11363_v56 = vpop.eup %11362  ;;  %10261 = vmatmul.mubr.msk.f32.gmra.mrb[116].mxu0 %vm766_vm0, %v14057_v2  ;;  %v6573_v57 = vmul.f32 %v11361_v41, %v13844_v21  ;;  %v14071_v25 = vadd.f32 %v13879_v11, %v6609_v17  ;;  %v7851_v17 = vld [vmem:[%s15707_s10 + $0x28] sm:$0xff] }
 0xa0e   : > { %v14067_v32 = vadd.f32 %v13879_v11, %v6608_v28  ;;  %v6572_v24 = vmul.f32 %v11363_v56, %v13848_v31  ;;  %v10672_v56 = vpack.c.bf16 %v7851_v17, %v7850_v14 }
 0xa0f   : > { %16071 = vst [vmem:[#allocation43_spill] sm:$0xff] %v14071_v25  ;;  %v6611_v59 = vmul.f32 %v13872_v3, %v6573_v57 }
 0xa10   : > { %16070 = vst [vmem:[#allocation82_spill] sm:$0xff] %v14067_v32  ;;  %v11365_v51 = vpop.eup %11364  ;;  %10263 = vmatprep.mubr.msk.f32.mxu0 %vm766_vm0, %v14067_v32  ;;  %v6610_v43 = vmul.f32 %v13872_v3, %v6572_v24 }
 0xa11   : > { %v11367_v42 = vpop.eup %11366  ;;  %10264 = vmatmul.mubr.msk.f32.gmra.mrb[118].mxu0 %vm766_vm0, %v14071_v25  ;;  %v6575_v21 = vmul.f32 %v11365_v51, %v13856_v9  ;;  %v14085_v4 = vadd.f32 %v13879_v11, %v6611_v59 }
 0xa12   : > { %v14081_v39 = vadd.f32 %v13879_v11, %v6610_v43  ;;  %v6574_v31 = vmul.f32 %v11367_v42, %v13860_v48  ;;  %v7846_v48 = vld [vmem:[%s15707_s10] sm:$0xff] }
 0xa13   : > { %16073 = vst [vmem:[#allocation55_spill] sm:$0xff] %v14085_v4  ;;  %v6613_v30 = vmul.f32 %v13872_v3, %v6575_v21 }
 0xa14   : > { %16072 = vst [vmem:[#allocation52_spill] sm:$0xff] %v14081_v39  ;;  %10266 = vmatprep.mubr.msk.f32.mxu0 %vm766_vm0, %v14081_v39  ;;  %v6612_v22 = vmul.f32 %v13872_v3, %v6574_v31  ;;  %v7847_v3 = vld [vmem:[%s15707_s10 + $0x8] sm:$0xff] }
 0xa15   : > { %10267 = vmatmul.mubr.msk.f32.gmra.mrb[120].mxu0 %vm766_vm0, %v14085_v4  ;;  %v14097_v5 = vadd.f32 %v13879_v11, %v6613_v30  ;;  %v10664_v0 = vpack.c.bf16 %v7847_v3, %v7846_v48 }
 0xa16   : > { %v14094_v9 = vadd.f32 %v13879_v11, %v6612_v22  ;;  %v7848_v11 = vld [vmem:[%s15707_s10 + $0x10] sm:$0xff] }
 0xa17   : > { %16075 = vst [vmem:[#allocation48_spill] sm:$0xff] %v14097_v5  ;;  %10665 = vmatprep.subr.bf16.mxu0 %v10664_v0  ;;  %v10668_v38 = vpack.c.bf16 %v7849_v53, %v7848_v11 }
 0xa18   : > { %16074 = vst [vmem:[#allocation45_spill] sm:$0xff] %v14094_v9  ;;  %10269 = vmatprep.mubr.msk.f32.mxu0 %vm766_vm0, %v14094_v9  ;;  %10667 = vmatpush3.bf16.msra.mxu0 %v10664_v0 }
 0xa19   : > { %10270 = vmatmul.mubr.msk.f32.gmra.mrb[122].mxu0 %vm766_vm0, %v14097_v5  ;;  %10669 = vmatprep.subr.bf16.mxu0 %v10668_v38 }
 0xa1c   : > { %10671 = vmatpush3.bf16.msra.mxu0 %v10668_v38 }
 0xa1d   : > { %10673 = vmatprep.subr.bf16.mxu0 %v10672_v56 }
 0xa20   : > { %10675 = vmatpush3.bf16.msra.mxu0 %v10672_v56 }
 0xab0   : > { %v10226_v54 = vpop.f32.mrb[92].mxu0 }
 0xab1   : > { %v14121_v1 = vadd.f32 %v10226_v54, %v14118_v63  ;;  %v6823_v7 = vpop.f32.mrb[93].mxu0 }
 0xab2   : > { %v14124_v50 = vadd.f32 %v14118_v63, %v6823_v7 }
 0xab3   : > { %v14127_v8 = vmul.f32 0.70710677, %v14121_v1 }
 0xab4   : > { %v14130_v40 = vmul.f32 0.70710677, %v14124_v50  ;;  %v10229_v19 = vpop.f32.mrb[94].mxu0 }
 0xab5   : > { %v14133_v16 = vand.u32 2147483647, %v14127_v8  ;;  %v14136_v6 = vadd.f32 %v10229_v19, %v14118_v63  ;;  %v6833_v37 = vpop.f32.mrb[95].mxu0  ;;  %vm7687_vm4 = vcmp.ge.f32.partialorder %v14127_v8, 0.0 }
 0xab6   : > { %v14145_v41 = vand.u32 2147483647, %v14130_v40  ;;  %v14148_v28 = vadd.f32 %v14118_v63, %v6833_v37  ;;  %vm7686_vm5 = vcmp.ge.f32.partialorder %v14130_v40, 0.0 }
 0xab7   : > { %v7079_v57 = vmul.f32 0.3275911, %v14133_v16  ;;  %v14152_v24 = vmul.f32 0.70710677, %v14136_v6  ;;  %v7495_v34 = vsub.f32 0.0, %v14133_v16 }
 0xab8   : > { %v7078_v59 = vmul.f32 0.3275911, %v14145_v41  ;;  %v14156_v51 = vmul.f32 0.70710677, %v14148_v28  ;;  %v10232_v21 = vpop.f32.mrb[96].mxu0 }
 0xab9   : > { %v7111_v43 = vadd.f32 1.0, %v7079_v57  ;;  %v14159_v42 = vand.u32 2147483647, %v14152_v24  ;;  %v6843_v22 = vpop.f32.mrb[97].mxu0  ;;  %v14167_v53 = vadd.f32 %v10232_v21, %v14118_v63  ;;  %vm7689_vm6 = vcmp.ge.f32.partialorder %v14152_v24, 0.0 }
 0xaba   : > { %v7110_v31 = vadd.f32 1.0, %v7078_v59  ;;  %v14162_v30 = vand.u32 2147483647, %v14156_v51  ;;  %v14170_v7 = vadd.f32 %v14118_v63, %v6843_v22  ;;  %vm7688_vm7 = vcmp.ge.f32.partialorder %v14156_v51, 0.0 }
 0xabb   : > { %11368 = vrcp.f32 %v7111_v43  ;;  %v7081_v48 = vmul.f32 0.3275911, %v14159_v42  ;;  %v14173_v19 = vmul.f32 0.70710677, %v14167_v53 }
 0xabc   : > { %11370 = vrcp.f32 %v7110_v31  ;;  %v7080_v3 = vmul.f32 0.3275911, %v14162_v30  ;;  %v10235_v0 = vpop.f32.mrb[98].mxu0  ;;  %v14176_v37 = vmul.f32 0.70710677, %v14170_v7 }
 0xabd   : > { %v7113_v11 = vadd.f32 1.0, %v7081_v48  ;;  %v6853_v38 = vpop.f32.mrb[99].mxu0  ;;  %v14179_v17 = vand.u32 2147483647, %v14173_v19  ;;  %v14182_v56 = vadd.f32 %v10235_v0, %v14118_v63  ;;  %vm7691_vm8 = vcmp.ge.f32.partialorder %v14173_v19, 0.0 }
 0xabe   : > { %v7112_v54 = vadd.f32 1.0, %v7080_v3  ;;  %v14187_v59 = vand.u32 2147483647, %v14176_v37  ;;  %v14190_v43 = vadd.f32 %v14118_v63, %v6853_v38  ;;  %vm7690_vm9 = vcmp.ge.f32.partialorder %v14176_v37, 0.0 }
 0xabf   : > { %11372 = vrcp.f32 %v7113_v11  ;;  %v7083_v21 = vmul.f32 0.3275911, %v14179_v17  ;;  %v14194_v31 = vmul.f32 0.70710677, %v14182_v56 }
 0xac0   : > { %11374 = vrcp.f32 %v7112_v54  ;;  %v10238_v14 = vpop.f32.mrb[100].mxu0  ;;  %v7082_v22 = vmul.f32 0.3275911, %v14187_v59  ;;  %v14198_v48 = vmul.f32 0.70710677, %v14190_v43 }
 0xac1   : > { %v14184_v57 = vpop.f32.mrb[101].mxu0  ;;  %v7115_v0 = vadd.f32 1.0, %v7083_v21  ;;  %v14203_v11 = vand.u32 2147483647, %v14194_v31  ;;  %vm7693_vm10 = vcmp.ge.f32.partialorder %v14194_v31, 0.0 }
 0xac2   : > { %v7114_v5 = vadd.f32 1.0, %v7082_v22  ;;  %v14211_v39 = vand.u32 2147483647, %v14198_v48  ;;  %vm7692_vm11 = vcmp.ge.f32.partialorder %v14198_v48, 0.0 }
 0xac3   : > { %11376 = vrcp.f32 %v7115_v0  ;;  %v7085_v21 = vmul.f32 0.3275911, %v14203_v11 }
 0xac4   : > { %v14205_v54 = vpop.f32.mrb[102].mxu0  ;;  %11378 = vrcp.f32 %v7114_v5  ;;  %v7084_v0 = vmul.f32 0.3275911, %v14211_v39 }
 0xac5   : > { %v14200_v3 = vpop.eup %11368  ;;  %v14213_v4 = vpop.f32.mrb[103].mxu0  ;;  %v7117_v12 = vadd.f32 1.0, %v7085_v21  ;;  %v7494_v21 = vsub.f32 0.0, %v14145_v41 }
 0xac6   : > { %v14207_v38 = vpop.eup %11370  ;;  %v7207_v9 = vmul.f32 1.0614054, %v14200_v3 }
 0xac7   : > { %v7206_v32 = vmul.f32 1.0614054, %v14207_v38  ;;  %11380 = vrcp.f32 %v7117_v12 }
 0xac8   : > { %v7239_v25 = vadd.f32 -1.4531521, %v7207_v9  ;;  %v14217_v47 = vpop.f32.mrb[104].mxu0 }
 0xac9   : > { %v14219_v2 = vpop.eup %11372  ;;  %v7238_v20 = vadd.f32 -1.4531521, %v7206_v32  ;;  %v14221_v49 = vpop.f32.mrb[105].mxu0 }
 0xaca   : > { %v14223_v22 = vpop.eup %11374  ;;  %v7271_v18 = vmul.f32 %v14200_v3, %v7239_v25  ;;  %v7209_v27 = vmul.f32 1.0614054, %v14219_v2  ;;  %v7116_v25 = vadd.f32 1.0, %v7084_v0 }
 0xacb   : > { %v7270_v13 = vmul.f32 %v14207_v38, %v7238_v20  ;;  %v7208_v9 = vmul.f32 1.0614054, %v14223_v22 }
 0xacc   : > { %v7241_v5 = vadd.f32 -1.4531521, %v7209_v27  ;;  %v7303_v36 = vadd.f32 1.4214138, %v7271_v18  ;;  %v14231_v62 = vpop.f32.mrb[106].mxu0  ;;  %v7527_v27 = vmul.f32 %v7495_v34, %v14133_v16  ;;  %11382 = vrcp.f32 %v7116_v25 }
 0xacd   : > { %v7240_v32 = vadd.f32 -1.4531521, %v7208_v9  ;;  %v7302_v29 = vadd.f32 1.4214138, %v7270_v13  ;;  %v14234_v45 = vpop.f32.mrb[107].mxu0  ;;  %v14238_v58 = vpop.eup %11376  ;;  %v7497_v9 = vsub.f32 0.0, %v14159_v42  ;;  %v14255_v16 = vadd.f32 %v10238_v14, %v14118_v63 }
 0xace   : > { %v7273_v26 = vmul.f32 %v14219_v2, %v7241_v5  ;;  %v7335_v18 = vmul.f32 %v14200_v3, %v7303_v36  ;;  %v14243_v33 = vpop.eup %11378  ;;  %v7211_v0 = vmul.f32 1.0614054, %v14238_v58  ;;  %v7496_v36 = vsub.f32 0.0, %v14162_v30 }
 0xacf   : > { %v7272_v20 = vmul.f32 %v14223_v22, %v7240_v32  ;;  %v7334_v13 = vmul.f32 %v14207_v38, %v7302_v29  ;;  %v7526_v32 = vmul.f32 %v7494_v21, %v14145_v41  ;;  %v7210_v34 = vmul.f32 1.0614054, %v14243_v33 }
 0xad0   : > { %v7305_v12 = vadd.f32 1.4214138, %v7273_v26  ;;  %v14247_v5 = vpop.f32.mrb[108].mxu0  ;;  %v7367_v55 = vadd.f32 -0.28449672, %v7335_v18  ;;  %v7529_v25 = vmul.f32 %v7497_v9, %v14159_v42  ;;  %v7528_v14 = vmul.f32 %v7496_v36, %v14162_v30 }
 0xad1   : > { %v7304_v52 = vadd.f32 1.4214138, %v7272_v20  ;;  %v14250_v35 = vpop.f32.mrb[109].mxu0  ;;  %v7560_v29 = vmul.f32 1.442695, %v7527_v27  ;;  %v14264_v10 = vpop.eup %11380  ;;  %v14509_v37 = vadd.f32 %v14247_v5, %v14118_v63 }
 0xad2   : > { %v7366_v26 = vadd.f32 -0.28449672, %v7334_v13  ;;  %v7337_v60 = vmul.f32 %v14219_v2, %v7305_v12  ;;  %v7243_v46 = vadd.f32 -1.4531521, %v7211_v0  ;;  %v7558_v41 = vmul.f32 1.442695, %v7526_v32 }
 0xad3   : > { %v7336_v21 = vmul.f32 %v14223_v22, %v7304_v52  ;;  %v7242_v23 = vadd.f32 -1.4531521, %v7210_v34  ;;  %v14268_v18 = vmul.f32 0.70710677, %v14255_v16  ;;  %v7399_v27 = vmul.f32 %v14200_v3, %v7367_v55 }
 0xad4   : > { %v14259_v61 = vpop.f32.mrb[110].mxu0  ;;  %11384 = vpow2.f32 %v7560_v29  ;;  %v7398_v42 = vmul.f32 %v14207_v38, %v7366_v26  ;;  %v7369_v9 = vadd.f32 -0.28449672, %v7337_v60  ;;  %v7564_v13 = vmul.f32 1.442695, %v7529_v25 }
 0xad5   : > { %16076 = vst [vmem:[#allocation64_spill] sm:$0xff] %v14259_v61  ;;  %v14262_v20 = vpop.f32.mrb[111].mxu0  ;;  %v7275_v12 = vmul.f32 %v14238_v58, %v7243_v46  ;;  %11386 = vpow2.f32 %v7558_v41  ;;  %v7368_v0 = vadd.f32 -0.28449672, %v7336_v21  ;;  %v7213_v32 = vmul.f32 1.0614054, %v14264_v10 }
 0xad6   : > { %16077 = vst [vmem:[#allocation50_spill] sm:$0xff] %v14262_v20  ;;  %v14278_v36 = vpop.eup %11382  ;;  %v7562_v34 = vmul.f32 1.442695, %v7528_v14  ;;  %v7499_v55 = vsub.f32 0.0, %v14179_v17  ;;  %v7274_v29 = vmul.f32 %v14243_v33, %v7242_v23  ;;  %v14283_v60 = vand.u32 2147483647, %v14268_v18 }
 0xad7   : > { %v14288_v46 = vmul.f32 0.5, %v14121_v1  ;;  %v7431_v25 = vadd.f32 0.2548296, %v7399_v27  ;;  %v14291_v41 = vmul.f32 0.5, %v14124_v50  ;;  %v7430_v15 = vadd.f32 0.2548296, %v7398_v42 }
 0xad8   : > { %v14273_v52 = vpop.f32.mrb[112].mxu0  ;;  %v7401_v14 = vmul.f32 %v14219_v2, %v7369_v9  ;;  %11388 = vpow2.f32 %v7564_v13  ;;  %v7307_v44 = vadd.f32 1.4214138, %v7275_v12  ;;  %v7400_v23 = vmul.f32 %v14223_v22, %v7368_v0 }
 0xad9   : > { %16078 = vst [vmem:[#allocation49_spill] sm:$0xff] %v14273_v52  ;;  %v14276_v30 = vpop.f32.mrb[113].mxu0  ;;  %v7245_v52 = vadd.f32 -1.4531521, %v7213_v32  ;;  %11390 = vpow2.f32 %v7562_v34  ;;  %v7531_v1 = vmul.f32 %v7499_v55, %v14179_v17  ;;  %v7306_v27 = vadd.f32 1.4214138, %v7274_v29 }
 0xada   : > { %16079 = vst [vmem:[#allocation44_spill] sm:$0xff] %v14276_v30  ;;  %v7498_v30 = vsub.f32 0.0, %v14187_v59  ;;  %v7087_v50 = vmul.f32 0.3275911, %v14283_v60  ;;  %v14303_v42 = vmul.f32 0.5, %v14136_v6  ;;  %v14306_v9 = vmul.f32 0.5, %v14148_v28 }
 0xadb   : > { %v7501_v13 = vsub.f32 0.0, %v14203_v11  ;;  %v7462_v0 = vmul.f32 %v14207_v38, %v7430_v15  ;;  %v7433_v32 = vadd.f32 0.2548296, %v7401_v14  ;;  %v14313_v17 = vmul.f32 0.5, %v14167_v53 }
 0xadc   : > { %v14285_v26 = vpop.f32.mrb[114].mxu0  ;;  %v7339_v34 = vmul.f32 %v14238_v58, %v7307_v44  ;;  %v7432_v6 = vadd.f32 0.2548296, %v7400_v23  ;;  %v7530_v29 = vmul.f32 %v7498_v30, %v14187_v59  ;;  %v7277_v28 = vmul.f32 %v14264_v10, %v7245_v52 }
 0xadd   : > { %16080 = vst [vmem:[#allocation47_spill] sm:$0xff] %v14285_v26  ;;  %v14293_v21 = vpop.f32.mrb[115].mxu0  ;;  %v7212_v26 = vmul.f32 1.0614054, %v14278_v36  ;;  %v7568_v20 = vmul.f32 1.442695, %v7531_v1  ;;  %v14323_v15 = vadd.f32 %v14118_v63, %v14184_v57  ;;  %v7533_v59 = vmul.f32 %v7501_v13, %v14203_v11 }
 0xade   : > { %16081 = vst [vmem:[#allocation58_spill] sm:$0xff] %v14293_v21  ;;  %v7463_v21 = vmul.f32 %v14200_v3, %v7431_v25  ;;  %v11385_v3 = vpop.eup %11384  ;;  %v7119_v61 = vadd.f32 1.0, %v7087_v50  ;;  %v14328_v14 = vmul.f32 0.5, %v14170_v7  ;;  %v7500_v52 = vsub.f32 0.0, %v14211_v39 }
 0xadf   : > { %v7244_v25 = vadd.f32 -1.4531521, %v7212_v26  ;;  %v11387_v44 = vpop.eup %11386  ;;  %v7465_v23 = vmul.f32 %v14219_v2, %v7433_v32  ;;  %v7371_v1 = vadd.f32 -0.28449672, %v7339_v34  ;;  %v7464_v57 = vmul.f32 %v14223_v22, %v7432_v6 }
 0xae0   : > { %v14309_v12 = vpop.f32.mrb[116].mxu0  ;;  %v7623_v38 = vmul.f32 %v11385_v3, %v7463_v21  ;;  %v7622_v26 = vmul.f32 %v11387_v44, %v7462_v0  ;;  %11392 = vrcp.f32 %v7119_v61  ;;  %v7309_v50 = vadd.f32 1.4214138, %v7277_v28 }
 0xae1   : > { %16082 = vst [vmem:[#allocation62_spill] sm:$0xff] %v14309_v12  ;;  %v14316_v55 = vpop.f32.mrb[117].mxu0  ;;  %v7338_v12 = vmul.f32 %v14243_v33, %v7306_v27  ;;  %v7566_v27 = vmul.f32 1.442695, %v7530_v29  ;;  %v7276_v21 = vmul.f32 %v14278_v36, %v7244_v25  ;;  %11394 = vpow2.f32 %v7568_v20 }
 0xae2   : > { %16083 = vst [vmem:[#allocation56_spill] sm:$0xff] %v14316_v55  ;;  %v11389_v3 = vpop.eup %11388  ;;  %v14339_v11 = vmul.f32 0.5, %v14182_v56  ;;  %v14342_v13 = vmul.f32 0.70710677, %v14323_v15  ;;  %v7655_v61 = vsub.f32 1.0, %v7623_v38  ;;  %v7532_v0 = vmul.f32 %v7500_v52, %v14211_v39 }
 0xae3   : > { %v7370_v7 = vadd.f32 -0.28449672, %v7338_v12  ;;  %v7572_v22 = vmul.f32 1.442695, %v7533_v59  ;;  %v14350_v32 = vadd.f32 %v14205_v54, %v14118_v63  ;;  %v11391_v20 = vpop.eup %11390  ;;  %v7654_v12 = vsub.f32 1.0, %v7622_v26 }
 0xae4   : > { %v14325_v53 = vpop.f32.mrb[118].mxu0  ;;  %v7625_v34 = vmul.f32 %v11389_v3, %v7465_v23  ;;  %v7403_v56 = vmul.f32 %v14238_v58, %v7371_v1  ;;  %v14354_v6 = vand.u32 2147483647, %v14342_v13  ;;  %v7624_v28 = vmul.f32 %v11391_v20, %v7464_v57 }
 0xae5   : > { %16084 = vst [vmem:[#allocation54_spill] sm:$0xff] %v14325_v53  ;;  %v14332_v30 = vpop.f32.mrb[119].mxu0  ;;  %11396 = vpow2.f32 %v7566_v27  ;;  %v14359_v25 = vmul.f32 0.5, %v14190_v43  ;;  %v7308_v39 = vadd.f32 1.4214138, %v7276_v21  ;;  %v7402_v44 = vmul.f32 %v14243_v33, %v7370_v7 }
 0xae6   : > { %16085 = vst [vmem:[#allocation63_spill] sm:$0xff] %v14332_v30  ;;  %v7341_v54 = vmul.f32 %v14264_v10, %v7309_v50  ;;  %v7086_v38 = vmul.f32 0.3275911, %v14354_v6  ;;  %v14366_v59 = vadd.f32 %v14118_v63, %v14213_v4  ;;  %v7719_v26 = vsub.f32 0.0, %v7655_v61 }
 0xae7   : > { %11398 = vpow2.f32 %v7572_v22  ;;  %v7570_v23 = vmul.f32 1.442695, %v7532_v0  ;;  %v14372_v43 = vmul.f32 0.70710677, %v14350_v32  ;;  %v7718_v1 = vsub.f32 0.0, %v7654_v12 }
 0xae8   : > { %v14344_v2 = vpop.f32.mrb[120].mxu0  ;;  %v7657_v57 = vsub.f32 1.0, %v7625_v34  ;;  %v7435_v27 = vadd.f32 0.2548296, %v7403_v56  ;;  %v7118_v50 = vadd.f32 1.0, %v7086_v38  ;;  %v7656_v4 = vsub.f32 1.0, %v7624_v28 }
 0xae9   : > { %16086 = vst [vmem:[#allocation57_spill] sm:$0xff] %v14344_v2  ;;  %v14356_v29 = vpop.f32.mrb[121].mxu0  ;;  %v7340_v3 = vmul.f32 %v14278_v36, %v7308_v39  ;;  %v14379_v7 = vand.u32 2147483647, %v14372_v43  ;;  %v14383_v22 = vadd.f32 %v14217_v47, %v14118_v63  ;;  %v7434_v20 = vadd.f32 0.2548296, %v7402_v44 }
 0xaea   : > { %16087 = vst [vmem:[#allocation60_spill] sm:$0xff] %v14356_v29  ;;  %v14385_v0 = vpop.eup %11392  ;;  %v7373_v34 = vadd.f32 -0.28449672, %v7341_v54  ;;  %11400 = vrcp.f32 %v7118_v50  ;;  %v14388_v56 = vmul.f32 0.70710677, %v14366_v59  ;;  %v7751_v28 = vsel %vm7687_vm4, %v7655_v61, %v7719_v26 }
 0xaeb   : > { %11402 = vpow2.f32 %v7570_v23  ;;  %v7215_v39 = vmul.f32 1.0614054, %v14385_v0  ;;  %v7089_v38 = vmul.f32 0.3275911, %v14379_v7  ;;  %v7750_v47 = vsel %vm7686_vm5, %v7654_v12, %v7718_v1 }
 0xaec   : > { %v14368_v52 = vpop.f32.mrb[122].mxu0  ;;  %v7467_v44 = vmul.f32 %v14238_v58, %v7435_v27  ;;  %v14398_v54 = vand.u32 2147483647, %v14388_v56  ;;  %v7720_v50 = vsub.f32 0.0, %v7656_v4  ;;  %v7372_v29 = vadd.f32 -0.28449672, %v7340_v3 }
 0xaed   : > { %16088 = vst [vmem:[#allocation46_spill] sm:$0xff] %v14368_v52  ;;  %v14375_v21 = vpop.f32.mrb[123].mxu0  ;;  %v7721_v52 = vsub.f32 0.0, %v7657_v57  ;;  %v7121_v2 = vadd.f32 1.0, %v7089_v38  ;;  %v14401_v8 = vmul.f32 0.70710677, %v14383_v22  ;;  %v7466_v26 = vmul.f32 %v14243_v33, %v7434_v20 }
 0xaee   : > { %16089 = vst [vmem:[#allocation53_spill] sm:$0xff] %v14375_v21  ;;  %v11395_v21 = vpop.eup %11394  ;;  %v7783_v61 = vadd.f32 1.0, %v7751_v28  ;;  %v7405_v23 = vmul.f32 %v14264_v10, %v7373_v34  ;;  %v7088_v40 = vmul.f32 0.3275911, %v14398_v54  ;;  %v14407_v1 = vmul.f32 0.5, %v14255_v16 }
 0xaef   : > { %v11397_v12 = vpop.eup %11396  ;;  %v7247_v58 = vadd.f32 -1.4531521, %v7215_v39  ;;  %11404 = vrcp.f32 %v7121_v2  ;;  %v14410_v27 = vand.u32 2147483647, %v14401_v8  ;;  %v7782_v3 = vadd.f32 1.0, %v7750_v47 }
 0xaf0   : > { %v7753_v38 = vsel %vm7689_vm6, %v7657_v57, %v7721_v52  ;;  %v7627_v28 = vmul.f32 %v11395_v21, %v7467_v44  ;;  %v7120_v30 = vadd.f32 1.0, %v7088_v40  ;;  %v7752_v20 = vsel %vm7688_vm7, %v7656_v4, %v7720_v50 }
 0xaf1   : > { %v11399_v33 = vpop.eup %11398  ;;  %v7404_v34 = vmul.f32 %v14278_v36, %v7372_v29  ;;  %v7091_v16 = vmul.f32 0.3275911, %v14410_v27  ;;  %v14420_v2 = vadd.f32 %v14118_v63, %v14221_v49  ;;  %v14423_v39 = vmul.f32 %v7783_v61, %v14288_v46 }
 0xaf2   : > { %v14425_v47 = vmul.f32 %v11397_v12, %v7466_v26  ;;  %v7437_v24 = vadd.f32 0.2548296, %v7405_v23  ;;  %v14429_v52 = vadd.f32 %v14231_v62, %v14118_v63  ;;  %v7279_v51 = vmul.f32 %v14385_v0, %v7247_v58 }
 0xaf3   : > { %16090 = vst [vmem:[#allocation51_spill] sm:$0xff] %v14423_v39  ;;  %11406 = vrcp.f32 %v7120_v30  ;;  %v7123_v29 = vadd.f32 1.0, %v7091_v16  ;;  %v14435_v49 = vadd.f32 %v14118_v63, %v14234_v45  ;;  %v7785_v46 = vadd.f32 1.0, %v7753_v38 }
 0xaf4   : > { %v14437_v57 = vpop.eup %11400  ;;  %v14439_v21 = vadd.f32 1.0, %v7752_v20  ;;  %v7659_v4 = vsub.f32 1.0, %v7627_v28  ;;  %v14442_v44 = vmul.f32 0.70710677, %v14420_v2  ;;  %v7436_v50 = vadd.f32 0.2548296, %v7404_v34 }
 0xaf5   : > { %v11403_v62 = vpop.eup %11402  ;;  %v7503_v61 = vsub.f32 0.0, %v14283_v60  ;;  %v7214_v30 = vmul.f32 1.0614054, %v14437_v57  ;;  %11408 = vrcp.f32 %v7123_v29  ;;  %v7658_v26 = vsub.f32 1.0, %v14425_v47 }
 0xaf6   : > { %v7469_v45 = vmul.f32 %v14264_v10, %v7437_v24  ;;  %v14449_v23 = vand.u32 2147483647, %v14442_v44  ;;  %v14452_v40 = vmul.f32 0.70710677, %v14429_v52  ;;  %v14455_v12 = vmul.f32 %v7782_v3, %v14291_v41 }
 0xaf7   : > { %v7311_v58 = vadd.f32 1.4214138, %v7279_v51  ;;  %v7246_v38 = vadd.f32 -1.4531521, %v7214_v30  ;;  %v14459_v28 = vmul.f32 0.70710677, %v14435_v49  ;;  %v14462_v20 = vmul.f32 %v7785_v46, %v14303_v42 }
 0xaf8   : > { %16091 = vst [vmem:[#allocation35_spill] sm:$0xff] %v14455_v12  ;;  %v7723_v10 = vsub.f32 0.0, %v7659_v4  ;;  %v7090_v34 = vmul.f32 0.3275911, %v14449_v23  ;;  %v14466_v16 = vand.u32 2147483647, %v14452_v40  ;;  %v7468_v41 = vmul.f32 %v14278_v36, %v7436_v50 }
 0xaf9   : > { %16092 = vst [vmem:[#allocation34_spill] sm:$0xff] %v14459_v28  ;;  %16093 = vst [vmem:[#allocation36_spill] sm:$0xff] %v14462_v20  ;;  %v14468_v47 = vpop.eup %11404  ;;  %v7535_v3 = vmul.f32 %v7503_v61, %v14283_v60  ;;  %v7278_v24 = vmul.f32 %v14437_v57, %v7246_v38  ;;  %v14474_v51 = vand.u32 2147483647, %v14459_v28  ;;  %v14476_v29 = vmul.f32 %v11399_v33, %v7469_v45 }
 0xafa   : > { %v7217_v42 = vmul.f32 1.0614054, %v14468_v47  ;;  %v7122_v46 = vadd.f32 1.0, %v7090_v34  ;;  %v7093_v30 = vmul.f32 0.3275911, %v14466_v16  ;;  %v7722_v20 = vsub.f32 0.0, %v7658_v26 }
 0xafb   : > { %v7343_v39 = vmul.f32 %v14385_v0, %v7311_v58  ;;  %v14482_v12 = vmul.f32 0.5, %v14323_v15  ;;  %v7092_v36 = vmul.f32 0.3275911, %v14474_v51  ;;  %v7755_v60 = vsel %vm7691_vm8, %v7659_v4, %v7723_v10 }
 0xafc   : > { %v7249_v50 = vadd.f32 -1.4531521, %v7217_v42  ;;  %11410 = vrcp.f32 %v7122_v46  ;;  %v7125_v33 = vadd.f32 1.0, %v7093_v30  ;;  %v7628_v45 = vmul.f32 %v11403_v62, %v7468_v41 }
 0xafd   : > { %v14487_v61 = vpop.eup %11406  ;;  %v7310_v38 = vadd.f32 1.4214138, %v7278_v24  ;;  %v7502_v34 = vsub.f32 0.0, %v14354_v6  ;;  %v7124_v53 = vadd.f32 1.0, %v7092_v36  ;;  %v7576_v55 = vmul.f32 1.442695, %v7535_v3 }
 0xafe   : > { %v14491_v58 = vmul.f32 0.5, %v14350_v32  ;;  %v7281_v15 = vmul.f32 %v14468_v47, %v7249_v50  ;;  %v7216_v28 = vmul.f32 1.0614054, %v14487_v61  ;;  %v7787_v4 = vadd.f32 1.0, %v7755_v60 }
 0xaff   : > { %v14495_v19 = vpop.eup %11408  ;;  %v7661_v10 = vsub.f32 1.0, %v14476_v29  ;;  %v7375_v62 = vadd.f32 -0.28449672, %v7343_v39  ;;  %11412 = vrcp.f32 %v7125_v33  ;;  %v7754_v41 = vsel %vm7690_vm9, %v7658_v26, %v7722_v20 }
 0xb00   : > { %v7248_v3 = vadd.f32 -1.4531521, %v7216_v28  ;;  %v7219_v32 = vmul.f32 1.0614054, %v14495_v19  ;;  %11414 = vrcp.f32 %v7124_v53  ;;  %v7660_v24 = vsub.f32 1.0, %v7628_v45 }
 0xb01   : > { %v7342_v42 = vmul.f32 %v14437_v57, %v7310_v38  ;;  %v7534_v46 = vmul.f32 %v7502_v34, %v14354_v6  ;;  %v7505_v29 = vsub.f32 0.0, %v14379_v7  ;;  %v7313_v30 = vadd.f32 1.4214138, %v7281_v15 }
 0xb02   : > { %v7280_v39 = vmul.f32 %v14487_v61, %v7248_v3  ;;  %v7251_v36 = vadd.f32 -1.4531521, %v7219_v32  ;;  %v7786_v26 = vadd.f32 1.0, %v7754_v41  ;;  %v7725_v28 = vsub.f32 0.0, %v7661_v10 }
 0xb03   : > { %v7407_v53 = vmul.f32 %v14385_v0, %v7375_v62  ;;  %11416 = vpow2.f32 %v7576_v55  ;;  %v14513_v20 = vmul.f32 0.5, %v14366_v59  ;;  %v7504_v6 = vsub.f32 0.0, %v14398_v54 }
 0xb04   : > { %v7312_v60 = vadd.f32 1.4214138, %v7280_v39  ;;  %v7283_v50 = vmul.f32 %v14495_v19, %v7251_v36  ;;  %v7724_v33 = vsub.f32 0.0, %v7660_v24  ;;  %v7574_v45 = vmul.f32 1.442695, %v7534_v46 }
 0xb05   : > { %v7507_v38 = vsub.f32 0.0, %v14410_v27  ;;  %v14519_v5 = vmul.f32 0.70710677, %v14509_v37  ;;  %v7374_v15 = vadd.f32 -0.28449672, %v7342_v42  ;;  %v7345_v55 = vmul.f32 %v14468_v47, %v7313_v30 }
 0xb06   : > { %v14521_v34 = vpop.eup %11410  ;;  %v7537_v59 = vmul.f32 %v7505_v29, %v14379_v7  ;;  %v7315_v62 = vadd.f32 1.4214138, %v7283_v50  ;;  %v14527_v41 = vmul.f32 %v14439_v21, %v14306_v9  ;;  %v7439_v3 = vadd.f32 0.2548296, %v7407_v53 }
 0xb07   : > { %v7218_v32 = vmul.f32 1.0614054, %v14521_v34  ;;  %v14531_v46 = vand.u32 2147483647, %v14519_v5  ;;  %v7757_v39 = vsel %vm7693_vm10, %v7661_v10, %v7725_v28  ;;  %v7344_v42 = vmul.f32 %v14487_v61, %v7312_v60 }
 0xb08   : > { %16094 = vst [vmem:[#allocation68_spill] sm:$0xff] %v14527_v41  ;;  %v7536_v30 = vmul.f32 %v7504_v6, %v14398_v54  ;;  %v7347_v7 = vmul.f32 %v14495_v19, %v7315_v62  ;;  %11418 = vpow2.f32 %v7574_v45  ;;  %v7539_v9 = vmul.f32 %v7507_v38, %v14410_v27 }
 0xb09   : > { %v14538_v29 = vpop.eup %11412  ;;  %v7250_v21 = vadd.f32 -1.4531521, %v7218_v32  ;;  %v7095_v36 = vmul.f32 0.3275911, %v14531_v46  ;;  %v7756_v31 = vsel %vm7692_vm11, %v7660_v24, %v7724_v33  ;;  %v7406_v10 = vmul.f32 %v14437_v57, %v7374_v15 }
 0xb0a   : > { %v14542_v53 = vpop.eup %11414  ;;  %v7377_v28 = vadd.f32 -0.28449672, %v7345_v55  ;;  %v7580_v60 = vmul.f32 1.442695, %v7537_v59  ;;  %v7471_v54 = vmul.f32 %v14385_v0, %v7439_v3  ;;  %v7221_v50 = vmul.f32 1.0614054, %v14538_v29 }
 0xb0b   : > { %v7282_v6 = vmul.f32 %v14521_v34, %v7250_v21  ;;  %v7127_v45 = vadd.f32 1.0, %v7095_v36  ;;  %v14551_v27 = vmul.f32 %v7787_v4, %v14313_v17  ;;  %v7376_v38 = vadd.f32 -0.28449672, %v7344_v42 }
 0xb0c   : > { %v7578_v62 = vmul.f32 1.442695, %v7536_v30  ;;  %v7379_v32 = vadd.f32 -0.28449672, %v7347_v7  ;;  %v7584_v48 = vmul.f32 1.442695, %v7539_v9  ;;  %v7409_v59 = vmul.f32 %v14468_v47, %v7377_v28 }
 0xb0d   : > { %v11417_v41 = vpop.eup %11416  ;;  %v7506_v24 = vsub.f32 0.0, %v14449_v23  ;;  %v7220_v33 = vmul.f32 1.0614054, %v14542_v53  ;;  %11420 = vrcp.f32 %v7127_v45  ;;  %v7789_v15 = vadd.f32 1.0, %v7757_v39 }
 0xb0e   : > { %v7788_v0 = vadd.f32 1.0, %v7756_v31  ;;  %v7438_v55 = vadd.f32 0.2548296, %v7406_v10  ;;  %v7631_v3 = vmul.f32 %v11417_v41, %v7471_v54  ;;  %11422 = vpow2.f32 %v7580_v60 }
 0xb0f   : > { %v7314_v21 = vadd.f32 1.4214138, %v7282_v6  ;;  %v7253_v17 = vadd.f32 -1.4531521, %v7221_v50  ;;  %v7408_v4 = vmul.f32 %v14487_v61, %v7376_v38  ;;  %11424 = vpow2.f32 %v7578_v62 }
 0xb10   : > { %v7411_v42 = vmul.f32 %v14495_v19, %v7379_v32  ;;  %v14560_v30 = vadd.f32 %v14118_v63, %v14250_v35  ;;  %v14563_v7 = vmul.f32 %v7786_v26, %v14328_v14  ;;  %11426 = vpow2.f32 %v7584_v48 }
 0xb11   : > { %v7538_v39 = vmul.f32 %v7506_v24, %v14449_v23  ;;  %v7252_v9 = vadd.f32 -1.4531521, %v7220_v33  ;;  %v14567_v41 = vmul.f32 %v7789_v15, %v14339_v11  ;;  %vm7695_vm12 = vcmp.ge.f32.partialorder %v14268_v18, 0.0  ;;  %v16096_v18 = vld [vmem:[#allocation50_spill] sm:$0xff] }
 0xb12   : > { %v7470_v36 = vmul.f32 %v14437_v57, %v7438_v55  ;;  %v7441_v31 = vadd.f32 0.2548296, %v7409_v59  ;;  %v14572_v10 = vmul.f32 0.5, %v14383_v22  ;;  %v11419_v35 = vpop.eup %11418  ;;  %v7663_v28 = vsub.f32 1.0, %v7631_v3 }
 0xb13   : > { %v7346_v14 = vmul.f32 %v14521_v34, %v7314_v21  ;;  %v7285_v26 = vmul.f32 %v14538_v29, %v7253_v17  ;;  %v7509_v23 = vsub.f32 0.0, %v14466_v16  ;;  %v14578_v60 = vmul.f32 %v7788_v0, %v14359_v25  ;;  %v16095_v17 = vld [vmem:[#allocation64_spill] sm:$0xff] }
 0xb14   : > { %v7440_v11 = vadd.f32 0.2548296, %v7408_v4  ;;  %v7443_v54 = vadd.f32 0.2548296, %v7411_v42  ;;  %v14581_v6 = vmul.f32 0.70710677, %v14560_v30  ;;  %v7284_v50 = vmul.f32 %v14542_v53, %v7252_v9 }
 0xb15   : > { %v14584_v57 = vmul.f32 0.5, %v14420_v2  ;;  %v7582_v22 = vmul.f32 1.442695, %v7538_v39  ;;  %v7508_v45 = vsub.f32 0.0, %v14474_v51  ;;  %v7630_v38 = vmul.f32 %v11419_v35, %v7470_v36 }
 0xb16   : > { %v7473_v62 = vmul.f32 %v14468_v47, %v7441_v31  ;;  %v14590_v32 = vmul.f32 0.5, %v14429_v52  ;;  %v14593_v25 = vand.u32 2147483647, %v14581_v6  ;;  %v7727_v24 = vsub.f32 0.0, %v7663_v28 }
 0xb17   : > { %v14595_v48 = vpop.eup %11420  ;;  %v7378_v33 = vadd.f32 -0.28449672, %v7346_v14  ;;  %v7317_v2 = vadd.f32 1.4214138, %v7285_v26  ;;  %v7541_v15 = vmul.f32 %v7509_v23, %v14466_v16  ;;  %v7472_v0 = vmul.f32 %v14487_v61, %v7440_v11 }
 0xb18   : > { %v7475_v55 = vmul.f32 %v14495_v19, %v7443_v54  ;;  %v7223_v59 = vmul.f32 1.0614054, %v14595_v48  ;;  %v7094_v47 = vmul.f32 0.3275911, %v14593_v25  ;;  %v11423_v52 = vpop.eup %11422  ;;  %vm7694_vm13 = vcmp.ge.f32.partialorder %v14342_v13, 0.0 }
 0xb19   : > { %11428 = vpow2.f32 %v7582_v22  ;;  %v7316_v3 = vadd.f32 1.4214138, %v7284_v50  ;;  %v7540_v21 = vmul.f32 %v7508_v45, %v14474_v51  ;;  %v14606_v4 = vadd.f32 %v16095_v17, %v14118_v63  ;;  %v11425_v16 = vpop.eup %11424 }
 0xb1a   : > { %v7662_v42 = vsub.f32 1.0, %v7630_v38  ;;  %v7633_v61 = vmul.f32 %v11423_v52, %v7473_v62  ;;  %v7255_v39 = vadd.f32 -1.4531521, %v7223_v59  ;;  %v7126_v19 = vadd.f32 1.0, %v7094_v47  ;;  %v11427_v9 = vpop.eup %11426 }
 0xb1b   : > { %v7759_v36 = vsel %vm7695_vm12, %v7663_v28, %v7727_v24  ;;  %v7410_v31 = vmul.f32 %v14521_v34, %v7378_v33  ;;  %v7349_v35 = vmul.f32 %v14538_v29, %v7317_v2  ;;  %v7588_v14 = vmul.f32 1.442695, %v7541_v15 }
 0xb1c   : > { %v7632_v26 = vmul.f32 %v11425_v16, %v7472_v0  ;;  %v7635_v51 = vmul.f32 %v11427_v9, %v7475_v55  ;;  %v14613_v23 = vmul.f32 0.5, %v14435_v49  ;;  %11430 = vrcp.f32 %v7126_v19  ;;  %v16097_v16 = vld [vmem:[#allocation49_spill] sm:$0xff] }
 0xb1d   : > { %vm7697_vm14 = vcmp.ge.f32.partialorder %v14372_v43, 0.0  ;;  %v7348_v11 = vmul.f32 %v14542_v53, %v7316_v3  ;;  %v7586_v54 = vmul.f32 1.442695, %v7540_v21  ;;  %v14618_v22 = vmul.f32 0.70710677, %v14606_v4 }
 0xb1e   : > { %v14622_v28 = vadd.f32 %v14118_v63, %v16096_v18  ;;  %v7791_v50 = vadd.f32 1.0, %v7759_v36  ;;  %v7726_v45 = vsub.f32 0.0, %v7662_v42  ;;  %v7665_v38 = vsub.f32 1.0, %v7633_v61 }
 0xb1f   : > { %v7287_v62 = vmul.f32 %v14595_v48, %v7255_v39  ;;  %vm7696_vm15 = vcmp.ge.f32.partialorder %v14388_v56, 0.0  ;;  %vm7699_vm1 = vcmp.ge.f32.partialorder %v14401_v8, 0.0  ;;  %v7442_v49 = vadd.f32 0.2548296, %v7410_v31 }
 0xb20   : > { %v7381_v24 = vadd.f32 -0.28449672, %v7349_v35  ;;  %11432 = vpow2.f32 %v7588_v14  ;;  %v14628_v33 = vand.u32 2147483647, %v14618_v22  ;;  %v7664_v2 = vsub.f32 1.0, %v7632_v26 }
 0xb21   : > { %v7667_v15 = vsub.f32 1.0, %v7635_v51  ;;  %v14631_v0 = vmul.f32 0.5, %v14509_v37  ;;  %v7511_v55 = vsub.f32 0.0, %v14531_v46  ;;  %v7380_v59 = vadd.f32 -0.28449672, %v7348_v11 }
 0xb22   : > { %11434 = vpow2.f32 %v7586_v54  ;;  %v7097_v47 = vmul.f32 0.3275911, %v14628_v33  ;;  %v14636_v52 = vmul.f32 0.70710677, %v14622_v28  ;;  %v7758_v3 = vsel %vm7694_vm13, %v7662_v42, %v7726_v45 }
 0xb23   : > { %v7729_v21 = vsub.f32 0.0, %v7665_v38  ;;  %v7319_v17 = vadd.f32 1.4214138, %v7287_v62  ;;  %v14642_v61 = vadd.f32 %v16097_v16, %v14118_v63  ;;  %v11429_v37 = vpop.eup %11428  ;;  %v7474_v39 = vmul.f32 %v14521_v34, %v7442_v49 }
 0xb24   : > { %v7413_v19 = vmul.f32 %v14538_v29, %v7381_v24  ;;  %v7129_v9 = vadd.f32 1.0, %v7097_v47  ;;  %v14647_v36 = vand.u32 2147483647, %v14636_v52  ;;  %v14650_v31 = vmul.f32 %v7791_v50, %v14407_v1  ;;  %v16098_v47 = vld [vmem:[#allocation44_spill] sm:$0xff] }
 0xb25   : > { %v7728_v13 = vsub.f32 0.0, %v7664_v2  ;;  %v7731_v42 = vsub.f32 0.0, %v7667_v15  ;;  %v7543_v35 = vmul.f32 %v7511_v55, %v14531_v46  ;;  %v7412_v14 = vmul.f32 %v14542_v53, %v7380_v59  ;;  %v14677_v59 = vld [vmem:[%s15706_s9] ss:$0 sm:$0xff] }
 0xb26   : > { %v14655_v63 = vmul.f32 0.5, %v14560_v30  ;;  %11436 = vrcp.f32 %v7129_v9  ;;  %v7096_v34 = vmul.f32 0.3275911, %v14647_v36  ;;  %v14658_v26 = vpop.eup %11430  ;;  %v7790_v51 = vadd.f32 1.0, %v7758_v3  ;;  %v16099_v3 = vld [vmem:[#allocation47_spill] sm:$0xff] }
 0xb27   : > { %v7761_v11 = vsel %vm7697_vm14, %v7665_v38, %v7729_v21  ;;  %v7351_v1 = vmul.f32 %v14595_v48, %v7319_v17  ;;  %v14664_v54 = vmul.f32 0.70710677, %v14642_v61  ;;  %v7634_v46 = vmul.f32 %v11429_v37, %v7474_v39 }
 0xb28   : > { %v7445_v18 = vadd.f32 0.2548296, %v7413_v19  ;;  %v7222_v50 = vmul.f32 1.0614054, %v14658_v26  ;;  %v7128_v30 = vadd.f32 1.0, %v7096_v34  ;;  %v7760_v45 = vsel %vm7696_vm15, %v7664_v2, %v7728_v13 }
 0xb29   : > { %v7763_v62 = vsel %vm7699_vm1, %v7667_v15, %v7731_v42  ;;  %v7592_v49 = vmul.f32 1.442695, %v7543_v35  ;;  %v14672_v43 = vand.u32 2147483647, %v14664_v54  ;;  %v7444_v24 = vadd.f32 0.2548296, %v7412_v14 }
 0xb2a   : > { %v11433_v38 = vpop.eup %11432  ;;  %v7254_v55 = vadd.f32 -1.4531521, %v7222_v50  ;;  %11438 = vrcp.f32 %v7128_v30  ;;  %v14681_v56 = vadd.f32 %v14677_v59, %v16098_v47  ;;  %vm7698_vm2 = vcmp.ge.f32.partialorder %v14442_v44, 0.0  ;;  %v16105_v44 = vld [vmem:[#allocation62_spill] sm:$0xff] }
 0xb2b   : > { %v7383_v8 = vadd.f32 -0.28449672, %v7351_v1  ;;  %v7510_v2 = vsub.f32 0.0, %v14593_v25  ;;  %v7099_v15 = vmul.f32 0.3275911, %v14672_v43  ;;  %v14688_v21 = vadd.f32 %v14677_v59, %v16099_v3 }
 0xb2c   : > { %v11435_v17 = vpop.eup %11434  ;;  %v7666_v16 = vsub.f32 1.0, %v7634_v46  ;;  %v7477_v37 = vmul.f32 %v14538_v29, %v7445_v18  ;;  %v7286_v39 = vmul.f32 %v14658_v26, %v7254_v55  ;;  %v14693_v19 = vmul.f32 0.70710677, %v14681_v56 }
 0xb2d   : > { %v14696_v9 = vmul.f32 %v7790_v51, %v14482_v12  ;;  %v7793_v13 = vadd.f32 1.0, %v7761_v11  ;;  %11440 = vpow2.f32 %v7592_v49  ;;  %v7131_v42 = vadd.f32 1.0, %v7099_v15 }
 0xb2e   : > { %v7792_v35 = vadd.f32 1.0, %v7760_v45  ;;  %v7476_v14 = vmul.f32 %v14542_v53, %v7444_v24  ;;  %v7318_v34 = vadd.f32 1.4214138, %v7286_v39  ;;  %v14700_v1 = vand.u32 2147483647, %v14693_v19  ;;  %v16104_v39 = vld [vmem:[#allocation34_spill] sm:$0xff] }
 0xb2f   : > { %v7795_v46 = vadd.f32 1.0, %v7763_v62  ;;  %v7415_v29 = vmul.f32 %v14595_v48, %v7383_v8  ;;  %11442 = vrcp.f32 %v7131_v42  ;;  %v14704_v18 = vmul.f32 0.70710677, %v14688_v21 }
 0xb30   : > { %v14706_v50 = vpop.eup %11436  ;;  %v7730_v12 = vsub.f32 0.0, %v7666_v16  ;;  %v7637_v51 = vmul.f32 %v11433_v38, %v7477_v37  ;;  %v7542_v11 = vmul.f32 %v7510_v2, %v14593_v25  ;;  %v7098_v30 = vmul.f32 0.3275911, %v14700_v1  ;;  %v16102_v38 = vld [vmem:[#allocation58_spill] sm:$0xff] }
 0xb31   : > { %16100 = vst [vmem:[#allocation4_spill] sm:$0xff] %v14704_v18  ;;  %v14711_v53 = vmul.f32 %v7793_v13, %v14491_v58  ;;  %v7350_v45 = vmul.f32 %v14658_v26, %v7318_v34  ;;  %v7225_v62 = vmul.f32 1.0614054, %v14706_v50  ;;  %v14716_v49 = vand.u32 2147483647, %v14704_v18 }
 0xb32   : > { %v14719_v24 = vmul.f32 %v7792_v35, %v14513_v20  ;;  %v7636_v55 = vmul.f32 %v11435_v17, %v7476_v14  ;;  %v7130_v47 = vadd.f32 1.0, %v7098_v30  ;;  %v14723_v25 = vadd.f32 %v14677_v59, %v16102_v38 }
 0xb33   : > { %16101 = vst [vmem:[#allocation2_spill] sm:$0xff] %v14711_v53  ;;  %v14726_v8 = vmul.f32 %v7795_v46, %v14572_v10  ;;  %v7447_v58 = vadd.f32 0.2548296, %v7415_v29  ;;  %v7257_v2 = vadd.f32 -1.4531521, %v7225_v62  ;;  %v7762_v37 = vsel %vm7698_vm2, %v7666_v16, %v7730_v12 }
 0xb34   : > { %v7101_v15 = vmul.f32 0.3275911, %v14716_v49  ;;  %v14729_v3 = vpop.eup %11438  ;;  %v7669_v20 = vsub.f32 1.0, %v7637_v51  ;;  %vm7701_vm3 = vcmp.ge.f32.partialorder %v14452_v40, 0.0  ;;  %v7590_v17 = vmul.f32 1.442695, %v7542_v11 }
 0xb35   : > { %16103 = vst [vmem:[#allocation5_spill] sm:$0xff] %v14726_v8  ;;  %11444 = vrcp.f32 %v7130_v47  ;;  %vm7700_vm4 = vcmp.ge.f32.partialorder %v16104_v39, 0.0  ;;  %v7382_v13 = vadd.f32 -0.28449672, %v7350_v45  ;;  %v7289_v10 = vmul.f32 %v14706_v50, %v7257_v2 }
 0xb36   : > { %v7224_v42 = vmul.f32 1.0614054, %v14729_v3  ;;  %v7133_v35 = vadd.f32 1.0, %v7101_v15  ;;  %v7668_v14 = vsub.f32 1.0, %v7636_v55  ;;  %v7513_v34 = vsub.f32 0.0, %v14628_v33 }
 0xb37   : > { %v14739_v46 = vmul.f32 0.70710677, %v14723_v25  ;;  %v14743_v16 = vadd.f32 %v14677_v59, %v16105_v44  ;;  %v11441_v29 = vpop.eup %11440  ;;  %v7479_v12 = vmul.f32 %v14595_v48, %v7447_v58  ;;  %v7321_v51 = vadd.f32 1.4214138, %v7289_v10 }
 0xb38   : > { %v7256_v11 = vadd.f32 -1.4531521, %v7224_v42  ;;  %11446 = vrcp.f32 %v7133_v35  ;;  %v7794_v30 = vadd.f32 1.0, %v7762_v37  ;;  %v14747_v45 = vmul.f32 0.5, %v14606_v4 }
 0xb39   : > { %11448 = vpow2.f32 %v7590_v17  ;;  %v14750_v62 = vand.u32 2147483647, %v14739_v46  ;;  %v14752_v55 = vpop.eup %11442  ;;  %v7733_v47 = vsub.f32 0.0, %v7669_v20  ;;  %v7414_v38 = vmul.f32 %v14658_v26, %v7382_v13 }
 0xb3a   : > { %v7288_v2 = vmul.f32 %v14729_v3, %v7256_v11  ;;  %v14757_v48 = vmul.f32 0.70710677, %v14743_v16  ;;  %v7732_v58 = vsub.f32 0.0, %v7668_v14  ;;  %v7353_v15 = vmul.f32 %v14706_v50, %v7321_v51 }
 0xb3b   : > { %v7227_v37 = vmul.f32 1.0614054, %v14752_v55  ;;  %v7100_v4 = vmul.f32 0.3275911, %v14750_v62  ;;  %v7639_v17 = vmul.f32 %v11441_v29, %v7479_v12  ;;  %v7545_v10 = vmul.f32 %v7513_v34, %v14628_v33 }
 0xb3c   : > { %16106 = vst [vmem:[#allocation3_spill] sm:$0xff] %v14757_v48  ;;  %v14764_v42 = vmul.f32 0.5, %v14622_v28  ;;  %v14767_v13 = vand.u32 2147483647, %v14757_v48  ;;  %v7512_v35 = vsub.f32 0.0, %v14647_v36  ;;  %v7515_v11 = vsub.f32 0.0, %v14672_v43 }
 0xb3d   : > { %v7259_v44 = vadd.f32 -1.4531521, %v7227_v37  ;;  %v7132_v8 = vadd.f32 1.0, %v7100_v4  ;;  %v7765_v51 = vsel %vm7701_vm3, %v7669_v20, %v7733_v47  ;;  %v7446_v18 = vadd.f32 0.2548296, %v7414_v38 }
 0xb3e   : > { %v7320_v53 = vadd.f32 1.4214138, %v7288_v2  ;;  %v7103_v29 = vmul.f32 0.3275911, %v14767_v13  ;;  %v7764_v28 = vsel %vm7700_vm4, %v7668_v14, %v7732_v58  ;;  %vm7703_vm5 = vcmp.ge.f32.partialorder %v14519_v5, 0.0 }
 0xb3f   : > { %v14774_v33 = vpop.eup %11444  ;;  %v7385_v34 = vadd.f32 -0.28449672, %v7353_v15  ;;  %v7291_v12 = vmul.f32 %v14752_v55, %v7259_v44  ;;  %11450 = vrcp.f32 %v7132_v8  ;;  %v14781_v37 = vmul.f32 %v7794_v30, %v14584_v57 }
 0xb40   : > { %v7671_v40 = vsub.f32 1.0, %v7639_v17  ;;  %v7596_v20 = vmul.f32 1.442695, %v7545_v10  ;;  %v7226_v47 = vmul.f32 1.0614054, %v14774_v33  ;;  %v7797_v38 = vadd.f32 1.0, %v7765_v51 }
 0xb41   : > { %v7544_v2 = vmul.f32 %v7512_v35, %v14647_v36  ;;  %v7323_v4 = vadd.f32 1.4214138, %v7291_v12  ;;  %v7135_v48 = vadd.f32 1.0, %v7103_v29  ;;  %v7796_v14 = vadd.f32 1.0, %v7764_v28  ;;  %v16107_v10 = vld [vmem:[#allocation56_spill] sm:$0xff] }
 0xb42   : > { %v14785_v39 = vpop.eup %11446  ;;  %v7478_v58 = vmul.f32 %v14658_v26, %v7446_v18  ;;  %v7352_v15 = vmul.f32 %v14729_v3, %v7320_v53  ;;  %v7547_v8 = vmul.f32 %v7515_v11, %v14672_v43  ;;  %v7417_v30 = vmul.f32 %v14706_v50, %v7385_v34  ;;  %v7852_v43 = vld [vmem:[%s15707_s10 + $0x30] sm:$0xff]  ;;  %v7853_v18 = vld [vmem:[%s15707_s10 + $0x38] sm:$0xff] }
 0xb43   : > { %v11449_v57 = vpop.eup %11448  ;;  %v7258_v17 = vadd.f32 -1.4531521, %v7226_v47  ;;  %11452 = vrcp.f32 %v7135_v48  ;;  %v14793_v44 = vadd.f32 %v14677_v59, %v16107_v10  ;;  %v7735_v36 = vsub.f32 0.0, %v7671_v40 }
 0xb44   : > { %11454 = vpow2.f32 %v7596_v20  ;;  %v14796_v35 = vmul.f32 0.5, %v14642_v61  ;;  %v7514_v26 = vsub.f32 0.0, %v14700_v1  ;;  %v14806_v53 = vmul.f32 %v7797_v38, %v14590_v32 }
 0xb45   : > { %v7594_v48 = vmul.f32 1.442695, %v7544_v2  ;;  %v7355_v11 = vmul.f32 %v14752_v55, %v7323_v4  ;;  %v7229_v51 = vmul.f32 1.0614054, %v14785_v39  ;;  %v14811_v61 = vmul.f32 %v7796_v14, %v14613_v23 }
 0xb46   : > { %v7638_v29 = vmul.f32 %v11449_v57, %v7478_v58  ;;  %v7384_v28 = vadd.f32 -0.28449672, %v7352_v15  ;;  %v7600_v34 = vmul.f32 1.442695, %v7547_v8  ;;  %v7449_v12 = vadd.f32 0.2548296, %v7417_v30 }
 0xb47   : > { %v7290_v20 = vmul.f32 %v14774_v33, %v7258_v17  ;;  %v14815_v47 = vmul.f32 0.70710677, %v14793_v44  ;;  %v10676_v10 = vpack.c.bf16 %v7853_v18, %v7852_v43  ;;  %v7767_v32 = vsel %vm7703_vm5, %v7671_v40, %v7735_v36 }
 0xb48   : > { %v14820_v38 = vmul.f32 0.5, %v14681_v56  ;;  %v7546_v2 = vmul.f32 %v7514_v26, %v14700_v1  ;;  %v7517_v23 = vsub.f32 0.0, %v14716_v49  ;;  %11456 = vpow2.f32 %v7594_v48 }
 0xb49   : > { %v14824_v4 = vpop.eup %11450  ;;  %v7387_v14 = vadd.f32 -0.28449672, %v7355_v11  ;;  %v7261_v58 = vadd.f32 -1.4531521, %v7229_v51  ;;  %v14827_v15 = vand.u32 2147483647, %v14815_v47  ;;  %10677 = vmatprep.subr.bf16.mxu0 %v10676_v10  ;;  %v7416_v5 = vmul.f32 %v14729_v3, %v7384_v28 }
 0xb4a   : > { %16108 = vst [vmem:[#allocation7_spill] sm:$0xff] %v14820_v38  ;;  %v7670_v8 = vsub.f32 1.0, %v7638_v29  ;;  %vm7702_vm6 = vcmp.ge.f32.partialorder %v14581_v6, 0.0  ;;  %11458 = vpow2.f32 %v7600_v34  ;;  %v7228_v56 = vmul.f32 1.0614054, %v14824_v4  ;;  %10679 = vmatpush3.bf16.msra.mxu0 %v10676_v10 }
 0xb4b   : > { %v7799_v1 = vadd.f32 1.0, %v7767_v32  ;;  %v7481_v40 = vmul.f32 %v14706_v50, %v7449_v12  ;;  %v7322_v57 = vadd.f32 1.4214138, %v7290_v20  ;;  %v7102_v30 = vmul.f32 0.3275911, %v14827_v15  ;;  %v16109_v32 = vld [vmem:[#allocation54_spill] sm:$0xff] }
 0xb4c   : > { %v7598_v17 = vmul.f32 1.442695, %v7546_v2  ;;  %v7549_v36 = vmul.f32 %v7517_v23, %v14716_v49  ;;  %v7260_v26 = vadd.f32 -1.4531521, %v7228_v56  ;;  %v7516_v43 = vsub.f32 0.0, %v14750_v62 }
 0xb4d   : > { %v14836_v18 = vpop.eup %11452  ;;  %v7419_v48 = vmul.f32 %v14752_v55, %v7387_v14  ;;  %v7293_v11 = vmul.f32 %v14785_v39, %v7261_v58  ;;  %v7519_v51 = vsub.f32 0.0, %v14767_v13  ;;  %v7134_v29 = vadd.f32 1.0, %v7102_v30 }
 0xb4e   : > { %v11455_v28 = vpop.eup %11454  ;;  %v7734_v50 = vsub.f32 0.0, %v7670_v8  ;;  %v7448_v34 = vadd.f32 0.2548296, %v7416_v5  ;;  %v7292_v12 = vmul.f32 %v14824_v4, %v7260_v26  ;;  %v7231_v20 = vmul.f32 1.0614054, %v14836_v18 }
 0xb4f   : > { %v7641_v49 = vmul.f32 %v11455_v28, %v7481_v40  ;;  %v7354_v10 = vmul.f32 %v14774_v33, %v7322_v57  ;;  %11460 = vrcp.f32 %v7134_v29  ;;  %v14846_v2 = vadd.f32 %v14677_v59, %v16109_v32  ;;  %v16111_v32 = vld [vmem:[#allocation35_spill] sm:$0xff] }
 0xb50   : > { %v7604_v23 = vmul.f32 1.442695, %v7549_v36  ;;  %v7324_v14 = vadd.f32 1.4214138, %v7292_v12  ;;  %v7548_v58 = vmul.f32 %v7516_v43, %v14750_v62  ;;  %v7263_v56 = vadd.f32 -1.4531521, %v7231_v20 }
 0xb51   : > { %v7451_v30 = vadd.f32 0.2548296, %v7419_v48  ;;  %v14850_v5 = vmul.f32 0.5, %v14688_v21  ;;  %v7325_v26 = vadd.f32 1.4214138, %v7293_v11  ;;  %v7551_v38 = vmul.f32 %v7519_v51, %v14767_v13  ;;  %v16110_v12 = vld [vmem:[#allocation63_spill] sm:$0xff] }
 0xb52   : > { %vm7705_vm7 = vcmp.ge.f32.partialorder %v14618_v22, 0.0  ;;  %v7480_v40 = vmul.f32 %v14729_v3, %v7448_v34  ;;  %11462 = vpow2.f32 %v7598_v17  ;;  %v14856_v57 = vmul.f32 0.5, %v14723_v25  ;;  %v11457_v29 = vpop.eup %11456 }
 0xb53   : > { %v7295_v36 = vmul.f32 %v14836_v18, %v7263_v56  ;;  %v7766_v62 = vsel %vm7702_vm6, %v7670_v8, %v7734_v50  ;;  %v7673_v43 = vsub.f32 1.0, %v7641_v49  ;;  %v7386_v21 = vadd.f32 -0.28449672, %v7354_v10 }
 0xb54   : > { %v14862_v48 = vmul.f32 0.70710677, %v14846_v2  ;;  %v11459_v13 = vpop.eup %11458  ;;  %v14865_v11 = vmul.f32 %v7799_v1, %v14631_v0  ;;  %11464 = vpow2.f32 %v7604_v23  ;;  %v7356_v3 = vmul.f32 %v14824_v4, %v7324_v14 }
 0xb55   : > { %v7602_v25 = vmul.f32 1.442695, %v7548_v58  ;;  %v7483_v17 = vmul.f32 %v14752_v55, %v7451_v30  ;;  %v7357_v51 = vmul.f32 %v14785_v39, %v7325_v26  ;;  %v7608_v28 = vmul.f32 1.442695, %v7551_v38  ;;  %v16112_v30 = vld [vmem:[#allocation51_spill] sm:$0xff] }
 0xb56   : > { %v14871_v6 = vand.u32 2147483647, %v14862_v48  ;;  %v7798_v8 = vadd.f32 1.0, %v7766_v62  ;;  %v7640_v50 = vmul.f32 %v11457_v29, %v7480_v40  ;;  %v7327_v34 = vadd.f32 1.4214138, %v7295_v36  ;;  %v16113_v29 = vld [vmem:[#allocation68_spill] sm:$0xff] }
 0xb57   : > { %v14875_v20 = vadd.f32 %v14677_v59, %v16110_v12  ;;  %v7737_v0 = vsub.f32 0.0, %v7673_v43  ;;  %v7418_v1 = vmul.f32 %v14774_v33, %v7386_v21  ;;  %vm7861_vm8 = vcmask 523264  }
 0xb58   : > { %v7105_v49 = vmul.f32 0.3275911, %v14871_v6  ;;  %v7388_v55 = vadd.f32 -0.28449672, %v7356_v3  ;;  %11466 = vpow2.f32 %v7602_v25  ;;  %v14880_v38 = vmul.f32 0.5, %v14743_v16  ;;  %10288 = vmatprep.mubr.msk.f32.mxu0 %vm7861_vm8, %v16111_v32 }
 0xb59   : > { %v7518_v10 = vsub.f32 0.0, %v14827_v15  ;;  %v14885_v23 = vpop.eup %11460  ;;  %vm7704_vm9 = vcmp.ge.f32.partialorder %v14636_v52, 0.0  ;;  %v14888_v14 = vmul.f32 %v11459_v13, %v7483_v17  ;;  %v7389_v58 = vadd.f32 -0.28449672, %v7357_v51  ;;  %10289 = vmatmul.mubr.msk.f32.vlgmr.msra.gmra.mrb[124].mxu0 %vm7861_vm8, %v16112_v30  ;;  %v16116_v30 = vld [vmem:[#allocation60_spill] sm:$0xff] }
 0xb5a   : > { %11468 = vpow2.f32 %v7608_v28  ;;  %v7137_v56 = vadd.f32 1.0, %v7105_v49  ;;  %v7672_v26 = vsub.f32 1.0, %v7640_v50  ;;  %v7359_v16 = vmul.f32 %v14836_v18, %v7327_v34  ;;  %10291 = vmatprep.mubr.msk.f32.mxu0 %vm7861_vm8, %v16113_v29  ;;  %v16115_v34 = vld [vmem:[#allocation36_spill] sm:$0xff] }
 0xb5b   : > { %v7230_v40 = vmul.f32 1.0614054, %v14885_v23  ;;  %v14895_v36 = vmul.f32 0.70710677, %v14875_v20  ;;  %v14900_v62 = vmul.f32 %v7798_v8, %v14655_v63  ;;  %v7769_v21 = vsel %vm7705_vm7, %v7673_v43, %v7737_v0  ;;  %v16114_v43 = vld [vmem:[#allocation57_spill] sm:$0xff] }
 0xb5c   : > { %v7450_v13 = vadd.f32 0.2548296, %v7418_v1  ;;  %11470 = vrcp.f32 %v7137_v56  ;;  %v11463_v3 = vpop.eup %11462  ;;  %vm7707_vm10 = vcmp.ge.f32.partialorder %v14664_v54, 0.0  ;;  %v7420_v25 = vmul.f32 %v14824_v4, %v7388_v55 }
 0xb5d   : > { %v14907_v17 = vmul.f32 0.5, %v14793_v44  ;;  %v7262_v51 = vadd.f32 -1.4531521, %v7230_v40  ;;  %v7550_v28 = vmul.f32 %v7518_v10, %v14827_v15  ;;  %v7675_v50 = vsub.f32 1.0, %v14888_v14  ;;  %10292 = vmatmul.mubr.msk.f32.gmra.mrb[126].mxu0 %vm7861_vm8, %v16115_v34 }
 0xb5e   : > { %v7421_v63 = vmul.f32 %v14785_v39, %v7389_v58  ;;  %v14913_v22 = vand.u32 2147483647, %v14895_v36  ;;  %v14917_v8 = vadd.f32 %v14677_v59, %v16114_v43  ;;  %v11465_v12 = vpop.eup %11464  ;;  %v7801_v44 = vadd.f32 1.0, %v7769_v21  ;;  %10294 = vmatprep.mubr.msk.f32.mxu0 %vm7861_vm8, %v14563_v7 }
 0xb5f   : > { %v7736_v0 = vsub.f32 0.0, %v7672_v26  ;;  %v7391_v1 = vadd.f32 -0.28449672, %v7359_v16  ;;  %v7294_v15 = vmul.f32 %v14885_v23, %v7262_v51  ;;  %v7482_v49 = vmul.f32 %v14774_v33, %v7450_v13 }
 0xb60   : > { %v7521_v55 = vsub.f32 0.0, %v14871_v6  ;;  %v7104_v10 = vmul.f32 0.3275911, %v14913_v22  ;;  %v14928_v32 = vmul.f32 0.70710677, %v14917_v8  ;;  %v14932_v16 = vadd.f32 %v14677_v59, %v16116_v30 }
 0xb61   : > { %v7452_v14 = vadd.f32 0.2548296, %v7420_v25  ;;  %v7326_v58 = vadd.f32 1.4214138, %v7294_v15  ;;  %v7606_v56 = vmul.f32 1.442695, %v7550_v28  ;;  %10295 = vmatmul.mubr.msk.f32.gmra.mrb[128].mxu0 %vm7861_vm8, %v14551_v27  ;;  %v14940_v13 = vmul.f32 %v7801_v44, %v14747_v45 }
 0xb62   : > { %v7739_v40 = vsub.f32 0.0, %v7675_v50  ;;  %v7453_v29 = vadd.f32 0.2548296, %v7421_v63  ;;  %v7136_v21 = vadd.f32 1.0, %v7104_v10  ;;  %v14935_v7 = vand.u32 2147483647, %v14928_v32  ;;  %v11467_v33 = vpop.eup %11466  ;;  %10297 = vmatprep.mubr.msk.f32.mxu0 %vm7861_vm8, %v14578_v60 }
 0xb63   : > { %v7768_v25 = vsel %vm7704_vm9, %v7672_v26, %v7736_v0  ;;  %v7423_v51 = vmul.f32 %v14836_v18, %v7391_v1  ;;  %v7358_v28 = vmul.f32 %v14885_v23, %v7326_v58  ;;  %v14948_v43 = vmul.f32 %v11463_v3, %v7482_v49  ;;  %v16117_v49 = vld [vmem:[#allocation46_spill] sm:$0xff]  ;;  %v16118_v58 = vld [vmem:[#allocation53_spill] sm:$0xff] }
 0xb64   : > { %v11469_v63 = vpop.eup %11468  ;;  %v7553_v34 = vmul.f32 %v7521_v55, %v14871_v6  ;;  %11472 = vrcp.f32 %v7136_v21  ;;  %v7107_v27 = vmul.f32 0.3275911, %v14935_v7  ;;  %v7484_v45 = vmul.f32 %v14824_v4, %v7452_v14 }
 0xb65   : > { %v7390_v44 = vadd.f32 -0.28449672, %v7358_v28  ;;  %11474 = vpow2.f32 %v7606_v56  ;;  %v14954_v52 = vmul.f32 0.70710677, %v14932_v16  ;;  %v7800_v0 = vadd.f32 1.0, %v7768_v25  ;;  %10298 = vmatmul.mubr.msk.f32.gmra.mrb[130].mxu0 %vm7861_vm8, %v14567_v41 }
 0xb66   : > { %v14956_v26 = vpop.eup %11470  ;;  %v7771_v60 = vsel %vm7707_vm10, %v7675_v50, %v7739_v40  ;;  %v7485_v3 = vmul.f32 %v14785_v39, %v7453_v29  ;;  %v7139_v1 = vadd.f32 1.0, %v7107_v27  ;;  %v7455_v6 = vadd.f32 0.2548296, %v7423_v51  ;;  %10300 = vmatprep.mubr.msk.f32.mxu0 %vm7861_vm8, %v14696_v9 }
 0xb67   : > { %v7422_v4 = vmul.f32 %v14885_v23, %v7390_v44  ;;  %v7233_v15 = vmul.f32 1.0614054, %v14956_v26  ;;  %v14967_v55 = vadd.f32 %v14677_v59, %v16117_v49  ;;  %v7674_v54 = vsub.f32 1.0, %v14948_v43  ;;  %v16120_v49 = vld [vmem:[#allocation4_spill] sm:$0xff] }
 0xb68   : > { %vm7706_vm11 = vcmp.ge.f32.partialorder %v14693_v19, 0.0  ;;  %v7612_v39 = vmul.f32 1.442695, %v7553_v34  ;;  %11476 = vrcp.f32 %v7139_v1  ;;  %v14974_v41 = vand.u32 2147483647, %v14954_v52 }
 0xb69   : > { %v14976_v50 = vmul.f32 %v11467_v33, %v7484_v45  ;;  %v7454_v10 = vadd.f32 0.2548296, %v7422_v4  ;;  %v7265_v14 = vadd.f32 -1.4531521, %v7233_v15  ;;  %v14980_v56 = vadd.f32 %v14677_v59, %v16118_v58  ;;  %10301 = vmatmul.mubr.msk.f32.gmra.mrb[132].mxu0 %vm7861_vm8, %v14650_v31  ;;  %v16119_v45 = vld [vmem:[#allocation2_spill] sm:$0xff] }
 0xb6a   : > { %v14983_v30 = vmul.f32 %v7800_v0, %v14764_v42  ;;  %v7803_v9 = vadd.f32 1.0, %v7771_v60  ;;  %v7520_v40 = vsub.f32 0.0, %v14913_v22  ;;  %v7106_v29 = vmul.f32 0.3275911, %v14974_v41  ;;  %10303 = vmatprep.mubr.msk.f32.mxu0 %vm7861_vm8, %v14719_v24 }
 0xb6b   : > { %v14989_v21 = vmul.f32 %v11465_v12, %v7485_v3  ;;  %v7487_v33 = vmul.f32 %v14836_v18, %v7455_v6  ;;  %v7297_v25 = vmul.f32 %v14956_v26, %v7265_v14  ;;  %v14994_v59 = vmul.f32 0.70710677, %v14967_v55 }
 0xb6c   : > { %v7738_v42 = vsub.f32 0.0, %v7674_v54  ;;  %v7486_v51 = vmul.f32 %v14885_v23, %v7454_v10  ;;  %v7138_v28 = vadd.f32 1.0, %v7106_v29  ;;  %v15000_v43 = vmul.f32 0.70710677, %v14980_v56  ;;  %v16122_v29 = vld [vmem:[#allocation5_spill] sm:$0xff] }
 0xb6d   : > { %v7676_v31 = vsub.f32 1.0, %v14976_v50  ;;  %vm7708_vm12 = vcmp.ge.f32.partialorder %v14739_v46, 0.0  ;;  %v7329_v18 = vadd.f32 1.4214138, %v7297_v25  ;;  %11478 = vpow2.f32 %v7612_v39  ;;  %10304 = vmatmul.mubr.msk.f32.gmra.mrb[134].mxu0 %vm7861_vm8, %v16119_v45  ;;  %v16123_v46 = vld [vmem:[#allocation7_spill] sm:$0xff] }
 0xb6e   : > { %v15005_v12 = vand.u32 2147483647, %v14994_v59  ;;  %v15007_v34 = vpop.eup %11472  ;;  %v7552_v24 = vmul.f32 %v7520_v40, %v14913_v22  ;;  %v7523_v27 = vsub.f32 0.0, %v14935_v7  ;;  %11480 = vrcp.f32 %v7138_v28  ;;  %10306 = vmatprep.mubr.msk.f32.mxu0 %vm7861_vm8, %v14781_v37  ;;  %v16121_v37 = vld [vmem:[#allocation3_spill] sm:$0xff] }
 0xb6f   : > { %v15012_v23 = vand.u32 2147483647, %v15000_v43  ;;  %v11475_v44 = vpop.eup %11474  ;;  %v7647_v0 = vmul.f32 %v11469_v63, %v7487_v33  ;;  %v7361_v60 = vmul.f32 %v14956_v26, %v7329_v18  ;;  %v7232_v3 = vmul.f32 1.0614054, %v15007_v34 }
 0xb70   : > { %v7109_v1 = vmul.f32 0.3275911, %v15005_v12  ;;  %v15022_v22 = vmul.f32 %v7803_v9, %v14796_v35  ;;  %v7677_v6 = vsub.f32 1.0, %v14989_v21  ;;  %v7646_v4 = vmul.f32 %v11475_v44, %v7486_v51 }
 0xb71   : > { %v7108_v15 = vmul.f32 0.3275911, %v15012_v23  ;;  %v7770_v63 = vsel %vm7706_vm11, %v7674_v54, %v7738_v42  ;;  %vm7709_vm13 = vcmp.ge.f32.partialorder %v16120_v49, 0.0  ;;  %v7393_v39 = vadd.f32 -0.28449672, %v7361_v60  ;;  %10307 = vmatmul.mubr.msk.f32.gmra.mrb[136].mxu0 %vm7861_vm8, %v16122_v29 }
 0xb72   : > { %v7264_v50 = vadd.f32 -1.4531521, %v7232_v3  ;;  %v7141_v10 = vadd.f32 1.0, %v7109_v1  ;;  %v15029_v14 = vpop.eup %11476  ;;  %v7740_v58 = vsub.f32 0.0, %v7676_v31  ;;  %vm7711_vm14 = vcmp.ge.f32.partialorder %v16121_v37, 0.0  ;;  %10309 = vmatprep.mubr.msk.f32.mxu0 %vm7861_vm8, %v14811_v61 }
 0xb73   : > { %v7610_v35 = vmul.f32 1.442695, %v7552_v24  ;;  %v7555_v9 = vmul.f32 %v7523_v27, %v14935_v7  ;;  %v7140_v40 = vadd.f32 1.0, %v7108_v15  ;;  %v7679_v21 = vsub.f32 1.0, %v7647_v0 }
 0xb74   : > { %vm7710_vm15 = vcmp.ge.f32.partialorder %v14815_v47, 0.0  ;;  %v7425_v19 = vmul.f32 %v14956_v26, %v7393_v39  ;;  %v7296_v54 = vmul.f32 %v15007_v34, %v7264_v50  ;;  %v7235_v33 = vmul.f32 1.0614054, %v15029_v14 }
 0xb75   : > { %v7802_v25 = vadd.f32 1.0, %v7770_v63  ;;  %v7678_v42 = vsub.f32 1.0, %v7646_v4  ;;  %v7522_v7 = vsub.f32 0.0, %v14974_v41  ;;  %11482 = vrcp.f32 %v7141_v10  ;;  %10310 = vmatmul.mubr.msk.f32.gmra.mrb[138].mxu0 %vm7861_vm8, %v14806_v53 }
 0xb76   : > { %v7457_v51 = vadd.f32 0.2548296, %v7425_v19  ;;  %v7328_v28 = vadd.f32 1.4214138, %v7296_v54  ;;  %v7267_v18 = vadd.f32 -1.4531521, %v7235_v33  ;;  %11484 = vrcp.f32 %v7140_v40  ;;  %10312 = vmatprep.mubr.msk.f32.mxu0 %vm7861_vm8, %v14900_v62 }
 0xb77   : > { %v7741_v24 = vsub.f32 0.0, %v7677_v6  ;;  %v7772_v27 = vsel %vm7708_vm12, %v7676_v31, %v7740_v58  ;;  %11486 = vpow2.f32 %v7610_v35  ;;  %v7616_v45 = vmul.f32 1.442695, %v7555_v9  ;;  %v11479_v44 = vpop.eup %11478 }
 0xb78   : > { %v7743_v61 = vsub.f32 0.0, %v7679_v21  ;;  %v7489_v0 = vmul.f32 %v14956_v26, %v7457_v51  ;;  %v7360_v60 = vmul.f32 %v15007_v34, %v7328_v28  ;;  %v7299_v3 = vmul.f32 %v15029_v14, %v7267_v18  ;;  %v15051_v1 = vpop.eup %11480 }
 0xb79   : > { %v7834_v31 = vmul.f32 %v7802_v25, %v16123_v46  ;;  %v7742_v4 = vsub.f32 0.0, %v7678_v42  ;;  %v7554_v15 = vmul.f32 %v7522_v7, %v14974_v41  ;;  %v7525_v53 = vsub.f32 0.0, %v15005_v12  ;;  %10313 = vmatmul.mubr.msk.f32.gmra.mrb[140].mxu0 %vm7861_vm8, %v14865_v11 }
 0xb7a   : > { %v7649_v63 = vmul.f32 %v11479_v44, %v7489_v0  ;;  %v7392_v39 = vadd.f32 -0.28449672, %v7360_v60  ;;  %v7331_v50 = vadd.f32 1.4214138, %v7299_v3  ;;  %v7234_v26 = vmul.f32 1.0614054, %v15051_v1  ;;  %10315 = vmatprep.mubr.msk.f32.mxu0 %vm7861_vm8, %v14983_v30 }
 0xb7b   : > { %v7773_v10 = vsel %vm7709_vm13, %v7677_v6, %v7741_v24  ;;  %v7804_v58 = vadd.f32 1.0, %v7772_v27  ;;  %11488 = vpow2.f32 %v7616_v45  ;;  %v7524_v62 = vsub.f32 0.0, %v15012_v23 }
 0xb7c   : > { %v7775_v41 = vsel %vm7711_vm14, %v7679_v21, %v7743_v61  ;;  %v7424_v35 = vmul.f32 %v15007_v34, %v7392_v39  ;;  %v7363_v9 = vmul.f32 %v15029_v14, %v7331_v50  ;;  %v7266_v40 = vadd.f32 -1.4531521, %v7234_v26 }
 0xb7d   : > { %v7774_v6 = vsel %vm7710_vm15, %v7678_v42, %v7742_v4  ;;  %vm7713_vm1 = vcmp.ge.f32.partialorder %v14862_v48, 0.0  ;;  %v15072_v49 = vmul.f32 0.5, %v14875_v20  ;;  %v7614_v11 = vmul.f32 1.442695, %v7554_v15  ;;  %10316 = vmatmul.mubr.msk.f32.gmra.mrb[142].mxu0 %vm7861_vm8, %v14940_v13 }
 0xb7e   : > { %v7557_v37 = vmul.f32 %v7525_v53, %v15005_v12  ;;  %v7681_v29 = vsub.f32 1.0, %v7649_v63  ;;  %v7456_v21 = vadd.f32 0.2548296, %v7424_v35  ;;  %v7395_v19 = vadd.f32 -0.28449672, %v7363_v9  ;;  %10318 = vmatprep.mubr.msk.f32.mxu0 %vm7861_vm8, %v7834_v31 }
 0xb7f   : > { %v7298_v54 = vmul.f32 %v15051_v1, %v7266_v40  ;;  %v15076_v33 = vpop.eup %11482  ;;  %v7805_v25 = vadd.f32 1.0, %v7773_v10  ;;  %v7836_v30 = vmul.f32 %v7804_v58, %v14856_v57  ;;  %v7807_v47 = vadd.f32 1.0, %v7775_v41 }
 0xb80   : > { %v7556_v42 = vmul.f32 %v7524_v62, %v15012_v23  ;;  %v15082_v20 = vpop.eup %11484  ;;  %v7806_v7 = vadd.f32 1.0, %v7774_v6  ;;  %v7488_v12 = vmul.f32 %v15007_v34, %v7456_v21  ;;  %v7427_v51 = vmul.f32 %v15029_v14, %v7395_v19 }
 0xb81   : > { %v7330_v28 = vadd.f32 1.4214138, %v7298_v54  ;;  %v11487_v18 = vpop.eup %11486  ;;  %11490 = vpow2.f32 %v7614_v11  ;;  %v7237_v57 = vmul.f32 1.0614054, %v15076_v33  ;;  %v7620_v24 = vmul.f32 1.442695, %v7557_v37  ;;  %10319 = vmatmul.mubr.msk.f32.gmra.mrb[144].mxu0 %vm7861_vm8, %v15022_v22 }
 0xb82   : > { %v7236_v23 = vmul.f32 1.0614054, %v15082_v20  ;;  %v7745_v27 = vsub.f32 0.0, %v7681_v29  ;;  %v7648_v45 = vmul.f32 %v11487_v18, %v7488_v12  ;;  %v7459_v13 = vadd.f32 0.2548296, %v7427_v51  ;;  %10321 = vmatprep.mubr.msk.f32.mxu0 %vm7861_vm8, %v7836_v30 }
 0xb83   : > { %v7362_v44 = vmul.f32 %v15051_v1, %v7330_v28  ;;  %v7269_v61 = vadd.f32 -1.4531521, %v7237_v57  ;;  %v7618_v34 = vmul.f32 1.442695, %v7556_v42  ;;  %v7838_v60 = vmul.f32 %v7806_v7, %v14907_v17 }
 0xb84   : > { %v7268_v0 = vadd.f32 -1.4531521, %v7236_v23  ;;  %v7680_v3 = vsub.f32 1.0, %v7648_v45  ;;  %v7491_v46 = vmul.f32 %v15029_v14, %v7459_v13  ;;  %v7837_v15 = vmul.f32 %v7805_v25, %v14850_v5 }
 0xb85   : > { %v7394_v31 = vadd.f32 -0.28449672, %v7362_v44  ;;  %v11489_v4 = vpop.eup %11488  ;;  %vm7712_vm2 = vcmp.ge.f32.partialorder %v14895_v36, 0.0  ;;  %v7301_v53 = vmul.f32 %v15076_v33, %v7269_v61  ;;  %v7777_v22 = vsel %vm7713_vm1, %v7681_v29, %v7745_v27 }
 0xb86   : > { %v7300_v63 = vmul.f32 %v15082_v20, %v7268_v0  ;;  %v7744_v39 = vsub.f32 0.0, %v7680_v3  ;;  %v7651_v17 = vmul.f32 %v11489_v4, %v7491_v46  ;;  %v7839_v14 = vmul.f32 %v7807_v47, %v14880_v38  ;;  %10322 = vmatmul.mubr.msk.f32.gmra.mrb[146].mxu0 %vm7861_vm8, %v7837_v15  ;;  %v16124_v15 = vld [vmem:[#allocation61_spill] sm:$0xff] }
 0xb87   : > { %v7426_v50 = vmul.f32 %v15051_v1, %v7394_v31  ;;  %v7333_v26 = vadd.f32 1.4214138, %v7301_v53  ;;  %11492 = vpow2.f32 %v7620_v24  ;;  %10324 = vmatprep.mubr.msk.f32.mxu0 %vm7861_vm8, %v7838_v60  ;;  %v7809_v62 = vadd.f32 1.0, %v7777_v22 }
 0xb88   : > { %v7332_v10 = vadd.f32 1.4214138, %v7300_v63  ;;  %v7776_v5 = vsel %vm7712_vm2, %v7680_v3, %v7744_v39  ;;  %v7683_v36 = vsub.f32 1.0, %v7651_v17  ;;  %11494 = vpow2.f32 %v7618_v34 }
 0xb89   : > { %v7458_v58 = vadd.f32 0.2548296, %v7426_v50  ;;  %v7808_v48 = vadd.f32 1.0, %v7776_v5  ;;  %v7365_v41 = vmul.f32 %v15076_v33, %v7333_v26  ;;  %v7009_v9 = vmul.f32 0.5, %v14846_v2 }
 0xb8a   : > { %v7364_v35 = vmul.f32 %v15082_v20, %v7332_v10  ;;  %v7747_v11 = vsub.f32 0.0, %v7683_v36  ;;  %10325 = vmatmul.mubr.msk.f32.gmra.mrb[148].mxu0 %vm7861_vm8, %v7839_v14  ;;  %vm7715_vm3 = vcmp.ge.f32.partialorder %v14928_v32, 0.0  ;;  %vm7714_vm4 = vcmp.ge.f32.partialorder %v14954_v52, 0.0  ;;  %v16126_v10 = vld [vmem:[#allocation37_spill] sm:$0xff] }
 0xb8b   : > { %v7490_v38 = vmul.f32 %v15051_v1, %v7458_v58  ;;  %v11491_v40 = vpop.eup %11490  ;;  %v7840_v6 = vmul.f32 %v7808_v48, %v15072_v49  ;;  %v7397_v37 = vadd.f32 -0.28449672, %v7365_v41  ;;  %v7841_v19 = vmul.f32 %v7809_v62, %v7009_v9 }
 0xb8c   : > { %v7396_v29 = vadd.f32 -0.28449672, %v7364_v35  ;;  %v7779_v1 = vsel %vm7715_vm3, %v7683_v36, %v7747_v11  ;;  %v7010_v57 = vmul.f32 0.5, %v14932_v16  ;;  %v7011_v27 = vmul.f32 0.5, %v14917_v8  ;;  %v16127_v36 = vld [vmem:[#allocation59_spill] sm:$0xff]  ;;  %v16129_v11 = vld [vmem:[#allocation40_spill] sm:$0xff] }
 0xb8d   : > { %v7650_v21 = vmul.f32 %v11491_v40, %v7490_v38  ;;  %v7429_v54 = vmul.f32 %v15076_v33, %v7397_v37  ;;  %10327 = vmatprep.mubr.msk.f32.mxu0 %vm7861_vm8, %v7840_v6  ;;  %v7811_v28 = vadd.f32 1.0, %v7779_v1  ;;  %vm7717_vm5 = vcmp.ge.f32.partialorder %v14994_v59, 0.0  ;;  %v15132_v59 = vld [vmem:[%s15708_s11] ss:$0 sm:$0xff]  ;;  %v16130_v1 = vld [vmem:[#allocation39_spill] sm:$0xff] }
 0xb8e   : > { %v7428_v25 = vmul.f32 %v15082_v20, %v7396_v29  ;;  %10328 = vmatmul.mubr.msk.f32.gmra.mrb[150].mxu0 %vm7861_vm8, %v7841_v19  ;;  %vm7716_vm6 = vcmp.ge.f32.partialorder %v15000_v43, 0.0  ;;  %v7012_v34 = vmul.f32 0.5, %v14980_v56  ;;  %v7013_v60 = vmul.f32 0.5, %v14967_v55  ;;  %v16125_v55 = vld [vmem:[#allocation38_spill] sm:$0xff] }
 0xb8f   : > { %v7682_v2 = vsub.f32 1.0, %v7650_v21  ;;  %v7461_v30 = vadd.f32 0.2548296, %v7429_v54  ;;  %v7843_v61 = vmul.f32 %v7811_v28, %v7011_v27  ;;  %v16128_v40 = vld [vmem:[#allocation66_spill] sm:$0xff] }
 0xb90   : > { %v7460_v47 = vadd.f32 0.2548296, %v7428_v25 }
 0xb91   : > { %v7746_v49 = vsub.f32 0.0, %v7682_v2  ;;  %v11493_v42 = vpop.eup %11492  ;;  %v7493_v7 = vmul.f32 %v15076_v33, %v7461_v30 }
 0xb92   : > { %v7492_v12 = vmul.f32 %v15082_v20, %v7460_v47  ;;  %v11495_v51 = vpop.eup %11494  ;;  %v16131_v47 = vld [vmem:[#allocation65_spill] sm:$0xff] }
 0xb93   : > { %v7778_v18 = vsel %vm7714_vm4, %v7682_v2, %v7746_v49  ;;  %v7653_v24 = vmul.f32 %v11493_v42, %v7493_v7 }
 0xb94   : > { %v7810_v32 = vadd.f32 1.0, %v7778_v18  ;;  %v7652_v23 = vmul.f32 %v11495_v51, %v7492_v12 }
 0xb95   : > { %v7685_v13 = vsub.f32 1.0, %v7653_v24  ;;  %v16133_v24 = vld [vmem:[#allocation42_spill] sm:$0xff] }
 0xb96   : > { %v7842_v45 = vmul.f32 %v7810_v32, %v7010_v57  ;;  %v7684_v44 = vsub.f32 1.0, %v7652_v23  ;;  %v16132_v57 = vld [vmem:[#allocation41_spill] sm:$0xff] }
 0xb97   : > { %v7749_v0 = vsub.f32 0.0, %v7685_v13 }
 0xb98   : > { %v7748_v52 = vsub.f32 0.0, %v7684_v44  ;;  %10330 = vmatprep.mubr.msk.f32.mxu0 %vm7861_vm8, %v7842_v45 }
 0xb99   : > { %10331 = vmatmul.mubr.msk.f32.gmra.mrb[152].mxu0 %vm7861_vm8, %v7843_v61  ;;  %v7781_v16 = vsel %vm7717_vm5, %v7685_v13, %v7749_v0 }
 0xb9a   : > { %v7780_v33 = vsel %vm7716_vm6, %v7684_v44, %v7748_v52  ;;  %v7813_v20 = vadd.f32 1.0, %v7781_v16  ;;  %v16134_v52 = vld [vmem:[#allocation72_spill] sm:$0xff] }
 0xb9b   : > { %v7812_v8 = vadd.f32 1.0, %v7780_v33  ;;  %v16135_v33 = vld [vmem:[#allocation83_spill] sm:$0xff] }
 0xb9c   : > { %v7845_v46 = vmul.f32 %v7813_v20, %v7013_v60 }
 0xb9d   : > { %v7844_v3 = vmul.f32 %v7812_v8, %v7012_v34 }
 0xb9f   : > { %10333 = vmatprep.mubr.msk.f32.mxu0 %vm7861_vm8, %v7844_v3 }
 0xba0   : > { %10334 = vmatmul.mubr.msk.f32.gmra.mrb[154].mxu0 %vm7861_vm8, %v7845_v46 }
 0xc2c   : > { %v10290_v43 = vpop.f32.mrb[124].mxu0 }
 0xc2d   : > { %v8030_v31 = vadd.f32 %v10290_v43, %v15132_v59  ;;  %v8024_v4 = vpop.f32.mrb[125].mxu0 }
 0xc2e   : > { %v8025_v56 = vadd.f32 %v15132_v59, %v8024_v4 }
 0xc2f   : > { %v15137_v53 = vadd.f32 %v8030_v31, %v16124_v15  ;;  %v16136_v31 = vld [vmem:[#allocation70_spill] sm:$0xff] }
 0xc30   : > { %v15140_v63 = vadd.f32 %v8025_v56, %v16125_v55  ;;  %v10293_v22 = vpop.f32.mrb[126].mxu0  ;;  %v16137_v56 = vld [vmem:[#allocation69_spill] sm:$0xff] }
 0xc31   : > { %v8040_v39 = vadd.f32 %v10293_v22, %v15132_v59  ;;  %v8034_v17 = vpop.f32.mrb[127].mxu0  ;;  %v8220_v50 = vsel %vm766_vm0, %v15137_v53, 0.0 }
 0xc32   : > { %v8035_v14 = vadd.f32 %v15132_v59, %v8034_v17  ;;  %8221 = vadd.xlane.f32.xlu0 %v8220_v50  ;;  %v8217_v26 = vsel %vm766_vm0, %v15140_v63, 0.0 }
 0xc33   : > { %v15149_v5 = vadd.f32 %v8040_v39, %v16126_v10  ;;  %8218 = vadd.xlane.f32.xlu1 %v8217_v26  ;;  %v16138_v26 = vld [vmem:[#allocation67_spill] sm:$0xff] }
 0xc34   : > { %v15152_v58 = vadd.f32 %v8035_v14, %v16127_v36  ;;  %v10296_v62 = vpop.f32.mrb[128].mxu0  ;;  %v16139_v36 = vld [vmem:[#allocation73_spill] sm:$0xff] }
 0xc35   : > { %v8050_v48 = vadd.f32 %v10296_v62, %v15132_v59  ;;  %v8044_v41 = vpop.f32.mrb[129].mxu0  ;;  %v8226_v35 = vsel %vm766_vm0, %v15149_v5, 0.0 }
 0xc36   : > { %v8045_v9 = vadd.f32 %v15132_v59, %v8044_v41  ;;  %8227 = vadd.xlane.f32.xlu0 %v8226_v35  ;;  %v8223_v38 = vsel %vm766_vm0, %v15152_v58, 0.0 }
 0xc37   : > { %v15161_v6 = vadd.f32 %v8050_v48, %v16128_v40  ;;  %8224 = vadd.xlane.f32.xlu1 %v8223_v38 }
 0xc38   : > { %v15164_v37 = vadd.f32 %v8045_v9, %v16129_v11  ;;  %v10299_v29 = vpop.f32.mrb[130].mxu0  ;;  %v16140_v11 = vld [vmem:[#allocation71_spill] sm:$0xff] }
 0xc39   : > { %v8060_v21 = vadd.f32 %v10299_v29, %v15132_v59  ;;  %v8054_v19 = vpop.f32.mrb[131].mxu0  ;;  %v8232_v54 = vsel %vm766_vm0, %v15161_v6, 0.0 }
 0xc3a   : > { %v8055_v25 = vadd.f32 %v15132_v59, %v8054_v19  ;;  %8233 = vadd.xlane.f32.xlu0 %v8232_v54  ;;  %v8229_v2 = vsel %vm766_vm0, %v15164_v37, 0.0 }
 0xc3b   : > { %v15173_v30 = vadd.f32 %v8060_v21, %v16130_v1  ;;  %8230 = vadd.xlane.f32.xlu1 %v8229_v2  ;;  %v16141_v21 = vld [vmem:[#allocation74_spill] sm:$0xff] }
 0xc3c   : > { %v15176_v49 = vadd.f32 %v8055_v25, %v16131_v47  ;;  %v10302_v42 = vpop.f32.mrb[132].mxu0 }
 0xc3d   : > { %v8070_v7 = vadd.f32 %v10302_v42, %v15132_v59  ;;  %v8064_v12 = vpop.f32.mrb[133].mxu0  ;;  %v8238_v51 = vsel %vm766_vm0, %v15173_v30, 0.0 }
 0xc3e   : > { %v8065_v28 = vadd.f32 %v15132_v59, %v8064_v12  ;;  %8239 = vadd.xlane.f32.xlu0 %v8238_v51  ;;  %v8235_v18 = vsel %vm766_vm0, %v15176_v49, 0.0  ;;  %v16143_v51 = vld [vmem:[#allocation84_spill] sm:$0xff] }
 0xc3f   : > { %v15185_v32 = vadd.f32 %v8070_v7, %v16132_v57  ;;  %8236 = vadd.xlane.f32.xlu1 %v8235_v18  ;;  %v16142_v7 = vld [vmem:[#allocation76_spill] sm:$0xff] }
 0xc40   : > { %v15188_v23 = vadd.f32 %v8065_v28, %v16133_v24  ;;  %v10305_v27 = vpop.f32.mrb[134].mxu0 }
 0xc41   : > { %v8080_v45 = vadd.f32 %v10305_v27, %v15132_v59  ;;  %v8074_v13 = vpop.f32.mrb[135].mxu0  ;;  %v8244_v44 = vsel %vm766_vm0, %v15185_v32, 0.0 }
 0xc42   : > { %v8075_v61 = vadd.f32 %v15132_v59, %v8074_v13  ;;  %8245 = vadd.xlane.f32.xlu0 %v8244_v44  ;;  %v8241_v0 = vsel %vm766_vm0, %v15188_v23, 0.0  ;;  %v16144_v44 = vld [vmem:[#allocation78_spill] sm:$0xff] }
 0xc43   : > { %v15197_v16 = vadd.f32 %v8080_v45, %v16134_v52  ;;  %8242 = vadd.xlane.f32.xlu1 %v8241_v0  ;;  %v16145_v0 = vld [vmem:[#allocation81_spill] sm:$0xff] }
 0xc44   : > { %v15200_v20 = vadd.f32 %v8075_v61, %v16135_v33  ;;  %v10308_v34 = vpop.f32.mrb[136].mxu0 }
 0xc45   : > { %v8090_v8 = vadd.f32 %v10308_v34, %v15132_v59  ;;  %v8084_v60 = vpop.f32.mrb[137].mxu0  ;;  %v8250_v3 = vsel %vm766_vm0, %v15197_v16, 0.0 }
 0xc46   : > { %v8085_v46 = vadd.f32 %v15132_v59, %v8084_v60  ;;  %8251 = vadd.xlane.f32.xlu0 %v8250_v3  ;;  %v8247_v43 = vsel %vm766_vm0, %v15200_v20, 0.0 }
 0xc47   : > { %v15209_v4 = vadd.f32 %v8090_v8, %v16136_v31  ;;  %8248 = vadd.xlane.f32.xlu1 %v8247_v43  ;;  %v16146_v43 = vld [vmem:[#allocation75_spill] sm:$0xff] }
 0xc48   : > { %v15212_v15 = vadd.f32 %v8085_v46, %v16137_v56  ;;  %v10311_v55 = vpop.f32.mrb[138].mxu0  ;;  %v16147_v56 = vld [vmem:[#allocation79_spill] sm:$0xff] }
 0xc49   : > { %v8100_v22 = vadd.f32 %v10311_v55, %v15132_v59  ;;  %v8094_v39 = vpop.f32.mrb[139].mxu0  ;;  %v8256_v17 = vsel %vm766_vm0, %v15209_v4, 0.0 }
 0xc4a   : > { %v8095_v50 = vadd.f32 %v15132_v59, %v8094_v39  ;;  %8257 = vadd.xlane.f32.xlu0 %v8256_v17  ;;  %v8253_v14 = vsel %vm766_vm0, %v15212_v15, 0.0 }
 0xc4b   : > { %v15221_v10 = vadd.f32 %v8100_v22, %v16138_v26  ;;  %8254 = vadd.xlane.f32.xlu1 %v8253_v14 }
 0xc4c   : > { %v15224_v62 = vadd.f32 %v8095_v50, %v16139_v36  ;;  %v10314_v48 = vpop.f32.mrb[140].mxu0  ;;  %v16148_v36 = vld [vmem:[#allocation77_spill] sm:$0xff] }
 0xc4d   : > { %v8110_v41 = vadd.f32 %v10314_v48, %v15132_v59  ;;  %v8104_v35 = vpop.f32.mrb[141].mxu0  ;;  %v8262_v9 = vsel %vm766_vm0, %v15221_v10, 0.0 }
 0xc4e   : > { %v8105_v38 = vadd.f32 %v15132_v59, %v8104_v35  ;;  %8263 = vadd.xlane.f32.xlu0 %v8262_v9  ;;  %v8259_v40 = vsel %vm766_vm0, %v15224_v62, 0.0 }
 0xc4f   : > { %v15233_v29 = vadd.f32 %v8110_v41, %v16140_v11  ;;  %8260 = vadd.xlane.f32.xlu1 %v8259_v40  ;;  %v16149_v41 = vld [vmem:[#allocation80_spill] sm:$0xff] }
 0xc50   : > { %v15236_v19 = vadd.f32 %v8105_v38, %v16141_v21  ;;  %v10317_v54 = vpop.f32.mrb[142].mxu0 }
 0xc51   : > { %v8120_v25 = vadd.f32 %v10317_v54, %v15132_v59  ;;  %v8114_v2 = vpop.f32.mrb[143].mxu0  ;;  %v8268_v1 = vsel %vm766_vm0, %v15233_v29, 0.0 }
 0xc52   : > { %v8115_v47 = vadd.f32 %v15132_v59, %v8114_v2  ;;  %8269 = vadd.xlane.f32.xlu0 %v8268_v1  ;;  %v8265_v42 = vsel %vm766_vm0, %v15236_v19, 0.0  ;;  %v16151_v1 = vld [vmem:[#allocation82_spill] sm:$0xff] }
 0xc53   : > { %v15245_v12 = vadd.f32 %v8120_v25, %v16142_v7  ;;  %8266 = vadd.xlane.f32.xlu1 %v8265_v42  ;;  %v16150_v25 = vld [vmem:[#allocation43_spill] sm:$0xff] }
 0xc54   : > { %v15248_v28 = vadd.f32 %v8115_v47, %v16143_v51  ;;  %v10320_v18 = vpop.f32.mrb[144].mxu0 }
 0xc55   : > { %v8130_v57 = vadd.f32 %v10320_v18, %v15132_v59  ;;  %v8124_v24 = vpop.f32.mrb[145].mxu0  ;;  %v8274_v27 = vsel %vm766_vm0, %v15245_v12, 0.0 }
 0xc56   : > { %v8125_v45 = vadd.f32 %v15132_v59, %v8124_v24  ;;  %8275 = vadd.xlane.f32.xlu0 %v8274_v27  ;;  %v8271_v13 = vsel %vm766_vm0, %v15248_v28, 0.0  ;;  %v16152_v27 = vld [vmem:[#allocation55_spill] sm:$0xff] }
 0xc57   : > { %v15257_v61 = vadd.f32 %v8130_v57, %v16144_v44  ;;  %8272 = vadd.xlane.f32.xlu1 %v8271_v13  ;;  %v16153_v13 = vld [vmem:[#allocation52_spill] sm:$0xff] }
 0xc58   : > { %v15260_v52 = vadd.f32 %v8125_v45, %v16145_v0 }
 0xc59   : > { %v10323_v33 = vpop.f32.mrb[146].mxu0  ;;  %v8280_v60 = vsel %vm766_vm0, %v15257_v61, 0.0 }
 0xc5a   : > { %v8140_v34 = vadd.f32 %v10323_v33, %v15132_v59  ;;  %v8134_v8 = vpop.f32.mrb[147].mxu0  ;;  %8281 = vadd.xlane.f32.xlu0 %v8280_v60  ;;  %v8277_v46 = vsel %vm766_vm0, %v15260_v52, 0.0 }
 0xc5b   : > { %v8135_v3 = vadd.f32 %v15132_v59, %v8134_v8  ;;  %8278 = vadd.xlane.f32.xlu1 %v8277_v46  ;;  %v16154_v46 = vld [vmem:[#allocation48_spill] sm:$0xff] }
 0xc5c   : > { %v15269_v31 = vadd.f32 %v8140_v34, %v16146_v43 }
 0xc5d   : > { %v15272_v55 = vadd.f32 %v8135_v3, %v16147_v56  ;;  %v10326_v22 = vpop.f32.mrb[148].mxu0  ;;  %v16155_v56 = vld [vmem:[#allocation45_spill] sm:$0xff] }
 0xc5e   : > { %v8150_v39 = vadd.f32 %v10326_v22, %v15132_v59  ;;  %v8144_v17 = vpop.f32.mrb[149].mxu0  ;;  %v8286_v50 = vsel %vm766_vm0, %v15269_v31, 0.0 }
 0xc5f   : > { %v8145_v14 = vadd.f32 %v15132_v59, %v8144_v17  ;;  %8287 = vadd.xlane.f32.xlu0 %v8286_v50  ;;  %v8283_v26 = vsel %vm766_vm0, %v15272_v55, 0.0 }
 0xc60   : > { %v15281_v48 = vadd.f32 %v8150_v39, %v16148_v36  ;;  %8284 = vadd.xlane.f32.xlu1 %v8283_v26 }
 0xc61   : > { %v15284_v35 = vadd.f32 %v8145_v14, %v16149_v41  ;;  %v10329_v9 = vpop.f32.mrb[150].mxu0 }
 0xc62   : > { %v8160_v38 = vadd.f32 %v10329_v9, %v15132_v59  ;;  %v8154_v40 = vpop.f32.mrb[151].mxu0  ;;  %v8292_v11 = vsel %vm766_vm0, %v15281_v48, 0.0 }
 0xc63   : > { %v8155_v21 = vadd.f32 %v15132_v59, %v8154_v40  ;;  %8293 = vadd.xlane.f32.xlu0 %v8292_v11  ;;  %v8289_v54 = vsel %vm766_vm0, %v15284_v35, 0.0 }
 0xc64   : > { %v15293_v2 = vadd.f32 %v8160_v38, %v16150_v25  ;;  %8290 = vadd.xlane.f32.xlu1 %v8289_v54 }
 0xc65   : > { %v15296_v47 = vadd.f32 %v8155_v21, %v16151_v1 }
 0xc66   : > { %v8298_v42 = vsel %vm766_vm0, %v15293_v2, 0.0 }
 0xc67   : > { %8299 = vadd.xlane.f32.xlu0 %v8298_v42  ;;  %v8295_v7 = vsel %vm766_vm0, %v15296_v47, 0.0 }
 0xc68   : > { %8296 = vadd.xlane.f32.xlu1 %v8295_v7 }
 0xc6c   : > { %v10332_v51 = vpop.f32.mrb[152].mxu0 }
 0xc6d   : > { %v8170_v18 = vadd.f32 %v10332_v51, %v15132_v59  ;;  %v8164_v57 = vpop.f32.mrb[153].mxu0 }
 0xc6e   : > { %v8165_v24 = vadd.f32 %v15132_v59, %v8164_v57 }
 0xc6f   : > { %v15305_v45 = vadd.f32 %v8170_v18, %v16152_v27 }
 0xc70   : > { %v15308_v44 = vadd.f32 %v8165_v24, %v16153_v13 }
 0xc71   : > { %v8304_v0 = vsel %vm766_vm0, %v15305_v45, 0.0 }
 0xc72   : > { %8305 = vadd.xlane.f32.xlu0 %v8304_v0  ;;  %v8301_v33 = vsel %vm766_vm0, %v15308_v44, 0.0 }
 0xc73   : > { %v10335_v34 = vpop.f32.mrb[154].mxu0  ;;  %8302 = vadd.xlane.f32.xlu1 %v8301_v33 }
 0xc74   : > { %v8180_v8 = vadd.f32 %v10335_v34, %v15132_v59  ;;  %v8174_v60 = vpop.f32.mrb[155].mxu0 }
 0xc75   : > { %v8175_v3 = vadd.f32 %v15132_v59, %v8174_v60 }
 0xc76   : > { %v15317_v43 = vadd.f32 %v8180_v8, %v16154_v46 }
 0xc77   : > { %v15320_v22 = vadd.f32 %v8175_v3, %v16155_v56 }
 0xc78   : > { %v8310_v39 = vsel %vm766_vm0, %v15317_v43, 0.0 }
 0xc79   : > { %8311 = vadd.xlane.f32.xlu0 %v8310_v39  ;;  %v8307_v17 = vsel %vm766_vm0, %v15320_v22, 0.0 }
 0xc7a   : > { %8308 = vadd.xlane.f32.xlu1 %v8307_v17 }
 0xcbf   : > { %v8222_v50 = vpop.xlane.xlu0 %8221 }
 0xcc0   : > { %v8314_v14 = vmul.f32 0.0625, %v8222_v50  ;;  %v8219_v26 = vpop.xlane.xlu1 %8218 }
 0xcc1   : > { %v8313_v36 = vmul.f32 0.0625, %v8219_v26 }
 0xcc2   : > { %v15327_v59 = vsub.f32 %v15137_v53, %v8314_v14 }
 0xcc3   : > { %v15330_v41 = vsub.f32 %v15140_v63, %v8313_v36  ;;  %v8228_v9 = vpop.xlane.xlu0 %8227 }
 0xcc4   : > { %v8316_v38 = vmul.f32 0.0625, %v8228_v9  ;;  %v8225_v40 = vpop.xlane.xlu1 %8224  ;;  %v8378_v11 = vmul.f32 %v15327_v59, %v15327_v59 }
 0xcc5   : > { %v8315_v21 = vmul.f32 0.0625, %v8225_v40  ;;  %v8377_v54 = vmul.f32 %v15330_v41, %v15330_v41 }
 0xcc6   : > { %v15337_v25 = vsub.f32 %v15149_v5, %v8316_v38  ;;  %v8412_v1 = vsel %vm766_vm0, %v8378_v11, 0.0 }
 0xcc7   : > { %v15341_v53 = vsub.f32 %v15152_v58, %v8315_v21  ;;  %v8234_v63 = vpop.xlane.xlu0 %8233  ;;  %8413 = vadd.xlane.f32.xlu0 %v8412_v1  ;;  %v8409_v42 = vsel %vm766_vm0, %v8377_v54, 0.0 }
 0xcc8   : > { %v8318_v7 = vmul.f32 0.0625, %v8234_v63  ;;  %v8231_v51 = vpop.xlane.xlu1 %8230  ;;  %8410 = vadd.xlane.f32.xlu1 %v8409_v42  ;;  %v8380_v18 = vmul.f32 %v15337_v25, %v15337_v25 }
 0xcc9   : > { %v8317_v57 = vmul.f32 0.0625, %v8231_v51  ;;  %v8379_v5 = vmul.f32 %v15341_v53, %v15341_v53 }
 0xcca   : > { %v15349_v24 = vsub.f32 %v15161_v6, %v8318_v7  ;;  %v8418_v58 = vsel %vm766_vm0, %v8380_v18, 0.0 }
 0xccb   : > { %v15353_v27 = vsub.f32 %v15164_v37, %v8317_v57  ;;  %v8240_v13 = vpop.xlane.xlu0 %8239  ;;  %8419 = vadd.xlane.f32.xlu0 %v8418_v58  ;;  %v8415_v0 = vsel %vm766_vm0, %v8379_v5, 0.0 }
 0xccc   : > { %v8320_v33 = vmul.f32 0.0625, %v8240_v13  ;;  %v8237_v34 = vpop.xlane.xlu1 %8236  ;;  %8416 = vadd.xlane.f32.xlu1 %v8415_v0  ;;  %v8382_v8 = vmul.f32 %v15349_v24, %v15349_v24 }
 0xccd   : > { %v8319_v60 = vmul.f32 0.0625, %v8237_v34  ;;  %v8381_v6 = vmul.f32 %v15353_v27, %v15353_v27 }
 0xcce   : > { %v15361_v3 = vsub.f32 %v15173_v30, %v8320_v33  ;;  %v8424_v37 = vsel %vm766_vm0, %v8382_v8, 0.0 }
 0xccf   : > { %v15365_v46 = vsub.f32 %v15176_v49, %v8319_v60  ;;  %v8246_v56 = vpop.xlane.xlu0 %8245  ;;  %8425 = vadd.xlane.f32.xlu0 %v8424_v37  ;;  %v8421_v39 = vsel %vm766_vm0, %v8381_v6, 0.0 }
 0xcd0   : > { %v8322_v17 = vmul.f32 0.0625, %v8246_v56  ;;  %v8243_v50 = vpop.xlane.xlu1 %8242  ;;  %8422 = vadd.xlane.f32.xlu1 %v8421_v39  ;;  %v8384_v14 = vmul.f32 %v15361_v3, %v15361_v3 }
 0xcd1   : > { %v8321_v26 = vmul.f32 0.0625, %v8243_v50  ;;  %v8383_v30 = vmul.f32 %v15365_v46, %v15365_v46 }
 0xcd2   : > { %v15373_v36 = vsub.f32 %v15185_v32, %v8322_v17  ;;  %v8430_v49 = vsel %vm766_vm0, %v8384_v14, 0.0 }
 0xcd3   : > { %v15377_v9 = vsub.f32 %v15188_v23, %v8321_v26  ;;  %v8252_v38 = vpop.xlane.xlu0 %8251  ;;  %8431 = vadd.xlane.f32.xlu0 %v8430_v49  ;;  %v8427_v40 = vsel %vm766_vm0, %v8383_v30, 0.0 }
 0xcd4   : > { %v8324_v11 = vmul.f32 0.0625, %v8252_v38  ;;  %v8249_v21 = vpop.xlane.xlu1 %8248  ;;  %8428 = vadd.xlane.f32.xlu1 %v8427_v40  ;;  %v8386_v54 = vmul.f32 %v15373_v36, %v15373_v36 }
 0xcd5   : > { %v8323_v1 = vmul.f32 0.0625, %v8249_v21  ;;  %v8385_v32 = vmul.f32 %v15377_v9, %v15377_v9 }
 0xcd6   : > { %v15385_v63 = vsub.f32 %v15197_v16, %v8324_v11  ;;  %v8436_v23 = vsel %vm766_vm0, %v8386_v54, 0.0 }
 0xcd7   : > { %v15389_v42 = vsub.f32 %v15200_v20, %v8323_v1  ;;  %v8258_v7 = vpop.xlane.xlu0 %8257  ;;  %8437 = vadd.xlane.f32.xlu0 %v8436_v23  ;;  %v8433_v51 = vsel %vm766_vm0, %v8385_v32, 0.0 }
 0xcd8   : > { %v8326_v18 = vmul.f32 0.0625, %v8258_v7  ;;  %v8255_v57 = vpop.xlane.xlu1 %8254  ;;  %8434 = vadd.xlane.f32.xlu1 %v8433_v51  ;;  %v8388_v5 = vmul.f32 %v15385_v63, %v15385_v63 }
 0xcd9   : > { %v8325_v58 = vmul.f32 0.0625, %v8255_v57  ;;  %v8387_v16 = vmul.f32 %v15389_v42, %v15389_v42 }
 0xcda   : > { %v15397_v13 = vsub.f32 %v15209_v4, %v8326_v18  ;;  %v8442_v20 = vsel %vm766_vm0, %v8388_v5, 0.0 }
 0xcdb   : > { %v15401_v0 = vsub.f32 %v15212_v15, %v8325_v58  ;;  %v8264_v33 = vpop.xlane.xlu0 %8263  ;;  %8443 = vadd.xlane.f32.xlu0 %v8442_v20  ;;  %v8439_v34 = vsel %vm766_vm0, %v8387_v16, 0.0 }
 0xcdc   : > { %v8328_v8 = vmul.f32 0.0625, %v8264_v33  ;;  %v8261_v60 = vpop.xlane.xlu1 %8260  ;;  %8440 = vadd.xlane.f32.xlu1 %v8439_v34  ;;  %v8390_v6 = vmul.f32 %v15397_v13, %v15397_v13 }
 0xcdd   : > { %v8327_v37 = vmul.f32 0.0625, %v8261_v60  ;;  %v8389_v4 = vmul.f32 %v15401_v0, %v15401_v0 }
 0xcde   : > { %v15409_v56 = vsub.f32 %v15221_v10, %v8328_v8  ;;  %v8448_v15 = vsel %vm766_vm0, %v8390_v6, 0.0 }
 0xcdf   : > { %v15413_v39 = vsub.f32 %v15224_v62, %v8327_v37  ;;  %v8270_v17 = vpop.xlane.xlu0 %8269  ;;  %8449 = vadd.xlane.f32.xlu0 %v8448_v15  ;;  %v8445_v50 = vsel %vm766_vm0, %v8389_v4, 0.0 }
 0xce0   : > { %v8330_v14 = vmul.f32 0.0625, %v8270_v17  ;;  %v8267_v26 = vpop.xlane.xlu1 %8266  ;;  %8446 = vadd.xlane.f32.xlu1 %v8445_v50  ;;  %v8392_v30 = vmul.f32 %v15409_v56, %v15409_v56 }
 0xce1   : > { %v8329_v49 = vmul.f32 0.0625, %v8267_v26  ;;  %v8391_v10 = vmul.f32 %v15413_v39, %v15413_v39 }
 0xce2   : > { %v15421_v38 = vsub.f32 %v15233_v29, %v8330_v14  ;;  %v8454_v62 = vsel %vm766_vm0, %v8392_v30, 0.0 }
 0xce3   : > { %v15425_v40 = vsub.f32 %v15236_v19, %v8329_v49  ;;  %v8276_v11 = vpop.xlane.xlu0 %8275  ;;  %8455 = vadd.xlane.f32.xlu0 %v8454_v62  ;;  %v8451_v21 = vsel %vm766_vm0, %v8391_v10, 0.0 }
 0xce4   : > { %v8332_v54 = vmul.f32 0.0625, %v8276_v11  ;;  %v8273_v1 = vpop.xlane.xlu1 %8272  ;;  %8452 = vadd.xlane.f32.xlu1 %v8451_v21  ;;  %v8394_v32 = vmul.f32 %v15421_v38, %v15421_v38 }
 0xce5   : > { %v8331_v23 = vmul.f32 0.0625, %v8273_v1  ;;  %v8393_v29 = vmul.f32 %v15425_v40, %v15425_v40 }
 0xce6   : > { %v15433_v7 = vsub.f32 %v15245_v12, %v8332_v54  ;;  %v8460_v19 = vsel %vm766_vm0, %v8394_v32, 0.0 }
 0xce7   : > { %v15437_v51 = vsub.f32 %v15248_v28, %v8331_v23  ;;  %v8282_v18 = vpop.xlane.xlu0 %8281  ;;  %8461 = vadd.xlane.f32.xlu0 %v8460_v19  ;;  %v8457_v57 = vsel %vm766_vm0, %v8393_v29, 0.0 }
 0xce8   : > { %v8334_v5 = vmul.f32 0.0625, %v8282_v18  ;;  %v8279_v58 = vpop.xlane.xlu1 %8278  ;;  %8458 = vadd.xlane.f32.xlu1 %v8457_v57  ;;  %v8396_v16 = vmul.f32 %v15433_v7, %v15433_v7 }
 0xce9   : > { %v8333_v20 = vmul.f32 0.0625, %v8279_v58  ;;  %v8395_v12 = vmul.f32 %v15437_v51, %v15437_v51 }
 0xcea   : > { %v15445_v33 = vsub.f32 %v15257_v61, %v8334_v5  ;;  %v8466_v28 = vsel %vm766_vm0, %v8396_v16, 0.0 }
 0xceb   : > { %v15449_v34 = vsub.f32 %v15260_v52, %v8333_v20  ;;  %8467 = vadd.xlane.f32.xlu0 %v8466_v28  ;;  %v8463_v60 = vsel %vm766_vm0, %v8395_v12, 0.0 }
 0xcec   : > { %v8288_v8 = vpop.xlane.xlu0 %8287  ;;  %8464 = vadd.xlane.f32.xlu1 %v8463_v60  ;;  %v8398_v4 = vmul.f32 %v15445_v33, %v15445_v33 }
 0xced   : > { %v8336_v6 = vmul.f32 0.0625, %v8288_v8  ;;  %v8285_v37 = vpop.xlane.xlu1 %8284  ;;  %v8397_v61 = vmul.f32 %v15449_v34, %v15449_v34 }
 0xcee   : > { %v8335_v15 = vmul.f32 0.0625, %v8285_v37  ;;  %v8472_v52 = vsel %vm766_vm0, %v8398_v4, 0.0 }
 0xcef   : > { %v15457_v17 = vsub.f32 %v15269_v31, %v8336_v6  ;;  %8473 = vadd.xlane.f32.xlu0 %v8472_v52  ;;  %v8469_v26 = vsel %vm766_vm0, %v8397_v61, 0.0 }
 0xcf0   : > { %v15461_v50 = vsub.f32 %v15272_v55, %v8335_v15  ;;  %v8294_v14 = vpop.xlane.xlu0 %8293  ;;  %8470 = vadd.xlane.f32.xlu1 %v8469_v26 }
 0xcf1   : > { %v8338_v30 = vmul.f32 0.0625, %v8294_v14  ;;  %v8291_v49 = vpop.xlane.xlu1 %8290  ;;  %v8400_v10 = vmul.f32 %v15457_v17, %v15457_v17 }
 0xcf2   : > { %v8337_v62 = vmul.f32 0.0625, %v8291_v49  ;;  %v8399_v31 = vmul.f32 %v15461_v50, %v15461_v50 }
 0xcf3   : > { %v15469_v11 = vsub.f32 %v15281_v48, %v8338_v30  ;;  %v8478_v55 = vsel %vm766_vm0, %v8400_v10, 0.0 }
 0xcf4   : > { %v15473_v21 = vsub.f32 %v15284_v35, %v8337_v62  ;;  %v8300_v54 = vpop.xlane.xlu0 %8299  ;;  %8479 = vadd.xlane.f32.xlu0 %v8478_v55  ;;  %v8475_v1 = vsel %vm766_vm0, %v8399_v31, 0.0 }
 0xcf5   : > { %v8340_v32 = vmul.f32 0.0625, %v8300_v54  ;;  %v8297_v23 = vpop.xlane.xlu1 %8296  ;;  %8476 = vadd.xlane.f32.xlu1 %v8475_v1  ;;  %v8402_v29 = vmul.f32 %v15469_v11, %v15469_v11 }
 0xcf6   : > { %v8339_v19 = vmul.f32 0.0625, %v8297_v23  ;;  %v8401_v48 = vmul.f32 %v15473_v21, %v15473_v21 }
 0xcf7   : > { %v15481_v18 = vsub.f32 %v15293_v2, %v8340_v32  ;;  %v8484_v35 = vsel %vm766_vm0, %v8402_v29, 0.0 }
 0xcf8   : > { %v15485_v57 = vsub.f32 %v15296_v47, %v8339_v19  ;;  %8485 = vadd.xlane.f32.xlu0 %v8484_v35  ;;  %v8481_v5 = vsel %vm766_vm0, %v8401_v48, 0.0 }
 0xcf9   : > { %8482 = vadd.xlane.f32.xlu1 %v8481_v5  ;;  %v8404_v58 = vmul.f32 %v15481_v18, %v15481_v18 }
 0xcfa   : > { %v8403_v16 = vmul.f32 %v15485_v57, %v15485_v57 }
 0xcfb   : > { %v8490_v20 = vsel %vm766_vm0, %v8404_v58, 0.0 }
 0xcfc   : > { %8491 = vadd.xlane.f32.xlu0 %v8490_v20  ;;  %v8487_v2 = vsel %vm766_vm0, %v8403_v16, 0.0 }
 0xcfd   : > { %8488 = vadd.xlane.f32.xlu1 %v8487_v2 }
 0xcff   : > { %v8306_v12 = vpop.xlane.xlu0 %8305 }
 0xd00   : > { %v8342_v28 = vmul.f32 0.0625, %v8306_v12  ;;  %v8303_v47 = vpop.xlane.xlu1 %8302 }
 0xd01   : > { %v8341_v8 = vmul.f32 0.0625, %v8303_v47 }
 0xd02   : > { %v15495_v60 = vsub.f32 %v15305_v45, %v8342_v28 }
 0xd03   : > { %v15498_v6 = vsub.f32 %v15308_v44, %v8341_v8 }
 0xd04   : > { %v8406_v37 = vmul.f32 %v15495_v60, %v15495_v60 }
 0xd05   : > { %v8405_v4 = vmul.f32 %v15498_v6, %v15498_v6 }
 0xd06   : > { %v8312_v15 = vpop.xlane.xlu0 %8311  ;;  %v8496_v61 = vsel %vm766_vm0, %v8406_v37, 0.0 }
 0xd07   : > { %v8344_v52 = vmul.f32 0.0625, %v8312_v15  ;;  %v8309_v14 = vpop.xlane.xlu1 %8308  ;;  %8497 = vadd.xlane.f32.xlu0 %v8496_v61  ;;  %v8493_v26 = vsel %vm766_vm0, %v8405_v4, 0.0  ;;  %v15521_v61 = vld [vmem:[%s15709_s12] ss:$0 sm:$0xff] }
 0xd08   : > { %v8343_v30 = vmul.f32 0.0625, %v8309_v14  ;;  %8494 = vadd.xlane.f32.xlu1 %v8493_v26 }
 0xd09   : > { %v15507_v45 = vsub.f32 %v15317_v43, %v8344_v52 }
 0xd0a   : > { %v15510_v44 = vsub.f32 %v15320_v22, %v8343_v30 }
 0xd0b   : > { %v8408_v49 = vmul.f32 %v15507_v45, %v15507_v45 }
 0xd0c   : > { %v8407_v10 = vmul.f32 %v15510_v44, %v15510_v44 }
 0xd0d   : > { %v8502_v62 = vsel %vm766_vm0, %v8408_v49, 0.0 }
 0xd0e   : > { %8503 = vadd.xlane.f32.xlu0 %v8502_v62  ;;  %v8499_v31 = vsel %vm766_vm0, %v8407_v10, 0.0  ;;  %v15527_v10 = vld [vmem:[%s15710_s13] ss:$0 sm:$0xff] }
 0xd0f   : > { %8500 = vadd.xlane.f32.xlu1 %v8499_v31 }
 0xd54   : > { %v8414_v55 = vpop.xlane.xlu0 %8413 }
 0xd55   : > { %v8506_v54 = vmul.f32 0.0625, %v8414_v55  ;;  %v8411_v1 = vpop.xlane.xlu1 %8410 }
 0xd56   : > { %v8505_v43 = vmul.f32 0.0625, %v8411_v1 }
 0xd57   : > { %v8538_v32 = vadd.f32 1e-05, %v8506_v54 }
 0xd58   : > { %v8537_v23 = vadd.f32 1e-05, %v8505_v43  ;;  %v8420_v22 = vpop.xlane.xlu0 %8419 }
 0xd59   : > { %11496 = vrsqrt.f32 %v8538_v32  ;;  %v8508_v29 = vmul.f32 0.0625, %v8420_v22  ;;  %v8417_v19 = vpop.xlane.xlu1 %8416 }
 0xd5a   : > { %11498 = vrsqrt.f32 %v8537_v23  ;;  %v8507_v48 = vmul.f32 0.0625, %v8417_v19 }
 0xd5b   : > { %v8540_v35 = vadd.f32 1e-05, %v8508_v29 }
 0xd5c   : > { %v8539_v5 = vadd.f32 1e-05, %v8507_v48  ;;  %v8426_v58 = vpop.xlane.xlu0 %8425 }
 0xd5d   : > { %11500 = vrsqrt.f32 %v8540_v35  ;;  %v8510_v16 = vmul.f32 0.0625, %v8426_v58  ;;  %v8423_v20 = vpop.xlane.xlu1 %8422 }
 0xd5e   : > { %11502 = vrsqrt.f32 %v8539_v5  ;;  %v8509_v2 = vmul.f32 0.0625, %v8423_v20 }
 0xd5f   : > { %v8542_v12 = vadd.f32 1e-05, %v8510_v16 }
 0xd60   : > { %v8541_v28 = vadd.f32 1e-05, %v8509_v2  ;;  %v8432_v47 = vpop.xlane.xlu0 %8431 }
 0xd61   : > { %11504 = vrsqrt.f32 %v8542_v12  ;;  %v8512_v8 = vmul.f32 0.0625, %v8432_v47  ;;  %v8429_v37 = vpop.xlane.xlu1 %8428 }
 0xd62   : > { %11506 = vrsqrt.f32 %v8541_v28  ;;  %v8511_v4 = vmul.f32 0.0625, %v8429_v37 }
 0xd63   : > { %v11497_v15 = vpop.eup %11496  ;;  %v8544_v52 = vadd.f32 1e-05, %v8512_v8 }
 0xd64   : > { %v11499_v14 = vpop.eup %11498  ;;  %v8602_v26 = vmul.f32 %v11497_v15, %v15327_v59  ;;  %v8543_v30 = vadd.f32 1e-05, %v8511_v4  ;;  %v8438_v49 = vpop.xlane.xlu0 %8437 }
 0xd65   : > { %v8601_v62 = vmul.f32 %v11499_v14, %v15330_v41  ;;  %11508 = vrsqrt.f32 %v8544_v52  ;;  %v8514_v31 = vmul.f32 0.0625, %v8438_v49  ;;  %v8435_v55 = vpop.xlane.xlu1 %8434 }
 0xd66   : > { %v8640_v54 = vmul.f32 %v15521_v61, %v8602_v26  ;;  %11510 = vrsqrt.f32 %v8543_v30  ;;  %v8513_v1 = vmul.f32 0.0625, %v8435_v55 }
 0xd67   : > { %v11501_v43 = vpop.eup %11500  ;;  %v8639_v59 = vmul.f32 %v15521_v61, %v8601_v62  ;;  %v8546_v32 = vadd.f32 1e-05, %v8514_v31 }
 0xd68   : > { %v11503_v23 = vpop.eup %11502  ;;  %v8678_v41 = vadd.f32 %v15527_v10, %v8640_v54  ;;  %v8604_v22 = vmul.f32 %v11501_v43, %v15337_v25  ;;  %v8545_v29 = vadd.f32 1e-05, %v8513_v1  ;;  %v8444_v19 = vpop.xlane.xlu0 %8443 }
 0xd69   : > { %v8677_v48 = vadd.f32 %v15527_v10, %v8639_v59  ;;  %v8603_v35 = vmul.f32 %v11503_v23, %v15341_v53  ;;  %11512 = vrsqrt.f32 %v8546_v32  ;;  %v8516_v5 = vmul.f32 0.0625, %v8444_v19  ;;  %v8441_v58 = vpop.xlane.xlu1 %8440 }
 0xd6a   : > { %8710 = vst.msk [vmem:[%s15535_s20 + $0x8] sm:$0xff] %vm766_vm0, %v8678_v41  ;;  %v8642_v16 = vmul.f32 %v15521_v61, %v8604_v22  ;;  %11514 = vrsqrt.f32 %v8545_v29  ;;  %v8515_v20 = vmul.f32 0.0625, %v8441_v58 }
 0xd6b   : > { %v11505_v2 = vpop.eup %11504  ;;  %8709 = vst.msk [vmem:[%s15535_s20] sm:$0xff] %vm766_vm0, %v8677_v48  ;;  %v8641_v25 = vmul.f32 %v15521_v61, %v8603_v35  ;;  %v8548_v12 = vadd.f32 1e-05, %v8516_v5 }
 0xd6c   : > { %v11507_v28 = vpop.eup %11506  ;;  %v8680_v53 = vadd.f32 %v15527_v10, %v8642_v16  ;;  %v8606_v47 = vmul.f32 %v11505_v2, %v15349_v24  ;;  %v8547_v8 = vadd.f32 1e-05, %v8515_v20  ;;  %v8450_v37 = vpop.xlane.xlu0 %8449 }
 0xd6d   : > { %v8679_v4 = vadd.f32 %v15527_v10, %v8641_v25  ;;  %v8605_v15 = vmul.f32 %v11507_v28, %v15353_v27  ;;  %11516 = vrsqrt.f32 %v8548_v12  ;;  %v8518_v52 = vmul.f32 0.0625, %v8450_v37  ;;  %v8447_v14 = vpop.xlane.xlu1 %8446 }
 0xd6e   : > { %8712 = vst.msk [vmem:[%s15535_s20 + $0x18] sm:$0xff] %vm766_vm0, %v8680_v53  ;;  %v8644_v26 = vmul.f32 %v15521_v61, %v8606_v47  ;;  %11518 = vrsqrt.f32 %v8547_v8  ;;  %v8517_v30 = vmul.f32 0.0625, %v8447_v14 }
 0xd6f   : > { %v11509_v49 = vpop.eup %11508  ;;  %8711 = vst.msk [vmem:[%s15535_s20 + $0x10] sm:$0xff] %vm766_vm0, %v8679_v4  ;;  %v8643_v24 = vmul.f32 %v15521_v61, %v8605_v15  ;;  %v8550_v62 = vadd.f32 1e-05, %v8518_v52 }
 0xd70   : > { %v11511_v31 = vpop.eup %11510  ;;  %v8682_v27 = vadd.f32 %v15527_v10, %v8644_v26  ;;  %v8608_v55 = vmul.f32 %v11509_v49, %v15361_v3  ;;  %v8549_v54 = vadd.f32 1e-05, %v8517_v30  ;;  %v8456_v1 = vpop.xlane.xlu0 %8455 }
 0xd71   : > { %v8681_v43 = vadd.f32 %v15527_v10, %v8643_v24  ;;  %v8607_v59 = vmul.f32 %v11511_v31, %v15365_v46  ;;  %11520 = vrsqrt.f32 %v8550_v62  ;;  %v8520_v32 = vmul.f32 0.0625, %v8456_v1  ;;  %v8453_v23 = vpop.xlane.xlu1 %8452 }
 0xd72   : > { %8714 = vst.msk [vmem:[%s15535_s20 + $0x28] sm:$0xff] %vm766_vm0, %v8682_v27  ;;  %v8646_v41 = vmul.f32 %v15521_v61, %v8608_v55  ;;  %11522 = vrsqrt.f32 %v8549_v54  ;;  %v8519_v22 = vmul.f32 0.0625, %v8453_v23 }
 0xd73   : > { %v11513_v29 = vpop.eup %11512  ;;  %8713 = vst.msk [vmem:[%s15535_s20 + $0x20] sm:$0xff] %vm766_vm0, %v8681_v43  ;;  %v8645_v3 = vmul.f32 %v15521_v61, %v8607_v59  ;;  %v8552_v19 = vadd.f32 1e-05, %v8520_v32 }
 0xd74   : > { %v11515_v48 = vpop.eup %11514  ;;  %v8684_v46 = vadd.f32 %v15527_v10, %v8646_v41  ;;  %v8610_v35 = vmul.f32 %v11513_v29, %v15373_v36  ;;  %v8551_v5 = vadd.f32 1e-05, %v8519_v22  ;;  %v8462_v58 = vpop.xlane.xlu0 %8461 }
 0xd75   : > { %v8683_v16 = vadd.f32 %v15527_v10, %v8645_v3  ;;  %v8609_v20 = vmul.f32 %v11515_v48, %v15377_v9  ;;  %11524 = vrsqrt.f32 %v8552_v19  ;;  %v8522_v2 = vmul.f32 0.0625, %v8462_v58  ;;  %v8459_v25 = vpop.xlane.xlu1 %8458 }
 0xd76   : > { %8716 = vst.msk [vmem:[%s15535_s20 + $0x38] sm:$0xff] %vm766_vm0, %v8684_v46  ;;  %v8648_v12 = vmul.f32 %v15521_v61, %v8610_v35  ;;  %11526 = vrsqrt.f32 %v8551_v5  ;;  %v8521_v28 = vmul.f32 0.0625, %v8459_v25 }
 0xd77   : > { %v11517_v53 = vpop.eup %11516  ;;  %8715 = vst.msk [vmem:[%s15535_s20 + $0x30] sm:$0xff] %vm766_vm0, %v8683_v16  ;;  %v8647_v36 = vmul.f32 %v15521_v61, %v8609_v20  ;;  %v8554_v47 = vadd.f32 1e-05, %v8522_v2 }
 0xd78   : > { %v11519_v8 = vpop.eup %11518  ;;  %v8686_v9 = vadd.f32 %v15527_v10, %v8648_v12  ;;  %v8612_v37 = vmul.f32 %v11517_v53, %v15385_v63  ;;  %v8553_v4 = vadd.f32 1e-05, %v8521_v28  ;;  %v8468_v15 = vpop.xlane.xlu0 %8467 }
 0xd79   : > { %v8685_v52 = vadd.f32 %v15527_v10, %v8647_v36  ;;  %v8611_v14 = vmul.f32 %v11519_v8, %v15389_v42  ;;  %11528 = vrsqrt.f32 %v8554_v47  ;;  %v8524_v26 = vmul.f32 0.0625, %v8468_v15  ;;  %v8465_v30 = vpop.xlane.xlu1 %8464 }
 0xd7a   : > { %8718 = vst.msk [vmem:[%s15535_s20 + $0x48] sm:$0xff] %vm766_vm0, %v8686_v9  ;;  %v8650_v49 = vmul.f32 %v15521_v61, %v8612_v37  ;;  %11530 = vrsqrt.f32 %v8553_v4  ;;  %v8523_v24 = vmul.f32 0.0625, %v8465_v30 }
 0xd7b   : > { %v11521_v62 = vpop.eup %11520  ;;  %8717 = vst.msk [vmem:[%s15535_s20 + $0x40] sm:$0xff] %vm766_vm0, %v8685_v52  ;;  %v8649_v63 = vmul.f32 %v15521_v61, %v8611_v14  ;;  %v8556_v31 = vadd.f32 1e-05, %v8524_v26 }
 0xd7c   : > { %v11523_v27 = vpop.eup %11522  ;;  %v8688_v42 = vadd.f32 %v15527_v10, %v8650_v49  ;;  %v8614_v55 = vmul.f32 %v11521_v62, %v15397_v13  ;;  %v8555_v54 = vadd.f32 1e-05, %v8523_v24  ;;  %v8474_v1 = vpop.xlane.xlu0 %8473 }
 0xd7d   : > { %v8687_v43 = vadd.f32 %v15527_v10, %v8649_v63  ;;  %v8613_v59 = vmul.f32 %v11523_v27, %v15401_v0  ;;  %11532 = vrsqrt.f32 %v8556_v31  ;;  %v8526_v32 = vmul.f32 0.0625, %v8474_v1  ;;  %v8471_v23 = vpop.xlane.xlu1 %8470 }
 0xd7e   : > { %8720 = vst.msk [vmem:[%s15535_s20 + $0x58] sm:$0xff] %vm766_vm0, %v8688_v42  ;;  %v8652_v41 = vmul.f32 %v15521_v61, %v8614_v55  ;;  %11534 = vrsqrt.f32 %v8555_v54  ;;  %v8525_v22 = vmul.f32 0.0625, %v8471_v23 }
 0xd7f   : > { %v11525_v29 = vpop.eup %11524  ;;  %8719 = vst.msk [vmem:[%s15535_s20 + $0x50] sm:$0xff] %vm766_vm0, %v8687_v43  ;;  %v8651_v13 = vmul.f32 %v15521_v61, %v8613_v59  ;;  %v8558_v3 = vadd.f32 1e-05, %v8526_v32 }
 0xd80   : > { %v11527_v19 = vpop.eup %11526  ;;  %v8690_v0 = vadd.f32 %v15527_v10, %v8652_v41  ;;  %v8616_v48 = vmul.f32 %v11525_v29, %v15409_v56  ;;  %v8557_v46 = vadd.f32 1e-05, %v8525_v22 }
 0xd81   : > { %v8480_v35 = vpop.xlane.xlu0 %8479  ;;  %v8689_v5 = vadd.f32 %v15527_v10, %v8651_v13  ;;  %v8615_v58 = vmul.f32 %v11527_v19, %v15413_v39  ;;  %11536 = vrsqrt.f32 %v8558_v3 }
 0xd82   : > { %v8528_v16 = vmul.f32 0.0625, %v8480_v35  ;;  %v8477_v20 = vpop.xlane.xlu1 %8476  ;;  %8722 = vst.msk [vmem:[%s15535_s20 + $0x68] sm:$0xff] %vm766_vm0, %v8690_v0  ;;  %v8654_v2 = vmul.f32 %v15521_v61, %v8616_v48  ;;  %11538 = vrsqrt.f32 %v8557_v46 }
 0xd83   : > { %v8527_v25 = vmul.f32 0.0625, %v8477_v20  ;;  %v11529_v12 = vpop.eup %11528  ;;  %8721 = vst.msk [vmem:[%s15535_s20 + $0x60] sm:$0xff] %vm766_vm0, %v8689_v5  ;;  %v8653_v56 = vmul.f32 %v15521_v61, %v8615_v58 }
 0xd84   : > { %v8560_v28 = vadd.f32 1e-05, %v8528_v16  ;;  %v11531_v53 = vpop.eup %11530  ;;  %v8692_v39 = vadd.f32 %v15527_v10, %v8654_v2  ;;  %v8618_v36 = vmul.f32 %v11529_v12, %v15421_v38 }
 0xd85   : > { %v8559_v47 = vadd.f32 1e-05, %v8527_v25  ;;  %v8486_v8 = vpop.xlane.xlu0 %8485  ;;  %v8691_v9 = vadd.f32 %v15527_v10, %v8653_v56  ;;  %v8617_v37 = vmul.f32 %v11531_v53, %v15425_v40 }
 0xd86   : > { %11540 = vrsqrt.f32 %v8560_v28  ;;  %v8530_v4 = vmul.f32 0.0625, %v8486_v8  ;;  %v8483_v15 = vpop.xlane.xlu1 %8482  ;;  %8724 = vst.msk [vmem:[%s15535_s20 + $0x78] sm:$0xff] %vm766_vm0, %v8692_v39  ;;  %v8656_v52 = vmul.f32 %v15521_v61, %v8618_v36 }
 0xd87   : > { %11542 = vrsqrt.f32 %v8559_v47  ;;  %v8529_v14 = vmul.f32 0.0625, %v8483_v15  ;;  %v11533_v26 = vpop.eup %11532  ;;  %8723 = vst.msk [vmem:[%s15535_s20 + $0x70] sm:$0xff] %vm766_vm0, %v8691_v9  ;;  %v8655_v38 = vmul.f32 %v15521_v61, %v8617_v37 }
 0xd88   : > { %v8562_v30 = vadd.f32 1e-05, %v8530_v4  ;;  %v11535_v49 = vpop.eup %11534  ;;  %v8694_v40 = vadd.f32 %v15527_v10, %v8656_v52  ;;  %v8620_v24 = vmul.f32 %v11533_v26, %v15433_v7 }
 0xd89   : > { %v8561_v62 = vadd.f32 1e-05, %v8529_v14  ;;  %v8492_v63 = vpop.xlane.xlu0 %8491  ;;  %v8693_v31 = vadd.f32 %v15527_v10, %v8655_v38  ;;  %v8619_v27 = vmul.f32 %v11535_v49, %v15437_v51 }
 0xd8a   : > { %11544 = vrsqrt.f32 %v8562_v30  ;;  %v8532_v42 = vmul.f32 0.0625, %v8492_v63  ;;  %v8489_v55 = vpop.xlane.xlu1 %8488  ;;  %8726 = vst.msk [vmem:[%s15535_s20 + $0x88] sm:$0xff] %vm766_vm0, %v8694_v40  ;;  %v8658_v54 = vmul.f32 %v15521_v61, %v8620_v24 }
 0xd8b   : > { %11546 = vrsqrt.f32 %v8561_v62  ;;  %v8531_v1 = vmul.f32 0.0625, %v8489_v55  ;;  %v11537_v43 = vpop.eup %11536  ;;  %8725 = vst.msk [vmem:[%s15535_s20 + $0x80] sm:$0xff] %vm766_vm0, %v8693_v31  ;;  %v8657_v7 = vmul.f32 %v15521_v61, %v8619_v27 }
 0xd8c   : > { %v8564_v59 = vadd.f32 1e-05, %v8532_v42  ;;  %v11539_v32 = vpop.eup %11538  ;;  %v8696_v51 = vadd.f32 %v15527_v10, %v8658_v54  ;;  %v8622_v23 = vmul.f32 %v11537_v43, %v15445_v33 }
 0xd8d   : > { %v8563_v41 = vadd.f32 1e-05, %v8531_v1  ;;  %v8695_v22 = vadd.f32 %v15527_v10, %v8657_v7  ;;  %v8621_v29 = vmul.f32 %v11539_v32, %v15449_v34 }
 0xd8e   : > { %11548 = vrsqrt.f32 %v8564_v59  ;;  %8728 = vst.msk [vmem:[%s15535_s20 + $0x98] sm:$0xff] %vm766_vm0, %v8696_v51  ;;  %v8660_v13 = vmul.f32 %v15521_v61, %v8622_v23 }
 0xd8f   : > { %11550 = vrsqrt.f32 %v8563_v41  ;;  %8727 = vst.msk [vmem:[%s15535_s20 + $0x90] sm:$0xff] %vm766_vm0, %v8695_v22  ;;  %v8659_v19 = vmul.f32 %v15521_v61, %v8621_v29 }
 0xd90   : > { %v11541_v3 = vpop.eup %11540  ;;  %v8698_v33 = vadd.f32 %v15527_v10, %v8660_v13 }
 0xd91   : > { %v11543_v0 = vpop.eup %11542  ;;  %v8624_v48 = vmul.f32 %v11541_v3, %v15457_v17  ;;  %v8697_v46 = vadd.f32 %v15527_v10, %v8659_v19 }
 0xd92   : > { %v8623_v34 = vmul.f32 %v11543_v0, %v15461_v50  ;;  %8730 = vst.msk [vmem:[%s15535_s20 + $0xa8] sm:$0xff] %vm766_vm0, %v8698_v33 }
 0xd93   : > { %v8662_v5 = vmul.f32 %v15521_v61, %v8624_v48  ;;  %8729 = vst.msk [vmem:[%s15535_s20 + $0xa0] sm:$0xff] %vm766_vm0, %v8697_v46 }
 0xd94   : > { %v8498_v35 = vpop.xlane.xlu0 %8497  ;;  %v11545_v20 = vpop.eup %11544  ;;  %v8661_v2 = vmul.f32 %v15521_v61, %v8623_v34 }
 0xd95   : > { %v8534_v58 = vmul.f32 0.0625, %v8498_v35  ;;  %v8495_v16 = vpop.xlane.xlu1 %8494  ;;  %v11547_v17 = vpop.eup %11546  ;;  %v8700_v12 = vadd.f32 %v15527_v10, %v8662_v5  ;;  %v8626_v50 = vmul.f32 %v11545_v20, %v15469_v11 }
 0xd96   : > { %v8533_v25 = vmul.f32 0.0625, %v8495_v16  ;;  %v8699_v28 = vadd.f32 %v15527_v10, %v8661_v2  ;;  %v8625_v53 = vmul.f32 %v11547_v17, %v15473_v21 }
 0xd97   : > { %v8566_v56 = vadd.f32 1e-05, %v8534_v58  ;;  %8732 = vst.msk [vmem:[%s15535_s20 + $0xb8] sm:$0xff] %vm766_vm0, %v8700_v12  ;;  %v8664_v36 = vmul.f32 %v15521_v61, %v8626_v50 }
 0xd98   : > { %v8565_v39 = vadd.f32 1e-05, %v8533_v25  ;;  %v11549_v47 = vpop.eup %11548  ;;  %8731 = vst.msk [vmem:[%s15535_s20 + $0xb0] sm:$0xff] %vm766_vm0, %v8699_v28  ;;  %v8663_v8 = vmul.f32 %v15521_v61, %v8625_v53 }
 0xd99   : > { %11552 = vrsqrt.f32 %v8566_v56  ;;  %v11551_v11 = vpop.eup %11550  ;;  %v8702_v9 = vadd.f32 %v15527_v10, %v8664_v36  ;;  %v8628_v37 = vmul.f32 %v11549_v47, %v15481_v18 }
 0xd9a   : > { %11554 = vrsqrt.f32 %v8565_v39  ;;  %v8701_v4 = vadd.f32 %v15527_v10, %v8663_v8  ;;  %v8627_v15 = vmul.f32 %v11551_v11, %v15485_v57 }
 0xd9b   : > { %v8504_v21 = vpop.xlane.xlu0 %8503  ;;  %8734 = vst.msk [vmem:[%s15535_s20 + $0xc8] sm:$0xff] %vm766_vm0, %v8702_v9  ;;  %v8666_v26 = vmul.f32 %v15521_v61, %v8628_v37 }
 0xd9c   : > { %v8536_v52 = vmul.f32 0.0625, %v8504_v21  ;;  %v8501_v14 = vpop.xlane.xlu1 %8500  ;;  %8733 = vst.msk [vmem:[%s15535_s20 + $0xc0] sm:$0xff] %vm766_vm0, %v8701_v4  ;;  %v8665_v30 = vmul.f32 %v15521_v61, %v8627_v15 }
 0xd9d   : > { %v8535_v38 = vmul.f32 0.0625, %v8501_v14  ;;  %v8704_v18 = vadd.f32 %v15527_v10, %v8666_v26 }
 0xd9e   : > { %v8568_v49 = vadd.f32 1e-05, %v8536_v52  ;;  %v8703_v24 = vadd.f32 %v15527_v10, %v8665_v30 }
 0xd9f   : > { %v8567_v40 = vadd.f32 1e-05, %v8535_v38  ;;  %8736 = vst.msk [vmem:[%s15535_s20 + $0xd8] sm:$0xff] %vm766_vm0, %v8704_v18 }
 0xda0   : > { %11556 = vrsqrt.f32 %v8568_v49  ;;  %8735 = vst.msk [vmem:[%s15535_s20 + $0xd0] sm:$0xff] %vm766_vm0, %v8703_v24 }
 0xda1   : > { %11558 = vrsqrt.f32 %v8567_v40 }
 0xda3   : > { %v11553_v57 = vpop.eup %11552 }
 0xda4   : > { %v11555_v62 = vpop.eup %11554  ;;  %v8630_v63 = vmul.f32 %v11553_v57, %v15495_v60 }
 0xda5   : > { %v8629_v31 = vmul.f32 %v11555_v62, %v15498_v6 }
 0xda6   : > { %v8668_v27 = vmul.f32 %v15521_v61, %v8630_v63 }
 0xda7   : > { %v8667_v42 = vmul.f32 %v15521_v61, %v8629_v31 }
 0xda8   : > { %v8706_v55 = vadd.f32 %v15527_v10, %v8668_v27 }
 0xda9   : > { %v8705_v54 = vadd.f32 %v15527_v10, %v8667_v42 }
 0xdaa   : > { %v11557_v1 = vpop.eup %11556  ;;  %8738 = vst.msk [vmem:[%s15535_s20 + $0xe8] sm:$0xff] %vm766_vm0, %v8706_v55 }
 0xdab   : > { %v11559_v43 = vpop.eup %11558  ;;  %8737 = vst.msk [vmem:[%s15535_s20 + $0xe0] sm:$0xff] %vm766_vm0, %v8705_v54  ;;  %v8632_v60 = vmul.f32 %v11557_v1, %v15507_v45 }
 0xdac   : > { %v8631_v7 = vmul.f32 %v11559_v43, %v15510_v44 }
 0xdad   : > { %v8670_v6 = vmul.f32 %v15521_v61, %v8632_v60 }
 0xdae   : > { %v8669_v59 = vmul.f32 %v15521_v61, %v8631_v7 }
 0xdaf   : > { %v8708_v32 = vadd.f32 %v15527_v10, %v8670_v6 }
 0xdb0   : > { %v8707_v51 = vadd.f32 %v15527_v10, %v8669_v59 }
 0xdb1   : > { %8740 = vst.msk [vmem:[%s15535_s20 + $0xf8] sm:$0xff] %vm766_vm0, %v8708_v32 }
 0xdb2   : > { %8739 = vst.msk [vmem:[%s15535_s20 + $0xf0] sm:$0xff] %vm766_vm0, %v8707_v51 }
 0xdb3 PF: > { %s24_s29 = sadd.s32 1, %s11567_s29  }
 0xdb4   : > { %p21_p4 = scmp.ge.s32.totalorder %s24_s29, 4  }
 0xdb6   :  { %23 = sbr.rel (!%p21_p4) target bundleno = 1 (0x1), region = 109 }

</bundles_post_ra>
